<compile_context>
chip_gen: v7x
topology: tpu7x:2x2x1
jax: 0.10.0
libtpu: 0.0.40
codegen_flags: <defaults>
</compile_context>

<pallas_src>
import functools

import jax
import jax.numpy as jnp
from jax.experimental import pallas as pl
from jax.experimental.pallas import tpu as pltpu


def _round_up(x, m):
    return ((x + m - 1) // m) * m


# --------------------------------------------------------------------------- #
# Kernel: one batch tile through the whole network, activations stay in VMEM. #
# --------------------------------------------------------------------------- #
def _convexnext_kernel(xin_ref, w_in_ref, w_skip_ref, w_out_ref, o_ref, act_ref,
                       *, n_hidden, n_in, n_layers, n_out):
    tb, hp = act_ref.shape
    act_dt = act_ref.dtype
    f32 = jnp.float32

    # (1, Hp) column mask: True on the n_hidden "real" feature columns [0, H).
    # Columns [H, H+F) carry x_input, column H+F carries a constant 1 (folded bias),
    # remaining padding columns stay 0.  All non-hidden columns bypass activations.
    col = jax.lax.broadcasted_iota(jnp.int32, (1, hp), 1)
    feat = col < n_hidden

    # ---- input layer: Linear(n_in -> n_hidden) + ReLU, on the VPU -----------
    # K = n_in + 1 (bias packed as a constant-1 virtual feature) -> an MXU matmul
    # would be pure fill/drain overhead.  w_in stays f32 (tiny).
    xin = xin_ref[...].astype(f32)                       # (tb, n_in)
    w0 = w_in_ref[...]                                   # (n_in + 1, hp) f32
    z = xin[:, 0:1] * w0[0:1, :]
    for f in range(1, n_in):
        z = z + xin[:, f:f + 1] * w0[f:f + 1, :]
    z = z + w0[n_in:n_in + 1, :]                         # bias row (+ ones / x carries)
    act_ref[...] = jnp.where(feat, jnp.maximum(z, 0.0), z).astype(act_dt)

    # ---- skip blocks: one fused [W_ln^T ; W_skp^T + I ; b^T,1] matmul + Softplus
    beta = f32(100.0)
    inv_beta = f32(0.01)
    threshold = f32(20.0)
    for l in range(n_layers):                            # static unroll (L is small)
        a = act_ref[...]                                 # compute dtype, no cast
        z = jnp.dot(a, w_skip_ref[l], preferred_element_type=f32)
        bz = beta * z
        # exp may overflow to +inf where bz > threshold; those lanes are replaced by
        # the linear branch below (PyTorch Softplus threshold rule) -> same result.
        soft = jnp.log1p(jnp.exp(bz)) * inv_beta
        y = jnp.where(bz > threshold, z, soft)
        act_ref[...] = jnp.where(feat, y, z).astype(act_dt)   # carries pass through

    # ---- out block: Linear + skip (+ folded bias), no activation ------------
    a = act_ref[...]
    zo = jnp.dot(a, w_out_ref[...], preferred_element_type=f32)   # (tb, Op)
    o_ref[...] = zo[:, :n_out].astype(o_ref.dtype)                # only real columns


# --------------------------------------------------------------------------- #
# Parameter packing: done ONCE (transposes / padding / bias folding hoisted).  #
# --------------------------------------------------------------------------- #
def pack_convexnext_params(w_in, b_in, skip_ln_w, skip_ln_b, skip_skp_w,
                           out_ln_w, out_ln_b, out_skp_w,
                           *, compute_dtype=jnp.bfloat16):
    """Weights in PyTorch Linear layout: (out_features, in_features)."""
    w_in = jnp.asarray(w_in, jnp.float32)
    H, F = w_in.shape                          # n_hidden, in_features
    out_ln_w = jnp.asarray(out_ln_w, jnp.float32)
    O = int(out_ln_w.shape[0])                 # out_features
    L = len(skip_ln_w)
    ones_col = H + F                           # constant-1 carry column (folded biases)
    Hp = _round_up(H + F + 1, 128)             # lane-dense hidden width (+ carries)
    Op = _round_up(O, 128)                     # lane-dense matmul N for the out block
    cdt = jnp.dtype(compute_dtype)
    eye_f = jnp.eye(F, dtype=jnp.float32)

    # input layer (F+1, Hp): rows [0,F) = W_in^T + identity x-carry,
    #                        row F     = bias row with a 1 in the ones column.
    # Kept f32: it is consumed on the VPU and is tiny.
    w_in_p = jnp.zeros((F + 1, Hp), jnp.float32)
    w_in_p = w_in_p.at[:F, :H].set(w_in.T)
    w_in_p = w_in_p.at[:F, H:H + F].set(eye_f)
    w_in_p = w_in_p.at[F, :H].set(jnp.asarray(b_in, jnp.float32))
    w_in_p = w_in_p.at[F, ones_col].set(1.0)

    # skip blocks (L, Hp, Hp): rows [0,H)=W_ln^T, rows [H,H+F)=W_skp^T + identity
    # x-carry, row H+F = bias row + ones carry.
    w_skip_p = jnp.zeros((L, Hp, Hp), jnp.float32)
    for l in range(L):
        w_skip_p = w_skip_p.at[l, :H, :H].set(jnp.asarray(skip_ln_w[l], jnp.float32).T)
        w_skip_p = w_skip_p.at[l, H:H + F, :H].set(jnp.asarray(skip_skp_w[l], jnp.float32).T)
        w_skip_p = w_skip_p.at[l, H:H + F, H:H + F].set(eye_f)
        w_skip_p = w_skip_p.at[l, ones_col, :H].set(jnp.asarray(skip_ln_b[l], jnp.float32))
        w_skip_p = w_skip_p.at[l, ones_col, ones_col].set(1.0)

    # out block (Hp, Op): W_out_ln^T / W_out_skp^T / bias row (no ones carry needed).
    w_out_p = jnp.zeros((Hp, Op), jnp.float32)
    w_out_p = w_out_p.at[:H, :O].set(out_ln_w.T)
    w_out_p = w_out_p.at[H:H + F, :O].set(jnp.asarray(out_skp_w, jnp.float32).T)
    w_out_p = w_out_p.at[ones_col, :O].set(jnp.asarray(out_ln_b, jnp.float32))

    return dict(
        w_in=w_in_p,                            # f32 (VPU path)
        w_skip=w_skip_p.astype(cdt),
        w_out=w_out_p.astype(cdt),
        dims=(H, F, O, Hp, Op, L), compute_dtype=cdt)


# --------------------------------------------------------------------------- #
# Forward wrapper                                                              #
# --------------------------------------------------------------------------- #
def convexnext_forward(x_input, params, *, block_b=2048):
    """x_input: (B, in_features) float32 query points -> (B, out_features)."""
    w_in_p, w_skip_p, w_out_p = params["w_in"], params["w_skip"], params["w_out"]
    H, F, O, Hp, Op, L = params["dims"]
    cdt = params["compute_dtype"]

    B = x_input.shape[0]
    assert x_input.shape[1] == F

    # Batch tile: multiple of 16 (bf16 sublane packing of the activation scratch).
    tb = int(min(block_b, _round_up(B, 16)))
    tb = max(16, (tb // 16) * 16)
    # Prefer >= 2 grid blocks so a megacore (v7x) can shard the parallel batch axis.
    if B >= 256 and _round_up(B, tb) // tb < 2:
        tb = max(16, _round_up((B + 1) // 2, 16))
    b_pad = _round_up(B, tb)

    x_p = x_input.astype(jnp.float32)
    if b_pad != B:
        x_p = jnp.pad(x_p, ((0, b_pad - B), (0, 0)))
    n_blocks = b_pad // tb

    kernel = functools.partial(
        _convexnext_kernel, n_hidden=H, n_in=F, n_layers=L, n_out=O)

    # Advisory cost estimate for XLA scheduling around the custom call.
    w_bytes = sum(int(a.size) * a.dtype.itemsize
                  for a in (w_in_p, w_skip_p, w_out_p))
    cost = pl.CostEstimate(
        flops=2 * b_pad * ((F + 1) * Hp + L * Hp * Hp + Hp * Op),
        transcendentals=2 * b_pad * Hp * L,
        bytes_accessed=int(x_p.size) * 4 + b_pad * O * 4 + w_bytes,
    )

    grid_spec = pltpu.PrefetchScalarGridSpec(
        num_scalar_prefetch=0,
        grid=(n_blocks,),
        in_specs=[
            pl.BlockSpec((tb, F), lambda i: (i, 0)),          # x_input tile (streamed)
            pl.BlockSpec((F + 1, Hp), lambda i: (0, 0)),      # packed input weight (resident)
            pl.BlockSpec((L, Hp, Hp), lambda i: (0, 0, 0)),   # packed skip weights (resident)
            pl.BlockSpec((Hp, Op), lambda i: (0, 0)),         # packed out weight (resident)
        ],
        out_specs=pl.BlockSpec((tb, O), lambda i: (i, 0)),    # real-width output (4 B/query)
        scratch_shapes=[pltpu.VMEM((tb, Hp), cdt)],           # resident activations
    )

    out = pl.pallas_call(
        kernel,
        out_shape=jax.ShapeDtypeStruct((b_pad, O), jnp.float32),
        grid_spec=grid_spec,
        compiler_params=pltpu.CompilerParams(
            dimension_semantics=("parallel",),       # independent batch tiles (v7x: 2 TCs)
            vmem_limit_bytes=32 * 1024 * 1024,       # safe on v5e/v6e (128 MiB) and v7x (64 MiB)
        ),
        cost_estimate=cost,
    )(x_p, w_in_p, w_skip_p, w_out_p)

    return out[:B]


# --------------------------------------------------------------------------- #
# Pure-JAX reference (mirrors the PyTorch module)                              #
# --------------------------------------------------------------------------- #
def convexnext_reference(x, w_in, b_in, skip_ln_w, skip_ln_b, skip_skp_w,
                         out_ln_w, out_ln_b, out_skp_w):
    hi = jax.lax.Precision.HIGHEST

    def lin(a, w, b=None):
        y = jnp.matmul(a, jnp.asarray(w).T, precision=hi)
        return y if b is None else y + jnp.asarray(b)

    x_input = x
    h = jnp.maximum(lin(x, w_in, b_in), 0.0)
    for wl, bl, ws in zip(skip_ln_w, skip_ln_b, skip_skp_w):
        z = lin(h, wl, bl) + lin(x_input, ws)
        bz = 100.0 * z
        h = jnp.where(bz > 20.0, z, jnp.log1p(jnp.exp(jnp.minimum(bz, 20.0))) / 100.0)
    return lin(h, out_ln_w, out_ln_b) + lin(x_input, out_skp_w)


# --------------------------------------------------------------------------- #
if __name__ == "__main__":
    # Module defaults: in_features=2, n_hidden=130, out_features=1; 2 skip layers.
    batch = 1024
    in_features = 2
    n_hidden = 130
    out_features = 1
    n_hidden_layers = 2

    key = jax.random.PRNGKey(0)
    kit = iter(jax.random.split(key, 32))

    def u(k, shape, fan_in):
        b = 1.0 / (float(fan_in) ** 0.5)
        return jax.random.uniform(k, shape, minval=-b, maxval=b, dtype=jnp.float32)

    x = jax.random.normal(next(kit), (batch, in_features), dtype=jnp.float32)

    w_in = u(next(kit), (n_hidden, in_features), in_features)
    b_in = u(next(kit), (n_hidden,), in_features)
    skip_ln_w, skip_ln_b, skip_skp_w = [], [], []
    for _ in range(n_hidden_layers):
        skip_ln_w.append(u(next(kit), (n_hidden, n_hidden), n_hidden))
        skip_ln_b.append(u(next(kit), (n_hidden,), n_hidden))
        skip_skp_w.append(u(next(kit), (n_hidden, in_features), in_features))
    out_ln_w = u(next(kit), (out_features, n_hidden), n_hidden)
    out_ln_b = u(next(kit), (out_features,), n_hidden)
    out_skp_w = u(next(kit), (out_features, in_features), in_features)

    ref = convexnext_reference(x, w_in, b_in, skip_ln_w, skip_ln_b, skip_skp_w,
                               out_ln_w, out_ln_b, out_skp_w)

    # f32 compute path (tight check).
    params_f32 = pack_convexnext_params(
        w_in, b_in, skip_ln_w, skip_ln_b, skip_skp_w,
        out_ln_w, out_ln_b, out_skp_w, compute_dtype=jnp.float32)
    out_f32 = jax.block_until_ready(convexnext_forward(x, params_f32))
    assert out_f32.shape == (batch, out_features)
    assert bool(jnp.all(jnp.isfinite(out_f32)))
    assert jnp.allclose(out_f32, ref, atol=2e-3, rtol=2e-3)

    # bf16 matmul operands + bf16 activation scratch (v5e/v6e/v7x MXU + bandwidth win);
    # Softplus math and accumulation stay f32.
    params_bf16 = pack_convexnext_params(
        w_in, b_in, skip_ln_w, skip_ln_b, skip_skp_w,
        out_ln_w, out_ln_b, out_skp_w, compute_dtype=jnp.bfloat16)
    out_bf16 = jax.block_until_ready(convexnext_forward(x, params_bf16))
    assert out_bf16.shape == (batch, out_features)
    assert bool(jnp.all(jnp.isfinite(out_bf16)))
    assert jnp.allclose(out_bf16, ref, atol=5e-2, rtol=5e-2)

    # Ragged batch / multi-block padding path (f32).
    x_small = x[:100]
    out_small = jax.block_until_ready(
        convexnext_forward(x_small, params_f32, block_b=48))
    assert out_small.shape == (100, out_features)
    assert jnp.allclose(out_small, ref[:100], atol=2e-3, rtol=2e-3)

    print("KERNEL_OK")
</pallas_src>

<mosaic_0001>
module attributes {stable_mosaic.version = 11 : i64} {
  func.func @_convexnext_kernel(%arg0: i32, %arg1: memref<512x2xf32, #tpu.memory_space<vmem>>, %arg2: memref<3x256xf32, #tpu.memory_space<vmem>>, %arg3: memref<2x256x256xf32, #tpu.memory_space<vmem>>, %arg4: memref<256x128xf32, #tpu.memory_space<vmem>>, %arg5: memref<512x1xf32, #tpu.memory_space<vmem>>, %arg6: memref<512x256xf32, #tpu.memory_space<vmem>>) attributes {dimension_semantics = [#tpu.dimension_semantics<parallel>], iteration_bounds = array<i64: 2>, scalar_prefetch = 0 : i64, scratch_operands = 1 : i64, tpu.core_type = #tpu.core_type<tc>, window_params = [{transform_indices = @transform_0, window_bounds = array<i64: 512, 2>}, {pipeline_mode = #tpu.pipeline_mode<synchronous>, transform_indices = @transform_1, window_bounds = array<i64: 3, 256>}, {pipeline_mode = #tpu.pipeline_mode<synchronous>, transform_indices = @transform_2, window_bounds = array<i64: 2, 256, 256>}, {pipeline_mode = #tpu.pipeline_mode<synchronous>, transform_indices = @transform_3, window_bounds = array<i64: 256, 128>}, {transform_indices = @transform_4, window_bounds = array<i64: 512, 1>}]} {
    %0 = tpu.iota {dimensions = array<i32: 1>} : vector<1x256xi32>
    %c130_i32 = arith.constant 130 : i32
    %1 = vector.broadcast %c130_i32 : i32 to vector<1x256xi32>
    %2 = arith.cmpi slt, %0, %1 : vector<1x256xi32>
    %c0 = arith.constant 0 : index
    %c0_0 = arith.constant 0 : index
    %3 = vector.load %arg1[%c0, %c0_0] : memref<512x2xf32, #tpu.memory_space<vmem>>, vector<512x2xf32>
    %c0_1 = arith.constant 0 : index
    %c0_2 = arith.constant 0 : index
    %4 = vector.load %arg2[%c0_1, %c0_2] : memref<3x256xf32, #tpu.memory_space<vmem>>, vector<3x256xf32>
    %5 = vector.extract_strided_slice %3 {offsets = [0, 0], sizes = [512, 1], strides = [1, 1]} : vector<512x2xf32> to vector<512x1xf32>
    %6 = vector.extract_strided_slice %4 {offsets = [0, 0], sizes = [1, 256], strides = [1, 1]} : vector<3x256xf32> to vector<1x256xf32>
    %7 = vector.broadcast %5 : vector<512x1xf32> to vector<512x256xf32>
    %8 = vector.broadcast %6 : vector<1x256xf32> to vector<512x256xf32>
    %9 = arith.mulf %7, %8 : vector<512x256xf32>
    %10 = vector.extract_strided_slice %3 {offsets = [0, 1], sizes = [512, 1], strides = [1, 1]} : vector<512x2xf32> to vector<512x1xf32>
    %11 = vector.extract_strided_slice %4 {offsets = [1, 0], sizes = [1, 256], strides = [1, 1]} : vector<3x256xf32> to vector<1x256xf32>
    %12 = vector.broadcast %10 : vector<512x1xf32> to vector<512x256xf32>
    %13 = vector.broadcast %11 : vector<1x256xf32> to vector<512x256xf32>
    %14 = arith.mulf %12, %13 : vector<512x256xf32>
    %15 = arith.addf %9, %14 : vector<512x256xf32>
    %16 = vector.extract_strided_slice %4 {offsets = [2, 0], sizes = [1, 256], strides = [1, 1]} : vector<3x256xf32> to vector<1x256xf32>
    %17 = vector.broadcast %16 : vector<1x256xf32> to vector<512x256xf32>
    %18 = arith.addf %15, %17 : vector<512x256xf32>
    %cst = arith.constant 0.000000e+00 : f32
    %19 = vector.broadcast %cst : f32 to vector<512x256xf32>
    %20 = arith.maximumf %18, %19 : vector<512x256xf32>
    %21 = vector.shape_cast %2 : vector<1x256xi1> to vector<1x256xi1>
    %22 = vector.broadcast %21 : vector<1x256xi1> to vector<512x256xi1>
    %23 = arith.select %22, %20, %18 : vector<512x256xi1>, vector<512x256xf32>
    %c0_3 = arith.constant 0 : index
    %c0_4 = arith.constant 0 : index
    %24 = vector.load %arg6[%c0_3, %c0_4] : memref<512x256xf32, #tpu.memory_space<vmem>>, vector<512x256xf32>
    tpu.vector_store %arg6[%c0_3, %c0_4], %23 {strides = array<i32>} : memref<512x256xf32, #tpu.memory_space<vmem>>, vector<512x256xf32>,
    %c0_5 = arith.constant 0 : index
    %c0_6 = arith.constant 0 : index
    %25 = vector.load %arg6[%c0_5, %c0_6] : memref<512x256xf32, #tpu.memory_space<vmem>>, vector<512x256xf32>
    %c0_7 = arith.constant 0 : index
    %c0_8 = arith.constant 0 : index
    %c0_9 = arith.constant 0 : index
    %26 = vector.load %arg3[%c0_7, %c0_8, %c0_9] : memref<2x256x256xf32, #tpu.memory_space<vmem>>, vector<1x256x256xf32>
    %27 = vector.shape_cast %26 : vector<1x256x256xf32> to vector<256x256xf32>
    %cst_10 = arith.constant dense<0.000000e+00> : vector<512x256xf32>
    %28 = tpu.matmul %25, %27, %cst_10 {dimension_numbers = #tpu.dot_dimension_numbers<[1], [0], [0], [1], [0, 0, 1, 1], [], []>} : vector<512x256xf32>, vector<256x256xf32>, vector<512x256xf32> -> vector<512x256xf32>
    %cst_11 = arith.constant 1.000000e+02 : f32
    %29 = vector.broadcast %cst_11 : f32 to vector<512x256xf32>
    %30 = arith.mulf %29, %28 : vector<512x256xf32>
    %31 = math.exp %30 : vector<512x256xf32>
    %32 = math.log1p %31 : vector<512x256xf32>
    %cst_12 = arith.constant 0.00999999977 : f32
    %33 = vector.broadcast %cst_12 : f32 to vector<512x256xf32>
    %34 = arith.mulf %32, %33 : vector<512x256xf32>
    %cst_13 = arith.constant 2.000000e+01 : f32
    %35 = vector.broadcast %cst_13 : f32 to vector<512x256xf32>
    %36 = arith.cmpf ogt, %30, %35 : vector<512x256xf32>
    %37 = arith.select %36, %28, %34 : vector<512x256xi1>, vector<512x256xf32>
    %38 = vector.shape_cast %2 : vector<1x256xi1> to vector<1x256xi1>
    %39 = vector.broadcast %38 : vector<1x256xi1> to vector<512x256xi1>
    %40 = arith.select %39, %37, %28 : vector<512x256xi1>, vector<512x256xf32>
    %c0_14 = arith.constant 0 : index
    %c0_15 = arith.constant 0 : index
    %41 = vector.load %arg6[%c0_14, %c0_15] : memref<512x256xf32, #tpu.memory_space<vmem>>, vector<512x256xf32>
    tpu.vector_store %arg6[%c0_14, %c0_15], %40 {strides = array<i32>} : memref<512x256xf32, #tpu.memory_space<vmem>>, vector<512x256xf32>,
    %c0_16 = arith.constant 0 : index
    %c0_17 = arith.constant 0 : index
    %42 = vector.load %arg6[%c0_16, %c0_17] : memref<512x256xf32, #tpu.memory_space<vmem>>, vector<512x256xf32>
    %c1 = arith.constant 1 : index
    %c0_18 = arith.constant 0 : index
    %c0_19 = arith.constant 0 : index
    %43 = vector.load %arg3[%c1, %c0_18, %c0_19] : memref<2x256x256xf32, #tpu.memory_space<vmem>>, vector<1x256x256xf32>
    %44 = vector.shape_cast %43 : vector<1x256x256xf32> to vector<256x256xf32>
    %cst_20 = arith.constant dense<0.000000e+00> : vector<512x256xf32>
    %45 = tpu.matmul %42, %44, %cst_20 {dimension_numbers = #tpu.dot_dimension_numbers<[1], [0], [0], [1], [0, 0, 1, 1], [], []>} : vector<512x256xf32>, vector<256x256xf32>, vector<512x256xf32> -> vector<512x256xf32>
    %cst_21 = arith.constant 1.000000e+02 : f32
    %46 = vector.broadcast %cst_21 : f32 to vector<512x256xf32>
    %47 = arith.mulf %46, %45 : vector<512x256xf32>
    %48 = math.exp %47 : vector<512x256xf32>
    %49 = math.log1p %48 : vector<512x256xf32>
    %cst_22 = arith.constant 0.00999999977 : f32
    %50 = vector.broadcast %cst_22 : f32 to vector<512x256xf32>
    %51 = arith.mulf %49, %50 : vector<512x256xf32>
    %cst_23 = arith.constant 2.000000e+01 : f32
    %52 = vector.broadcast %cst_23 : f32 to vector<512x256xf32>
    %53 = arith.cmpf ogt, %47, %52 : vector<512x256xf32>
    %54 = arith.select %53, %45, %51 : vector<512x256xi1>, vector<512x256xf32>
    %55 = vector.shape_cast %2 : vector<1x256xi1> to vector<1x256xi1>
    %56 = vector.broadcast %55 : vector<1x256xi1> to vector<512x256xi1>
    %57 = arith.select %56, %54, %45 : vector<512x256xi1>, vector<512x256xf32>
    %c0_24 = arith.constant 0 : index
    %c0_25 = arith.constant 0 : index
    %58 = vector.load %arg6[%c0_24, %c0_25] : memref<512x256xf32, #tpu.memory_space<vmem>>, vector<512x256xf32>
    tpu.vector_store %arg6[%c0_24, %c0_25], %57 {strides = array<i32>} : memref<512x256xf32, #tpu.memory_space<vmem>>, vector<512x256xf32>,
    %c0_26 = arith.constant 0 : index
    %c0_27 = arith.constant 0 : index
    %59 = vector.load %arg6[%c0_26, %c0_27] : memref<512x256xf32, #tpu.memory_space<vmem>>, vector<512x256xf32>
    %c0_28 = arith.constant 0 : index
    %c0_29 = arith.constant 0 : index
    %60 = vector.load %arg4[%c0_28, %c0_29] : memref<256x128xf32, #tpu.memory_space<vmem>>, vector<256x128xf32>
    %cst_30 = arith.constant dense<0.000000e+00> : vector<512x128xf32>
    %61 = tpu.matmul %59, %60, %cst_30 {dimension_numbers = #tpu.dot_dimension_numbers<[1], [0], [0], [1], [0, 0, 1, 1], [], []>} : vector<512x256xf32>, vector<256x128xf32>, vector<512x128xf32> -> vector<512x128xf32>
    %62 = vector.extract_strided_slice %61 {offsets = [0, 0], sizes = [512, 1], strides = [1, 1]} : vector<512x128xf32> to vector<512x1xf32>
    %c0_31 = arith.constant 0 : index
    %c0_32 = arith.constant 0 : index
    %63 = vector.load %arg5[%c0_31, %c0_32] : memref<512x1xf32, #tpu.memory_space<vmem>>, vector<512x1xf32>
    tpu.vector_store %arg5[%c0_31, %c0_32], %62 {strides = array<i32>} : memref<512x1xf32, #tpu.memory_space<vmem>>, vector<512x1xf32>,
    return
  }
  func.func @transform_0(%arg0: i32) -> (i32, i32) {
    %c0_i32 = arith.constant 0 : i32
    %c0_i32_0 = arith.constant 0 : i32
    return %arg0, %c0_i32 : i32, i32
  }
  func.func @transform_1(%arg0: i32) -> (i32, i32) {
    %c0_i32 = arith.constant 0 : i32
    %c0_i32_0 = arith.constant 0 : i32
    %c0_i32_1 = arith.constant 0 : i32
    return %c0_i32, %c0_i32_0 : i32, i32
  }
  func.func @transform_2(%arg0: i32) -> (i32, i32, i32) {
    %c0_i32 = arith.constant 0 : i32
    %c0_i32_0 = arith.constant 0 : i32
    %c0_i32_1 = arith.constant 0 : i32
    %c0_i32_2 = arith.constant 0 : i32
    return %c0_i32, %c0_i32_0, %c0_i32_1 : i32, i32, i32
  }
  func.func @transform_3(%arg0: i32) -> (i32, i32) {
    %c0_i32 = arith.constant 0 : i32
    %c0_i32_0 = arith.constant 0 : i32
    %c0_i32_1 = arith.constant 0 : i32
    return %c0_i32, %c0_i32_0 : i32, i32
  }
  func.func @transform_4(%arg0: i32) -> (i32, i32) {
    %c0_i32 = arith.constant 0 : i32
    %c0_i32_0 = arith.constant 0 : i32
    return %arg0, %c0_i32 : i32, i32
  }
}

</mosaic_0001>

<bundles_post_ra>
// kernel: tpu_custom_call.1
= control target key start
LH: loop header
LB: loop body
LE: loop exit
PB: predicated region body
PF: predicated region fallthrough
CT: control target
= control target key end

     0   :  { %9 = vsyncpa [#allocation4], 0  ;;  %s9539_s15 = smov 0   ;;  %s16106_s0 = inlined_call_operand.vmem [shape: f32[1024,2], index: 0, kind: input, shape index: {}]   ;;  %s16107_s1 = inlined_call_operand.vmem [shape: f32[3,256], index: 1, kind: input, shape index: {}]   ;;  %s16108_s2 = inlined_call_operand.vmem [shape: f32[2,256,256], index: 2, kind: input, shape index: {}]   ;;  %s16109_s3 = inlined_call_operand.hbm [shape: f32[256,128], index: 3, kind: input, shape index: {}]   ;;  %s16110_s4 = inlined_call_operand.vmem [shape: f32[1024,1], index: 4, kind: output, shape index: {}]  }
   0x1 LB: > { %s8130_s16 = sadd.s32 4294967295, %s9506_s15   ;;  %p8132_p0 = scmp.ge.s32.totalorder %s9506_s15, 1  ;;  %s9506_s15 = sphi %s9539_s15, %s15_s15  }
   0x2   : > { %p135_p1 = scmp.lt.s32.totalorder %s9506_s15, 3  ;;  %s9508_s17 = smov [#allocation3]  }
   0x3   : > { %s153_s18 = sshll.u32 %s9508_s17, 4  ;;  %p9553_p3 = scmp.eq.s32.totalorder %s8130_s16, 0  ;;  %s154_s18 = int_to_ptr.vmem [resolvable:$true] %s153_s18 }
   0x4   : > { %p9547_p2 = pnand %p8132_p0, %p135_p1  ;;  %s9468_s24 = scalar_lea.hbm %s16109_s3, 4096 }
   0x5   : > { %s16339_s20 = scalar_select %p9553_p3, 1, 0 }
   0x6   : > { %s16338_s19 = scalar_select %p9547_p2, 1, 0 }
   0x7   : > { %p8419_p4 = pneg %p9547_p2  ;;  %p9469_p6 = scmp.ne.s32.totalorder %s16109_s3, %s9468_s24 }
   0x8   : > { %p9475_p10 = scmp.lt.u32.totalorder %s9468_s24, %s16109_s3 }
   0x9   : > { %p9561_p5 = pnand %p9553_p3, %p8419_p4 }
   0xb   : > { %p9470_p7 = pneg %p9561_p5 }
   0xd   : > { %p9471_p8 = pnand %p9470_p7, %p9469_p6 }
   0xf   : > { %p9472_p9 = pneg %p9471_p8 }
  0x11   : > { %p9477_p11 = pnand %p9475_p10, %p9472_p9 }
  0x13   : > { %9480 = shalt.err (!%p9477_p11)
}
  0x14   : > { %s9481_s29 = scalar_lea.vmem %s154_s18, 4096  ;;  %p9489_p1 = scmp.lt.s32.totalorder %s154_s18, %s154_s18 }
  0x15   : > { %p9482_p12 = scmp.ne.s32.totalorder %s154_s18, %s9481_s29  ;;  %p9490_p4 = scmp.lt.s32.totalorder %s9481_s29, %s9481_s29 }
  0x17   : > { %p9484_p13 = pnand %p9482_p12, %p9470_p7  ;;  %p9491_p3 = por %p9490_p4, %p9489_p1 }
  0x19   : > { %p9485_p0 = pneg %p9484_p13 }
  0x1b   : > { %p9492_p2 = pnand %p9491_p3, %p9485_p0 }
  0x1d   : > { %9495 = shalt.err (!%p9492_p2)
}
  0x1e   : > { %s9509_s30 = smov 128   ;;  %s9510_s5 = smov 8  }
  0x1f   : > { %8422 = dma.hbm_to_vmem [thread:$0]  (!%p9561_p5), %s16109_s3, 4096, %s154_s18, [#allocation4], %s9509_s30, %s9509_s30, %s9510_s5  }
  0x20   : > { %p16341_p6 = scmp.ne.s32.totalorder %s16338_s19, 0 }
  0x22   : > { %178 = sbr.rel (%p16341_p6) target bundleno = 1680 (0x690), region = 36 }
  0x29   : > { %p16342_p8 = scmp.ne.s32.totalorder %s16339_s20, 0 }
  0x2b   : > { %9501 = dma.done.wait (%p16342_p8), [#allocation4], 4096  }
  0x2c   : > { %9503 = vsyncadd (%p16342_p8), [#allocation4], 4294963200  ;;  %s8137_s8 = sshll.u32 %s8130_s16, 6  ;;  %v9511_v0 = vmov 0   ;;  %v9512_v3 = vmov 1   ;;  %v1946_v5 = vld [vmem:[%s16108_s2 + $0x8] sm:$0xff] }
  0x2d   : > { %8441 = vset.pattern.permute.xlu1 %v9511_v0  ;;  %8439 = vset.pattern.permute.xlu0 %v9511_v0  ;;  %p205_p2 = scmp.lt.s32.totalorder %s8137_s8, 127  ;;  %v1948_v6 = vld [vmem:[%s16108_s2 + $0x18] sm:$0xff]  ;;  %v1945_v7 = vld [vmem:[%s16108_s2] sm:$0xff]  ;;  %v1947_v8 = vld [vmem:[%s16108_s2 + $0x10] sm:$0xff] }
  0x2e   : > { %v8207_v9 = vpack.c.bf16 %v1948_v6, %v1946_v5  ;;  %v8209_v10 = vpack.c.bf16 %v1947_v8, %v1945_v7  ;;  %v1950_v11 = vld [vmem:[%s16108_s2 + $0x28] sm:$0xff]  ;;  %v1952_v12 = vld [vmem:[%s16108_s2 + $0x38] sm:$0xff]  ;;  %v1949_v14 = vld [vmem:[%s16108_s2 + $0x20] sm:$0xff] }
  0x2f   : > { %s17097_s8 = smov (!%p205_p2, %s8137_s8), 127  ;;  %v8211_v13 = vpack.c.bf16 %v1952_v12, %v1950_v11  ;;  %v1951_v15 = vld [vmem:[%s16108_s2 + $0x30] sm:$0xff]  ;;  %v1954_v16 = vld [vmem:[%s16108_s2 + $0x48] sm:$0xff]  ;;  %v1956_v17 = vld [vmem:[%s16108_s2 + $0x58] sm:$0xff] }
  0x30   : > { %s8138_s9 = sshll.u32 %s17097_s8, 3  ;;  %8208 = vmatprep.subr.bf16.mxu0 %v8207_v9  ;;  %v8213_v19 = vpack.c.bf16 %v1951_v15, %v1949_v14  ;;  %8383 = vmatprep.subr.bf16.mxu1 %v8207_v9  ;;  %v8215_v20 = vpack.c.bf16 %v1956_v17, %v1954_v16  ;;  %v1953_v21 = vld [vmem:[%s16108_s2 + $0x40] sm:$0xff]  ;;  %v1955_v22 = vld [vmem:[%s16108_s2 + $0x50] sm:$0xff]  ;;  %v1958_v23 = vld [vmem:[%s16108_s2 + $0x68] sm:$0xff] }
  0x31   : > { %s9597_s12 = scalar_lea.vmem %s16106_s0, %s8138_s9  ;;  %8210 = vmatpush1.bf16.msra.mxu0 %v8209_v10  ;;  %8399 = vmatpush1.bf16.msra.mxu1 %v8209_v10  ;;  %v1960_v24 = vld [vmem:[%s16108_s2 + $0x78] sm:$0xff]  ;;  %v8217_v26 = vpack.c.bf16 %v1955_v22, %v1953_v21  ;;  %v1957_v28 = vld [vmem:[%s16108_s2 + $0x60] sm:$0xff]  ;;  %v1959_v29 = vld [vmem:[%s16108_s2 + $0x70] sm:$0xff]  ;;  %s15644_s26 = scalar_lea.vmem %s16110_s4, %s8138_s9 }
  0x32   : > { %v222_v1 = vld [vmem:[%s9597_s12 + $0x8] sm:$0xff]  ;;  %v221_v2 = vld [vmem:[%s9597_s12] sm:$0xff]  ;;  %v223_v4 = vld [vmem:[%s9597_s12 + $0x10] sm:$0xff]  ;;  %8212 = vmatprep.subr.bf16.mxu0 %v8211_v13  ;;  %8384 = vmatprep.subr.bf16.mxu1 %v8211_v13  ;;  %v8219_v27 = vpack.c.bf16 %v1960_v24, %v1958_v23  ;;  %v8221_v33 = vpack.c.bf16 %v1959_v29, %v1957_v28 }
  0x33   : > { %293 = vperm.xlu1 %8441, %v222_v1   ;;  %288 = vperm.xlu0 %8439, %v221_v2   ;;  %v224_v18 = vld [vmem:[%s9597_s12 + $0x18] sm:$0xff]  ;;  %v225_v25 = vld [vmem:[%s9597_s12 + $0x20] sm:$0xff]  ;;  %v1962_v30 = vld [vmem:[%s16108_s2 + $0x88] sm:$0xff] }
  0x34   : > { %v1964_v31 = vld [vmem:[%s16108_s2 + $0x98] sm:$0xff]  ;;  %v226_v32 = vld [vmem:[%s9597_s12 + $0x28] sm:$0xff]  ;;  %v1961_v35 = vld [vmem:[%s16108_s2 + $0x80] sm:$0xff] }
  0x35   : > { %8214 = vmatpush1.bf16.msra.mxu0 %v8213_v19  ;;  %8400 = vmatpush1.bf16.msra.mxu1 %v8213_v19  ;;  %v8223_v34 = vpack.c.bf16 %v1964_v31, %v1962_v30  ;;  %v1963_v36 = vld [vmem:[%s16108_s2 + $0x90] sm:$0xff]  ;;  %v1966_v37 = vld [vmem:[%s16108_s2 + $0xa8] sm:$0xff]  ;;  %v1968_v38 = vld [vmem:[%s16108_s2 + $0xb8] sm:$0xff] }
  0x36   : > { %8216 = vmatprep.subr.bf16.mxu0 %v8215_v20  ;;  %8385 = vmatprep.subr.bf16.mxu1 %v8215_v20  ;;  %v227_v39 = vld [vmem:[%s9597_s12 + $0x30] sm:$0xff]  ;;  %v8225_v40 = vpack.c.bf16 %v1963_v36, %v1961_v35  ;;  %v8227_v41 = vpack.c.bf16 %v1968_v38, %v1966_v37  ;;  %v1965_v42 = vld [vmem:[%s16108_s2 + $0xa0] sm:$0xff]  ;;  %v1970_v44 = vld [vmem:[%s16108_s2 + $0xc8] sm:$0xff] }
  0x37   : > { %8442 = vset.pattern.permute.xlu1 %v9512_v3  ;;  %8440 = vset.pattern.permute.xlu0 %v9512_v3  ;;  %v1967_v43 = vld [vmem:[%s16108_s2 + $0xb0] sm:$0xff]  ;;  %v1972_v45 = vld [vmem:[%s16108_s2 + $0xd8] sm:$0xff]  ;;  %v1969_v49 = vld [vmem:[%s16108_s2 + $0xc0] sm:$0xff] }
  0x38   : > { %758 = vperm.xlu1 %8442, %v222_v1   ;;  %754 = vperm.xlu0 %8440, %v221_v2   ;;  %v228_v46 = vld [vmem:[%s9597_s12 + $0x38] sm:$0xff]  ;;  %v8229_v47 = vpack.c.bf16 %v1967_v43, %v1965_v42  ;;  %v8231_v48 = vpack.c.bf16 %v1972_v45, %v1970_v44  ;;  %v1971_v50 = vld [vmem:[%s16108_s2 + $0xd0] sm:$0xff]  ;;  %v1974_v51 = vld [vmem:[%s16108_s2 + $0xe8] sm:$0xff] }
  0x39   : > { %8218 = vmatpush1.bf16.msra.mxu0 %v8217_v26  ;;  %8401 = vmatpush1.bf16.msra.mxu1 %v8217_v26  ;;  %v1976_v52 = vld [vmem:[%s16108_s2 + $0xf8] sm:$0xff]  ;;  %v229_v53 = vld [vmem:[%s9597_s12 + $0x40] sm:$0xff]  ;;  %v8233_v54 = vpack.c.bf16 %v1971_v50, %v1969_v49  ;;  %v1975_v57 = vld [vmem:[%s16108_s2 + $0xf0] sm:$0xff] }
  0x3a   : > { %8220 = vmatprep.subr.bf16.mxu0 %v8219_v27  ;;  %8386 = vmatprep.subr.bf16.mxu1 %v8219_v27  ;;  %v8235_v55 = vpack.c.bf16 %v1976_v52, %v1974_v51  ;;  %v1973_v56 = vld [vmem:[%s16108_s2 + $0xe0] sm:$0xff]  ;;  %v1978_v58 = vld [vmem:[%s16108_s2 + $0x108] sm:$0xff]  ;;  %v1980_v59 = vld [vmem:[%s16108_s2 + $0x118] sm:$0xff] }
  0x3b   : > { %v230_v60 = vld [vmem:[%s9597_s12 + $0x48] sm:$0xff]  ;;  %v8237_v61 = vpack.c.bf16 %v1975_v57, %v1973_v56  ;;  %v8239_v62 = vpack.c.bf16 %v1980_v59, %v1978_v58  ;;  %v1977_v63 = vld [vmem:[%s16108_s2 + $0x100] sm:$0xff]  ;;  %v1984_v2 = vld [vmem:[%s16108_s2 + $0x138] sm:$0xff] }
  0x3c   : > { %8443 = vset.pattern.permute.xlu1 %v9511_v0  ;;  %762 = vperm.xlu0 %8440, %v223_v4   ;;  %v1979_v0 = vld [vmem:[%s16108_s2 + $0x110] sm:$0xff]  ;;  %v1982_v1 = vld [vmem:[%s16108_s2 + $0x128] sm:$0xff]  ;;  %v1981_v6 = vld [vmem:[%s16108_s2 + $0x120] sm:$0xff] }
  0x3d   : > { %298 = vperm.xlu1 %8443, %v223_v4   ;;  %8222 = vmatpush1.bf16.msra.mxu0 %v8221_v33  ;;  %v231_v3 = vld [vmem:[%s9597_s12 + $0x50] sm:$0xff]  ;;  %v8241_v4 = vpack.c.bf16 %v1979_v0, %v1977_v63  ;;  %v8243_v5 = vpack.c.bf16 %v1984_v2, %v1982_v1  ;;  %v1986_v8 = vld [vmem:[%s16108_s2 + $0x148] sm:$0xff]  ;;  %v1988_v9 = vld [vmem:[%s16108_s2 + $0x158] sm:$0xff]  ;;  %v216_v63 = vlaneseq }
  0x3e   : > { %8224 = vmatprep.subr.bf16.mxu0 %v8223_v34  ;;  %8402 = vmatpush1.bf16.msra.mxu1 %v8221_v33  ;;  %v1983_v7 = vld [vmem:[%s16108_s2 + $0x130] sm:$0xff]  ;;  %v232_v10 = vld [vmem:[%s9597_s12 + $0x58] sm:$0xff]  ;;  %v8247_v12 = vpack.c.bf16 %v1988_v9, %v1986_v8  ;;  %v1985_v13 = vld [vmem:[%s16108_s2 + $0x140] sm:$0xff] }
  0x3f   : > { %8387 = vmatprep.subr.bf16.mxu1 %v8223_v34  ;;  %v8245_v11 = vpack.c.bf16 %v1983_v7, %v1981_v6  ;;  %v1987_v14 = vld [vmem:[%s16108_s2 + $0x150] sm:$0xff]  ;;  %v1990_v15 = vld [vmem:[%s16108_s2 + $0x168] sm:$0xff]  ;;  %v1992_v16 = vld [vmem:[%s16108_s2 + $0x178] sm:$0xff]  ;;  %v608_v1 = vshrl.u32 %v216_v63, 7 }
  0x40   : > { %766 = vperm.xlu0 %8440, %v224_v18   ;;  %v233_v17 = vld [vmem:[%s9597_s12 + $0x60] sm:$0xff]  ;;  %v8251_v19 = vpack.c.bf16 %v1992_v16, %v1990_v15  ;;  %v1991_v21 = vld [vmem:[%s16108_s2 + $0x170] sm:$0xff]  ;;  %v1994_v22 = vld [vmem:[%s16108_s2 + $0x188] sm:$0xff] }
  0x41   : > { %303 = vperm.xlu1 %8443, %v224_v18   ;;  %8226 = vmatpush1.bf16.msra.mxu0 %v8225_v40  ;;  %v8249_v18 = vpack.c.bf16 %v1987_v14, %v1985_v13  ;;  %v1989_v20 = vld [vmem:[%s16108_s2 + $0x160] sm:$0xff]  ;;  %v1996_v23 = vld [vmem:[%s16108_s2 + $0x198] sm:$0xff]  ;;  %v234_v24 = vld [vmem:[%s9597_s12 + $0x68] sm:$0xff]  ;;  %v1011_v6 = vsub.s32 1, %v608_v1  ;;  %v1015_v7 = vsub.s32 5, %v608_v1  ;;  %v1289_v9 = vsub.s32 6, %v608_v1 }
  0x42   : > { %8228 = vmatprep.subr.bf16.mxu0 %v8227_v41  ;;  %8403 = vmatpush1.bf16.msra.mxu1 %v8225_v40  ;;  %v8255_v26 = vpack.c.bf16 %v1996_v23, %v1994_v22  ;;  %v1993_v27 = vld [vmem:[%s16108_s2 + $0x180] sm:$0xff]  ;;  %v1995_v28 = vld [vmem:[%s16108_s2 + $0x190] sm:$0xff]  ;;  %v1998_v29 = vld [vmem:[%s16108_s2 + $0x1a8] sm:$0xff] }
  0x43   : > { %8388 = vmatprep.subr.bf16.mxu1 %v8227_v41  ;;  %v2000_v30 = vld [vmem:[%s16108_s2 + $0x1b8] sm:$0xff]  ;;  %v235_v31 = vld [vmem:[%s9597_s12 + $0x70] sm:$0xff]  ;;  %v1997_v34 = vld [vmem:[%s16108_s2 + $0x1a0] sm:$0xff] }
  0x44   : > { %770 = vperm.xlu0 %8440, %v225_v25   ;;  %v8259_v33 = vpack.c.bf16 %v2000_v30, %v1998_v29  ;;  %v1999_v35 = vld [vmem:[%s16108_s2 + $0x1b0] sm:$0xff]  ;;  %v2002_v36 = vld [vmem:[%s16108_s2 + $0x1c8] sm:$0xff]  ;;  %v2004_v37 = vld [vmem:[%s16108_s2 + $0x1d8] sm:$0xff] }
  0x45   : > { %308 = vperm.xlu1 %8443, %v225_v25   ;;  %8230 = vmatpush1.bf16.msra.mxu0 %v8229_v47  ;;  %v8253_v25 = vpack.c.bf16 %v1991_v21, %v1989_v20  ;;  %v236_v38 = vld [vmem:[%s9597_s12 + $0x78] sm:$0xff]  ;;  %v8263_v40 = vpack.c.bf16 %v2004_v37, %v2002_v36  ;;  %v2001_v41 = vld [vmem:[%s16108_s2 + $0x1c0] sm:$0xff]  ;;  %v2003_v42 = vld [vmem:[%s16108_s2 + $0x1d0] sm:$0xff] }
  0x46   : > { %8232 = vmatprep.subr.bf16.mxu0 %v8231_v48  ;;  %8404 = vmatpush1.bf16.msra.mxu1 %v8229_v47  ;;  %v2006_v43 = vld [vmem:[%s16108_s2 + $0x1e8] sm:$0xff]  ;;  %v2008_v44 = vld [vmem:[%s16108_s2 + $0x1f8] sm:$0xff]  ;;  %v237_v45 = vld [vmem:[%s9597_s12 + $0x80] sm:$0xff] }
  0x47   : > { %8389 = vmatprep.subr.bf16.mxu1 %v8231_v48  ;;  %v8267_v47 = vpack.c.bf16 %v2008_v44, %v2006_v43  ;;  %v2005_v48 = vld [vmem:[%s16108_s2 + $0x1e0] sm:$0xff]  ;;  %v2007_v49 = vld [vmem:[%s16108_s2 + $0x1f0] sm:$0xff]  ;;  %v238_v50 = vld [vmem:[%s9597_s12 + $0x88] sm:$0xff] }
  0x48   : > { %774 = vperm.xlu0 %8440, %v226_v32   ;;  %v8269_v51 = vpack.c.bf16 %v2007_v49, %v2005_v48  ;;  %v239_v52 = vld [vmem:[%s9597_s12 + $0x90] sm:$0xff]  ;;  %v244_v57 = vld [vmem:[%s9597_s12 + $0xb8] sm:$0xff]  ;;  %v245_v58 = vld [vmem:[%s9597_s12 + $0xc0] sm:$0xff] }
  0x49   : > { %313 = vperm.xlu1 %8443, %v226_v32   ;;  %8234 = vmatpush1.bf16.msra.mxu0 %v8233_v54  ;;  %v8257_v32 = vpack.c.bf16 %v1995_v28, %v1993_v27  ;;  %v243_v56 = vld [vmem:[%s9597_s12 + $0xb0] sm:$0xff]  ;;  %v246_v59 = vld [vmem:[%s9597_s12 + $0xc8] sm:$0xff]  ;;  %v253_v8 = vld [vmem:[%s9597_s12 + $0x100] sm:$0xff] }
  0x4a   : > { %8236 = vmatprep.subr.bf16.mxu0 %v8235_v55  ;;  %8405 = vmatpush1.bf16.msra.mxu1 %v8233_v54  ;;  %v241_v54 = vld [vmem:[%s9597_s12 + $0xa0] sm:$0xff]  ;;  %v250_v0 = vld [vmem:[%s9597_s12 + $0xe8] sm:$0xff]  ;;  %v251_v2 = vld [vmem:[%s9597_s12 + $0xf0] sm:$0xff] }
  0x4b   : > { %8390 = vmatprep.subr.bf16.mxu1 %v8235_v55  ;;  %v242_v55 = vld [vmem:[%s9597_s12 + $0xa8] sm:$0xff]  ;;  %v252_v15 = vld [vmem:[%s9597_s12 + $0xf8] sm:$0xff] }
  0x4c   : > { %778 = vperm.xlu0 %8440, %v227_v39  }
  0x4d   : > { %318 = vperm.xlu1 %8443, %v227_v39   ;;  %8238 = vmatpush1.bf16.msra.mxu0 %v8237_v61  ;;  %v8261_v39 = vpack.c.bf16 %v1999_v35, %v1997_v34 }
  0x4e   : > { %8240 = vmatprep.subr.bf16.mxu0 %v8239_v62  ;;  %8406 = vmatpush1.bf16.msra.mxu1 %v8237_v61  ;;  %v248_v61 = vld [vmem:[%s9597_s12 + $0xd8] sm:$0xff] }
  0x4f   : > { %8391 = vmatprep.subr.bf16.mxu1 %v8239_v62  ;;  %v249_v62 = vld [vmem:[%s9597_s12 + $0xe0] sm:$0xff] }
  0x50   : > { %782 = vperm.xlu0 %8440, %v228_v46  }
  0x51   : > { %323 = vperm.xlu1 %8443, %v228_v46   ;;  %8242 = vmatpush1.bf16.msra.mxu0 %v8241_v4  ;;  %v8265_v46 = vpack.c.bf16 %v2003_v42, %v2001_v41 }
  0x52   : > { %8244 = vmatprep.subr.bf16.mxu0 %v8243_v5  ;;  %8407 = vmatpush1.bf16.msra.mxu1 %v8241_v4  ;;  %v613_v4 = vsub.s32 4, %v608_v1 }
  0x53   : > { %8392 = vmatprep.subr.bf16.mxu1 %v8243_v5  ;;  %v285_v5 = vld [vmem:[%s16107_s1] sm:$0x77] }
  0x54   : > { %786 = vperm.xlu0 %8440, %v229_v53   ;;  %v1012_v13 = vrot.slane %v285_v5, %v1011_v6  ;;  %v1016_v14 = vrot.slane %v285_v5, %v1015_v7 }
  0x55   : > { %328 = vperm.xlu1 %8443, %v229_v53   ;;  %8246 = vmatpush1.bf16.msra.mxu0 %v8245_v11  ;;  %v240_v53 = vld [vmem:[%s9597_s12 + $0x98] sm:$0xff] }
  0x56   : > { %8248 = vmatprep.subr.bf16.mxu0 %v8247_v12  ;;  %8408 = vmatpush1.bf16.msra.mxu1 %v8245_v11  ;;  %v614_v11 = vrot.slane %v285_v5, %v613_v4  ;;  %v9831_v22 = vrot.slane %v1012_v13, %v1011_v6  ;;  %v9833_v23 = vrot.slane %v1016_v14, %v1011_v6  ;;  %v8142_v4 = vld [vmem:[%s16108_s2 + $0x208] sm:$0xff] }
  0x57   : > { %8393 = vmatprep.subr.bf16.mxu1 %v8247_v12  ;;  %v1285_v12 = vsub.s32 2, %v608_v1 }
  0x58   : > { %790 = vperm.xlu0 %8440, %v230_v60  }
  0x59   : > { %333 = vperm.xlu1 %8443, %v230_v60   ;;  %8250 = vmatpush1.bf16.msra.mxu0 %v8249_v18  ;;  %v247_v60 = vld [vmem:[%s9597_s12 + $0xd0] sm:$0xff]  ;;  %v1286_v21 = vrot.slane %v285_v5, %v1285_v12 }
  0x5a   : > { %8252 = vmatprep.subr.bf16.mxu0 %v8251_v19  ;;  %8409 = vmatpush1.bf16.msra.mxu1 %v8249_v18  ;;  %v1290_v18 = vrot.slane %v285_v5, %v1289_v9 }
  0x5b   : > { %8394 = vmatprep.subr.bf16.mxu1 %v8251_v19 }
  0x5c   : > { %794 = vperm.xlu0 %8440, %v231_v3  }
  0x5d   : > { %338 = vperm.xlu1 %8443, %v231_v3   ;;  %8254 = vmatpush1.bf16.msra.mxu0 %v8253_v25  ;;  %v609_v3 = vsub.s32 0, %v608_v1 }
  0x5e   : > { %8256 = vmatprep.subr.bf16.mxu0 %v8255_v26  ;;  %8410 = vmatpush1.bf16.msra.mxu1 %v8253_v25  ;;  %v217_v25 = vand.u32 127, %v216_v63 }
  0x5f   : > { %8395 = vmatprep.subr.bf16.mxu1 %v8255_v26  ;;  %v9829_v20 = vrot.slane %v614_v11, %v609_v3  ;;  %v9836_v26 = vrot.slane %v1290_v18, %v1285_v12 }
  0x60   : > { %798 = vperm.xlu0 %8440, %v232_v10  }
  0x61   : > { %343 = vperm.xlu1 %8443, %v232_v10   ;;  %8258 = vmatpush1.bf16.msra.mxu0 %v8257_v32  ;;  %v610_v10 = vrot.slane %v285_v5, %v609_v3  ;;  %v8144_v5 = vld [vmem:[%s16108_s2 + $0x218] sm:$0xff] }
  0x62   : > { %8260 = vmatprep.subr.bf16.mxu0 %v8259_v33  ;;  %8411 = vmatpush1.bf16.msra.mxu1 %v8257_v32  ;;  %v9841_v32 = vrot.slane %v1286_v21, %v1285_v12 }
  0x63   : > { %8396 = vmatprep.subr.bf16.mxu1 %v8259_v33  ;;  %v9827_v19 = vrot.slane %v610_v10, %v609_v3  ;;  %v257_v3 = vld [vmem:[%s9597_s12 + $0x120] sm:$0xff] }
  0x64   : > { %802 = vperm.xlu0 %8440, %v233_v17  }
  0x65   : > { %348 = vperm.xlu1 %8443, %v233_v17   ;;  %8262 = vmatpush1.bf16.msra.mxu0 %v8261_v39 }
  0x66   : > { %8264 = vmatprep.subr.bf16.mxu0 %v8263_v40  ;;  %8412 = vmatpush1.bf16.msra.mxu1 %v8261_v39  ;;  %v9849_v39 = vadd.s32 128, %v217_v25 }
  0x67   : > { %8397 = vmatprep.subr.bf16.mxu1 %v8263_v40 }
  0x68   : > { %806 = vperm.xlu0 %8440, %v234_v24   ;;  %vm220_vm0 = vcmp.lt.s32.totalorder %v9849_v39, 130 }
  0x69   : > { %353 = vperm.xlu1 %8443, %v234_v24   ;;  %8266 = vmatpush1.bf16.msra.mxu0 %v8265_v46  ;;  %v254_v24 = vld [vmem:[%s9597_s12 + $0x108] sm:$0xff] }
  0x6a   : > { %8268 = vmatprep.subr.bf16.mxu0 %v8267_v47  ;;  %8413 = vmatpush1.bf16.msra.mxu1 %v8265_v46 }
  0x6b   : > { %8398 = vmatprep.subr.bf16.mxu1 %v8267_v47 }
  0x6c   : > { %810 = vperm.xlu0 %8440, %v235_v31  }
  0x6d   : > { %358 = vperm.xlu1 %8443, %v235_v31   ;;  %8270 = vmatpush1.bf16.msra.mxu0 %v8269_v51 }
  0x6e   : > { %8414 = vmatpush1.bf16.msra.mxu1 %v8269_v51 }
  0x70   : > { %814 = vperm.xlu0 %8440, %v236_v38  }
  0x71   : > { %363 = vperm.xlu1 %8443, %v236_v38   ;;  %v255_v38 = vld [vmem:[%s9597_s12 + $0x110] sm:$0xff] }
  0x74   : > { %818 = vperm.xlu0 %8440, %v237_v45  }
  0x75   : > { %368 = vperm.xlu1 %8443, %v237_v45  }
  0x78   : > { %822 = vperm.xlu0 %8440, %v238_v50  }
  0x79   : > { %373 = vperm.xlu1 %8443, %v238_v50  }
  0x7c   : > { %826 = vperm.xlu0 %8440, %v239_v52  }
  0x7d   : > { %378 = vperm.xlu1 %8443, %v239_v52   ;;  %v256_v52 = vld [vmem:[%s9597_s12 + $0x118] sm:$0xff] }
  0x80   : > { %830 = vperm.xlu0 %8440, %v240_v53  }
  0x81   : > { %383 = vperm.xlu1 %8443, %v240_v53  }
  0x84   : > { %834 = vperm.xlu0 %8440, %v241_v54  }
  0x85   : > { %388 = vperm.xlu1 %8443, %v241_v54  }
  0x88   : > { %838 = vperm.xlu0 %8440, %v242_v55  }
  0x89   : > { %393 = vperm.xlu1 %8443, %v242_v55  }
  0x8c   : > { %842 = vperm.xlu0 %8440, %v243_v56  }
  0x8d   : > { %398 = vperm.xlu1 %8443, %v243_v56  }
  0x90   : > { %846 = vperm.xlu0 %8440, %v244_v57  }
  0x91   : > { %403 = vperm.xlu1 %8443, %v244_v57  }
  0x94   : > { %850 = vperm.xlu0 %8440, %v245_v58  }
  0x95   : > { %408 = vperm.xlu1 %8443, %v245_v58  }
  0x98   : > { %854 = vperm.xlu0 %8440, %v246_v59  }
  0x99   : > { %413 = vperm.xlu1 %8443, %v246_v59  }
  0x9c   : > { %858 = vperm.xlu0 %8440, %v247_v60  }
  0x9d   : > { %418 = vperm.xlu1 %8443, %v247_v60  }
  0xa0   : > { %862 = vperm.xlu0 %8440, %v248_v61  }
  0xa1   : > { %423 = vperm.xlu1 %8443, %v248_v61  }
  0xa4   : > { %866 = vperm.xlu0 %8440, %v249_v62  }
  0xa5   : > { %428 = vperm.xlu1 %8443, %v249_v62  }
  0xa8   : > { %870 = vperm.xlu0 %8440, %v250_v0  }
  0xa9   : > { %433 = vperm.xlu1 %8443, %v250_v0  }
  0xac   : > { %874 = vperm.xlu0 %8440, %v251_v2  }
  0xad   : > { %438 = vperm.xlu1 %8443, %v251_v2  }
  0xb0   : > { %882 = vperm.xlu0 %8440, %v253_v8  }
  0xb1   : > { %448 = vperm.xlu1 %8443, %v253_v8   ;;  %v8271_v8 = vpack.c.bf16 %v8144_v5, %v8142_v4 }
  0xb2   : > { %v294_v16 = vpop.permute.xlu1 %293  ;;  %v289_v17 = vpop.permute.xlu0 %288 }
  0xb3   : > { %v628_v27 = vmul.f32 %v9829_v20, %v294_v16  ;;  %v625_v28 = vmul.f32 %v9827_v19, %v289_v17  ;;  %v626_v29 = vmul.f32 %v9829_v20, %v289_v17  ;;  %v627_v37 = vmul.f32 %v9827_v19, %v294_v16  ;;  %8272 = vmatprep.subr.bf16.mxu1 %v8271_v8 }
  0xb4   : > { %878 = vperm.xlu0 %8440, %v252_v15  }
  0xb5   : > { %443 = vperm.xlu1 %8443, %v252_v15  }
  0xb7   : > { %v759_v30 = vpop.permute.xlu1 %758  ;;  %v755_v31 = vpop.permute.xlu0 %754 }
  0xb8   : > { %v1029_v33 = vmul.f32 %v9831_v22, %v759_v30  ;;  %v1030_v34 = vmul.f32 %v9833_v23, %v759_v30  ;;  %v1027_v35 = vmul.f32 %v9831_v22, %v755_v31  ;;  %v1028_v36 = vmul.f32 %v9833_v23, %v755_v31  ;;  %886 = vperm.xlu0 %8440, %v254_v24  }
  0xb9   : > { %453 = vperm.xlu1 %8443, %v254_v24   ;;  %v258_v24 = vld [vmem:[%s9597_s12 + $0x128] sm:$0xff] }
  0xba   : > { %v1158_v40 = vadd.f32 %v1030_v34, %v628_v27  ;;  %v1155_v41 = vadd.f32 %v1027_v35, %v625_v28  ;;  %v1156_v42 = vadd.f32 %v1028_v36, %v626_v29  ;;  %v1157_v43 = vadd.f32 %v1029_v33, %v627_v37 }
  0xbb   : > { %v763_v44 = vpop.permute.xlu0 %762 }
  0xbc   : > { %v1031_v45 = vmul.f32 %v9831_v22, %v763_v44  ;;  %v1032_v46 = vmul.f32 %v9833_v23, %v763_v44  ;;  %v299_v47 = vpop.permute.xlu1 %298  ;;  %890 = vperm.xlu0 %8440, %v255_v38   ;;  %v1302_v48 = vadd.f32 %v9836_v26, %v1156_v42  ;;  %v1301_v49 = vadd.f32 %v9841_v32, %v1155_v41  ;;  %v259_v42 = vld [vmem:[%s9597_s12 + $0x130] sm:$0xff] }
  0xbd   : > { %v629_v50 = vmul.f32 %v9827_v19, %v299_v47  ;;  %v630_v51 = vmul.f32 %v9829_v20, %v299_v47  ;;  %458 = vperm.xlu1 %8443, %v255_v38   ;;  %v1304_v53 = vadd.f32 %v9836_v26, %v1158_v40  ;;  %v1303_v59 = vadd.f32 %v9841_v32, %v1157_v43 }
  0xbe   : > { %v1430_v54 = vmax.f32 %v1302_v48, 0.0  ;;  %v1429_v0 = vmax.f32 %v1301_v49, 0.0 }
  0xbf   : > { %v1159_v55 = vadd.f32 %v1031_v45, %v629_v50  ;;  %v1160_v56 = vadd.f32 %v1032_v46, %v630_v51  ;;  %v767_v57 = vpop.permute.xlu0 %766  ;;  %v1432_v58 = vmax.f32 %v1304_v53, 0.0  ;;  %v1431_v11 = vmax.f32 %v1303_v59, 0.0 }
  0xc0   : > { %v1033_v60 = vmul.f32 %v9831_v22, %v767_v57  ;;  %v1034_v61 = vmul.f32 %v9833_v23, %v767_v57  ;;  %v304_v62 = vpop.permute.xlu1 %303  ;;  %894 = vperm.xlu0 %8440, %v256_v52   ;;  %v1562_v63 = vsel %vm220_vm0, %v1430_v54, %v1302_v48 }
  0xc1   : > { %v631_v1 = vmul.f32 %v9827_v19, %v304_v62  ;;  %v632_v2 = vmul.f32 %v9829_v20, %v304_v62  ;;  %463 = vperm.xlu1 %8443, %v256_v52   ;;  %2073 = vmatprep.mubr.f32.mxu0 %v1562_v63  ;;  %v1564_v6 = vsel %vm220_vm0, %v1432_v58, %v1304_v53 }
  0xc2   : > { %2074 = vmatmul.mubr.f32.vlgmr.msra.gmra.mrb[0].mxu0 %v1429_v0  ;;  %v1306_v7 = vadd.f32 %v9836_v26, %v1160_v56  ;;  %v1305_v12 = vadd.f32 %v9841_v32, %v1159_v55  ;;  %v260_v56 = vld [vmem:[%s9597_s12 + $0x138] sm:$0xff] }
  0xc3   : > { %v1162_v9 = vadd.f32 %v1034_v61, %v632_v2  ;;  %2079 = vmatprep.mubr.f32.mxu0 %v1564_v6  ;;  %v771_v10 = vpop.permute.xlu0 %770  ;;  %v1161_v13 = vadd.f32 %v1033_v60, %v631_v1  ;;  %v261_v6 = vld [vmem:[%s9597_s12 + $0x140] sm:$0xff] }
  0xc4   : > { %v1035_v14 = vmul.f32 %v9831_v22, %v771_v10  ;;  %v1036_v15 = vmul.f32 %v9833_v23, %v771_v10  ;;  %v309_v16 = vpop.permute.xlu1 %308  ;;  %898 = vperm.xlu0 %8440, %v257_v3   ;;  %v1434_v17 = vmax.f32 %v1306_v7, 0.0  ;;  %v1433_v36 = vmax.f32 %v1305_v12, 0.0 }
  0xc5   : > { %v633_v18 = vmul.f32 %v9827_v19, %v309_v16  ;;  %v634_v21 = vmul.f32 %v9829_v20, %v309_v16  ;;  %468 = vperm.xlu1 %8443, %v257_v3   ;;  %v1308_v25 = vadd.f32 %v9836_v26, %v1162_v9  ;;  %v1307_v37 = vadd.f32 %v9841_v32, %v1161_v13 }
  0xc6   : > { %2080 = vmatmul.mubr.f32.gmra.mrb[2].mxu0 %v1431_v11  ;;  %v1566_v27 = vsel %vm220_vm0, %v1434_v17, %v1306_v7 }
  0xc7   : > { %v1163_v28 = vadd.f32 %v1035_v14, %v633_v18  ;;  %v1164_v29 = vadd.f32 %v1036_v15, %v634_v21  ;;  %2085 = vmatprep.mubr.f32.mxu0 %v1566_v27  ;;  %v775_v30 = vpop.permute.xlu0 %774  ;;  %v1436_v31 = vmax.f32 %v1308_v25, 0.0  ;;  %v1435_v52 = vmax.f32 %v1307_v37, 0.0 }
  0xc8   : > { %v1037_v33 = vmul.f32 %v9831_v22, %v775_v30  ;;  %v1038_v34 = vmul.f32 %v9833_v23, %v775_v30  ;;  %v314_v35 = vpop.permute.xlu1 %313  ;;  %902 = vperm.xlu0 %8440, %v258_v24  }
  0xc9   : > { %v635_v38 = vmul.f32 %v9827_v19, %v314_v35  ;;  %v636_v40 = vmul.f32 %v9829_v20, %v314_v35  ;;  %473 = vperm.xlu1 %8443, %v258_v24   ;;  %v1568_v41 = vsel %vm220_vm0, %v1436_v31, %v1308_v25  ;;  %v1310_v43 = vadd.f32 %v9836_v26, %v1164_v29  ;;  %v262_v24 = vld [vmem:[%s9597_s12 + $0x148] sm:$0xff] }
  0xca   : > { %2086 = vmatmul.mubr.f32.gmra.mrb[4].mxu0 %v1433_v36  ;;  %v1309_v47 = vadd.f32 %v9841_v32, %v1163_v28 }
  0xcb   : > { %v1166_v44 = vadd.f32 %v1038_v34, %v636_v40  ;;  %2091 = vmatprep.mubr.f32.mxu0 %v1568_v41  ;;  %v779_v45 = vpop.permute.xlu0 %778  ;;  %v1438_v46 = vmax.f32 %v1310_v43, 0.0  ;;  %v1165_v48 = vadd.f32 %v1037_v33, %v635_v38  ;;  %v263_v41 = vld [vmem:[%s9597_s12 + $0x150] sm:$0xff] }
  0xcc   : > { %v1039_v49 = vmul.f32 %v9831_v22, %v779_v45  ;;  %v1040_v50 = vmul.f32 %v9833_v23, %v779_v45  ;;  %v319_v51 = vpop.permute.xlu1 %318  ;;  %906 = vperm.xlu0 %8440, %v259_v42   ;;  %v1437_v60 = vmax.f32 %v1309_v47, 0.0 }
  0xcd   : > { %v637_v53 = vmul.f32 %v9827_v19, %v319_v51  ;;  %v638_v54 = vmul.f32 %v9829_v20, %v319_v51  ;;  %478 = vperm.xlu1 %8443, %v259_v42   ;;  %v1570_v55 = vsel %vm220_vm0, %v1438_v46, %v1310_v43  ;;  %v1312_v57 = vadd.f32 %v9836_v26, %v1166_v44 }
  0xce   : > { %2092 = vmatmul.mubr.f32.gmra.mrb[6].mxu0 %v1435_v52  ;;  %v1311_v2 = vadd.f32 %v9841_v32, %v1165_v48 }
  0xcf   : > { %v1168_v58 = vadd.f32 %v1040_v50, %v638_v54  ;;  %2097 = vmatprep.mubr.f32.mxu0 %v1570_v55  ;;  %v783_v59 = vpop.permute.xlu0 %782  ;;  %v1440_v61 = vmax.f32 %v1312_v57, 0.0  ;;  %v1167_v62 = vadd.f32 %v1039_v49, %v637_v53  ;;  %v264_v55 = vld [vmem:[%s9597_s12 + $0x158] sm:$0xff] }
  0xd0   : > { %v1041_v63 = vmul.f32 %v9831_v22, %v783_v59  ;;  %v1042_v0 = vmul.f32 %v9833_v23, %v783_v59  ;;  %v324_v1 = vpop.permute.xlu1 %323  ;;  %910 = vperm.xlu0 %8440, %v260_v56   ;;  %v1439_v15 = vmax.f32 %v1311_v2, 0.0 }
  0xd1   : > { %v639_v3 = vmul.f32 %v9827_v19, %v324_v1  ;;  %v640_v4 = vmul.f32 %v9829_v20, %v324_v1  ;;  %483 = vperm.xlu1 %8443, %v260_v56   ;;  %v1572_v5 = vsel %vm220_vm0, %v1440_v61, %v1312_v57  ;;  %v1314_v7 = vadd.f32 %v9836_v26, %v1168_v58 }
  0xd2   : > { %2098 = vmatmul.mubr.f32.gmra.mrb[8].mxu0 %v1437_v60  ;;  %v1313_v16 = vadd.f32 %v9841_v32, %v1167_v62 }
  0xd3   : > { %v1169_v8 = vadd.f32 %v1041_v63, %v639_v3  ;;  %v1170_v9 = vadd.f32 %v1042_v0, %v640_v4  ;;  %2103 = vmatprep.mubr.f32.mxu0 %v1572_v5  ;;  %v787_v10 = vpop.permute.xlu0 %786  ;;  %v1442_v11 = vmax.f32 %v1314_v7, 0.0  ;;  %v265_v5 = vld [vmem:[%s9597_s12 + $0x160] sm:$0xff] }
  0xd4   : > { %v1043_v12 = vmul.f32 %v9831_v22, %v787_v10  ;;  %v1044_v13 = vmul.f32 %v9833_v23, %v787_v10  ;;  %v329_v14 = vpop.permute.xlu1 %328  ;;  %914 = vperm.xlu0 %8440, %v261_v6   ;;  %v1441_v36 = vmax.f32 %v1313_v16, 0.0 }
  0xd5   : > { %v641_v17 = vmul.f32 %v9827_v19, %v329_v14  ;;  %v642_v18 = vmul.f32 %v9829_v20, %v329_v14  ;;  %488 = vperm.xlu1 %8443, %v261_v6   ;;  %v1574_v21 = vsel %vm220_vm0, %v1442_v11, %v1314_v7  ;;  %v1316_v25 = vadd.f32 %v9836_v26, %v1170_v9 }
  0xd6   : > { %2104 = vmatmul.mubr.f32.gmra.mrb[10].mxu0 %v1439_v15  ;;  %v1315_v30 = vadd.f32 %v9841_v32, %v1169_v8 }
  0xd7   : > { %v1172_v27 = vadd.f32 %v1044_v13, %v642_v18  ;;  %2109 = vmatprep.mubr.f32.mxu0 %v1574_v21  ;;  %v791_v28 = vpop.permute.xlu0 %790  ;;  %v1444_v29 = vmax.f32 %v1316_v25, 0.0  ;;  %v1171_v31 = vadd.f32 %v1043_v12, %v641_v17  ;;  %v266_v21 = vld [vmem:[%s9597_s12 + $0x168] sm:$0xff] }
  0xd8   : > { %v1045_v33 = vmul.f32 %v9831_v22, %v791_v28  ;;  %v1046_v34 = vmul.f32 %v9833_v23, %v791_v28  ;;  %v334_v35 = vpop.permute.xlu1 %333  ;;  %918 = vperm.xlu0 %8440, %v262_v24   ;;  %v1443_v45 = vmax.f32 %v1315_v30, 0.0 }
  0xd9   : > { %v643_v37 = vmul.f32 %v9827_v19, %v334_v35  ;;  %v644_v38 = vmul.f32 %v9829_v20, %v334_v35  ;;  %493 = vperm.xlu1 %8443, %v262_v24   ;;  %v1576_v40 = vsel %vm220_vm0, %v1444_v29, %v1316_v25  ;;  %v1318_v42 = vadd.f32 %v9836_v26, %v1172_v27 }
  0xda   : > { %2110 = vmatmul.mubr.f32.gmra.mrb[12].mxu0 %v1441_v36  ;;  %v1317_v51 = vadd.f32 %v9841_v32, %v1171_v31 }
  0xdb   : > { %v1174_v43 = vadd.f32 %v1046_v34, %v644_v38  ;;  %2115 = vmatprep.mubr.f32.mxu0 %v1576_v40  ;;  %v795_v44 = vpop.permute.xlu0 %794  ;;  %v1446_v46 = vmax.f32 %v1318_v42, 0.0  ;;  %v1173_v47 = vadd.f32 %v1045_v33, %v643_v37  ;;  %v267_v40 = vld [vmem:[%s9597_s12 + $0x170] sm:$0xff] }
  0xdc   : > { %v1047_v48 = vmul.f32 %v9831_v22, %v795_v44  ;;  %v1048_v49 = vmul.f32 %v9833_v23, %v795_v44  ;;  %v339_v50 = vpop.permute.xlu1 %338  ;;  %922 = vperm.xlu0 %8440, %v263_v41   ;;  %v1445_v0 = vmax.f32 %v1317_v51, 0.0 }
  0xdd   : > { %v645_v52 = vmul.f32 %v9827_v19, %v339_v50  ;;  %v646_v53 = vmul.f32 %v9829_v20, %v339_v50  ;;  %498 = vperm.xlu1 %8443, %v263_v41   ;;  %v1578_v54 = vsel %vm220_vm0, %v1446_v46, %v1318_v42  ;;  %v1320_v56 = vadd.f32 %v9836_v26, %v1174_v43 }
  0xde   : > { %2116 = vmatmul.mubr.f32.gmra.mrb[14].mxu0 %v1443_v45  ;;  %v1319_v1 = vadd.f32 %v9841_v32, %v1173_v47 }
  0xdf   : > { %v1175_v57 = vadd.f32 %v1047_v48, %v645_v52  ;;  %v1176_v58 = vadd.f32 %v1048_v49, %v646_v53  ;;  %2121 = vmatprep.mubr.f32.mxu0 %v1578_v54  ;;  %v799_v59 = vpop.permute.xlu0 %798  ;;  %v1448_v60 = vmax.f32 %v1320_v56, 0.0  ;;  %v268_v54 = vld [vmem:[%s9597_s12 + $0x178] sm:$0xff] }
  0xe0   : > { %v1049_v61 = vmul.f32 %v9831_v22, %v799_v59  ;;  %v1050_v62 = vmul.f32 %v9833_v23, %v799_v59  ;;  %v344_v63 = vpop.permute.xlu1 %343  ;;  %926 = vperm.xlu0 %8440, %v264_v55   ;;  %v1447_v15 = vmax.f32 %v1319_v1, 0.0 }
  0xe1   : > { %v647_v2 = vmul.f32 %v9827_v19, %v344_v63  ;;  %v648_v3 = vmul.f32 %v9829_v20, %v344_v63  ;;  %503 = vperm.xlu1 %8443, %v264_v55   ;;  %v1580_v4 = vsel %vm220_vm0, %v1448_v60, %v1320_v56  ;;  %v1322_v6 = vadd.f32 %v9836_v26, %v1176_v58 }
  0xe2   : > { %2122 = vmatmul.mubr.f32.gmra.mrb[16].mxu0 %v1445_v0  ;;  %v1321_v10 = vadd.f32 %v9841_v32, %v1175_v57 }
  0xe3   : > { %v1178_v7 = vadd.f32 %v1050_v62, %v648_v3  ;;  %2127 = vmatprep.mubr.f32.mxu0 %v1580_v4  ;;  %v803_v8 = vpop.permute.xlu0 %802  ;;  %v1450_v9 = vmax.f32 %v1322_v6, 0.0  ;;  %v1177_v11 = vadd.f32 %v1049_v61, %v647_v2  ;;  %v269_v4 = vld [vmem:[%s9597_s12 + $0x180] sm:$0xff] }
  0xe4   : > { %v1051_v12 = vmul.f32 %v9831_v22, %v803_v8  ;;  %v1052_v13 = vmul.f32 %v9833_v23, %v803_v8  ;;  %v349_v14 = vpop.permute.xlu1 %348  ;;  %930 = vperm.xlu0 %8440, %v265_v5   ;;  %v1449_v28 = vmax.f32 %v1321_v10, 0.0 }
  0xe5   : > { %v649_v16 = vmul.f32 %v9827_v19, %v349_v14  ;;  %v650_v17 = vmul.f32 %v9829_v20, %v349_v14  ;;  %508 = vperm.xlu1 %8443, %v265_v5   ;;  %v1582_v18 = vsel %vm220_vm0, %v1450_v9, %v1322_v6  ;;  %v1324_v24 = vadd.f32 %v9836_v26, %v1178_v7 }
  0xe6   : > { %2128 = vmatmul.mubr.f32.gmra.mrb[18].mxu0 %v1447_v15  ;;  %v1323_v35 = vadd.f32 %v9841_v32, %v1177_v11 }
  0xe7   : > { %v1180_v25 = vadd.f32 %v1052_v13, %v650_v17  ;;  %2133 = vmatprep.mubr.f32.mxu0 %v1582_v18  ;;  %v807_v27 = vpop.permute.xlu0 %806  ;;  %v1452_v29 = vmax.f32 %v1324_v24, 0.0  ;;  %v1179_v30 = vadd.f32 %v1051_v12, %v649_v16 }
  0xe8   : > { %v1053_v31 = vmul.f32 %v9831_v22, %v807_v27  ;;  %v1054_v33 = vmul.f32 %v9833_v23, %v807_v27  ;;  %v354_v34 = vpop.permute.xlu1 %353  ;;  %934 = vperm.xlu0 %8440, %v266_v21   ;;  %v1451_v49 = vmax.f32 %v1323_v35, 0.0 }
  0xe9   : > { %v651_v36 = vmul.f32 %v9827_v19, %v354_v34  ;;  %v652_v37 = vmul.f32 %v9829_v20, %v354_v34  ;;  %513 = vperm.xlu1 %8443, %v266_v21   ;;  %v1584_v38 = vsel %vm220_vm0, %v1452_v29, %v1324_v24  ;;  %v1326_v41 = vadd.f32 %v9836_v26, %v1180_v25  ;;  %v270_v21 = vld [vmem:[%s9597_s12 + $0x188] sm:$0xff] }
  0xea   : > { %2134 = vmatmul.mubr.f32.gmra.mrb[20].mxu0 %v1449_v28  ;;  %v1325_v50 = vadd.f32 %v9841_v32, %v1179_v30 }
  0xeb   : > { %v1181_v42 = vadd.f32 %v1053_v31, %v651_v36  ;;  %v1182_v43 = vadd.f32 %v1054_v33, %v652_v37  ;;  %2139 = vmatprep.mubr.f32.mxu0 %v1584_v38  ;;  %v811_v44 = vpop.permute.xlu0 %810  ;;  %v1454_v45 = vmax.f32 %v1326_v41, 0.0 }
  0xec   : > { %v1055_v46 = vmul.f32 %v9831_v22, %v811_v44  ;;  %v1056_v47 = vmul.f32 %v9833_v23, %v811_v44  ;;  %v359_v48 = vpop.permute.xlu1 %358  ;;  %938 = vperm.xlu0 %8440, %v267_v40   ;;  %v1453_v0 = vmax.f32 %v1325_v50, 0.0 }
  0xed   : > { %v653_v51 = vmul.f32 %v9827_v19, %v359_v48  ;;  %v654_v52 = vmul.f32 %v9829_v20, %v359_v48  ;;  %518 = vperm.xlu1 %8443, %v267_v40   ;;  %v1586_v53 = vsel %vm220_vm0, %v1454_v45, %v1326_v41  ;;  %v1328_v55 = vadd.f32 %v9836_v26, %v1182_v43  ;;  %v271_v40 = vld [vmem:[%s9597_s12 + $0x190] sm:$0xff] }
  0xee   : > { %2140 = vmatmul.mubr.f32.gmra.mrb[22].mxu0 %v1451_v49  ;;  %v1327_v59 = vadd.f32 %v9841_v32, %v1181_v42 }
  0xef   : > { %v1184_v56 = vadd.f32 %v1056_v47, %v654_v52  ;;  %2145 = vmatprep.mubr.f32.mxu0 %v1586_v53  ;;  %v815_v57 = vpop.permute.xlu0 %814  ;;  %v1456_v58 = vmax.f32 %v1328_v55, 0.0  ;;  %v1183_v60 = vadd.f32 %v1055_v46, %v653_v51 }
  0xf0   : > { %v1057_v61 = vmul.f32 %v9831_v22, %v815_v57  ;;  %v1058_v62 = vmul.f32 %v9833_v23, %v815_v57  ;;  %v364_v63 = vpop.permute.xlu1 %363  ;;  %942 = vperm.xlu0 %8440, %v268_v54   ;;  %v1455_v8 = vmax.f32 %v1327_v59, 0.0 }
  0xf1   : > { %v655_v1 = vmul.f32 %v9827_v19, %v364_v63  ;;  %v656_v2 = vmul.f32 %v9829_v20, %v364_v63  ;;  %523 = vperm.xlu1 %8443, %v268_v54   ;;  %v1588_v3 = vsel %vm220_vm0, %v1456_v58, %v1328_v55  ;;  %v1330_v5 = vadd.f32 %v9836_v26, %v1184_v56  ;;  %v272_v54 = vld [vmem:[%s9597_s12 + $0x198] sm:$0xff] }
  0xf2   : > { %2146 = vmatmul.mubr.f32.gmra.mrb[24].mxu0 %v1453_v0  ;;  %v1329_v14 = vadd.f32 %v9841_v32, %v1183_v60 }
  0xf3   : > { %v1186_v6 = vadd.f32 %v1058_v62, %v656_v2  ;;  %2151 = vmatprep.mubr.f32.mxu0 %v1588_v3  ;;  %v819_v7 = vpop.permute.xlu0 %818  ;;  %v1458_v9 = vmax.f32 %v1330_v5, 0.0  ;;  %v1185_v10 = vadd.f32 %v1057_v61, %v655_v1 }
  0xf4   : > { %v1059_v11 = vmul.f32 %v9831_v22, %v819_v7  ;;  %v1060_v12 = vmul.f32 %v9833_v23, %v819_v7  ;;  %v369_v13 = vpop.permute.xlu1 %368  ;;  %946 = vperm.xlu0 %8440, %v269_v4   ;;  %v1457_v33 = vmax.f32 %v1329_v14, 0.0 }
  0xf5   : > { %v1332_v15 = vadd.f32 %v9836_v26, %v1186_v6  ;;  %v657_v16 = vmul.f32 %v9827_v19, %v369_v13  ;;  %v658_v17 = vmul.f32 %v9829_v20, %v369_v13  ;;  %528 = vperm.xlu1 %8443, %v269_v4   ;;  %v1590_v18 = vsel %vm220_vm0, %v1458_v9, %v1330_v5  ;;  %v273_v4 = vld [vmem:[%s9597_s12 + $0x1a0] sm:$0xff] }
  0xf6   : > { %2152 = vmatmul.mubr.f32.gmra.mrb[26].mxu0 %v1455_v8  ;;  %v1331_v34 = vadd.f32 %v9841_v32, %v1185_v10 }
  0xf7   : > { %v1187_v24 = vadd.f32 %v1059_v11, %v657_v16  ;;  %v1188_v25 = vadd.f32 %v1060_v12, %v658_v17  ;;  %2157 = vmatprep.mubr.f32.mxu0 %v1590_v18  ;;  %v823_v27 = vpop.permute.xlu0 %822  ;;  %v1460_v28 = vmax.f32 %v1332_v15, 0.0  ;;  %v274_v18 = vld [vmem:[%s9597_s12 + $0x1a8] sm:$0xff] }
  0xf8   : > { %v1061_v29 = vmul.f32 %v9831_v22, %v823_v27  ;;  %v1062_v30 = vmul.f32 %v9833_v23, %v823_v27  ;;  %v374_v31 = vpop.permute.xlu1 %373  ;;  %950 = vperm.xlu0 %8440, %v270_v21   ;;  %v1459_v49 = vmax.f32 %v1331_v34, 0.0 }
  0xf9   : > { %v1334_v35 = vadd.f32 %v9836_v26, %v1188_v25  ;;  %v659_v36 = vmul.f32 %v9827_v19, %v374_v31  ;;  %v660_v37 = vmul.f32 %v9829_v20, %v374_v31  ;;  %533 = vperm.xlu1 %8443, %v270_v21   ;;  %v1592_v38 = vsel %vm220_vm0, %v1460_v28, %v1332_v15 }
  0xfa   : > { %2158 = vmatmul.mubr.f32.gmra.mrb[28].mxu0 %v1457_v33  ;;  %v1333_v44 = vadd.f32 %v9841_v32, %v1187_v24 }
  0xfb   : > { %v1190_v41 = vadd.f32 %v1062_v30, %v660_v37  ;;  %2163 = vmatprep.mubr.f32.mxu0 %v1592_v38  ;;  %v827_v42 = vpop.permute.xlu0 %826  ;;  %v1462_v43 = vmax.f32 %v1334_v35, 0.0  ;;  %v1189_v45 = vadd.f32 %v1061_v29, %v659_v36  ;;  %v275_v38 = vld [vmem:[%s9597_s12 + $0x1b0] sm:$0xff] }
  0xfc   : > { %v1063_v46 = vmul.f32 %v9831_v22, %v827_v42  ;;  %v1064_v47 = vmul.f32 %v9833_v23, %v827_v42  ;;  %v379_v48 = vpop.permute.xlu1 %378  ;;  %954 = vperm.xlu0 %8440, %v271_v40   ;;  %v1461_v57 = vmax.f32 %v1333_v44, 0.0 }
  0xfd   : > { %v1336_v50 = vadd.f32 %v9836_v26, %v1190_v41  ;;  %v661_v51 = vmul.f32 %v9827_v19, %v379_v48  ;;  %v662_v52 = vmul.f32 %v9829_v20, %v379_v48  ;;  %538 = vperm.xlu1 %8443, %v271_v40   ;;  %v1594_v53 = vsel %vm220_vm0, %v1462_v43, %v1334_v35 }
  0xfe   : > { %2164 = vmatmul.mubr.f32.gmra.mrb[30].mxu0 %v1459_v49  ;;  %v1335_v63 = vadd.f32 %v9841_v32, %v1189_v45 }
  0xff   : > { %v1192_v55 = vadd.f32 %v1064_v47, %v662_v52  ;;  %2169 = vmatprep.mubr.f32.mxu0 %v1594_v53  ;;  %v831_v56 = vpop.permute.xlu0 %830  ;;  %v1464_v58 = vmax.f32 %v1336_v50, 0.0  ;;  %v1191_v59 = vadd.f32 %v1063_v46, %v661_v51  ;;  %v276_v53 = vld [vmem:[%s9597_s12 + $0x1b8] sm:$0xff] }
 0x100   : > { %v1065_v60 = vmul.f32 %v9831_v22, %v831_v56  ;;  %v1066_v61 = vmul.f32 %v9833_v23, %v831_v56  ;;  %v384_v62 = vpop.permute.xlu1 %383  ;;  %958 = vperm.xlu0 %8440, %v272_v54   ;;  %v1463_v12 = vmax.f32 %v1335_v63, 0.0 }
 0x101   : > { %v1338_v0 = vadd.f32 %v9836_v26, %v1192_v55  ;;  %v663_v1 = vmul.f32 %v9827_v19, %v384_v62  ;;  %v664_v2 = vmul.f32 %v9829_v20, %v384_v62  ;;  %543 = vperm.xlu1 %8443, %v272_v54   ;;  %v1596_v3 = vsel %vm220_vm0, %v1464_v58, %v1336_v50 }
 0x102   : > { %2170 = vmatmul.mubr.f32.gmra.mrb[32].mxu0 %v1461_v57  ;;  %v1337_v13 = vadd.f32 %v9841_v32, %v1191_v59 }
 0x103   : > { %v1193_v5 = vadd.f32 %v1065_v60, %v663_v1  ;;  %v1194_v6 = vadd.f32 %v1066_v61, %v664_v2  ;;  %2175 = vmatprep.mubr.f32.mxu0 %v1596_v3  ;;  %v835_v7 = vpop.permute.xlu0 %834  ;;  %v1466_v8 = vmax.f32 %v1338_v0, 0.0  ;;  %v277_v3 = vld [vmem:[%s9597_s12 + $0x1c0] sm:$0xff] }
 0x104   : > { %v1067_v9 = vmul.f32 %v9831_v22, %v835_v7  ;;  %v1068_v10 = vmul.f32 %v9833_v23, %v835_v7  ;;  %v389_v11 = vpop.permute.xlu1 %388  ;;  %962 = vperm.xlu0 %8440, %v273_v4   ;;  %v1465_v33 = vmax.f32 %v1337_v13, 0.0 }
 0x105   : > { %v1340_v14 = vadd.f32 %v9836_v26, %v1194_v6  ;;  %v665_v15 = vmul.f32 %v9827_v19, %v389_v11  ;;  %v666_v16 = vmul.f32 %v9829_v20, %v389_v11  ;;  %548 = vperm.xlu1 %8443, %v273_v4   ;;  %v1598_v17 = vsel %vm220_vm0, %v1466_v8, %v1338_v0 }
 0x106   : > { %2176 = vmatmul.mubr.f32.gmra.mrb[34].mxu0 %v1463_v12  ;;  %v1339_v27 = vadd.f32 %v9841_v32, %v1193_v5 }
 0x107   : > { %v1196_v21 = vadd.f32 %v1068_v10, %v666_v16  ;;  %2181 = vmatprep.mubr.f32.mxu0 %v1598_v17  ;;  %v839_v24 = vpop.permute.xlu0 %838  ;;  %v1468_v25 = vmax.f32 %v1340_v14, 0.0  ;;  %v1195_v28 = vadd.f32 %v1067_v9, %v665_v15  ;;  %v278_v17 = vld [vmem:[%s9597_s12 + $0x1c8] sm:$0xff] }
 0x108   : > { %v1069_v29 = vmul.f32 %v9831_v22, %v839_v24  ;;  %v1070_v30 = vmul.f32 %v9833_v23, %v839_v24  ;;  %v394_v31 = vpop.permute.xlu1 %393  ;;  %966 = vperm.xlu0 %8440, %v274_v18   ;;  %v1467_v42 = vmax.f32 %v1339_v27, 0.0 }
 0x109   : > { %v1342_v34 = vadd.f32 %v9836_v26, %v1196_v21  ;;  %v667_v35 = vmul.f32 %v9827_v19, %v394_v31  ;;  %v668_v36 = vmul.f32 %v9829_v20, %v394_v31  ;;  %553 = vperm.xlu1 %8443, %v274_v18   ;;  %v1600_v37 = vsel %vm220_vm0, %v1468_v25, %v1340_v14 }
 0x10a   : > { %2182 = vmatmul.mubr.f32.gmra.mrb[36].mxu0 %v1465_v33  ;;  %v1341_v48 = vadd.f32 %v9841_v32, %v1195_v28 }
 0x10b   : > { %v1198_v40 = vadd.f32 %v1070_v30, %v668_v36  ;;  %2187 = vmatprep.mubr.f32.mxu0 %v1600_v37  ;;  %v843_v41 = vpop.permute.xlu0 %842  ;;  %v1470_v43 = vmax.f32 %v1342_v34, 0.0  ;;  %v1197_v44 = vadd.f32 %v1069_v29, %v667_v35  ;;  %v279_v37 = vld [vmem:[%s9597_s12 + $0x1d0] sm:$0xff] }
 0x10c   : > { %v1071_v45 = vmul.f32 %v9831_v22, %v843_v41  ;;  %v1072_v46 = vmul.f32 %v9833_v23, %v843_v41  ;;  %v399_v47 = vpop.permute.xlu1 %398  ;;  %970 = vperm.xlu0 %8440, %v275_v38   ;;  %v1469_v61 = vmax.f32 %v1341_v48, 0.0 }
 0x10d   : > { %v1344_v49 = vadd.f32 %v9836_v26, %v1198_v40  ;;  %v669_v50 = vmul.f32 %v9827_v19, %v399_v47  ;;  %v670_v51 = vmul.f32 %v9829_v20, %v399_v47  ;;  %558 = vperm.xlu1 %8443, %v275_v38   ;;  %v1602_v52 = vsel %vm220_vm0, %v1470_v43, %v1342_v34 }
 0x10e   : > { %2188 = vmatmul.mubr.f32.gmra.mrb[38].mxu0 %v1467_v42  ;;  %v1343_v62 = vadd.f32 %v9841_v32, %v1197_v44 }
 0x10f   : > { %v1199_v54 = vadd.f32 %v1071_v45, %v669_v50  ;;  %v1200_v55 = vadd.f32 %v1072_v46, %v670_v51  ;;  %2193 = vmatprep.mubr.f32.mxu0 %v1602_v52  ;;  %v847_v56 = vpop.permute.xlu0 %846  ;;  %v1472_v57 = vmax.f32 %v1344_v49, 0.0  ;;  %v280_v52 = vld [vmem:[%s9597_s12 + $0x1d8] sm:$0xff] }
 0x110   : > { %v1073_v58 = vmul.f32 %v9831_v22, %v847_v56  ;;  %v1074_v59 = vmul.f32 %v9833_v23, %v847_v56  ;;  %v404_v60 = vpop.permute.xlu1 %403  ;;  %974 = vperm.xlu0 %8440, %v276_v53   ;;  %v1471_v12 = vmax.f32 %v1343_v62, 0.0 }
 0x111   : > { %v1346_v63 = vadd.f32 %v9836_v26, %v1200_v55  ;;  %v671_v0 = vmul.f32 %v9827_v19, %v404_v60  ;;  %v672_v1 = vmul.f32 %v9829_v20, %v404_v60  ;;  %563 = vperm.xlu1 %8443, %v276_v53   ;;  %v1604_v2 = vsel %vm220_vm0, %v1472_v57, %v1344_v49 }
 0x112   : > { %2194 = vmatmul.mubr.f32.gmra.mrb[40].mxu0 %v1469_v61  ;;  %v1345_v7 = vadd.f32 %v9841_v32, %v1199_v54 }
 0x113   : > { %v1202_v4 = vadd.f32 %v1074_v59, %v672_v1  ;;  %2199 = vmatprep.mubr.f32.mxu0 %v1604_v2  ;;  %v851_v5 = vpop.permute.xlu0 %850  ;;  %v1474_v6 = vmax.f32 %v1346_v63, 0.0  ;;  %v1201_v8 = vadd.f32 %v1073_v58, %v671_v0  ;;  %v281_v2 = vld [vmem:[%s9597_s12 + $0x1e0] sm:$0xff] }
 0x114   : > { %v1075_v9 = vmul.f32 %v9831_v22, %v851_v5  ;;  %v1076_v10 = vmul.f32 %v9833_v23, %v851_v5  ;;  %v409_v11 = vpop.permute.xlu1 %408  ;;  %978 = vperm.xlu0 %8440, %v277_v3   ;;  %v1473_v24 = vmax.f32 %v1345_v7, 0.0 }
 0x115   : > { %v1348_v13 = vadd.f32 %v9836_v26, %v1202_v4  ;;  %v673_v14 = vmul.f32 %v9827_v19, %v409_v11  ;;  %v674_v15 = vmul.f32 %v9829_v20, %v409_v11  ;;  %568 = vperm.xlu1 %8443, %v277_v3   ;;  %v1606_v16 = vsel %vm220_vm0, %v1474_v6, %v1346_v63 }
 0x116   : > { %2200 = vmatmul.mubr.f32.gmra.mrb[42].mxu0 %v1471_v12  ;;  %v1347_v31 = vadd.f32 %v9841_v32, %v1201_v8 }
 0x117   : > { %v1204_v18 = vadd.f32 %v1076_v10, %v674_v15  ;;  %2205 = vmatprep.mubr.f32.mxu0 %v1606_v16  ;;  %v855_v21 = vpop.permute.xlu0 %854  ;;  %v1476_v25 = vmax.f32 %v1348_v13, 0.0  ;;  %v1203_v27 = vadd.f32 %v1075_v9, %v673_v14  ;;  %v282_v16 = vld [vmem:[%s9597_s12 + $0x1e8] sm:$0xff] }
 0x118   : > { %v1077_v28 = vmul.f32 %v9831_v22, %v855_v21  ;;  %v1078_v29 = vmul.f32 %v9833_v23, %v855_v21  ;;  %v414_v30 = vpop.permute.xlu1 %413  ;;  %982 = vperm.xlu0 %8440, %v278_v17   ;;  %v1475_v46 = vmax.f32 %v1347_v31, 0.0 }
 0x119   : > { %v1350_v33 = vadd.f32 %v9836_v26, %v1204_v18  ;;  %v675_v34 = vmul.f32 %v9827_v19, %v414_v30  ;;  %v676_v35 = vmul.f32 %v9829_v20, %v414_v30  ;;  %573 = vperm.xlu1 %8443, %v278_v17   ;;  %v1608_v36 = vsel %vm220_vm0, %v1476_v25, %v1348_v13 }
 0x11a   : > { %2206 = vmatmul.mubr.f32.gmra.mrb[44].mxu0 %v1473_v24  ;;  %v1349_v47 = vadd.f32 %v9841_v32, %v1203_v27 }
 0x11b   : > { %v1205_v38 = vadd.f32 %v1077_v28, %v675_v34  ;;  %v1206_v40 = vadd.f32 %v1078_v29, %v676_v35  ;;  %2211 = vmatprep.mubr.f32.mxu0 %v1608_v36  ;;  %v859_v41 = vpop.permute.xlu0 %858  ;;  %v1478_v42 = vmax.f32 %v1350_v33, 0.0  ;;  %v283_v36 = vld [vmem:[%s9597_s12 + $0x1f0] sm:$0xff] }
 0x11c   : > { %v1079_v43 = vmul.f32 %v9831_v22, %v859_v41  ;;  %v1080_v44 = vmul.f32 %v9833_v23, %v859_v41  ;;  %v419_v45 = vpop.permute.xlu1 %418  ;;  %986 = vperm.xlu0 %8440, %v279_v37   ;;  %v1477_v61 = vmax.f32 %v1349_v47, 0.0 }
 0x11d   : > { %v1352_v48 = vadd.f32 %v9836_v26, %v1206_v40  ;;  %v677_v49 = vmul.f32 %v9827_v19, %v419_v45  ;;  %v678_v50 = vmul.f32 %v9829_v20, %v419_v45  ;;  %578 = vperm.xlu1 %8443, %v279_v37   ;;  %v1610_v51 = vsel %vm220_vm0, %v1478_v42, %v1350_v33 }
 0x11e   : > { %2212 = vmatmul.mubr.f32.gmra.mrb[46].mxu0 %v1475_v46  ;;  %v1351_v56 = vadd.f32 %v9841_v32, %v1205_v38 }
 0x11f   : > { %v1208_v53 = vadd.f32 %v1080_v44, %v678_v50  ;;  %2217 = vmatprep.mubr.f32.mxu0 %v1610_v51  ;;  %v863_v54 = vpop.permute.xlu0 %862  ;;  %v1480_v55 = vmax.f32 %v1352_v48, 0.0  ;;  %v1207_v57 = vadd.f32 %v1079_v43, %v677_v49  ;;  %v284_v51 = vld [vmem:[%s9597_s12 + $0x1f8] sm:$0xff] }
 0x120   : > { %v1081_v58 = vmul.f32 %v9831_v22, %v863_v54  ;;  %v1082_v59 = vmul.f32 %v9833_v23, %v863_v54  ;;  %v424_v60 = vpop.permute.xlu1 %423  ;;  %990 = vperm.xlu0 %8440, %v280_v52   ;;  %v1479_v5 = vmax.f32 %v1351_v56, 0.0 }
 0x121   : > { %v1354_v62 = vadd.f32 %v9836_v26, %v1208_v53  ;;  %v679_v63 = vmul.f32 %v9827_v19, %v424_v60  ;;  %v680_v0 = vmul.f32 %v9829_v20, %v424_v60  ;;  %583 = vperm.xlu1 %8443, %v280_v52   ;;  %v1612_v1 = vsel %vm220_vm0, %v1480_v55, %v1352_v48 }
 0x122   : > { %2218 = vmatmul.mubr.f32.gmra.mrb[48].mxu0 %v1477_v61  ;;  %v1353_v11 = vadd.f32 %v9841_v32, %v1207_v57 }
 0x123   : > { %v1210_v3 = vadd.f32 %v1082_v59, %v680_v0  ;;  %2223 = vmatprep.mubr.f32.mxu0 %v1612_v1  ;;  %v867_v4 = vpop.permute.xlu0 %866  ;;  %v1482_v6 = vmax.f32 %v1354_v62, 0.0  ;;  %v1209_v7 = vadd.f32 %v1081_v58, %v679_v63 }
 0x124   : > { %v1083_v8 = vmul.f32 %v9831_v22, %v867_v4  ;;  %v1084_v9 = vmul.f32 %v9833_v23, %v867_v4  ;;  %v429_v10 = vpop.permute.xlu1 %428  ;;  %994 = vperm.xlu0 %8440, %v281_v2   ;;  %v1481_v29 = vmax.f32 %v1353_v11, 0.0 }
 0x125   : > { %v1356_v12 = vadd.f32 %v9836_v26, %v1210_v3  ;;  %v681_v13 = vmul.f32 %v9827_v19, %v429_v10  ;;  %v682_v14 = vmul.f32 %v9829_v20, %v429_v10  ;;  %588 = vperm.xlu1 %8443, %v281_v2   ;;  %v1614_v15 = vsel %vm220_vm0, %v1482_v6, %v1354_v62  ;;  %v8143_v6 = vld [vmem:[%s16108_s2 + $0x210] sm:$0xff] }
 0x126   : > { %2224 = vmatmul.mubr.f32.gmra.mrb[50].mxu0 %v1479_v5  ;;  %v1355_v30 = vadd.f32 %v9841_v32, %v1209_v7  ;;  %v8141_v5 = vld [vmem:[%s16108_s2 + $0x200] sm:$0xff] }
 0x127   : > { %v1211_v17 = vadd.f32 %v1083_v8, %v681_v13  ;;  %v1212_v18 = vadd.f32 %v1084_v9, %v682_v14  ;;  %2229 = vmatprep.mubr.f32.mxu0 %v1614_v15  ;;  %v871_v21 = vpop.permute.xlu0 %870  ;;  %v1484_v24 = vmax.f32 %v1356_v12, 0.0  ;;  %v8148_v13 = vld [vmem:[%s16108_s2 + $0x238] sm:$0xff] }
 0x128   : > { %v1085_v25 = vmul.f32 %v9831_v22, %v871_v21  ;;  %v1086_v27 = vmul.f32 %v9833_v23, %v871_v21  ;;  %v434_v28 = vpop.permute.xlu1 %433  ;;  %998 = vperm.xlu0 %8440, %v282_v16   ;;  %v1483_v46 = vmax.f32 %v1355_v30, 0.0  ;;  %v8273_v21 = vpack.c.bf16 %v8143_v6, %v8141_v5 }
 0x129   : > { %v1358_v31 = vadd.f32 %v9836_v26, %v1212_v18  ;;  %v683_v33 = vmul.f32 %v9827_v19, %v434_v28  ;;  %v684_v34 = vmul.f32 %v9829_v20, %v434_v28  ;;  %593 = vperm.xlu1 %8443, %v282_v16   ;;  %v1616_v35 = vsel %vm220_vm0, %v1484_v24, %v1356_v12  ;;  %v8146_v12 = vld [vmem:[%s16108_s2 + $0x228] sm:$0xff] }
 0x12a   : > { %2230 = vmatmul.mubr.f32.gmra.mrb[52].mxu0 %v1481_v29  ;;  %v1357_v41 = vadd.f32 %v9841_v32, %v1211_v17  ;;  %v8275_v29 = vpack.c.bf16 %v8148_v13, %v8146_v12  ;;  %v8155_v12 = vld [vmem:[%s16108_s2 + $0x270] sm:$0xff] }
 0x12b   : > { %v1214_v37 = vadd.f32 %v1086_v27, %v684_v34  ;;  %2235 = vmatprep.mubr.f32.mxu0 %v1616_v35  ;;  %v875_v38 = vpop.permute.xlu0 %874  ;;  %v1486_v40 = vmax.f32 %v1358_v31, 0.0  ;;  %v1213_v42 = vadd.f32 %v1085_v25, %v683_v33 }
 0x12c   : > { %v1087_v43 = vmul.f32 %v9831_v22, %v875_v38  ;;  %v1088_v44 = vmul.f32 %v9833_v23, %v875_v38  ;;  %v439_v45 = vpop.permute.xlu1 %438  ;;  %1002 = vperm.xlu0 %8440, %v283_v36   ;;  %v1485_v54 = vmax.f32 %v1357_v41, 0.0 }
 0x12d   : > { %v1360_v47 = vadd.f32 %v9836_v26, %v1214_v37  ;;  %v685_v48 = vmul.f32 %v9827_v19, %v439_v45  ;;  %v686_v49 = vmul.f32 %v9829_v20, %v439_v45  ;;  %598 = vperm.xlu1 %8443, %v283_v36   ;;  %v1618_v50 = vsel %vm220_vm0, %v1486_v40, %v1358_v31  ;;  %v8145_v36 = vld [vmem:[%s16108_s2 + $0x220] sm:$0xff]  ;;  %v8147_v37 = vld [vmem:[%s16108_s2 + $0x230] sm:$0xff] }
 0x12e   : > { %2236 = vmatmul.mubr.f32.gmra.mrb[54].mxu0 %v1483_v46  ;;  %v1359_v60 = vadd.f32 %v9841_v32, %v1213_v42 }
 0x12f   : > { %v1216_v52 = vadd.f32 %v1088_v44, %v686_v49  ;;  %2241 = vmatprep.mubr.f32.mxu0 %v1618_v50  ;;  %v883_v53 = vpop.permute.xlu0 %882  ;;  %v1488_v55 = vmax.f32 %v1360_v47, 0.0  ;;  %v1215_v56 = vadd.f32 %v1087_v43, %v685_v48  ;;  %v8150_v43 = vld [vmem:[%s16108_s2 + $0x248] sm:$0xff]  ;;  %v8152_v44 = vld [vmem:[%s16108_s2 + $0x258] sm:$0xff]  ;;  %v8277_v50 = vpack.c.bf16 %v8147_v37, %v8145_v36  ;;  %v8157_v36 = vld [vmem:[%s16108_s2 + $0x280] sm:$0xff] }
 0x130   : > { %v1091_v57 = vmul.f32 %v9831_v22, %v883_v53  ;;  %v1092_v58 = vmul.f32 %v9833_v23, %v883_v53  ;;  %v449_v59 = vpop.permute.xlu1 %448  ;;  %1006 = vperm.xlu0 %8440, %v284_v51   ;;  %v1487_v10 = vmax.f32 %v1359_v60, 0.0  ;;  %v8159_v37 = vld [vmem:[%s16108_s2 + $0x290] sm:$0xff] }
 0x131   : > { %v1362_v61 = vadd.f32 %v9836_v26, %v1216_v52  ;;  %v689_v62 = vmul.f32 %v9827_v19, %v449_v59  ;;  %v690_v63 = vmul.f32 %v9829_v20, %v449_v59  ;;  %603 = vperm.xlu1 %8443, %v284_v51   ;;  %v1620_v0 = vsel %vm220_vm0, %v1488_v55, %v1360_v47 }
 0x132   : > { %2242 = vmatmul.mubr.f32.gmra.mrb[56].mxu0 %v1485_v54  ;;  %v1361_v11 = vadd.f32 %v9841_v32, %v1215_v56  ;;  %v8279_v55 = vpack.c.bf16 %v8152_v44, %v8150_v43  ;;  %v8149_v56 = vld [vmem:[%s16108_s2 + $0x240] sm:$0xff]  ;;  %v8162_v43 = vld [vmem:[%s16108_s2 + $0x2a8] sm:$0xff]  ;;  %v8164_v44 = vld [vmem:[%s16108_s2 + $0x2b8] sm:$0xff] }
 0x133   : > { %v1219_v1 = vadd.f32 %v1091_v57, %v689_v62  ;;  %v1220_v2 = vadd.f32 %v1092_v58, %v690_v63  ;;  %2247 = vmatprep.mubr.f32.mxu0 %v1620_v0  ;;  %v879_v3 = vpop.permute.xlu0 %878  ;;  %v1490_v4 = vmax.f32 %v1362_v61, 0.0  ;;  %v8151_v57 = vld [vmem:[%s16108_s2 + $0x250] sm:$0xff]  ;;  %v8154_v62 = vld [vmem:[%s16108_s2 + $0x268] sm:$0xff]  ;;  %v8156_v63 = vld [vmem:[%s16108_s2 + $0x278] sm:$0xff] }
 0x134   : > { %v1089_v7 = vmul.f32 %v9831_v22, %v879_v3  ;;  %v1090_v8 = vmul.f32 %v9833_v23, %v879_v3  ;;  %v444_v9 = vpop.permute.xlu1 %443  ;;  %v1489_v34 = vmax.f32 %v1361_v11, 0.0  ;;  %v8281_v5 = vpack.c.bf16 %v8151_v57, %v8149_v56  ;;  %v8153_v11 = vld [vmem:[%s16108_s2 + $0x260] sm:$0xff]  ;;  %v8163_v57 = vld [vmem:[%s16108_s2 + $0x2b0] sm:$0xff] }
 0x135   : > { %v687_v14 = vmul.f32 %v9827_v19, %v444_v9  ;;  %v688_v15 = vmul.f32 %v9829_v20, %v444_v9  ;;  %v1622_v16 = vsel %vm220_vm0, %v1490_v4, %v1362_v61  ;;  %v1366_v17 = vadd.f32 %v9836_v26, %v1220_v2  ;;  %v8161_v56 = vld [vmem:[%s16108_s2 + $0x2a0] sm:$0xff] }
 0x136   : > { %2248 = vmatmul.mubr.f32.gmra.mrb[58].mxu0 %v1487_v10  ;;  %v1365_v18 = vadd.f32 %v9841_v32, %v1219_v1  ;;  %v8283_v10 = vpack.c.bf16 %v8156_v63, %v8154_v62  ;;  %v8166_v62 = vld [vmem:[%s16108_s2 + $0x2c8] sm:$0xff]  ;;  %v8168_v63 = vld [vmem:[%s16108_s2 + $0x2d8] sm:$0xff] }
 0x137   : > { %v1217_v24 = vadd.f32 %v1089_v7, %v687_v14  ;;  %v1218_v25 = vadd.f32 %v1090_v8, %v688_v15  ;;  %2253 = vmatprep.mubr.f32.mxu0 %v1622_v16  ;;  %v887_v27 = vpop.permute.xlu0 %886  ;;  %v1494_v28 = vmax.f32 %v1366_v17, 0.0 }
 0x138   : > { %v1093_v30 = vmul.f32 %v9831_v22, %v887_v27  ;;  %v1094_v31 = vmul.f32 %v9833_v23, %v887_v27  ;;  %v454_v33 = vpop.permute.xlu1 %453  ;;  %v1493_v35 = vmax.f32 %v1365_v18, 0.0  ;;  %v8160_v18 = vld [vmem:[%s16108_s2 + $0x298] sm:$0xff] }
 0x139   : > { %v1364_v38 = vadd.f32 %v9836_v26, %v1218_v25  ;;  %v691_v40 = vmul.f32 %v9827_v19, %v454_v33  ;;  %v692_v41 = vmul.f32 %v9829_v20, %v454_v33  ;;  %v1626_v42 = vsel %vm220_vm0, %v1494_v28, %v1366_v17  ;;  %v8158_v17 = vld [vmem:[%s16108_s2 + $0x288] sm:$0xff] }
 0x13a   : > { %2254 = vmatmul.mubr.f32.gmra.mrb[60].mxu0 %v1489_v34  ;;  %2265 = vmatprep.mubr.f32.mxu1 %v1626_v42  ;;  %v1363_v45 = vadd.f32 %v9841_v32, %v1217_v24 }
 0x13b   : > { %v1221_v46 = vadd.f32 %v1093_v30, %v691_v40  ;;  %v1222_v47 = vadd.f32 %v1094_v31, %v692_v41  ;;  %2266 = vmatmul.mubr.f32.vlgmr.msra.gmra.mrb[0].mxu1 %v1493_v35  ;;  %v891_v48 = vpop.permute.xlu0 %890  ;;  %v1492_v49 = vmax.f32 %v1364_v38, 0.0  ;;  %v8287_v35 = vpack.c.bf16 %v8160_v18, %v8158_v17  ;;  %v8170_v17 = vld [vmem:[%s16108_s2 + $0x2e8] sm:$0xff]  ;;  %v8172_v18 = vld [vmem:[%s16108_s2 + $0x2f8] sm:$0xff] }
 0x13c   : > { %v1095_v51 = vmul.f32 %v9831_v22, %v891_v48  ;;  %v1096_v52 = vmul.f32 %v9833_v23, %v891_v48  ;;  %v459_v53 = vpop.permute.xlu1 %458  ;;  %v1491_v54 = vmax.f32 %v1363_v45, 0.0  ;;  %8274 = vmatpush1.bf16.msra.mxu1 %v8273_v21 }
 0x13d   : > { %v1368_v58 = vadd.f32 %v9836_v26, %v1222_v47  ;;  %v693_v59 = vmul.f32 %v9827_v19, %v459_v53  ;;  %v694_v60 = vmul.f32 %v9829_v20, %v459_v53  ;;  %v1624_v61 = vsel %vm220_vm0, %v1492_v49, %v1364_v38  ;;  %8276 = vmatprep.subr.bf16.mxu1 %v8275_v29 }
 0x13e   : > { %2259 = vmatprep.mubr.f32.mxu0 %v1624_v61  ;;  %v1367_v0 = vadd.f32 %v9841_v32, %v1221_v46  ;;  %v8285_v29 = vpack.c.bf16 %v8155_v12, %v8153_v11  ;;  %v8165_v11 = vld [vmem:[%s16108_s2 + $0x2c0] sm:$0xff]  ;;  %v8167_v12 = vld [vmem:[%s16108_s2 + $0x2d0] sm:$0xff] }
 0x13f   : > { %v1223_v1 = vadd.f32 %v1095_v51, %v693_v59  ;;  %v1224_v2 = vadd.f32 %v1096_v52, %v694_v60  ;;  %2260 = vmatmul.mubr.f32.gmra.mrb[62].mxu0 %v1491_v54  ;;  %v895_v3 = vpop.permute.xlu0 %894  ;;  %v1496_v4 = vmax.f32 %v1368_v58, 0.0 }
 0x140   : > { %v1097_v6 = vmul.f32 %v9831_v22, %v895_v3  ;;  %v1098_v7 = vmul.f32 %v9833_v23, %v895_v3  ;;  %v464_v8 = vpop.permute.xlu1 %463  ;;  %v1495_v9 = vmax.f32 %v1367_v0, 0.0  ;;  %8278 = vmatpush1.bf16.msra.mxu1 %v8277_v50  ;;  %v8289_v50 = vpack.c.bf16 %v8159_v37, %v8157_v36  ;;  %v8169_v36 = vld [vmem:[%s16108_s2 + $0x2e0] sm:$0xff]  ;;  %v8171_v37 = vld [vmem:[%s16108_s2 + $0x2f0] sm:$0xff] }
 0x141   : > { %v1370_v13 = vadd.f32 %v9836_v26, %v1224_v2  ;;  %v695_v14 = vmul.f32 %v9827_v19, %v464_v8  ;;  %v696_v15 = vmul.f32 %v9829_v20, %v464_v8  ;;  %v1628_v16 = vsel %vm220_vm0, %v1496_v4, %v1368_v58  ;;  %8280 = vmatprep.subr.bf16.mxu1 %v8279_v55 }
 0x142   : > { %2271 = vmatprep.mubr.f32.mxu1 %v1628_v16  ;;  %v1369_v21 = vadd.f32 %v9841_v32, %v1223_v1  ;;  %v8291_v55 = vpack.c.bf16 %v8164_v44, %v8162_v43  ;;  %v8174_v43 = vld [vmem:[%s16108_s2 + $0x308] sm:$0xff]  ;;  %v8176_v44 = vld [vmem:[%s16108_s2 + $0x318] sm:$0xff] }
 0x143   : > { %v1225_v24 = vadd.f32 %v1097_v6, %v695_v14  ;;  %v1226_v25 = vadd.f32 %v1098_v7, %v696_v15  ;;  %2272 = vmatmul.mubr.f32.gmra.mrb[2].mxu1 %v1495_v9  ;;  %v899_v27 = vpop.permute.xlu0 %898  ;;  %v1498_v28 = vmax.f32 %v1370_v13, 0.0 }
 0x144   : > { %v1099_v30 = vmul.f32 %v9831_v22, %v899_v27  ;;  %v1100_v31 = vmul.f32 %v9833_v23, %v899_v27  ;;  %v469_v33 = vpop.permute.xlu1 %468  ;;  %v1497_v34 = vmax.f32 %v1369_v21, 0.0  ;;  %8282 = vmatpush1.bf16.msra.mxu1 %v8281_v5  ;;  %v8293_v5 = vpack.c.bf16 %v8163_v57, %v8161_v56  ;;  %v8173_v56 = vld [vmem:[%s16108_s2 + $0x300] sm:$0xff]  ;;  %v8175_v57 = vld [vmem:[%s16108_s2 + $0x310] sm:$0xff] }
 0x145   : > { %v1372_v38 = vadd.f32 %v9836_v26, %v1226_v25  ;;  %v697_v40 = vmul.f32 %v9827_v19, %v469_v33  ;;  %v698_v41 = vmul.f32 %v9829_v20, %v469_v33  ;;  %v1630_v42 = vsel %vm220_vm0, %v1498_v28, %v1370_v13  ;;  %8284 = vmatprep.subr.bf16.mxu1 %v8283_v10 }
 0x146   : > { %2277 = vmatprep.mubr.f32.mxu1 %v1630_v42  ;;  %v1371_v45 = vadd.f32 %v9841_v32, %v1225_v24  ;;  %v8295_v10 = vpack.c.bf16 %v8168_v63, %v8166_v62  ;;  %v8178_v62 = vld [vmem:[%s16108_s2 + $0x328] sm:$0xff]  ;;  %v8180_v63 = vld [vmem:[%s16108_s2 + $0x338] sm:$0xff] }
 0x147   : > { %v1227_v46 = vadd.f32 %v1099_v30, %v697_v40  ;;  %v1228_v47 = vadd.f32 %v1100_v31, %v698_v41  ;;  %2278 = vmatmul.mubr.f32.gmra.mrb[4].mxu1 %v1497_v34  ;;  %v903_v48 = vpop.permute.xlu0 %902  ;;  %v1500_v49 = vmax.f32 %v1372_v38, 0.0 }
 0x148   : > { %v1101_v51 = vmul.f32 %v9831_v22, %v903_v48  ;;  %v1102_v52 = vmul.f32 %v9833_v23, %v903_v48  ;;  %v474_v53 = vpop.permute.xlu1 %473  ;;  %v1499_v54 = vmax.f32 %v1371_v45, 0.0  ;;  %8286 = vmatpush1.bf16.msra.mxu1 %v8285_v29  ;;  %v8297_v29 = vpack.c.bf16 %v8167_v12, %v8165_v11  ;;  %v8177_v11 = vld [vmem:[%s16108_s2 + $0x320] sm:$0xff]  ;;  %v8179_v12 = vld [vmem:[%s16108_s2 + $0x330] sm:$0xff] }
 0x149   : > { %v1374_v58 = vadd.f32 %v9836_v26, %v1228_v47  ;;  %v699_v59 = vmul.f32 %v9827_v19, %v474_v53  ;;  %v700_v60 = vmul.f32 %v9829_v20, %v474_v53  ;;  %v1632_v61 = vsel %vm220_vm0, %v1500_v49, %v1372_v38  ;;  %8288 = vmatprep.subr.bf16.mxu1 %v8287_v35 }
 0x14a   : > { %2283 = vmatprep.mubr.f32.mxu1 %v1632_v61  ;;  %v1373_v0 = vadd.f32 %v9841_v32, %v1227_v46  ;;  %v8299_v35 = vpack.c.bf16 %v8172_v18, %v8170_v17  ;;  %v8182_v17 = vld [vmem:[%s16108_s2 + $0x348] sm:$0xff]  ;;  %v8184_v18 = vld [vmem:[%s16108_s2 + $0x358] sm:$0xff] }
 0x14b   : > { %v1229_v1 = vadd.f32 %v1101_v51, %v699_v59  ;;  %v1230_v2 = vadd.f32 %v1102_v52, %v700_v60  ;;  %2284 = vmatmul.mubr.f32.gmra.mrb[6].mxu1 %v1499_v54  ;;  %v907_v3 = vpop.permute.xlu0 %906  ;;  %v1502_v4 = vmax.f32 %v1374_v58, 0.0 }
 0x14c   : > { %v1103_v6 = vmul.f32 %v9831_v22, %v907_v3  ;;  %v1104_v7 = vmul.f32 %v9833_v23, %v907_v3  ;;  %v479_v8 = vpop.permute.xlu1 %478  ;;  %v1501_v9 = vmax.f32 %v1373_v0, 0.0  ;;  %8290 = vmatpush1.bf16.msra.mxu1 %v8289_v50  ;;  %v8301_v50 = vpack.c.bf16 %v8171_v37, %v8169_v36  ;;  %v8181_v36 = vld [vmem:[%s16108_s2 + $0x340] sm:$0xff]  ;;  %v8183_v37 = vld [vmem:[%s16108_s2 + $0x350] sm:$0xff] }
 0x14d   : > { %v1376_v13 = vadd.f32 %v9836_v26, %v1230_v2  ;;  %v701_v14 = vmul.f32 %v9827_v19, %v479_v8  ;;  %v702_v15 = vmul.f32 %v9829_v20, %v479_v8  ;;  %v1634_v16 = vsel %vm220_vm0, %v1502_v4, %v1374_v58  ;;  %8292 = vmatprep.subr.bf16.mxu1 %v8291_v55 }
 0x14e   : > { %2289 = vmatprep.mubr.f32.mxu1 %v1634_v16  ;;  %v1375_v21 = vadd.f32 %v9841_v32, %v1229_v1  ;;  %v8303_v55 = vpack.c.bf16 %v8176_v44, %v8174_v43  ;;  %v8186_v43 = vld [vmem:[%s16108_s2 + $0x368] sm:$0xff]  ;;  %v8188_v44 = vld [vmem:[%s16108_s2 + $0x378] sm:$0xff] }
 0x14f   : > { %v1231_v24 = vadd.f32 %v1103_v6, %v701_v14  ;;  %v1232_v25 = vadd.f32 %v1104_v7, %v702_v15  ;;  %2290 = vmatmul.mubr.f32.gmra.mrb[8].mxu1 %v1501_v9  ;;  %v911_v27 = vpop.permute.xlu0 %910  ;;  %v1504_v28 = vmax.f32 %v1376_v13, 0.0 }
 0x150   : > { %v1105_v30 = vmul.f32 %v9831_v22, %v911_v27  ;;  %v1106_v31 = vmul.f32 %v9833_v23, %v911_v27  ;;  %v484_v33 = vpop.permute.xlu1 %483  ;;  %v1503_v34 = vmax.f32 %v1375_v21, 0.0  ;;  %8294 = vmatpush1.bf16.msra.mxu1 %v8293_v5  ;;  %v8305_v5 = vpack.c.bf16 %v8175_v57, %v8173_v56  ;;  %v8185_v56 = vld [vmem:[%s16108_s2 + $0x360] sm:$0xff]  ;;  %v8187_v57 = vld [vmem:[%s16108_s2 + $0x370] sm:$0xff] }
 0x151   : > { %v1378_v38 = vadd.f32 %v9836_v26, %v1232_v25  ;;  %v703_v40 = vmul.f32 %v9827_v19, %v484_v33  ;;  %v704_v41 = vmul.f32 %v9829_v20, %v484_v33  ;;  %v1636_v42 = vsel %vm220_vm0, %v1504_v28, %v1376_v13  ;;  %8296 = vmatprep.subr.bf16.mxu1 %v8295_v10 }
 0x152   : > { %2295 = vmatprep.mubr.f32.mxu1 %v1636_v42  ;;  %v1377_v45 = vadd.f32 %v9841_v32, %v1231_v24  ;;  %v8307_v10 = vpack.c.bf16 %v8180_v63, %v8178_v62  ;;  %v8190_v62 = vld [vmem:[%s16108_s2 + $0x388] sm:$0xff]  ;;  %v8192_v63 = vld [vmem:[%s16108_s2 + $0x398] sm:$0xff] }
 0x153   : > { %v1233_v46 = vadd.f32 %v1105_v30, %v703_v40  ;;  %v1234_v47 = vadd.f32 %v1106_v31, %v704_v41  ;;  %2296 = vmatmul.mubr.f32.gmra.mrb[10].mxu1 %v1503_v34  ;;  %v915_v48 = vpop.permute.xlu0 %914  ;;  %v1506_v49 = vmax.f32 %v1378_v38, 0.0 }
 0x154   : > { %v1107_v51 = vmul.f32 %v9831_v22, %v915_v48  ;;  %v1108_v52 = vmul.f32 %v9833_v23, %v915_v48  ;;  %v489_v53 = vpop.permute.xlu1 %488  ;;  %v1505_v54 = vmax.f32 %v1377_v45, 0.0  ;;  %8298 = vmatpush1.bf16.msra.mxu1 %v8297_v29  ;;  %v8309_v29 = vpack.c.bf16 %v8179_v12, %v8177_v11  ;;  %v8189_v11 = vld [vmem:[%s16108_s2 + $0x380] sm:$0xff]  ;;  %v8191_v12 = vld [vmem:[%s16108_s2 + $0x390] sm:$0xff] }
 0x155   : > { %v1380_v58 = vadd.f32 %v9836_v26, %v1234_v47  ;;  %v705_v59 = vmul.f32 %v9827_v19, %v489_v53  ;;  %v706_v60 = vmul.f32 %v9829_v20, %v489_v53  ;;  %v1638_v61 = vsel %vm220_vm0, %v1506_v49, %v1378_v38  ;;  %8300 = vmatprep.subr.bf16.mxu1 %v8299_v35 }
 0x156   : > { %2301 = vmatprep.mubr.f32.mxu1 %v1638_v61  ;;  %v1379_v0 = vadd.f32 %v9841_v32, %v1233_v46  ;;  %v8311_v35 = vpack.c.bf16 %v8184_v18, %v8182_v17  ;;  %v8194_v17 = vld [vmem:[%s16108_s2 + $0x3a8] sm:$0xff]  ;;  %v8196_v18 = vld [vmem:[%s16108_s2 + $0x3b8] sm:$0xff] }
 0x157   : > { %v1235_v1 = vadd.f32 %v1107_v51, %v705_v59  ;;  %v1236_v2 = vadd.f32 %v1108_v52, %v706_v60  ;;  %2302 = vmatmul.mubr.f32.gmra.mrb[12].mxu1 %v1505_v54  ;;  %v919_v3 = vpop.permute.xlu0 %918  ;;  %v1508_v4 = vmax.f32 %v1380_v58, 0.0 }
 0x158   : > { %v1109_v6 = vmul.f32 %v9831_v22, %v919_v3  ;;  %v1110_v7 = vmul.f32 %v9833_v23, %v919_v3  ;;  %v494_v8 = vpop.permute.xlu1 %493  ;;  %v1507_v9 = vmax.f32 %v1379_v0, 0.0  ;;  %8302 = vmatpush1.bf16.msra.mxu1 %v8301_v50  ;;  %v8313_v50 = vpack.c.bf16 %v8183_v37, %v8181_v36  ;;  %v8193_v36 = vld [vmem:[%s16108_s2 + $0x3a0] sm:$0xff]  ;;  %v8195_v37 = vld [vmem:[%s16108_s2 + $0x3b0] sm:$0xff] }
 0x159   : > { %v1382_v13 = vadd.f32 %v9836_v26, %v1236_v2  ;;  %v707_v14 = vmul.f32 %v9827_v19, %v494_v8  ;;  %v708_v15 = vmul.f32 %v9829_v20, %v494_v8  ;;  %v1640_v16 = vsel %vm220_vm0, %v1508_v4, %v1380_v58  ;;  %8304 = vmatprep.subr.bf16.mxu1 %v8303_v55 }
 0x15a   : > { %2307 = vmatprep.mubr.f32.mxu1 %v1640_v16  ;;  %v1381_v21 = vadd.f32 %v9841_v32, %v1235_v1  ;;  %v8315_v55 = vpack.c.bf16 %v8188_v44, %v8186_v43  ;;  %v8198_v43 = vld [vmem:[%s16108_s2 + $0x3c8] sm:$0xff]  ;;  %v8200_v44 = vld [vmem:[%s16108_s2 + $0x3d8] sm:$0xff] }
 0x15b   : > { %v1237_v24 = vadd.f32 %v1109_v6, %v707_v14  ;;  %v1238_v25 = vadd.f32 %v1110_v7, %v708_v15  ;;  %2308 = vmatmul.mubr.f32.gmra.mrb[14].mxu1 %v1507_v9  ;;  %v923_v27 = vpop.permute.xlu0 %922  ;;  %v1510_v28 = vmax.f32 %v1382_v13, 0.0 }
 0x15c   : > { %v1111_v30 = vmul.f32 %v9831_v22, %v923_v27  ;;  %v1112_v31 = vmul.f32 %v9833_v23, %v923_v27  ;;  %v499_v33 = vpop.permute.xlu1 %498  ;;  %v1509_v34 = vmax.f32 %v1381_v21, 0.0  ;;  %8306 = vmatpush1.bf16.msra.mxu1 %v8305_v5  ;;  %v8317_v5 = vpack.c.bf16 %v8187_v57, %v8185_v56  ;;  %v8197_v56 = vld [vmem:[%s16108_s2 + $0x3c0] sm:$0xff]  ;;  %v8199_v57 = vld [vmem:[%s16108_s2 + $0x3d0] sm:$0xff] }
 0x15d   : > { %v1384_v38 = vadd.f32 %v9836_v26, %v1238_v25  ;;  %v709_v40 = vmul.f32 %v9827_v19, %v499_v33  ;;  %v710_v41 = vmul.f32 %v9829_v20, %v499_v33  ;;  %v1642_v42 = vsel %vm220_vm0, %v1510_v28, %v1382_v13  ;;  %8308 = vmatprep.subr.bf16.mxu1 %v8307_v10 }
 0x15e   : > { %2313 = vmatprep.mubr.f32.mxu1 %v1642_v42  ;;  %v1383_v45 = vadd.f32 %v9841_v32, %v1237_v24  ;;  %v8319_v10 = vpack.c.bf16 %v8192_v63, %v8190_v62  ;;  %v8202_v62 = vld [vmem:[%s16108_s2 + $0x3e8] sm:$0xff]  ;;  %v8204_v63 = vld [vmem:[%s16108_s2 + $0x3f8] sm:$0xff] }
 0x15f   : > { %v1239_v46 = vadd.f32 %v1111_v30, %v709_v40  ;;  %v1240_v47 = vadd.f32 %v1112_v31, %v710_v41  ;;  %2314 = vmatmul.mubr.f32.gmra.mrb[16].mxu1 %v1509_v34  ;;  %v927_v48 = vpop.permute.xlu0 %926  ;;  %v1512_v49 = vmax.f32 %v1384_v38, 0.0 }
 0x160   : > { %v1113_v51 = vmul.f32 %v9831_v22, %v927_v48  ;;  %v1114_v52 = vmul.f32 %v9833_v23, %v927_v48  ;;  %v504_v53 = vpop.permute.xlu1 %503  ;;  %v1511_v54 = vmax.f32 %v1383_v45, 0.0  ;;  %8310 = vmatpush1.bf16.msra.mxu1 %v8309_v29  ;;  %v8321_v29 = vpack.c.bf16 %v8191_v12, %v8189_v11 }
 0x161   : > { %v1386_v58 = vadd.f32 %v9836_v26, %v1240_v47  ;;  %v711_v59 = vmul.f32 %v9827_v19, %v504_v53  ;;  %v712_v60 = vmul.f32 %v9829_v20, %v504_v53  ;;  %v1644_v61 = vsel %vm220_vm0, %v1512_v49, %v1384_v38  ;;  %8312 = vmatprep.subr.bf16.mxu1 %v8311_v35 }
 0x162   : > { %2319 = vmatprep.mubr.f32.mxu1 %v1644_v61  ;;  %v1385_v0 = vadd.f32 %v9841_v32, %v1239_v46  ;;  %v8323_v35 = vpack.c.bf16 %v8196_v18, %v8194_v17 }
 0x163   : > { %v1241_v1 = vadd.f32 %v1113_v51, %v711_v59  ;;  %v1242_v2 = vadd.f32 %v1114_v52, %v712_v60  ;;  %2320 = vmatmul.mubr.f32.gmra.mrb[18].mxu1 %v1511_v54  ;;  %v931_v3 = vpop.permute.xlu0 %930  ;;  %v1514_v4 = vmax.f32 %v1386_v58, 0.0 }
 0x164   : > { %v1115_v6 = vmul.f32 %v9831_v22, %v931_v3  ;;  %v1116_v7 = vmul.f32 %v9833_v23, %v931_v3  ;;  %v509_v8 = vpop.permute.xlu1 %508  ;;  %v1513_v9 = vmax.f32 %v1385_v0, 0.0  ;;  %8314 = vmatpush1.bf16.msra.mxu1 %v8313_v50  ;;  %v8325_v50 = vpack.c.bf16 %v8195_v37, %v8193_v36 }
 0x165   : > { %v1388_v13 = vadd.f32 %v9836_v26, %v1242_v2  ;;  %v713_v14 = vmul.f32 %v9827_v19, %v509_v8  ;;  %v714_v15 = vmul.f32 %v9829_v20, %v509_v8  ;;  %v1646_v16 = vsel %vm220_vm0, %v1514_v4, %v1386_v58  ;;  %8316 = vmatprep.subr.bf16.mxu1 %v8315_v55 }
 0x166   : > { %2325 = vmatprep.mubr.f32.mxu1 %v1646_v16  ;;  %v1387_v21 = vadd.f32 %v9841_v32, %v1241_v1  ;;  %v8327_v55 = vpack.c.bf16 %v8200_v44, %v8198_v43  ;;  %v8203_v16 = vld [vmem:[%s16108_s2 + $0x3f0] sm:$0xff] }
 0x167   : > { %v1243_v24 = vadd.f32 %v1115_v6, %v713_v14  ;;  %v1244_v25 = vadd.f32 %v1116_v7, %v714_v15  ;;  %2326 = vmatmul.mubr.f32.gmra.mrb[20].mxu1 %v1513_v9  ;;  %v935_v27 = vpop.permute.xlu0 %934  ;;  %v1516_v28 = vmax.f32 %v1388_v13, 0.0  ;;  %v8201_v15 = vld [vmem:[%s16108_s2 + $0x3e0] sm:$0xff] }
 0x168   : > { %v1117_v30 = vmul.f32 %v9831_v22, %v935_v27  ;;  %v1118_v31 = vmul.f32 %v9833_v23, %v935_v27  ;;  %v514_v33 = vpop.permute.xlu1 %513  ;;  %v1515_v34 = vmax.f32 %v1387_v21, 0.0  ;;  %8318 = vmatpush1.bf16.msra.mxu1 %v8317_v5  ;;  %v8329_v5 = vpack.c.bf16 %v8199_v57, %v8197_v56 }
 0x169   : > { %v1390_v38 = vadd.f32 %v9836_v26, %v1244_v25  ;;  %v715_v40 = vmul.f32 %v9827_v19, %v514_v33  ;;  %v716_v41 = vmul.f32 %v9829_v20, %v514_v33  ;;  %v1648_v42 = vsel %vm220_vm0, %v1516_v28, %v1388_v13  ;;  %8320 = vmatprep.subr.bf16.mxu1 %v8319_v10 }
 0x16a   : > { %2331 = vmatprep.mubr.f32.mxu1 %v1648_v42  ;;  %v1389_v45 = vadd.f32 %v9841_v32, %v1243_v24  ;;  %v8331_v10 = vpack.c.bf16 %v8204_v63, %v8202_v62 }
 0x16b   : > { %v1245_v46 = vadd.f32 %v1117_v30, %v715_v40  ;;  %v1246_v47 = vadd.f32 %v1118_v31, %v716_v41  ;;  %2332 = vmatmul.mubr.f32.gmra.mrb[22].mxu1 %v1515_v34  ;;  %v939_v48 = vpop.permute.xlu0 %938  ;;  %v1518_v49 = vmax.f32 %v1390_v38, 0.0  ;;  %v8333_v31 = vpack.c.bf16 %v8203_v16, %v8201_v15 }
 0x16c   : > { %v1119_v51 = vmul.f32 %v9831_v22, %v939_v48  ;;  %v1120_v52 = vmul.f32 %v9833_v23, %v939_v48  ;;  %v519_v53 = vpop.permute.xlu1 %518  ;;  %v1517_v54 = vmax.f32 %v1389_v45, 0.0  ;;  %8322 = vmatpush1.bf16.msra.mxu1 %v8321_v29 }
 0x16d   : > { %v1392_v58 = vadd.f32 %v9836_v26, %v1246_v47  ;;  %v717_v59 = vmul.f32 %v9827_v19, %v519_v53  ;;  %v718_v60 = vmul.f32 %v9829_v20, %v519_v53  ;;  %v1650_v61 = vsel %vm220_vm0, %v1518_v49, %v1390_v38  ;;  %8324 = vmatprep.subr.bf16.mxu1 %v8323_v35 }
 0x16e   : > { %2337 = vmatprep.mubr.f32.mxu1 %v1650_v61  ;;  %v1391_v0 = vadd.f32 %v9841_v32, %v1245_v46 }
 0x16f   : > { %v1247_v1 = vadd.f32 %v1119_v51, %v717_v59  ;;  %v1248_v2 = vadd.f32 %v1120_v52, %v718_v60  ;;  %2338 = vmatmul.mubr.f32.gmra.mrb[24].mxu1 %v1517_v54  ;;  %v943_v3 = vpop.permute.xlu0 %942  ;;  %v1520_v4 = vmax.f32 %v1392_v58, 0.0 }
 0x170   : > { %v1121_v6 = vmul.f32 %v9831_v22, %v943_v3  ;;  %v1122_v7 = vmul.f32 %v9833_v23, %v943_v3  ;;  %v524_v8 = vpop.permute.xlu1 %523  ;;  %v1519_v9 = vmax.f32 %v1391_v0, 0.0  ;;  %8326 = vmatpush1.bf16.msra.mxu1 %v8325_v50 }
 0x171   : > { %v1394_v11 = vadd.f32 %v9836_v26, %v1248_v2  ;;  %v719_v12 = vmul.f32 %v9827_v19, %v524_v8  ;;  %v720_v13 = vmul.f32 %v9829_v20, %v524_v8  ;;  %v1652_v14 = vsel %vm220_vm0, %v1520_v4, %v1392_v58  ;;  %8328 = vmatprep.subr.bf16.mxu1 %v8327_v55 }
 0x172   : > { %2343 = vmatprep.mubr.f32.mxu1 %v1652_v14  ;;  %v1393_v17 = vadd.f32 %v9841_v32, %v1247_v1 }
 0x173   : > { %v1249_v18 = vadd.f32 %v1121_v6, %v719_v12  ;;  %v1250_v21 = vadd.f32 %v1122_v7, %v720_v13  ;;  %2344 = vmatmul.mubr.f32.gmra.mrb[26].mxu1 %v1519_v9  ;;  %v947_v24 = vpop.permute.xlu0 %946  ;;  %v1522_v25 = vmax.f32 %v1394_v11, 0.0 }
 0x174   : > { %v1123_v27 = vmul.f32 %v9831_v22, %v947_v24  ;;  %v1124_v28 = vmul.f32 %v9833_v23, %v947_v24  ;;  %v529_v29 = vpop.permute.xlu1 %528  ;;  %v1521_v30 = vmax.f32 %v1393_v17, 0.0  ;;  %8330 = vmatpush1.bf16.msra.mxu1 %v8329_v5 }
 0x175   : > { %v1396_v33 = vadd.f32 %v9836_v26, %v1250_v21  ;;  %v721_v34 = vmul.f32 %v9827_v19, %v529_v29  ;;  %v722_v35 = vmul.f32 %v9829_v20, %v529_v29  ;;  %v1654_v36 = vsel %vm220_vm0, %v1522_v25, %v1394_v11  ;;  %8332 = vmatprep.subr.bf16.mxu1 %v8331_v10 }
 0x176   : > { %2349 = vmatprep.mubr.f32.mxu1 %v1654_v36  ;;  %v1395_v37 = vadd.f32 %v9841_v32, %v1249_v18 }
 0x177   : > { %v1251_v38 = vadd.f32 %v1123_v27, %v721_v34  ;;  %v1252_v40 = vadd.f32 %v1124_v28, %v722_v35  ;;  %2350 = vmatmul.mubr.f32.gmra.mrb[28].mxu1 %v1521_v30  ;;  %v951_v41 = vpop.permute.xlu0 %950  ;;  %v1524_v42 = vmax.f32 %v1396_v33, 0.0 }
 0x178   : > { %v1125_v43 = vmul.f32 %v9831_v22, %v951_v41  ;;  %v1126_v44 = vmul.f32 %v9833_v23, %v951_v41  ;;  %v534_v45 = vpop.permute.xlu1 %533  ;;  %v1523_v46 = vmax.f32 %v1395_v37, 0.0  ;;  %8334 = vmatpush1.bf16.msra.mxu1 %v8333_v31 }
 0x179   : > { %v1398_v47 = vadd.f32 %v9836_v26, %v1252_v40  ;;  %v723_v48 = vmul.f32 %v9827_v19, %v534_v45  ;;  %v724_v49 = vmul.f32 %v9829_v20, %v534_v45  ;;  %v1656_v50 = vsel %vm220_vm0, %v1524_v42, %v1396_v33 }
 0x17a   : > { %2355 = vmatprep.mubr.f32.mxu1 %v1656_v50  ;;  %v1397_v51 = vadd.f32 %v9841_v32, %v1251_v38 }
 0x17b   : > { %v1253_v52 = vadd.f32 %v1125_v43, %v723_v48  ;;  %v1254_v53 = vadd.f32 %v1126_v44, %v724_v49  ;;  %2356 = vmatmul.mubr.f32.gmra.mrb[30].mxu1 %v1523_v46  ;;  %v955_v54 = vpop.permute.xlu0 %954  ;;  %v1526_v55 = vmax.f32 %v1398_v47, 0.0 }
 0x17c   : > { %v1127_v56 = vmul.f32 %v9831_v22, %v955_v54  ;;  %v1128_v57 = vmul.f32 %v9833_v23, %v955_v54  ;;  %v539_v58 = vpop.permute.xlu1 %538  ;;  %v1525_v59 = vmax.f32 %v1397_v51, 0.0 }
 0x17d   : > { %v1400_v60 = vadd.f32 %v9836_v26, %v1254_v53  ;;  %v725_v61 = vmul.f32 %v9827_v19, %v539_v58  ;;  %v726_v62 = vmul.f32 %v9829_v20, %v539_v58  ;;  %v1658_v63 = vsel %vm220_vm0, %v1526_v55, %v1398_v47 }
 0x17e   : > { %2361 = vmatprep.mubr.f32.mxu1 %v1658_v63  ;;  %v1399_v0 = vadd.f32 %v9841_v32, %v1253_v52 }
 0x17f   : > { %v1255_v1 = vadd.f32 %v1127_v56, %v725_v61  ;;  %v1256_v2 = vadd.f32 %v1128_v57, %v726_v62  ;;  %2362 = vmatmul.mubr.f32.gmra.mrb[32].mxu1 %v1525_v59  ;;  %v959_v3 = vpop.permute.xlu0 %958  ;;  %v1528_v4 = vmax.f32 %v1400_v60, 0.0 }
 0x180   : > { %v1129_v5 = vmul.f32 %v9831_v22, %v959_v3  ;;  %v1130_v6 = vmul.f32 %v9833_v23, %v959_v3  ;;  %v544_v7 = vpop.permute.xlu1 %543  ;;  %v1527_v8 = vmax.f32 %v1399_v0, 0.0 }
 0x181   : > { %v1402_v9 = vadd.f32 %v9836_v26, %v1256_v2  ;;  %v727_v10 = vmul.f32 %v9827_v19, %v544_v7  ;;  %v728_v11 = vmul.f32 %v9829_v20, %v544_v7  ;;  %v1660_v12 = vsel %vm220_vm0, %v1528_v4, %v1400_v60 }
 0x182   : > { %2367 = vmatprep.mubr.f32.mxu1 %v1660_v12  ;;  %v1401_v13 = vadd.f32 %v9841_v32, %v1255_v1 }
 0x183   : > { %v1257_v14 = vadd.f32 %v1129_v5, %v727_v10  ;;  %v1258_v15 = vadd.f32 %v1130_v6, %v728_v11  ;;  %2368 = vmatmul.mubr.f32.gmra.mrb[34].mxu1 %v1527_v8  ;;  %v963_v16 = vpop.permute.xlu0 %962  ;;  %v1530_v17 = vmax.f32 %v1402_v9, 0.0 }
 0x184   : > { %v1131_v18 = vmul.f32 %v9831_v22, %v963_v16  ;;  %v1132_v21 = vmul.f32 %v9833_v23, %v963_v16  ;;  %v549_v24 = vpop.permute.xlu1 %548  ;;  %v1529_v25 = vmax.f32 %v1401_v13, 0.0 }
 0x185   : > { %v1404_v27 = vadd.f32 %v9836_v26, %v1258_v15  ;;  %v729_v28 = vmul.f32 %v9827_v19, %v549_v24  ;;  %v730_v29 = vmul.f32 %v9829_v20, %v549_v24  ;;  %v1662_v30 = vsel %vm220_vm0, %v1530_v17, %v1402_v9 }
 0x186   : > { %2373 = vmatprep.mubr.f32.mxu1 %v1662_v30  ;;  %v1403_v31 = vadd.f32 %v9841_v32, %v1257_v14 }
 0x187   : > { %v1259_v33 = vadd.f32 %v1131_v18, %v729_v28  ;;  %v1260_v34 = vadd.f32 %v1132_v21, %v730_v29  ;;  %2374 = vmatmul.mubr.f32.gmra.mrb[36].mxu1 %v1529_v25  ;;  %v967_v35 = vpop.permute.xlu0 %966  ;;  %v1532_v36 = vmax.f32 %v1404_v27, 0.0 }
 0x188   : > { %v1133_v37 = vmul.f32 %v9831_v22, %v967_v35  ;;  %v1134_v38 = vmul.f32 %v9833_v23, %v967_v35  ;;  %v554_v40 = vpop.permute.xlu1 %553  ;;  %v1531_v41 = vmax.f32 %v1403_v31, 0.0 }
 0x189   : > { %v1406_v42 = vadd.f32 %v9836_v26, %v1260_v34  ;;  %v731_v43 = vmul.f32 %v9827_v19, %v554_v40  ;;  %v732_v44 = vmul.f32 %v9829_v20, %v554_v40  ;;  %v1664_v45 = vsel %vm220_vm0, %v1532_v36, %v1404_v27 }
 0x18a   : > { %2379 = vmatprep.mubr.f32.mxu1 %v1664_v45  ;;  %v1405_v46 = vadd.f32 %v9841_v32, %v1259_v33 }
 0x18b   : > { %v1261_v47 = vadd.f32 %v1133_v37, %v731_v43  ;;  %v1262_v48 = vadd.f32 %v1134_v38, %v732_v44  ;;  %2380 = vmatmul.mubr.f32.gmra.mrb[38].mxu1 %v1531_v41  ;;  %v971_v49 = vpop.permute.xlu0 %970  ;;  %v1534_v50 = vmax.f32 %v1406_v42, 0.0 }
 0x18c   : > { %v1135_v51 = vmul.f32 %v9831_v22, %v971_v49  ;;  %v1136_v52 = vmul.f32 %v9833_v23, %v971_v49  ;;  %v559_v53 = vpop.permute.xlu1 %558  ;;  %v1533_v54 = vmax.f32 %v1405_v46, 0.0 }
 0x18d   : > { %v1408_v55 = vadd.f32 %v9836_v26, %v1262_v48  ;;  %v733_v56 = vmul.f32 %v9827_v19, %v559_v53  ;;  %v734_v57 = vmul.f32 %v9829_v20, %v559_v53  ;;  %v1666_v58 = vsel %vm220_vm0, %v1534_v50, %v1406_v42 }
 0x18e   : > { %2385 = vmatprep.mubr.f32.mxu1 %v1666_v58  ;;  %v1407_v59 = vadd.f32 %v9841_v32, %v1261_v47 }
 0x18f   : > { %v1263_v60 = vadd.f32 %v1135_v51, %v733_v56  ;;  %v1264_v61 = vadd.f32 %v1136_v52, %v734_v57  ;;  %2386 = vmatmul.mubr.f32.gmra.mrb[40].mxu1 %v1533_v54  ;;  %v975_v62 = vpop.permute.xlu0 %974  ;;  %v1536_v63 = vmax.f32 %v1408_v55, 0.0 }
 0x190   : > { %v1137_v0 = vmul.f32 %v9831_v22, %v975_v62  ;;  %v1138_v1 = vmul.f32 %v9833_v23, %v975_v62  ;;  %v564_v2 = vpop.permute.xlu1 %563  ;;  %v1535_v3 = vmax.f32 %v1407_v59, 0.0 }
 0x191   : > { %v1410_v4 = vadd.f32 %v9836_v26, %v1264_v61  ;;  %v735_v5 = vmul.f32 %v9827_v19, %v564_v2  ;;  %v736_v6 = vmul.f32 %v9829_v20, %v564_v2  ;;  %v1668_v7 = vsel %vm220_vm0, %v1536_v63, %v1408_v55 }
 0x192   : > { %2391 = vmatprep.mubr.f32.mxu1 %v1668_v7  ;;  %v1409_v8 = vadd.f32 %v9841_v32, %v1263_v60 }
 0x193   : > { %v1265_v9 = vadd.f32 %v1137_v0, %v735_v5  ;;  %v1266_v10 = vadd.f32 %v1138_v1, %v736_v6  ;;  %2392 = vmatmul.mubr.f32.gmra.mrb[42].mxu1 %v1535_v3  ;;  %v979_v11 = vpop.permute.xlu0 %978  ;;  %v1538_v12 = vmax.f32 %v1410_v4, 0.0 }
 0x194   : > { %v1140_v13 = vmul.f32 %v9833_v23, %v979_v11  ;;  %v569_v14 = vpop.permute.xlu1 %568  ;;  %v1537_v21 = vmax.f32 %v1409_v8, 0.0  ;;  %v1139_v29 = vmul.f32 %v9831_v22, %v979_v11 }
 0x195   : > { %v1412_v15 = vadd.f32 %v9836_v26, %v1266_v10  ;;  %v738_v16 = vmul.f32 %v9829_v20, %v569_v14  ;;  %v10510_v17 = vpop.f32.mrb[0].mxu0  ;;  %v1670_v18 = vsel %vm220_vm0, %v1538_v12, %v1410_v4  ;;  %v1411_v28 = vadd.f32 %v9841_v32, %v1265_v9 }
 0x196   : > { %v10514_v24 = vpop.f32.mrb[1].mxu0  ;;  %2397 = vmatprep.mubr.f32.mxu1 %v1670_v18  ;;  %v737_v30 = vmul.f32 %v9827_v19, %v569_v14  ;;  %v10557_v3 = vmul.f32 100.0, %v10510_v17 }
 0x197   : > { %v1268_v25 = vadd.f32 %v1140_v13, %v738_v16  ;;  %2398 = vmatmul.mubr.f32.gmra.mrb[44].mxu1 %v1537_v21  ;;  %v1540_v27 = vmax.f32 %v1412_v15, 0.0  ;;  %v983_v31 = vpop.permute.xlu0 %982  ;;  %v1539_v41 = vmax.f32 %v1411_v28, 0.0  ;;  %v10542_v56 = vmul.f32 100.0, %v10514_v24 }
 0x198   : > { %v574_v33 = vpop.permute.xlu1 %573  ;;  %v1142_v38 = vmul.f32 %v9833_v23, %v983_v31  ;;  %v1267_v42 = vadd.f32 %v1139_v29, %v737_v30  ;;  %v1141_v45 = vmul.f32 %v9831_v22, %v983_v31  ;;  %v2586_v14 = vmul.f32 1.442695, %v10557_v3 }
 0x199   : > { %v10519_v34 = vpop.f32.mrb[2].mxu0  ;;  %v1672_v36 = vsel %vm220_vm0, %v1540_v27, %v1412_v15  ;;  %v1414_v37 = vadd.f32 %v9836_v26, %v1268_v25  ;;  %v740_v40 = vmul.f32 %v9829_v20, %v574_v33  ;;  %v739_v46 = vmul.f32 %v9827_v19, %v574_v33 }
 0x19a   : > { %v10521_v35 = vpop.f32.mrb[3].mxu0  ;;  %2403 = vmatprep.mubr.f32.mxu1 %v1672_v36  ;;  %v1413_v49 = vadd.f32 %v9841_v32, %v1267_v42  ;;  %v2588_v63 = vmul.f32 1.442695, %v10542_v56  ;;  %vm4123_vm4 = vcmp.gt.f32.partialorder %v10542_v56, 20.0  ;;  %vm4122_vm6 = vcmp.gt.f32.partialorder %v10557_v3, 20.0 }
 0x19b   : > { %2404 = vmatmul.mubr.f32.gmra.mrb[46].mxu1 %v1539_v41  ;;  %v1270_v47 = vadd.f32 %v1142_v38, %v740_v40  ;;  %v1542_v48 = vmax.f32 %v1414_v37, 0.0  ;;  %v987_v50 = vpop.permute.xlu0 %986  ;;  %v1269_v57 = vadd.f32 %v1141_v45, %v739_v46  ;;  %v10553_v0 = vmul.f32 100.0, %v10521_v35 }
 0x19c   : > { %v579_v53 = vpop.permute.xlu1 %578  ;;  %v1541_v54 = vmax.f32 %v1413_v49, 0.0  ;;  %v1144_v59 = vmul.f32 %v9833_v23, %v987_v50  ;;  %v1143_v6 = vmul.f32 %v9831_v22, %v987_v50  ;;  %8444 = vpow2.f32 %v2588_v63 }
 0x19d   : > { %v10528_v43 = vpop.f32.mrb[4].mxu0  ;;  %v1674_v51 = vsel %vm220_vm0, %v1542_v48, %v1414_v37  ;;  %v1416_v58 = vadd.f32 %v9836_v26, %v1270_v47  ;;  %v742_v60 = vmul.f32 %v9829_v20, %v579_v53  ;;  %v1415_v2 = vadd.f32 %v9841_v32, %v1269_v57 }
 0x19e   : > { %v10530_v44 = vpop.f32.mrb[5].mxu0  ;;  %2409 = vmatprep.mubr.f32.mxu1 %v1674_v51  ;;  %v741_v7 = vmul.f32 %v9827_v19, %v579_v53  ;;  %v2592_v10 = vmul.f32 1.442695, %v10553_v0  ;;  %vm4125_vm5 = vcmp.gt.f32.partialorder %v10553_v0, 20.0 }
 0x19f   : > { %2410 = vmatmul.mubr.f32.gmra.mrb[48].mxu1 %v1541_v54  ;;  %v1544_v1 = vmax.f32 %v1416_v58, 0.0  ;;  %v1272_v4 = vadd.f32 %v1144_v59, %v742_v60  ;;  %v991_v8 = vpop.permute.xlu0 %990  ;;  %v1543_v13 = vmax.f32 %v1415_v2, 0.0  ;;  %v10598_v59 = vmul.f32 100.0, %v10530_v44 }
 0x1a0   : > { %v584_v11 = vpop.permute.xlu1 %583  ;;  %v1271_v18 = vadd.f32 %v1143_v6, %v741_v7  ;;  %8446 = vpow2.f32 %v2592_v10  ;;  %v1146_v25 = vmul.f32 %v9833_v23, %v991_v8  ;;  %v1145_v37 = vmul.f32 %v9831_v22, %v991_v8 }
 0x1a1   : > { %v10537_v52 = vpop.f32.mrb[6].mxu0  ;;  %v1676_v12 = vsel %vm220_vm0, %v1544_v1, %v1416_v58  ;;  %v1418_v15 = vadd.f32 %v9836_v26, %v1272_v4  ;;  %v744_v27 = vmul.f32 %v9829_v20, %v584_v11  ;;  %8448 = vpow2.f32 %v2586_v14 }
 0x1a2   : > { %v10539_v55 = vpop.f32.mrb[7].mxu0  ;;  %2415 = vmatprep.mubr.f32.mxu1 %v1676_v12  ;;  %v1417_v33 = vadd.f32 %v9841_v32, %v1271_v18  ;;  %v743_v38 = vmul.f32 %v9827_v19, %v584_v11  ;;  %v2596_v14 = vmul.f32 1.442695, %v10598_v59  ;;  %vm4127_vm10 = vcmp.gt.f32.partialorder %v10598_v59, 20.0 }
 0x1a3   : > { %2416 = vmatmul.mubr.f32.gmra.mrb[50].mxu1 %v1543_v13  ;;  %v995_v28 = vpop.permute.xlu0 %994  ;;  %v1546_v30 = vmax.f32 %v1418_v15, 0.0  ;;  %v1274_v40 = vadd.f32 %v1146_v25, %v744_v27 }
 0x1a4   : > { %v589_v29 = vpop.permute.xlu1 %588  ;;  %v1545_v42 = vmax.f32 %v1417_v33, 0.0  ;;  %v1148_v46 = vmul.f32 %v9833_v23, %v995_v28  ;;  %v1273_v50 = vadd.f32 %v1145_v37, %v743_v38  ;;  %v1147_v60 = vmul.f32 %v9831_v22, %v995_v28 }
 0x1a5   : > { %v10547_v61 = vpop.f32.mrb[8].mxu0  ;;  %v1678_v41 = vsel %vm220_vm0, %v1546_v30, %v1418_v15  ;;  %v746_v47 = vmul.f32 %v9829_v20, %v589_v29  ;;  %v1420_v51 = vadd.f32 %v9836_v26, %v1274_v40  ;;  %v745_v63 = vmul.f32 %v9827_v19, %v589_v29 }
 0x1a6   : > { %v10549_v62 = vpop.f32.mrb[9].mxu0  ;;  %2421 = vmatprep.mubr.f32.mxu1 %v1678_v41  ;;  %v10585_v45 = vpop.eup %8444  ;;  %v1419_v11 = vadd.f32 %v9841_v32, %v1273_v50  ;;  %v10622_v38 = vmul.f32 100.0, %v10519_v34 }
 0x1a7   : > { %2422 = vmatmul.mubr.f32.gmra.mrb[52].mxu1 %v1545_v42  ;;  %v999_v49 = vpop.permute.xlu0 %998  ;;  %v2851_v57 = vadd.f32 1.0, %v10585_v45  ;;  %v1276_v1 = vadd.f32 %v1148_v46, %v746_v47  ;;  %v1548_v10 = vmax.f32 %v1420_v51, 0.0  ;;  %v1275_v15 = vadd.f32 %v1147_v60, %v745_v63 }
 0x1a8   : > { %v594_v53 = vpop.permute.xlu1 %593  ;;  %v1150_v4 = vmul.f32 %v9833_v23, %v999_v49  ;;  %v1547_v33 = vmax.f32 %v1419_v11, 0.0  ;;  %v2854_v50 = vmul.f32 -0.5, %v10585_v45  ;;  %v1149_v60 = vmul.f32 %v9831_v22, %v999_v49 }
 0x1a9   : > { %v10559_v5 = vpop.f32.mrb[10].mxu0  ;;  %v748_v6 = vmul.f32 %v9829_v20, %v594_v53  ;;  %8450 = vlog2.f32 %v2851_v57  ;;  %v1422_v18 = vadd.f32 %v9836_v26, %v1276_v1  ;;  %v1680_v30 = vsel %vm220_vm0, %v1548_v10, %v1420_v51 }
 0x1aa   : > { %v10563_v9 = vpop.f32.mrb[11].mxu0  ;;  %v10595_v58 = vpop.eup %8446  ;;  %2427 = vmatprep.mubr.f32.mxu1 %v1680_v30  ;;  %v1421_v46 = vadd.f32 %v9841_v32, %v1275_v15  ;;  %v747_v63 = vmul.f32 %v9827_v19, %v594_v53  ;;  %v2590_v11 = vmul.f32 1.442695, %v10622_v38  ;;  %v2857_v49 = vand.u32 2147483647, %v10585_v45 }
 0x1ab   : > { %v10608_v8 = vpop.eup %8448  ;;  %v2869_v12 = vadd.f32 1.0, %v10595_v58  ;;  %v1003_v13 = vpop.permute.xlu0 %1002  ;;  %v1278_v29 = vadd.f32 %v1150_v4, %v748_v6  ;;  %2428 = vmatmul.mubr.f32.gmra.mrb[54].mxu1 %v1547_v33  ;;  %v1550_v42 = vmax.f32 %v1422_v18, 0.0  ;;  %v2855_v30 = vadd.f32 1.0, %v2854_v50 }
 0x1ac   : > { %v599_v25 = vpop.permute.xlu1 %598  ;;  %v2842_v28 = vadd.f32 1.0, %v10608_v8  ;;  %v1152_v40 = vmul.f32 %v9833_v23, %v1003_v13  ;;  %v1549_v4 = vmax.f32 %v1421_v46, 0.0  ;;  %v2845_v15 = vmul.f32 -0.5, %v10608_v8 }
 0x1ad   : > { %v10570_v16 = vpop.f32.mrb[12].mxu0  ;;  %8452 = vlog2.f32 %v2869_v12  ;;  %v750_v41 = vmul.f32 %v9829_v20, %v599_v25  ;;  %v1424_v51 = vadd.f32 %v9836_v26, %v1278_v29  ;;  %v1682_v1 = vsel %vm220_vm0, %v1550_v42, %v1422_v18 }
 0x1ae   : > { %v10572_v21 = vpop.f32.mrb[13].mxu0  ;;  %8454 = vpow2.f32 %v2596_v14  ;;  %v10639_v12 = vmul.f32 100.0, %v10539_v55  ;;  %2433 = vmatprep.mubr.f32.mxu1 %v1682_v1  ;;  %v1151_v53 = vmul.f32 %v9831_v22, %v1003_v13  ;;  %v1277_v1 = vadd.f32 %v1149_v60, %v747_v63 }
 0x1af   : > { %8456 = vlog2.f32 %v2842_v28  ;;  %v1007_v57 = vpop.permute.xlu0 %1006  ;;  %v1280_v14 = vadd.f32 %v1152_v40, %v750_v41  ;;  %v749_v28 = vmul.f32 %v9827_v19, %v599_v25  ;;  %2434 = vmatmul.mubr.f32.gmra.mrb[56].mxu1 %v1549_v4  ;;  %v1552_v46 = vmax.f32 %v1424_v51, 0.0 }
 0x1b0   : > { %v604_v6 = vpop.permute.xlu1 %603  ;;  %v1154_v33 = vmul.f32 %v9833_v23, %v1007_v57  ;;  %v2872_v41 = vmul.f32 -0.5, %v10595_v58  ;;  %v2846_v25 = vadd.f32 1.0, %v2845_v15  ;;  %8458 = vpow2.f32 %v2590_v11 }
 0x1b1   : > { %v10576_v31 = vpop.f32.mrb[14].mxu0  ;;  %v752_v42 = vmul.f32 %v9829_v20, %v604_v6  ;;  %v1426_v13 = vadd.f32 %v9836_v26, %v1280_v14  ;;  %v2856_v23 = vmul.f32 %v10585_v45, %v2855_v30  ;;  %vm10657_vm1 = vcmp.lt.f32.partialorder %v2857_v49, 0.0004427343 }
 0x1b2   : > { %v10579_v36 = vpop.f32.mrb[15].mxu0  ;;  %v1684_v60 = vsel %vm220_vm0, %v1552_v46, %v1424_v51  ;;  %v2873_v15 = vadd.f32 1.0, %v2872_v41  ;;  %v1153_v11 = vmul.f32 %v9831_v22, %v1007_v57  ;;  %v1423_v45 = vadd.f32 %v9841_v32, %v1277_v1 }
 0x1b3   : > { %v8451_v29 = vpop.eup %8450  ;;  %2439 = vmatprep.mubr.f32.mxu1 %v1684_v60  ;;  %v1554_v51 = vmax.f32 %v1426_v13, 0.0  ;;  %vm4124_vm8 = vcmp.gt.f32.partialorder %v10622_v38, 20.0  ;;  %vm4129_vm13 = vcmp.gt.f32.partialorder %v10639_v12, 20.0 }
 0x1b4   : > { %v2853_v4 = vmul.f32 0.6931472, %v8451_v29  ;;  %v10672_v29 = vmul.f32 100.0, %v10549_v62  ;;  %v2874_v1 = vmul.f32 %v10595_v58, %v2873_v15 }
 0x1b5   : > { %v10589_v48 = vpop.f32.mrb[16].mxu0 }
 0x1b6   : > { %v10592_v54 = vpop.f32.mrb[17].mxu0  ;;  %v2859_v30 = vsel %vm10657_vm1, %v2856_v23, %v2853_v4  ;;  %v10686_v4 = vmul.f32 100.0, %v10528_v43 }
 0x1b7   : > { %v8453_v50 = vpop.eup %8452  ;;  %v3995_v23 = vmul.f32 0.01, %v2859_v30 }
 0x1b8   : > { %v10665_v14 = vpop.eup %8454  ;;  %vm4126_vm12 = vcmp.gt.f32.partialorder %v10686_v4, 20.0 }
 0x1b9   : > { %v10602_v2 = vpop.f32.mrb[18].mxu0  ;;  %v8457_v49 = vpop.eup %8456  ;;  %v2887_v57 = vadd.f32 1.0, %v10665_v14  ;;  %v2893_v60 = vand.u32 2147483647, %v10665_v14 }
 0x1ba   : > { %v10606_v7 = vpop.f32.mrb[19].mxu0  ;;  %v2844_v41 = vmul.f32 0.6931472, %v8457_v49 }
 0x1bb   : > { %vm2894_vm7 = vcmp.lt.f32.partialorder %v2893_v60, 0.0004427343 }
 0x1bd   : > { %v10614_v27 = vpop.f32.mrb[20].mxu0 }
 0x1be   : > { %16343 = vst [vmem:[#allocation6_spill] sm:$0xff] %v10614_v27  ;;  %v10619_v37 = vpop.f32.mrb[21].mxu0 }
 0x1c1   : > { %v10627_v47 = vpop.f32.mrb[22].mxu0 }
 0x1c2   : > { %16344 = vst [vmem:[#allocation7_spill] sm:$0xff] %v10627_v47  ;;  %v10635_v10 = vpop.f32.mrb[23].mxu0  ;;  %v2600_v47 = vmul.f32 1.442695, %v10639_v12 }
 0x1c4   : > { %8460 = vpow2.f32 %v2600_v47  ;;  %v1686_v47 = vsel %vm220_vm0, %v1554_v51, %v1426_v13 }
 0x1c5   : > { %v10645_v18 = vpop.f32.mrb[24].mxu0  ;;  %8462 = vlog2.f32 %v2887_v57  ;;  %v10727_v57 = vmul.f32 100.0, %v10563_v9 }
 0x1c6   : > { %16345 = vst [vmem:[#allocation8_spill] sm:$0xff] %v10645_v18  ;;  %v10649_v40 = vpop.f32.mrb[25].mxu0  ;;  %v1279_v18 = vadd.f32 %v1151_v53, %v749_v28  ;;  %v751_v53 = vmul.f32 %v9827_v19, %v604_v6  ;;  %v2875_v28 = vand.u32 2147483647, %v10595_v58  ;;  %v2848_v19 = vand.u32 2147483647, %v10608_v8 }
 0x1c7   : > { %16346 = vst [vmem:[#allocation9_spill] sm:$0xff] %v10649_v40  ;;  %v1282_v40 = vadd.f32 %v1154_v33, %v752_v42  ;;  %v2871_v33 = vmul.f32 0.6931472, %v8453_v50  ;;  %v1551_v42 = vmax.f32 %v1423_v45, 0.0 }
 0x1c8   : > { %v1425_v22 = vadd.f32 %v9841_v32, %v1279_v18  ;;  %v1281_v50 = vadd.f32 %v1153_v11, %v751_v53  ;;  %vm10690_vm2 = vcmp.lt.f32.partialorder %v2875_v28, 0.0004427343  ;;  %vm10698_vm3 = vcmp.lt.f32.partialorder %v2848_v19, 0.0004427343  ;;  %v10704_v53 = vpop.eup %8458 }
 0x1c9   : > { %v10654_v27 = vpop.f32.mrb[26].mxu0  ;;  %v1428_v6 = vadd.f32 %v9836_v26, %v1282_v40  ;;  %2440 = vmatmul.mubr.f32.gmra.mrb[58].mxu1 %v1551_v42  ;;  %v2604_v26 = vmul.f32 1.442695, %v10672_v29  ;;  %v2847_v40 = vmul.f32 %v10608_v8, %v2846_v25  ;;  %v2877_v58 = vsel %vm10690_vm2, %v2874_v1, %v2871_v33 }
 0x1ca   : > { %v10663_v63 = vpop.f32.mrb[27].mxu0  ;;  %2445 = vmatprep.mubr.f32.mxu1 %v1686_v47  ;;  %v1553_v13 = vmax.f32 %v1425_v22, 0.0  ;;  %v2594_v8 = vmul.f32 1.442695, %v10686_v4  ;;  %v1427_v25 = vadd.f32 %v9841_v32, %v1281_v50  ;;  %v4251_v28 = vsel %vm4123_vm4, %v10514_v24, %v3995_v23 }
 0x1cb   : > { %v1556_v15 = vmax.f32 %v1428_v6, 0.0  ;;  %v2850_v45 = vsel %vm10698_vm3, %v2847_v40, %v2844_v41  ;;  %v3997_v51 = vmul.f32 0.01, %v2877_v58  ;;  %8464 = vpow2.f32 %v2604_v26 }
 0x1cc   : > { %v10717_v33 = vmul.f32 100.0, %v10537_v52  ;;  %v1555_v42 = vmax.f32 %v1427_v25, 0.0  ;;  %v3994_v19 = vmul.f32 0.01, %v2850_v45  ;;  %8466 = vpow2.f32 %v2594_v8 }
 0x1cd   : > { %v10682_v46 = vpop.f32.mrb[28].mxu0  ;;  %2446 = vmatmul.mubr.f32.gmra.mrb[60].mxu1 %v1553_v13  ;;  %v1688_v30 = vsel %vm220_vm0, %v1556_v15, %v1428_v6  ;;  %v4379_v6 = vsel %vm220_vm0, %v4251_v28, %v10514_v24  ;;  %v4253_v47 = vsel %vm4125_vm5, %v10521_v35, %v3997_v51  ;;  %v2890_v41 = vmul.f32 -0.5, %v10665_v14 }
 0x1ce   : > { %v10688_v18 = vpop.f32.mrb[29].mxu0  ;;  %2451 = vmatprep.mubr.f32.mxu1 %v1688_v30  ;;  %v10721_v22 = vpop.eup %8460  ;;  %v2598_v1 = vmul.f32 1.442695, %v10717_v33  ;;  %v4250_v0 = vsel %vm4122_vm6, %v10510_v17, %v3994_v19  ;;  %v2860_v20 = vadd.f32 1.0, %v10704_v53  ;;  %v2608_v24 = vmul.f32 1.442695, %v10727_v57 }
 0x1cf   : > { %v2905_v23 = vadd.f32 1.0, %v10721_v22  ;;  %v4381_v3 = vsel %vm220_vm0, %v4253_v47, %v10521_v35  ;;  %v8463_v40 = vpop.eup %8462  ;;  %v2891_v58 = vadd.f32 1.0, %v2890_v41  ;;  %v10753_v15 = vmul.f32 100.0, %v10572_v21 }
 0x1d0   : > { %8468 = vlog2.f32 %v2860_v20  ;;  %v2889_v8 = vmul.f32 0.6931472, %v8463_v40  ;;  %v2863_v35 = vmul.f32 -0.5, %v10704_v53  ;;  %vm4131_vm2 = vcmp.gt.f32.partialorder %v10672_v29, 20.0 }
 0x1d1   : > { %v10702_v11 = vpop.f32.mrb[30].mxu0  ;;  %2452 = vmatmul.mubr.f32.gmra.mrb[62].mxu1 %v1555_v42  ;;  %8470 = vpow2.f32 %v2598_v1  ;;  %v2892_v28 = vmul.f32 %v10665_v14, %v2891_v58  ;;  %v10765_v42 = vmul.f32 100.0, %v10547_v61  ;;  %v2612_v19 = vmul.f32 1.442695, %v10753_v15 }
 0x1d2   : > { %v10711_v49 = vpop.f32.mrb[31].mxu0  ;;  %4891 = vmatprep.mubr.f32.mxu1 %v4379_v6  ;;  %8472 = vlog2.f32 %v2905_v23  ;;  %v2864_v41 = vadd.f32 1.0, %v2863_v35  ;;  %v10771_v1 = vmul.f32 100.0, %v10579_v36  ;;  %v2908_v23 = vmul.f32 -0.5, %v10721_v22 }
 0x1d3   : > { %8474 = vpow2.f32 %v2608_v24  ;;  %v2895_v47 = vsel %vm2894_vm7, %v2892_v28, %v2889_v8  ;;  %v2602_v40 = vmul.f32 1.442695, %v10765_v42  ;;  %vm4128_vm3 = vcmp.gt.f32.partialorder %v10717_v33, 20.0 }
 0x1d4   : > { %v2865_v35 = vmul.f32 %v10704_v53, %v2864_v41  ;;  %v2911_v41 = vand.u32 2147483647, %v10721_v22  ;;  %vm4130_vm5 = vcmp.gt.f32.partialorder %v10765_v42, 20.0  ;;  %vm4133_vm6 = vcmp.gt.f32.partialorder %v10727_v57, 20.0 }
 0x1d5   : > { %v10719_v56 = vpop.f32.mrb[32].mxu0  ;;  %4892 = vmatmul.mubr.f32.vlgmr.msra.gmra.mrb[64].mxu1 %v4250_v0  ;;  %v10749_v17 = vpop.eup %8464  ;;  %v2866_v0 = vand.u32 2147483647, %v10704_v53 }
 0x1d6   : > { %v10723_v32 = vpop.f32.mrb[33].mxu0  ;;  %4897 = vmatprep.mubr.f32.mxu1 %v4381_v3  ;;  %v10758_v25 = vpop.eup %8466  ;;  %v2923_v51 = vadd.f32 1.0, %v10749_v17  ;;  %v3999_v3 = vmul.f32 0.01, %v2895_v47  ;;  %v2909_v47 = vadd.f32 1.0, %v2908_v23 }
 0x1d7   : > { %v2878_v14 = vadd.f32 1.0, %v10758_v25  ;;  %vm2867_vm9 = vcmp.lt.f32.partialorder %v2866_v0, 0.0004427343  ;;  %v2881_v59 = vmul.f32 -0.5, %v10758_v25  ;;  %vm10815_vm11 = vcmp.lt.f32.partialorder %v2911_v41, 0.0004427343 }
 0x1d8   : > { %8476 = vlog2.f32 %v2923_v51  ;;  %v4255_v53 = vsel %vm4127_vm10, %v10530_v44, %v3999_v3 }
 0x1d9   : > { %v10736_v50 = vpop.f32.mrb[34].mxu0  ;;  %8478 = vpow2.f32 %v2612_v19  ;;  %v10790_v19 = vmul.f32 100.0, %v10559_v5 }
 0x1da   : > { %16353 = vst [vmem:[#allocation10_spill] sm:$0xff] %v10736_v50  ;;  %v10741_v26 = vpop.f32.mrb[35].mxu0  ;;  %v8469_v24 = vpop.eup %8468  ;;  %8480 = vlog2.f32 %v2878_v14  ;;  %v10799_v14 = vmul.f32 100.0, %v10592_v54 }
 0x1db   : > { %v10781_v60 = vpop.eup %8470  ;;  %v2862_v8 = vmul.f32 0.6931472, %v8469_v24  ;;  %8482 = vpow2.f32 %v2602_v40  ;;  %v2910_v40 = vmul.f32 %v10721_v22, %v2909_v47  ;;  %v2882_v47 = vadd.f32 1.0, %v2881_v59 }
 0x1dc   : > { %v8473_v28 = vpop.eup %8472  ;;  %v2896_v23 = vadd.f32 1.0, %v10781_v60  ;;  %vm4132_vm10 = vcmp.gt.f32.partialorder %v10790_v19, 20.0 }
 0x1dd   : > { %v10747_v13 = vpop.f32.mrb[36].mxu0  ;;  %v10786_v51 = vpop.eup %8474  ;;  %v2907_v0 = vmul.f32 0.6931472, %v8473_v28  ;;  %v4383_v28 = vsel %vm220_vm0, %v4255_v53, %v10530_v44  ;;  %v10827_v44 = vmul.f32 100.0, %v10570_v16  ;;  %v2884_v53 = vand.u32 2147483647, %v10758_v25 }
 0x1de   : > { %16354 = vst [vmem:[#allocation11_spill] sm:$0xff] %v10747_v13  ;;  %v10755_v45 = vpop.f32.mrb[37].mxu0 }
 0x1df   : > { %v2913_v22 = vsel %vm10815_vm11, %v2910_v40, %v2907_v0  ;;  %vm2885_vm14 = vcmp.lt.f32.partialorder %v2884_v53, 0.0004427343 }
 0x1e0   : > { %v4001_v0 = vmul.f32 0.01, %v2913_v22 }
 0x1e1   : > { %v10762_v30 = vpop.f32.mrb[38].mxu0 }
 0x1e2   : > { %16355 = vst [vmem:[#allocation12_spill] sm:$0xff] %v10762_v30  ;;  %v10768_v6 = vpop.f32.mrb[39].mxu0  ;;  %v2616_v30 = vmul.f32 1.442695, %v10771_v1  ;;  %v4257_v12 = vsel %vm4129_vm13, %v10539_v55, %v4001_v0  ;;  %vm4134_vm13 = vcmp.gt.f32.partialorder %v10827_v44, 20.0 }
 0x1e3   : > { %16356 = vst [vmem:[#allocation13_spill] sm:$0xff] %v10768_v6 }
 0x1e4   : > { %8484 = vpow2.f32 %v2616_v30  ;;  %v2620_v30 = vmul.f32 1.442695, %v10799_v14 }
 0x1e5   : > { %v10776_v20 = vpop.f32.mrb[40].mxu0  ;;  %8486 = vlog2.f32 %v2896_v23  ;;  %v2899_v23 = vmul.f32 -0.5, %v10781_v60 }
 0x1e6   : > { %16357 = vst [vmem:[#allocation14_spill] sm:$0xff] %v10776_v20  ;;  %v10779_v58 = vpop.f32.mrb[41].mxu0  ;;  %v2868_v20 = vsel %vm2867_vm9, %v2865_v35, %v2862_v8  ;;  %v2941_v8 = vadd.f32 1.0, %v10786_v51  ;;  %v2606_v35 = vmul.f32 1.442695, %v10790_v19 }
 0x1e7   : > { %16358 = vst [vmem:[#allocation15_spill] sm:$0xff] %v10779_v58  ;;  %v3996_v24 = vmul.f32 0.01, %v2868_v20  ;;  %v2926_v20 = vmul.f32 -0.5, %v10749_v17  ;;  %v2900_v53 = vadd.f32 1.0, %v2899_v23 }
 0x1e8   : > { %8488 = vlog2.f32 %v2941_v8 }
 0x1e9   : > { %v10792_v13 = vpop.f32.mrb[42].mxu0  ;;  %v4252_v3 = vsel %vm4124_vm8, %v10519_v34, %v3996_v24  ;;  %v8477_v34 = vpop.eup %8476  ;;  %v2927_v41 = vadd.f32 1.0, %v2926_v20  ;;  %8490 = vpow2.f32 %v2606_v35  ;;  %v2610_v35 = vmul.f32 1.442695, %v10827_v44 }
 0x1ea   : > { %16359 = vst [vmem:[#allocation16_spill] sm:$0xff] %v10792_v13  ;;  %v10796_v58 = vpop.f32.mrb[43].mxu0  ;;  %4898 = vmatmul.mubr.f32.gmra.mrb[66].mxu1 %v4252_v3  ;;  %v10824_v24 = vpop.eup %8478  ;;  %v2929_v3 = vand.u32 2147483647, %v10749_v17  ;;  %v2925_v59 = vmul.f32 0.6931472, %v8477_v34  ;;  %8492 = vpow2.f32 %v2620_v30 }
 0x1eb   : > { %16360 = vst [vmem:[#allocation17_spill] sm:$0xff] %v10796_v58  ;;  %4903 = vmatprep.mubr.f32.mxu1 %v4383_v28  ;;  %v8481_v58 = vpop.eup %8480  ;;  %v2959_v8 = vadd.f32 1.0, %v10824_v24  ;;  %v2928_v34 = vmul.f32 %v10749_v17, %v2927_v41  ;;  %v2902_v41 = vand.u32 2147483647, %v10781_v60  ;;  %vm4135_vm8 = vcmp.gt.f32.partialorder %v10753_v15, 20.0 }
 0x1ec   : > { %v2880_v40 = vmul.f32 0.6931472, %v8481_v58  ;;  %v10839_v20 = vpop.eup %8482  ;;  %vm10847_vm15 = vcmp.lt.f32.partialorder %v2929_v3, 0.0004427343 }
 0x1ed   : > { %v10813_v13 = vpop.f32.mrb[44].mxu0  ;;  %v2931_v17 = vsel %vm10847_vm15, %v2928_v34, %v2925_v59  ;;  %8494 = vlog2.f32 %v2959_v8  ;;  %v4385_v59 = vsel %vm220_vm0, %v4257_v12, %v10539_v55  ;;  %vm2903_vm1 = vcmp.lt.f32.partialorder %v2902_v41, 0.0004427343 }
 0x1ee   : > { %16361 = vst [vmem:[#allocation18_spill] sm:$0xff] %v10813_v13  ;;  %v10819_v38 = vpop.f32.mrb[45].mxu0  ;;  %v2883_v13 = vmul.f32 %v10758_v25, %v2882_v47  ;;  %v10852_v25 = vmul.f32 100.0, %v10576_v31  ;;  %v10856_v58 = vpop.eup %8484  ;;  %8496 = vpow2.f32 %v2610_v35  ;;  %v4003_v22 = vmul.f32 0.01, %v2931_v17 }
 0x1ef   : > { %16364 = vst [vmem:[#allocation19_spill] sm:$0xff] %v10819_v38  ;;  %v2977_v23 = vadd.f32 1.0, %v10856_v58  ;;  %v2947_v55 = vand.u32 2147483647, %v10786_v51  ;;  %v2962_v41 = vmul.f32 -0.5, %v10824_v24 }
 0x1f0   : > { %v2886_v30 = vsel %vm2885_vm14, %v2883_v13, %v2880_v40  ;;  %v2914_v13 = vadd.f32 1.0, %v10839_v20  ;;  %v8487_v40 = vpop.eup %8486  ;;  %vm4137_vm14 = vcmp.gt.f32.partialorder %v10771_v1, 20.0 }
 0x1f1   : > { %v10831_v28 = vpop.f32.mrb[46].mxu0  ;;  %v3998_v50 = vmul.f32 0.01, %v2886_v30  ;;  %v2898_v35 = vmul.f32 0.6931472, %v8487_v40  ;;  %v2901_v30 = vmul.f32 %v10781_v60, %v2900_v53  ;;  %v10890_v53 = vmul.f32 100.0, %v10589_v48 }
 0x1f2   : > { %16365 = vst [vmem:[#allocation20_spill] sm:$0xff] %v10831_v28  ;;  %v10837_v38 = vpop.f32.mrb[47].mxu0  ;;  %v10844_v28 = vmul.f32 100.0, %v10606_v7  ;;  %8498 = vlog2.f32 %v2914_v13  ;;  %v8489_v34 = vpop.eup %8488  ;;  %v4259_v40 = vsel %vm4131_vm2, %v10549_v62, %v4003_v22  ;;  %vm10903_vm4 = vcmp.lt.f32.partialorder %v2947_v55, 0.0004427343 }
 0x1f3   : > { %16366 = vst [vmem:[#allocation21_spill] sm:$0xff] %v10837_v38  ;;  %v2944_v38 = vmul.f32 -0.5, %v10786_v51  ;;  %v4254_v0 = vsel %vm4126_vm12, %v10528_v43, %v3998_v50  ;;  %v10879_v43 = vpop.eup %8490  ;;  %v2614_v50 = vmul.f32 1.442695, %v10852_v25  ;;  %v2904_v12 = vsel %vm2903_vm1, %v2901_v30, %v2898_v35 }
 0x1f4   : > { %v2624_v3 = vmul.f32 1.442695, %v10844_v28  ;;  %4904 = vmatmul.mubr.f32.gmra.mrb[68].mxu1 %v4254_v0  ;;  %v10883_v0 = vmul.f32 100.0, %v10619_v37  ;;  %v10887_v17 = vpop.eup %8492  ;;  %v2943_v60 = vmul.f32 0.6931472, %v8489_v34  ;;  %v2980_v35 = vmul.f32 -0.5, %v10856_v58 }
 0x1f5   : > { %v10854_v47 = vpop.f32.mrb[48].mxu0  ;;  %4909 = vmatprep.mubr.f32.mxu1 %v4385_v59  ;;  %v2945_v4 = vadd.f32 1.0, %v2944_v38  ;;  %v2917_v38 = vmul.f32 -0.5, %v10839_v20  ;;  %v4000_v29 = vmul.f32 0.01, %v2904_v12  ;;  %v2932_v59 = vadd.f32 1.0, %v10879_v43 }
 0x1f6   : > { %16369 = vst [vmem:[#allocation22_spill] sm:$0xff] %v10854_v47  ;;  %v10860_v6 = vpop.f32.mrb[49].mxu0  ;;  %8500 = vpow2.f32 %v2624_v3  ;;  %v2628_v34 = vmul.f32 1.442695, %v10883_v0  ;;  %v2995_v22 = vadd.f32 1.0, %v10887_v17  ;;  %v2998_v42 = vmul.f32 -0.5, %v10887_v17 }
 0x1f7   : > { %16370 = vst [vmem:[#allocation23_spill] sm:$0xff] %v10860_v6  ;;  %8502 = vlog2.f32 %v2977_v23  ;;  %v2946_v23 = vmul.f32 %v10786_v51, %v2945_v4  ;;  %v4256_v30 = vsel %vm4128_vm3, %v10537_v52, %v4000_v29  ;;  %v8495_v12 = vpop.eup %8494  ;;  %v2965_v51 = vand.u32 2147483647, %v10824_v24 }
 0x1f8   : > { %8504 = vpow2.f32 %v2614_v50  ;;  %4910 = vmatmul.mubr.f32.gmra.mrb[70].mxu1 %v4256_v30  ;;  %v4387_v4 = vsel %vm220_vm0, %v4259_v40, %v10549_v62  ;;  %v2918_v50 = vadd.f32 1.0, %v2917_v38  ;;  %v2963_v52 = vadd.f32 1.0, %v2962_v41 }
 0x1f9   : > { %v10874_v8 = vpop.f32.mrb[50].mxu0  ;;  %8506 = vlog2.f32 %v2932_v59  ;;  %v2949_v33 = vsel %vm10903_vm4, %v2946_v23, %v2943_v60  ;;  %v2618_v29 = vmul.f32 1.442695, %v10890_v53  ;;  %v10922_v59 = vmul.f32 100.0, %v10635_v10  ;;  %4915 = vmatprep.mubr.f32.mxu1 %v4387_v4  ;;  %v16390_v4 = vld [vmem:[#allocation7_spill] sm:$0xff] }
 0x1fa   : > { %16371 = vst [vmem:[#allocation24_spill] sm:$0xff] %v10874_v8  ;;  %v10877_v47 = vpop.f32.mrb[51].mxu0  ;;  %v2920_v60 = vand.u32 2147483647, %v10839_v20  ;;  %v10928_v62 = vmul.f32 100.0, %v10602_v2  ;;  %8508 = vpow2.f32 %v2628_v34  ;;  %v2935_v30 = vmul.f32 -0.5, %v10879_v43 }
 0x1fb   : > { %16372 = vst [vmem:[#allocation25_spill] sm:$0xff] %v10877_v47  ;;  %v4005_v40 = vmul.f32 0.01, %v2949_v33  ;;  %v2961_v41 = vmul.f32 0.6931472, %v8495_v12  ;;  %8510 = vlog2.f32 %v2995_v22  ;;  %v2919_v8 = vmul.f32 %v10839_v20, %v2918_v50 }
 0x1fc   : > { %vm10933_vm7 = vcmp.lt.f32.partialorder %v2965_v51, 0.0004427343  ;;  %v2964_v34 = vmul.f32 %v10824_v24, %v2963_v52  ;;  %8512 = vpow2.f32 %v2618_v29  ;;  %v2632_v22 = vmul.f32 1.442695, %v10922_v59 }
 0x1fd   : > { %v10893_v13 = vpop.f32.mrb[52].mxu0  ;;  %vm2921_vm9 = vcmp.lt.f32.partialorder %v2920_v60, 0.0004427343  ;;  %v2981_v51 = vadd.f32 1.0, %v2980_v35  ;;  %v2983_v20 = vand.u32 2147483647, %v10856_v58  ;;  %v4261_v24 = vsel %vm4133_vm6, %v10563_v9, %v4005_v40 }
 0x1fe   : > { %16373 = vst [vmem:[#allocation26_spill] sm:$0xff] %v10893_v13  ;;  %v10898_v3 = vpop.f32.mrb[53].mxu0  ;;  %v10918_v13 = vpop.eup %8496  ;;  %v2967_v52 = vsel %vm10933_vm7, %v2964_v34, %v2961_v41  ;;  %v16387_v34 = vld [vmem:[#allocation6_spill] sm:$0xff]  ;;  %vm4136_vm2 = vcmp.gt.f32.partialorder %v10852_v25, 20.0  ;;  %vm4139_vm3 = vcmp.gt.f32.partialorder %v10799_v14, 20.0  ;;  %vm4138_vm6 = vcmp.gt.f32.partialorder %v10890_v53, 20.0 }
 0x1ff   : > { %16374 = vst [vmem:[#allocation27_spill] sm:$0xff] %v10898_v3  ;;  %v8499_v23 = vpop.eup %8498  ;;  %v2950_v3 = vadd.f32 1.0, %v10918_v13  ;;  %v2953_v40 = vmul.f32 -0.5, %v10918_v13  ;;  %vm10969_vm11 = vcmp.lt.f32.partialorder %v2983_v20, 0.0004427343  ;;  %v11091_v25 = vmul.f32 100.0, %v10711_v49 }
 0x200   : > { %v10941_v6 = vpop.eup %8500  ;;  %vm4141_vm7 = vcmp.gt.f32.partialorder %v10844_v28, 20.0 }
 0x201   : > { %v10916_v55 = vpop.f32.mrb[54].mxu0  ;;  %v8503_v33 = vpop.eup %8502  ;;  %8514 = vlog2.f32 %v2950_v3  ;;  %v3013_v35 = vadd.f32 1.0, %v10941_v6  ;;  %v2938_v3 = vand.u32 2147483647, %v10879_v43 }
 0x202   : > { %16377 = vst [vmem:[#allocation28_spill] sm:$0xff] %v10916_v55  ;;  %v10930_v38 = vpop.f32.mrb[55].mxu0  ;;  %v2916_v55 = vmul.f32 0.6931472, %v8499_v23  ;;  %v2936_v23 = vadd.f32 1.0, %v2935_v30  ;;  %v10955_v60 = vpop.eup %8504  ;;  %8516 = vpow2.f32 %v2632_v22  ;;  %v4389_v22 = vsel %vm220_vm0, %v4261_v24, %v10563_v9 }
 0x203   : > { %16378 = vst [vmem:[#allocation29_spill] sm:$0xff] %v10930_v38  ;;  %v2979_v38 = vmul.f32 0.6931472, %v8503_v33  ;;  %v4007_v30 = vmul.f32 0.01, %v2967_v52  ;;  %v2954_v24 = vadd.f32 1.0, %v2953_v40 }
 0x204   : > { %v2922_v50 = vsel %vm2921_vm9, %v2919_v8, %v2916_v55  ;;  %v8507_v55 = vpop.eup %8506  ;;  %v2937_v20 = vmul.f32 %v10879_v43, %v2936_v23  ;;  %vm2939_vm12 = vcmp.lt.f32.partialorder %v2938_v3, 0.0004427343  ;;  %vm4143_vm9 = vcmp.gt.f32.partialorder %v10883_v0, 20.0 }
 0x205   : > { %v10939_v47 = vpop.f32.mrb[56].mxu0  ;;  %v4002_v29 = vmul.f32 0.01, %v2922_v50  ;;  %v10974_v50 = vmul.f32 100.0, %v16387_v34  ;;  %v2934_v52 = vmul.f32 0.6931472, %v8507_v55 }
 0x206   : > { %16381 = vst [vmem:[#allocation30_spill] sm:$0xff] %v10939_v47  ;;  %v10946_v12 = vpop.f32.mrb[57].mxu0  ;;  %v2622_v47 = vmul.f32 1.442695, %v10928_v62  ;;  %v2956_v55 = vand.u32 2147483647, %v10918_v13 }
 0x207   : > { %16382 = vst [vmem:[#allocation31_spill] sm:$0xff] %v10946_v12  ;;  %v16383_v12 = vld [vmem:[#allocation9_spill] sm:$0xff]  ;;  %v4258_v57 = vsel %vm4130_vm5, %v10547_v61, %v4002_v29  ;;  %v2982_v61 = vmul.f32 %v10856_v58, %v2981_v51  ;;  %v10984_v29 = vpop.eup %8508  ;;  %v2940_v51 = vsel %vm2939_vm12, %v2937_v20, %v2934_v52 }
 0x208   : > { %v10960_v8 = vmul.f32 100.0, %v16383_v12  ;;  %4916 = vmatmul.mubr.f32.gmra.mrb[72].mxu1 %v4258_v57  ;;  %8518 = vpow2.f32 %v2622_v47  ;;  %v2968_v57 = vadd.f32 1.0, %v10955_v60  ;;  %v8511_v9 = vpop.eup %8510  ;;  %v4263_v47 = vsel %vm4135_vm8, %v10572_v21, %v4007_v30 }
 0x209   : > { %v10967_v41 = vpop.f32.mrb[58].mxu0  ;;  %4921 = vmatprep.mubr.f32.mxu1 %v4389_v22  ;;  %v2985_v58 = vsel %vm10969_vm11, %v2982_v61, %v2979_v38  ;;  %8520 = vlog2.f32 %v3013_v35  ;;  %v4004_v3 = vmul.f32 0.01, %v2940_v51  ;;  %v2999_v38 = vadd.f32 1.0, %v2998_v42 }
 0x20a   : > { %16384 = vst [vmem:[#allocation32_spill] sm:$0xff] %v10967_v41  ;;  %v10979_v33 = vpop.f32.mrb[59].mxu0  ;;  %v2636_v41 = vmul.f32 1.442695, %v10960_v8  ;;  %8522 = vlog2.f32 %v2968_v57  ;;  %v3001_v35 = vand.u32 2147483647, %v10887_v17  ;;  %v4391_v42 = vsel %vm220_vm0, %v4263_v47, %v10572_v21 }
 0x20b   : > { %v3031_v40 = vadd.f32 1.0, %v10984_v29  ;;  %v11008_v61 = vmul.f32 100.0, %v16390_v4  ;;  %v4009_v20 = vmul.f32 0.01, %v2985_v58  ;;  %v2997_v15 = vmul.f32 0.6931472, %v8511_v9 }
 0x20c   : > { %8524 = vpow2.f32 %v2636_v41  ;;  %v4260_v30 = vsel %vm4132_vm10, %v10559_v5, %v4004_v3  ;;  %v2955_v51 = vmul.f32 %v10918_v13, %v2954_v24  ;;  %v2626_v58 = vmul.f32 1.442695, %v10974_v50 }
 0x20d   : > { %v10988_v12 = vpop.f32.mrb[60].mxu0  ;;  %4922 = vmatmul.mubr.f32.gmra.mrb[74].mxu1 %v4260_v30  ;;  %vm2957_vm15 = vcmp.lt.f32.partialorder %v2956_v55, 0.0004427343  ;;  %v3000_v5 = vmul.f32 %v10887_v17, %v2999_v38  ;;  %8526 = vlog2.f32 %v3031_v40  ;;  %v2630_v21 = vmul.f32 1.442695, %v11008_v61 }
 0x20e   : > { %16388 = vst [vmem:[#allocation6_spill] sm:$0xff] %v10988_v12  ;;  %v10993_v43 = vpop.f32.mrb[61].mxu0  ;;  %v10995_v23 = vpop.f32.mrb[0].mxu1  ;;  %4927 = vmatprep.mubr.f32.mxu1 %v4391_v42  ;;  %v4265_v13 = vsel %vm4137_vm14, %v10579_v36, %v4009_v20  ;;  %vm11029_vm1 = vcmp.lt.f32.partialorder %v3001_v35, 0.0004427343  ;;  %v11034_v24 = vmul.f32 100.0, %v10663_v63  ;;  %8528 = vpow2.f32 %v2626_v58 }
 0x20f   : > { %16389 = vst [vmem:[#allocation33_spill] sm:$0xff] %v10995_v23  ;;  %v11001_v22 = vpop.f32.mrb[1].mxu1  ;;  %v11003_v12 = vpop.eup %8512  ;;  %v2971_v23 = vmul.f32 -0.5, %v10955_v60  ;;  %v3003_v55 = vsel %vm11029_vm1, %v3000_v5, %v2997_v15  ;;  %v3016_v17 = vmul.f32 -0.5, %v10941_v6  ;;  %v2974_v30 = vand.u32 2147483647, %v10955_v60 }
 0x210   : > { %v8515_v52 = vpop.eup %8514  ;;  %v2986_v40 = vadd.f32 1.0, %v11003_v12  ;;  %v4393_v15 = vsel %vm220_vm0, %v4265_v13, %v10579_v36  ;;  %v3034_v36 = vmul.f32 -0.5, %v10984_v29  ;;  %vm4140_vm11 = vcmp.gt.f32.partialorder %v10928_v62, 20.0 }
 0x211   : > { %v2952_v57 = vmul.f32 0.6931472, %v8515_v52  ;;  %v11022_v19 = vpop.eup %8516  ;;  %v2972_v38 = vadd.f32 1.0, %v2971_v23  ;;  %v3017_v58 = vadd.f32 1.0, %v3016_v17  ;;  %vm2975_vm4 = vcmp.lt.f32.partialorder %v2974_v30, 0.0004427343 }
 0x212   : > { %v11020_v41 = vpop.f32.mrb[62].mxu0  ;;  %v11040_v52 = vpop.eup %8518  ;;  %v3049_v35 = vadd.f32 1.0, %v11022_v19  ;;  %8530 = vlog2.f32 %v2986_v40  ;;  %v3037_v30 = vand.u32 2147483647, %v10984_v29  ;;  %vm4142_vm14 = vcmp.gt.f32.partialorder %v10974_v50, 20.0 }
 0x213   : > { %16391 = vst [vmem:[#allocation7_spill] sm:$0xff] %v11020_v41  ;;  %v2958_v9 = vsel %vm2957_vm15, %v2955_v51, %v2952_v57  ;;  %v11026_v47 = vpop.f32.mrb[63].mxu0  ;;  %v8521_v42 = vpop.eup %8520  ;;  %v4011_v57 = vmul.f32 0.01, %v3003_v55  ;;  %8532 = vpow2.f32 %v2630_v21  ;;  %v2640_v51 = vmul.f32 1.442695, %v11034_v24 }
 0x214   : > { %v4006_v3 = vmul.f32 0.01, %v2958_v9  ;;  %v8523_v23 = vpop.eup %8522  ;;  %v2973_v5 = vmul.f32 %v10955_v60, %v2972_v38  ;;  %8534 = vlog2.f32 %v3049_v35  ;;  %v3015_v13 = vmul.f32 0.6931472, %v8521_v42  ;;  %v16397_v42 = vld [vmem:[#allocation8_spill] sm:$0xff] }
 0x215   : > { %v2970_v44 = vmul.f32 0.6931472, %v8523_v23  ;;  %v11059_v21 = vmul.f32 100.0, %v10688_v18  ;;  %v4267_v17 = vsel %vm4139_vm3, %v10592_v54, %v4011_v57  ;;  %8536 = vpow2.f32 %v2640_v51 }
 0x216   : > { %v4262_v20 = vsel %vm4134_vm13, %v10570_v16, %v4006_v3  ;;  %v3019_v16 = vand.u32 2147483647, %v10941_v6  ;;  %v11054_v9 = vpop.eup %8524  ;;  %v2989_v3 = vmul.f32 -0.5, %v11003_v12  ;;  %v11062_v55 = vpop.f32.mrb[2].mxu1  ;;  %v3004_v38 = vadd.f32 1.0, %v11040_v52 }
 0x217   : > { %4928 = vmatmul.mubr.f32.gmra.mrb[76].mxu1 %v4262_v20  ;;  %v2976_v1 = vsel %vm2975_vm4, %v2973_v5, %v2970_v44  ;;  %16394 = vst [vmem:[#allocation34_spill] sm:$0xff] %v11062_v55  ;;  %v11066_v14 = vpop.f32.mrb[3].mxu1  ;;  %v8527_v40 = vpop.eup %8526  ;;  %v3018_v35 = vmul.f32 %v10941_v6, %v3017_v58  ;;  %v3035_v23 = vadd.f32 1.0, %v3034_v36  ;;  %v3067_v57 = vadd.f32 1.0, %v11054_v9 }
 0x218   : > { %4933 = vmatprep.mubr.f32.mxu1 %v4393_v15  ;;  %v4008_v60 = vmul.f32 0.01, %v2976_v1  ;;  %vm11069_vm5 = vcmp.lt.f32.partialorder %v3019_v16, 0.0004427343  ;;  %v11075_v15 = vmul.f32 100.0, %v16397_v42  ;;  %8538 = vlog2.f32 %v3004_v38  ;;  %v11087_v5 = vpop.eup %8528 }
 0x219   : > { %v3021_v6 = vsel %vm11069_vm5, %v3018_v35, %v3015_v13  ;;  %v2644_v58 = vmul.f32 1.442695, %v11059_v21  ;;  %v4395_v16 = vsel %vm220_vm0, %v4267_v17, %v10592_v54  ;;  %v2990_v44 = vadd.f32 1.0, %v2989_v3 }
 0x21a   : > { %v4264_v51 = vsel %vm4136_vm2, %v10576_v31, %v4008_v60  ;;  %v3033_v36 = vmul.f32 0.6931472, %v8527_v40  ;;  %v2992_v31 = vand.u32 2147483647, %v11003_v12  ;;  %vm11095_vm8 = vcmp.lt.f32.partialorder %v3037_v30, 0.0004427343 }
 0x21b   : > { %4934 = vmatmul.mubr.f32.gmra.mrb[78].mxu1 %v4264_v51  ;;  %v2634_v54 = vmul.f32 1.442695, %v11075_v15  ;;  %v3007_v3 = vmul.f32 -0.5, %v11040_v52  ;;  %v4013_v60 = vmul.f32 0.01, %v3021_v6  ;;  %v3036_v38 = vmul.f32 %v10984_v29, %v3035_v23  ;;  %v11108_v51 = vpop.f32.mrb[4].mxu1 }
 0x21c   : > { %4939 = vmatprep.mubr.f32.mxu1 %v4395_v16  ;;  %v8531_v13 = vpop.eup %8530  ;;  %v3052_v40 = vmul.f32 -0.5, %v11022_v19  ;;  %8540 = vlog2.f32 %v3067_v57  ;;  %v2991_v20 = vmul.f32 %v11003_v12, %v2990_v44  ;;  %v3022_v30 = vadd.f32 1.0, %v11087_v5  ;;  %16400 = vst [vmem:[#allocation8_spill] sm:$0xff] %v11108_v51  ;;  %v11116_v23 = vpop.f32.mrb[5].mxu1 }
 0x21d   : > { %v11101_v17 = vpop.eup %8532  ;;  %8542 = vpow2.f32 %v2644_v58  ;;  %v2988_v35 = vmul.f32 0.6931472, %v8531_v13  ;;  %v3039_v55 = vsel %vm11095_vm8, %v3036_v38, %v3033_v36  ;;  %v11113_v6 = vmul.f32 100.0, %v10654_v27  ;;  %16401 = vst [vmem:[#allocation35_spill] sm:$0xff] %v11116_v23 }
 0x21e   : > { %v8535_v16 = vpop.eup %8534  ;;  %v2648_v29 = vmul.f32 1.442695, %v11091_v25  ;;  %vm2993_vm10 = vcmp.lt.f32.partialorder %v2992_v31, 0.0004427343  ;;  %v3055_v12 = vand.u32 2147483647, %v11022_v19  ;;  %8544 = vlog2.f32 %v3022_v30 }
 0x21f   : > { %v2994_v57 = vsel %vm2993_vm10, %v2991_v20, %v2988_v35  ;;  %v3008_v58 = vadd.f32 1.0, %v3007_v3  ;;  %v11120_v44 = vpop.eup %8536  ;;  %v4269_v36 = vsel %vm4141_vm7, %v10606_v7, %v4013_v60  ;;  %v3053_v13 = vadd.f32 1.0, %v3052_v40 }
 0x220   : > { %v4010_v1 = vmul.f32 0.01, %v2994_v57  ;;  %v3010_v38 = vand.u32 2147483647, %v11040_v52  ;;  %v4015_v31 = vmul.f32 0.01, %v3039_v55  ;;  %8546 = vpow2.f32 %v2634_v54 }
 0x221   : > { %v3051_v51 = vmul.f32 0.6931472, %v8535_v16  ;;  %v11127_v23 = vmul.f32 100.0, %v10723_v32  ;;  %8548 = vpow2.f32 %v2648_v29  ;;  %v3025_v35 = vmul.f32 -0.5, %v11087_v5 }
 0x222   : > { %v8539_v41 = vpop.eup %8538  ;;  %v4266_v3 = vsel %vm4138_vm6, %v10589_v48, %v4010_v1  ;;  %v3040_v28 = vadd.f32 1.0, %v11101_v17  ;;  %v3085_v60 = vadd.f32 1.0, %v11120_v44  ;;  %v4397_v55 = vsel %vm220_vm0, %v4269_v36, %v10606_v7 }
 0x223   : > { %4940 = vmatmul.mubr.f32.gmra.mrb[80].mxu1 %v4266_v3  ;;  %v3006_v54 = vmul.f32 0.6931472, %v8539_v41  ;;  %v3009_v40 = vmul.f32 %v11040_v52, %v3008_v58  ;;  %v3054_v20 = vmul.f32 %v11022_v19, %v3053_v13  ;;  %v3070_v30 = vmul.f32 -0.5, %v11054_v9  ;;  %v11150_v52 = vpop.f32.mrb[6].mxu1 }
 0x224   : > { %v2638_v48 = vmul.f32 1.442695, %v11113_v6  ;;  %4945 = vmatprep.mubr.f32.mxu1 %v4397_v55  ;;  %vm3011_vm12 = vcmp.lt.f32.partialorder %v3010_v38, 0.0004427343  ;;  %v4271_v53 = vsel %vm4143_vm9, %v10619_v37, %v4015_v31  ;;  %vm11145_vm13 = vcmp.lt.f32.partialorder %v3055_v12, 0.0004427343 }
 0x225   : > { %v2652_v7 = vmul.f32 1.442695, %v11127_v23  ;;  %v3012_v41 = vsel %vm3011_vm12, %v3009_v40, %v3006_v54  ;;  %v3057_v29 = vsel %vm11145_vm13, %v3054_v20, %v3051_v51  ;;  %v3026_v58 = vadd.f32 1.0, %v3025_v35  ;;  %v11155_v0 = vpop.f32.mrb[7].mxu1 }
 0x226   : > { %v8541_v19 = vpop.eup %8540  ;;  %v4012_v57 = vmul.f32 0.01, %v3012_v41  ;;  %8550 = vlog2.f32 %v3040_v28  ;;  %v3073_v36 = vand.u32 2147483647, %v11054_v9  ;;  %v11161_v13 = vmul.f32 100.0, %v10682_v46 }
 0x227   : > { %v11157_v12 = vpop.eup %8542  ;;  %8552 = vlog2.f32 %v3085_v60  ;;  %v3028_v1 = vand.u32 2147483647, %v11087_v5  ;;  %vm4145_vm15 = vcmp.gt.f32.partialorder %v10922_v59, 20.0  ;;  %v3071_v38 = vadd.f32 1.0, %v3070_v30 }
 0x228   : > { %8554 = vpow2.f32 %v2638_v48  ;;  %v4268_v51 = vsel %vm4140_vm11, %v10602_v2, %v4012_v57  ;;  %v8545_v31 = vpop.eup %8544  ;;  %v4017_v3 = vmul.f32 0.01, %v3057_v29  ;;  %v4399_v35 = vsel %vm220_vm0, %v4271_v53, %v10619_v37  ;;  %v11194_v29 = vpop.f32.mrb[8].mxu1 }
 0x229   : > { %8556 = vpow2.f32 %v2652_v7  ;;  %4946 = vmatmul.mubr.f32.gmra.mrb[82].mxu1 %v4268_v51  ;;  %v3043_v28 = vmul.f32 -0.5, %v11101_v17  ;;  %v3069_v60 = vmul.f32 0.6931472, %v8541_v19  ;;  %v3103_v55 = vadd.f32 1.0, %v11157_v12  ;;  %16406 = vst [vmem:[#allocation36_spill] sm:$0xff] %v11194_v29 }
 0x22a   : > { %4951 = vmatprep.mubr.f32.mxu1 %v4399_v35  ;;  %v3024_v54 = vmul.f32 0.6931472, %v8545_v31  ;;  %v3027_v40 = vmul.f32 %v11087_v5, %v3026_v58  ;;  %v11174_v20 = vpop.eup %8546  ;;  %vm11176_vm1 = vcmp.lt.f32.partialorder %v3073_v36, 0.0004427343  ;;  %v2642_v62 = vmul.f32 1.442695, %v11161_v13 }
 0x22b   : > { %vm3029_vm2 = vcmp.lt.f32.partialorder %v3028_v1, 0.0004427343  ;;  %v11181_v30 = vpop.eup %8548  ;;  %v3072_v37 = vmul.f32 %v11054_v9, %v3071_v38  ;;  %v11185_v48 = vmul.f32 100.0, %v10702_v11  ;;  %v11188_v53 = vmul.f32 100.0, %v10741_v26  ;;  %v11200_v36 = vpop.f32.mrb[9].mxu1 }
 0x22c   : > { %v3030_v5 = vsel %vm3029_vm2, %v3027_v40, %v3024_v54  ;;  %v4273_v16 = vsel %vm4145_vm15, %v10635_v10, %v4017_v3  ;;  %v3088_v7 = vmul.f32 -0.5, %v11120_v44  ;;  %v3044_v19 = vadd.f32 1.0, %v3043_v28 }
 0x22d   : > { %v4014_v41 = vmul.f32 0.01, %v3030_v5  ;;  %v3075_v9 = vsel %vm11176_vm1, %v3072_v37, %v3069_v60  ;;  %8558 = vlog2.f32 %v3103_v55  ;;  %v3046_v57 = vand.u32 2147483647, %v11101_v17  ;;  %v16407_v37 = vld [vmem:[#allocation9_spill] sm:$0xff] }
 0x22e   : > { %v3058_v58 = vadd.f32 1.0, %v11174_v20  ;;  %8560 = vpow2.f32 %v2642_v62  ;;  %v3121_v59 = vadd.f32 1.0, %v11181_v30  ;;  %v2656_v51 = vmul.f32 1.442695, %v11188_v53 }
 0x22f   : > { %v4270_v1 = vsel %vm4142_vm14, %v16387_v34, %v4014_v41  ;;  %v4401_v31 = vsel %vm220_vm0, %v4273_v16, %v10635_v10  ;;  %vm4144_vm3 = vcmp.gt.f32.partialorder %v11008_v61, 20.0  ;;  %v4019_v35 = vmul.f32 0.01, %v3075_v9 }
 0x230   : > { %v8551_v38 = vpop.eup %8550  ;;  %4952 = vmatmul.mubr.f32.gmra.mrb[84].mxu1 %v4270_v1  ;;  %8562 = vlog2.f32 %v3058_v58  ;;  %v3045_v60 = vmul.f32 %v11101_v17, %v3044_v19  ;;  %vm4147_vm4 = vcmp.gt.f32.partialorder %v10960_v8, 20.0  ;;  %v3089_v34 = vadd.f32 1.0, %v3088_v7  ;;  %v11229_v19 = vpop.f32.mrb[10].mxu1 }
 0x231   : > { %v8553_v3 = vpop.eup %8552  ;;  %4957 = vmatprep.mubr.f32.mxu1 %v4401_v31  ;;  %v3042_v28 = vmul.f32 0.6931472, %v8551_v38  ;;  %v2646_v50 = vmul.f32 1.442695, %v11185_v48  ;;  %vm3047_vm5 = vcmp.lt.f32.partialorder %v3046_v57, 0.0004427343  ;;  %8564 = vlog2.f32 %v3121_v59 }
 0x232   : > { %v11212_v55 = vpop.eup %8554  ;;  %v3091_v10 = vand.u32 2147483647, %v11120_v44  ;;  %v11220_v40 = vmul.f32 100.0, %v10755_v45  ;;  %v3087_v62 = vmul.f32 0.6931472, %v8553_v3  ;;  %v11223_v17 = vmul.f32 100.0, %v10719_v56 }
 0x233   : > { %v11216_v54 = vpop.eup %8556  ;;  %v3048_v2 = vsel %vm3047_vm5, %v3045_v60, %v3042_v28  ;;  %8566 = vpow2.f32 %v2656_v51  ;;  %v3061_v8 = vmul.f32 -0.5, %v11174_v20  ;;  %v4275_v5 = vsel %vm4147_vm4, %v16407_v37, %v4019_v35  ;;  %16408 = vst [vmem:[#allocation9_spill] sm:$0xff] %v11229_v19  ;;  %v11234_v59 = vpop.f32.mrb[11].mxu1  ;;  %v16411_v3 = vld [vmem:[#allocation13_spill] sm:$0xff] }
 0x234   : > { %v3106_v16 = vmul.f32 -0.5, %v11157_v12  ;;  %v4016_v7 = vmul.f32 0.01, %v3048_v2  ;;  %v3076_v41 = vadd.f32 1.0, %v11212_v55  ;;  %v3090_v9 = vmul.f32 %v11120_v44, %v3089_v34  ;;  %v11267_v1 = vpop.f32.mrb[12].mxu1 }
 0x235   : > { %v3109_v57 = vand.u32 2147483647, %v11157_v12  ;;  %8568 = vpow2.f32 %v2646_v50  ;;  %v3139_v58 = vadd.f32 1.0, %v11216_v54  ;;  %vm11236_vm6 = vcmp.lt.f32.partialorder %v3091_v10, 0.0004427343  ;;  %16414 = vst [vmem:[#allocation13_spill] sm:$0xff] %v11267_v1 }
 0x236   : > { %v2660_v38 = vmul.f32 1.442695, %v11220_v40  ;;  %v4272_v51 = vsel %vm4144_vm3, %v16390_v4, %v4016_v7  ;;  %8570 = vlog2.f32 %v3076_v41  ;;  %v3093_v44 = vsel %vm11236_vm6, %v3090_v9, %v3087_v62 }
 0x237   : > { %v8559_v31 = vpop.eup %8558  ;;  %v11247_v35 = vmul.f32 100.0, %v16411_v3  ;;  %4958 = vmatmul.mubr.f32.gmra.mrb[86].mxu1 %v4272_v51  ;;  %v4403_v28 = vsel %vm220_vm0, %v4275_v5, %v16407_v37  ;;  %v3062_v60 = vadd.f32 1.0, %v3061_v8  ;;  %vm4146_vm7 = vcmp.gt.f32.partialorder %v11075_v15, 20.0 }
 0x238   : > { %v11252_v34 = vpop.eup %8560  ;;  %v3107_v61 = vadd.f32 1.0, %v3106_v16  ;;  %v2650_v4 = vmul.f32 1.442695, %v11223_v17  ;;  %4963 = vmatprep.mubr.f32.mxu1 %v4403_v28  ;;  %v3064_v50 = vand.u32 2147483647, %v11174_v20  ;;  %vm4149_vm8 = vcmp.gt.f32.partialorder %v11034_v24, 20.0 }
 0x239   : > { %vm11258_vm9 = vcmp.lt.f32.partialorder %v3109_v57, 0.0004427343  ;;  %v3124_v62 = vmul.f32 -0.5, %v11181_v30  ;;  %8572 = vlog2.f32 %v3139_v58  ;;  %v4021_v8 = vmul.f32 0.01, %v3093_v44  ;;  %v16415_v28 = vld [vmem:[#allocation10_spill] sm:$0xff] }
 0x23a   : > { %v8563_v10 = vpop.eup %8562  ;;  %v3105_v37 = vmul.f32 0.6931472, %v8559_v31  ;;  %8574 = vpow2.f32 %v2660_v38  ;;  %v3079_v5 = vmul.f32 -0.5, %v11212_v55  ;;  %v2664_v16 = vmul.f32 1.442695, %v11247_v35  ;;  %v11273_v38 = vpop.f32.mrb[13].mxu1 }
 0x23b   : > { %v3060_v7 = vmul.f32 0.6931472, %v8563_v10  ;;  %v3063_v41 = vmul.f32 %v11174_v20, %v3062_v60  ;;  %v3094_v9 = vadd.f32 1.0, %v11252_v34  ;;  %v8565_v57 = vpop.eup %8564  ;;  %v3108_v51 = vmul.f32 %v11157_v12, %v3107_v61  ;;  %16416 = vst [vmem:[#allocation10_spill] sm:$0xff] %v11273_v38 }
 0x23c   : > { %8576 = vpow2.f32 %v2650_v4  ;;  %v11271_v58 = vmul.f32 100.0, %v16415_v28  ;;  %vm3065_vm10 = vcmp.lt.f32.partialorder %v3064_v50, 0.0004427343  ;;  %v3125_v44 = vadd.f32 1.0, %v3124_v62  ;;  %v16417_v62 = vld [vmem:[#allocation15_spill] sm:$0xff] }
 0x23d   : > { %v11275_v31 = vpop.eup %8566  ;;  %v3127_v10 = vand.u32 2147483647, %v11181_v30  ;;  %v3066_v20 = vsel %vm3065_vm10, %v3063_v41, %v3060_v7  ;;  %8578 = vlog2.f32 %v3094_v9  ;;  %vm4148_vm11 = vcmp.gt.f32.partialorder %v11113_v6, 20.0  ;;  %v16426_v6 = vld [vmem:[#allocation12_spill] sm:$0xff] }
 0x23e   : > { %v4277_v12 = vsel %vm4149_vm8, %v10663_v63, %v4021_v8  ;;  %v3111_v60 = vsel %vm11258_vm9, %v3108_v51, %v3105_v37  ;;  %v4018_v61 = vmul.f32 0.01, %v3066_v20  ;;  %v3080_v4 = vadd.f32 1.0, %v3079_v5 }
 0x23f   : > { %v11284_v50 = vpop.eup %8568  ;;  %v3123_v1 = vmul.f32 0.6931472, %v8565_v57  ;;  %8580 = vpow2.f32 %v2664_v16  ;;  %v11287_v19 = vmul.f32 100.0, %v16417_v62  ;;  %v3082_v7 = vand.u32 2147483647, %v11212_v55 }
 0x240   : > { %v8571_v41 = vpop.eup %8570  ;;  %vm4151_vm12 = vcmp.gt.f32.partialorder %v11059_v21, 20.0  ;;  %v3157_v24 = vadd.f32 1.0, %v11275_v31  ;;  %v4274_v2 = vsel %vm4146_vm7, %v16397_v42, %v4018_v61  ;;  %v3097_v8 = vmul.f32 -0.5, %v11252_v34 }
 0x241   : > { %v4023_v37 = vmul.f32 0.01, %v3111_v60  ;;  %v3126_v5 = vmul.f32 %v11181_v30, %v3125_v44  ;;  %v2654_v16 = vmul.f32 1.442695, %v11271_v58  ;;  %4964 = vmatmul.mubr.f32.gmra.mrb[88].mxu1 %v4274_v2  ;;  %v4405_v9 = vsel %vm220_vm0, %v4277_v12, %v10663_v63  ;;  %v11311_v63 = vpop.f32.mrb[14].mxu1  ;;  %v16421_v12 = vld [vmem:[#allocation11_spill] sm:$0xff] }
 0x242   : > { %vm11301_vm13 = vcmp.lt.f32.partialorder %v3127_v10, 0.0004427343  ;;  %v3142_v51 = vmul.f32 -0.5, %v11216_v54  ;;  %4969 = vmatprep.mubr.f32.mxu1 %v4405_v9  ;;  %v3078_v42 = vmul.f32 0.6931472, %v8571_v41  ;;  %v3081_v15 = vmul.f32 %v11212_v55, %v3080_v4  ;;  %16420 = vst [vmem:[#allocation15_spill] sm:$0xff] %v11311_v63 }
 0x243   : > { %v8573_v20 = vpop.eup %8572  ;;  %v3129_v30 = vsel %vm11301_vm13, %v3126_v5, %v3123_v1  ;;  %v2668_v44 = vmul.f32 1.442695, %v11287_v19  ;;  %vm3083_vm14 = vcmp.lt.f32.partialorder %v3082_v7, 0.0004427343  ;;  %v3112_v60 = vadd.f32 1.0, %v11284_v50  ;;  %v11319_v41 = vpop.f32.mrb[15].mxu1 }
 0x244   : > { %v11313_v10 = vpop.eup %8574  ;;  %vm4150_vm15 = vcmp.gt.f32.partialorder %v11161_v13, 20.0  ;;  %8582 = vlog2.f32 %v3157_v24  ;;  %v11317_v61 = vmul.f32 100.0, %v16421_v12  ;;  %v3084_v55 = vsel %vm3083_vm14, %v3081_v15, %v3078_v42  ;;  %16422 = vst [vmem:[#allocation11_spill] sm:$0xff] %v11319_v41 }
 0x245   : > { %v3098_v4 = vadd.f32 1.0, %v3097_v8  ;;  %v4279_v1 = vsel %vm4151_vm12, %v10688_v18, %v4023_v37  ;;  %v4020_v7 = vmul.f32 0.01, %v3084_v55  ;;  %v3100_v2 = vand.u32 2147483647, %v11252_v34 }
 0x246   : > { %8584 = vlog2.f32 %v3112_v60  ;;  %v11325_v5 = vpop.eup %8576  ;;  %v4025_v9 = vmul.f32 0.01, %v3129_v30  ;;  %v3143_v57 = vadd.f32 1.0, %v3142_v51  ;;  %v3145_v24 = vand.u32 2147483647, %v11216_v54 }
 0x247   : > { %8586 = vpow2.f32 %v2654_v16  ;;  %v8579_v63 = vpop.eup %8578  ;;  %v3141_v42 = vmul.f32 0.6931472, %v8573_v20  ;;  %v3175_v8 = vadd.f32 1.0, %v11313_v10  ;;  %v4276_v21 = vsel %vm4148_vm11, %v10654_v27, %v4020_v7 }
 0x248   : > { %8588 = vpow2.f32 %v2668_v44  ;;  %4970 = vmatmul.mubr.f32.gmra.mrb[90].mxu1 %v4276_v21  ;;  %v4407_v37 = vsel %vm220_vm0, %v4279_v1, %v10688_v18  ;;  %v3096_v15 = vmul.f32 0.6931472, %v8579_v63  ;;  %v3099_v51 = vmul.f32 %v11252_v34, %v3098_v4  ;;  %v16423_v44 = vld [vmem:[#allocation17_spill] sm:$0xff]  ;;  %v11354_v1 = vpop.f32.mrb[16].mxu1 }
 0x249   : > { %v3115_v30 = vmul.f32 -0.5, %v11284_v50  ;;  %v11337_v16 = vpop.eup %8580  ;;  %vm4153_vm1 = vcmp.gt.f32.partialorder %v11091_v25, 20.0  ;;  %v2658_v20 = vmul.f32 1.442695, %v11317_v61  ;;  %v11342_v60 = vmul.f32 100.0, %v16423_v44  ;;  %4975 = vmatprep.mubr.f32.mxu1 %v4407_v37  ;;  %16427 = vst [vmem:[#allocation17_spill] sm:$0xff] %v11354_v1 }
 0x24a   : > { %vm3101_vm2 = vcmp.lt.f32.partialorder %v3100_v2, 0.0004427343  ;;  %v3144_v27 = vmul.f32 %v11216_v54, %v3143_v57  ;;  %vm11345_vm3 = vcmp.lt.f32.partialorder %v3145_v24, 0.0004427343  ;;  %v11350_v34 = vmul.f32 100.0, %v16426_v6  ;;  %v11360_v24 = vpop.f32.mrb[17].mxu1 }
 0x24b   : > { %v3102_v63 = vsel %vm3101_vm2, %v3099_v51, %v3096_v15  ;;  %v4281_v55 = vsel %vm4153_vm1, %v10711_v49, %v4025_v9  ;;  %v3160_v25 = vmul.f32 -0.5, %v11275_v31  ;;  %8590 = vlog2.f32 %v3175_v8  ;;  %16428 = vst [vmem:[#allocation12_spill] sm:$0xff] %v11360_v24  ;;  %v16438_v24 = vld [vmem:[#allocation16_spill] sm:$0xff] }
 0x24c   : > { %v4022_v4 = vmul.f32 0.01, %v3102_v63  ;;  %v3147_v7 = vsel %vm11345_vm3, %v3144_v27, %v3141_v42  ;;  %v3193_v54 = vadd.f32 1.0, %v11337_v16  ;;  %v3116_v2 = vadd.f32 1.0, %v3115_v30 }
 0x24d   : > { %v3130_v57 = vadd.f32 1.0, %v11325_v5  ;;  %8592 = vpow2.f32 %v2658_v20  ;;  %v2672_v21 = vmul.f32 1.442695, %v11342_v60  ;;  %v3118_v8 = vand.u32 2147483647, %v11284_v50 }
 0x24e   : > { %v4278_v9 = vsel %vm4150_vm15, %v10682_v46, %v4022_v4  ;;  %v8583_v37 = vpop.eup %8582  ;;  %v2662_v15 = vmul.f32 1.442695, %v11350_v34  ;;  %v4409_v42 = vsel %vm220_vm0, %v4281_v55, %v10711_v49  ;;  %vm4152_vm4 = vcmp.gt.f32.partialorder %v11185_v48, 20.0  ;;  %v16429_v55 = vld [vmem:[#allocation19_spill] sm:$0xff] }
 0x24f   : > { %4976 = vmatmul.mubr.f32.gmra.mrb[92].mxu1 %v4278_v9  ;;  %8594 = vlog2.f32 %v3130_v57  ;;  %v4027_v30 = vmul.f32 0.01, %v3147_v7  ;;  %vm4155_vm5 = vcmp.gt.f32.partialorder %v11127_v23, 20.0  ;;  %v3163_v13 = vand.u32 2147483647, %v11275_v31 }
 0x250   : > { %v8585_v51 = vpop.eup %8584  ;;  %4981 = vmatprep.mubr.f32.mxu1 %v4409_v42  ;;  %v3161_v20 = vadd.f32 1.0, %v3160_v25  ;;  %8596 = vlog2.f32 %v3193_v54  ;;  %v3117_v18 = vmul.f32 %v11284_v50, %v3116_v2  ;;  %v3178_v49 = vmul.f32 -0.5, %v11313_v10  ;;  %v16430_v54 = vld [vmem:[#allocation14_spill] sm:$0xff] }
 0x251   : > { %v11374_v46 = vpop.eup %8586  ;;  %v3114_v27 = vmul.f32 0.6931472, %v8585_v51  ;;  %8598 = vpow2.f32 %v2672_v21  ;;  %v11381_v4 = vmul.f32 100.0, %v16429_v55  ;;  %vm3119_vm6 = vcmp.lt.f32.partialorder %v3118_v8, 0.0004427343  ;;  %v11391_v21 = vpop.f32.mrb[18].mxu1 }
 0x252   : > { %v11377_v63 = vpop.eup %8588  ;;  %v3159_v7 = vmul.f32 0.6931472, %v8583_v37  ;;  %8600 = vpow2.f32 %v2662_v15  ;;  %v3133_v9 = vmul.f32 -0.5, %v11325_v5  ;;  %v4283_v25 = vsel %vm4155_vm5, %v10723_v32, %v4027_v30  ;;  %16431 = vst [vmem:[#allocation19_spill] sm:$0xff] %v11391_v21  ;;  %v11400_v23 = vpop.f32.mrb[19].mxu1 }
 0x253   : > { %v3120_v57 = vsel %vm3119_vm6, %v3117_v18, %v3114_v27  ;;  %v11388_v50 = vmul.f32 100.0, %v16430_v54  ;;  %v3148_v42 = vadd.f32 1.0, %v11374_v46  ;;  %v3162_v51 = vmul.f32 %v11275_v31, %v3161_v20  ;;  %16434 = vst [vmem:[#allocation14_spill] sm:$0xff] %v11400_v23 }
 0x254   : > { %v4024_v2 = vmul.f32 0.01, %v3120_v57  ;;  %vm11394_vm7 = vcmp.lt.f32.partialorder %v3163_v13, 0.0004427343  ;;  %v3181_v37 = vand.u32 2147483647, %v11313_v10  ;;  %v4411_v20 = vsel %vm220_vm0, %v4283_v25, %v10723_v32 }
 0x255   : > { %v3211_v15 = vadd.f32 1.0, %v11377_v63  ;;  %v8591_v30 = vpop.eup %8590  ;;  %v3179_v27 = vadd.f32 1.0, %v3178_v49  ;;  %v2676_v18 = vmul.f32 1.442695, %v11381_v4  ;;  %8602 = vlog2.f32 %v3148_v42  ;;  %v16437_v42 = vld [vmem:[#allocation21_spill] sm:$0xff] }
 0x256   : > { %v4280_v57 = vsel %vm4152_vm4, %v10702_v11, %v4024_v2  ;;  %v3165_v31 = vsel %vm11394_vm7, %v3162_v51, %v3159_v7  ;;  %v3196_v13 = vmul.f32 -0.5, %v11337_v16  ;;  %v3134_v21 = vadd.f32 1.0, %v3133_v9 }
 0x257   : > { %4982 = vmatmul.mubr.f32.gmra.mrb[94].mxu1 %v4280_v57  ;;  %v11412_v1 = vpop.eup %8592  ;;  %vm4154_vm8 = vcmp.gt.f32.partialorder %v11223_v17, 20.0  ;;  %vm4157_vm9 = vcmp.gt.f32.partialorder %v11188_v53, 20.0  ;;  %v2666_v11 = vmul.f32 1.442695, %v11388_v50  ;;  %v3136_v48 = vand.u32 2147483647, %v11325_v5 }
 0x258   : > { %4987 = vmatprep.mubr.f32.mxu1 %v4411_v20  ;;  %v3177_v7 = vmul.f32 0.6931472, %v8591_v30  ;;  %vm11418_vm10 = vcmp.lt.f32.partialorder %v3181_v37, 0.0004427343  ;;  %8604 = vlog2.f32 %v3211_v15  ;;  %v3151_v32 = vmul.f32 -0.5, %v11374_v46 }
 0x259   : > { %v8595_v49 = vpop.eup %8594  ;;  %v4029_v9 = vmul.f32 0.01, %v3165_v31  ;;  %v3180_v25 = vmul.f32 %v11313_v10, %v3179_v27  ;;  %8606 = vpow2.f32 %v2676_v18  ;;  %v11425_v51 = vmul.f32 100.0, %v16437_v42  ;;  %v11435_v10 = vpop.f32.mrb[20].mxu1 }
 0x25a   : > { %v8597_v8 = vpop.eup %8596  ;;  %v3197_v57 = vadd.f32 1.0, %v3196_v13  ;;  %v3132_v20 = vmul.f32 0.6931472, %v8595_v49  ;;  %v3135_v23 = vmul.f32 %v11325_v5, %v3134_v21  ;;  %v3166_v37 = vadd.f32 1.0, %v11412_v1  ;;  %16439 = vst [vmem:[#allocation21_spill] sm:$0xff] %v11435_v10  ;;  %v11442_v31 = vpop.f32.mrb[21].mxu1 }
 0x25b   : > { %v11429_v30 = vpop.eup %8598  ;;  %v3199_v15 = vand.u32 2147483647, %v11337_v16  ;;  %v11433_v41 = vmul.f32 100.0, %v16438_v24  ;;  %vm3137_vm11 = vcmp.lt.f32.partialorder %v3136_v48, 0.0004427343  ;;  %vm4156_vm12 = vcmp.gt.f32.partialorder %v11271_v58, 20.0 }
 0x25c   : > { %v11437_v27 = vpop.eup %8600  ;;  %v3183_v18 = vsel %vm11418_vm10, %v3180_v25, %v3177_v7  ;;  %v3138_v5 = vsel %vm3137_vm11, %v3135_v23, %v3132_v20  ;;  %v3152_v21 = vadd.f32 1.0, %v3151_v32  ;;  %8608 = vlog2.f32 %v3166_v37  ;;  %v11469_v37 = vpop.f32.mrb[22].mxu1 }
 0x25d   : > { %v4285_v13 = vsel %vm4157_vm9, %v10741_v26, %v4029_v9  ;;  %v2680_v48 = vmul.f32 1.442695, %v11425_v51  ;;  %v4026_v49 = vmul.f32 0.01, %v3138_v5  ;;  %v3154_v10 = vand.u32 2147483647, %v11374_v46 }
 0x25e   : > { %v3195_v29 = vmul.f32 0.6931472, %v8597_v8  ;;  %v3198_v38 = vmul.f32 %v11337_v16, %v3197_v57  ;;  %8610 = vpow2.f32 %v2666_v11  ;;  %v3229_v7 = vadd.f32 1.0, %v11429_v30  ;;  %16442 = vst [vmem:[#allocation16_spill] sm:$0xff] %v11469_v37 }
 0x25f   : > { %v8603_v23 = vpop.eup %8602  ;;  %v4031_v2 = vmul.f32 0.01, %v3183_v18  ;;  %v4282_v32 = vsel %vm4154_vm8, %v10719_v56, %v4026_v49  ;;  %v3169_v53 = vmul.f32 -0.5, %v11412_v1  ;;  %v3184_v9 = vadd.f32 1.0, %v11437_v27  ;;  %v16444_v49 = vld [vmem:[#allocation23_spill] sm:$0xff] }
 0x260   : > { %v3214_v25 = vmul.f32 -0.5, %v11377_v63  ;;  %4988 = vmatmul.mubr.f32.gmra.mrb[96].mxu1 %v4282_v32  ;;  %v4413_v16 = vsel %vm220_vm0, %v4285_v13, %v10741_v26  ;;  %v3150_v11 = vmul.f32 0.6931472, %v8603_v23  ;;  %v3153_v8 = vmul.f32 %v11374_v46, %v3152_v21  ;;  %v11474_v21 = vpop.f32.mrb[23].mxu1 }
 0x261   : > { %vm11461_vm13 = vcmp.lt.f32.partialorder %v3199_v15, 0.0004427343  ;;  %v2670_v56 = vmul.f32 1.442695, %v11433_v41  ;;  %8612 = vpow2.f32 %v2680_v48  ;;  %4993 = vmatprep.mubr.f32.mxu1 %v4413_v16  ;;  %vm3155_vm14 = vcmp.lt.f32.partialorder %v3154_v10, 0.0004427343 }
 0x262   : > { %v8605_v17 = vpop.eup %8604  ;;  %vm4159_vm15 = vcmp.gt.f32.partialorder %v11220_v40, 20.0  ;;  %v3201_v20 = vsel %vm11461_vm13, %v3198_v38, %v3195_v29  ;;  %8614 = vlog2.f32 %v3229_v7  ;;  %v3156_v26 = vsel %vm3155_vm14, %v3153_v8, %v3150_v11  ;;  %v16443_v40 = vld [vmem:[#allocation18_spill] sm:$0xff] }
 0x263   : > { %v11471_v46 = vpop.eup %8606  ;;  %v4287_v15 = vsel %vm4159_vm15, %v10755_v45, %v4031_v2  ;;  %v4028_v18 = vmul.f32 0.01, %v3156_v26  ;;  %v3170_v5 = vadd.f32 1.0, %v3169_v53  ;;  %8616 = vlog2.f32 %v3184_v9 }
 0x264   : > { %v3215_v10 = vadd.f32 1.0, %v3214_v25  ;;  %v3217_v13 = vand.u32 2147483647, %v11377_v63  ;;  %v11478_v48 = vmul.f32 100.0, %v16443_v40  ;;  %v3172_v29 = vand.u32 2147483647, %v11412_v1 }
 0x265   : > { %v4033_v38 = vmul.f32 0.01, %v3201_v20  ;;  %8618 = vpow2.f32 %v2670_v56  ;;  %v11482_v7 = vmul.f32 100.0, %v16444_v49  ;;  %v4284_v23 = vsel %vm4156_vm12, %v16415_v28, %v4028_v18 }
 0x266   : > { %v8609_v2 = vpop.eup %8608  ;;  %v3213_v32 = vmul.f32 0.6931472, %v8605_v17  ;;  %v3247_v53 = vadd.f32 1.0, %v11471_v46  ;;  %4994 = vmatmul.mubr.f32.gmra.mrb[98].mxu1 %v4284_v23  ;;  %v4415_v9 = vsel %vm220_vm0, %v4287_v15, %v10755_v45  ;;  %v3187_v25 = vmul.f32 -0.5, %v11437_v27 }
 0x267   : > { %vm4161_vm1 = vcmp.gt.f32.partialorder %v11247_v35, 20.0  ;;  %4999 = vmatprep.mubr.f32.mxu1 %v4415_v9  ;;  %v3168_v16 = vmul.f32 0.6931472, %v8609_v2  ;;  %v3171_v11 = vmul.f32 %v11412_v1, %v3170_v5  ;;  %v3216_v28 = vmul.f32 %v11377_v63, %v3215_v10  ;;  %v11512_v5 = vpop.f32.mrb[24].mxu1 }
 0x268   : > { %v11494_v8 = vpop.eup %8610  ;;  %vm11497_vm2 = vcmp.lt.f32.partialorder %v3217_v13, 0.0004427343  ;;  %v2674_v57 = vmul.f32 1.442695, %v11478_v48  ;;  %vm3173_vm3 = vcmp.lt.f32.partialorder %v3172_v29, 0.0004427343  ;;  %v4289_v45 = vsel %vm4161_vm1, %v16411_v3, %v4033_v38 }
 0x269   : > { %v3232_v56 = vmul.f32 -0.5, %v11429_v30  ;;  %v2684_v35 = vmul.f32 1.442695, %v11482_v7  ;;  %v3174_v17 = vsel %vm3173_vm3, %v3171_v11, %v3168_v16  ;;  %v3219_v1 = vsel %vm11497_vm2, %v3216_v28, %v3213_v32  ;;  %16447 = vst [vmem:[#allocation18_spill] sm:$0xff] %v11512_v5  ;;  %v16448_v13 = vld [vmem:[#allocation25_spill] sm:$0xff]  ;;  %v11518_v23 = vpop.f32.mrb[25].mxu1 }
 0x26a   : > { %8620 = vlog2.f32 %v3247_v53  ;;  %v4030_v20 = vmul.f32 0.01, %v3174_v17  ;;  %v3188_v63 = vadd.f32 1.0, %v3187_v25  ;;  %vm4158_vm4 = vcmp.gt.f32.partialorder %v11317_v61, 20.0  ;;  %v16449_v28 = vld [vmem:[#allocation20_spill] sm:$0xff] }
 0x26b   : > { %v11507_v26 = vpop.eup %8612  ;;  %v3190_v15 = vand.u32 2147483647, %v11437_v27  ;;  %v3202_v18 = vadd.f32 1.0, %v11494_v8  ;;  %8622 = vpow2.f32 %v2674_v57  ;;  %v11515_v29 = vmul.f32 100.0, %v16448_v13 }
 0x26c   : > { %v8615_v10 = vpop.eup %8614  ;;  %v4286_v38 = vsel %vm4158_vm4, %v16421_v12, %v4030_v20  ;;  %v4035_v32 = vmul.f32 0.01, %v3219_v1  ;;  %v3233_v53 = vadd.f32 1.0, %v3232_v56  ;;  %8624 = vpow2.f32 %v2684_v35 }
 0x26d   : > { %v8617_v2 = vpop.eup %8616  ;;  %5000 = vmatmul.mubr.f32.gmra.mrb[100].mxu1 %v4286_v38  ;;  %v4417_v61 = vsel %vm220_vm0, %v4289_v45, %v16411_v3  ;;  %v3265_v9 = vadd.f32 1.0, %v11507_v26  ;;  %v3189_v16 = vmul.f32 %v11437_v27, %v3188_v63  ;;  %8626 = vlog2.f32 %v3202_v18  ;;  %v16450_v27 = vld [vmem:[#allocation27_spill] sm:$0xff] }
 0x26e   : > { %5005 = vmatprep.mubr.f32.mxu1 %v4417_v61  ;;  %v3186_v25 = vmul.f32 0.6931472, %v8617_v2  ;;  %v3235_v12 = vand.u32 2147483647, %v11429_v30  ;;  %v11529_v58 = vmul.f32 100.0, %v16449_v28  ;;  %v3250_v56 = vmul.f32 -0.5, %v11471_v46 }
 0x26f   : > { %v11525_v11 = vpop.eup %8618  ;;  %vm3191_vm5 = vcmp.lt.f32.partialorder %v3190_v15, 0.0004427343  ;;  %v3231_v57 = vmul.f32 0.6931472, %v8615_v10  ;;  %v2688_v3 = vmul.f32 1.442695, %v11515_v29  ;;  %v3234_v20 = vmul.f32 %v11429_v30, %v3233_v53 }
 0x270   : > { %v3192_v45 = vsel %vm3191_vm5, %v3189_v16, %v3186_v25  ;;  %vm4160_vm6 = vcmp.gt.f32.partialorder %v11350_v34, 20.0  ;;  %vm4163_vm7 = vcmp.gt.f32.partialorder %v11287_v19, 20.0  ;;  %v11536_v35 = vmul.f32 100.0, %v16450_v27  ;;  %v11547_v19 = vpop.f32.mrb[26].mxu1 }
 0x271   : > { %v3205_v17 = vmul.f32 -0.5, %v11494_v8  ;;  %v4291_v1 = vsel %vm4163_vm7, %v16417_v62, %v4035_v32  ;;  %8628 = vlog2.f32 %v3265_v9  ;;  %v4032_v63 = vmul.f32 0.01, %v3192_v45  ;;  %16453 = vst [vmem:[#allocation23_spill] sm:$0xff] %v11547_v19  ;;  %v11554_v32 = vpop.f32.mrb[27].mxu1 }
 0x272   : > { %vm11541_vm8 = vcmp.lt.f32.partialorder %v3235_v12, 0.0004427343  ;;  %v2678_v18 = vmul.f32 1.442695, %v11529_v58  ;;  %v3220_v10 = vadd.f32 1.0, %v11525_v11  ;;  %v3251_v61 = vadd.f32 1.0, %v3250_v56 }
 0x273   : > { %v3237_v2 = vsel %vm11541_vm8, %v3234_v20, %v3231_v57  ;;  %8630 = vpow2.f32 %v2688_v3  ;;  %v4288_v30 = vsel %vm4160_vm6, %v16426_v6, %v4032_v63  ;;  %16454 = vst [vmem:[#allocation25_spill] sm:$0xff] %v11554_v32  ;;  %v2692_v53 = vmul.f32 1.442695, %v11536_v35  ;;  %v16455_v3 = vld [vmem:[#allocation22_spill] sm:$0xff] }
 0x274   : > { %v8621_v38 = vpop.eup %8620  ;;  %5006 = vmatmul.mubr.f32.gmra.mrb[102].mxu1 %v4288_v30  ;;  %v4419_v9 = vsel %vm220_vm0, %v4291_v1, %v16417_v62  ;;  %v3206_v25 = vadd.f32 1.0, %v3205_v17  ;;  %8632 = vlog2.f32 %v3220_v10  ;;  %v3253_v12 = vand.u32 2147483647, %v11471_v46  ;;  %v11584_v30 = vpop.f32.mrb[28].mxu1 }
 0x275   : > { %v11560_v16 = vpop.eup %8622  ;;  %5011 = vmatprep.mubr.f32.mxu1 %v4419_v9  ;;  %v3208_v57 = vand.u32 2147483647, %v11494_v8  ;;  %v4037_v6 = vmul.f32 0.01, %v3237_v2  ;;  %v3249_v56 = vmul.f32 0.6931472, %v8621_v38  ;;  %8634 = vpow2.f32 %v2678_v18 }
 0x276   : > { %v11564_v34 = vpop.eup %8624  ;;  %v11567_v45 = vmul.f32 100.0, %v16455_v3  ;;  %vm4165_vm9 = vcmp.gt.f32.partialorder %v11342_v60, 20.0  ;;  %v3252_v62 = vmul.f32 %v11471_v46, %v3251_v61  ;;  %v3223_v17 = vmul.f32 -0.5, %v11525_v11  ;;  %16458 = vst [vmem:[#allocation20_spill] sm:$0xff] %v11584_v30 }
 0x277   : > { %v8627_v20 = vpop.eup %8626  ;;  %v3268_v1 = vmul.f32 -0.5, %v11507_v26  ;;  %8636 = vpow2.f32 %v2692_v53  ;;  %v3207_v15 = vmul.f32 %v11494_v8, %v3206_v25  ;;  %vm11574_vm10 = vcmp.lt.f32.partialorder %v3253_v12, 0.0004427343  ;;  %v16459_v53 = vld [vmem:[#allocation29_spill] sm:$0xff] }
 0x278   : > { %v3204_v63 = vmul.f32 0.6931472, %v8627_v20  ;;  %v3283_v18 = vadd.f32 1.0, %v11564_v34  ;;  %vm3209_vm11 = vcmp.lt.f32.partialorder %v3208_v57, 0.0004427343  ;;  %v3238_v38 = vadd.f32 1.0, %v11560_v16 }
 0x279   : > { %v4293_v60 = vsel %vm4165_vm9, %v16423_v44, %v4037_v6  ;;  %v3255_v46 = vsel %vm11574_vm10, %v3252_v62, %v3249_v56  ;;  %v2682_v2 = vmul.f32 1.442695, %v11567_v45  ;;  %v11587_v9 = vmul.f32 100.0, %v16459_v53  ;;  %v16460_v20 = vld [vmem:[#allocation24_spill] sm:$0xff]  ;;  %v11594_v62 = vpop.f32.mrb[29].mxu1 }
 0x27a   : > { %v3210_v61 = vsel %vm3209_vm11, %v3207_v15, %v3204_v63  ;;  %v3224_v12 = vadd.f32 1.0, %v3223_v17  ;;  %8638 = vlog2.f32 %v3238_v38  ;;  %vm4162_vm12 = vcmp.gt.f32.partialorder %v11388_v50, 20.0  ;;  %16461 = vst [vmem:[#allocation27_spill] sm:$0xff] %v11594_v62 }
 0x27b   : > { %v8629_v8 = vpop.eup %8628  ;;  %v4034_v25 = vmul.f32 0.01, %v3210_v61  ;;  %v3269_v57 = vadd.f32 1.0, %v3268_v1  ;;  %v11591_v6 = vmul.f32 100.0, %v16460_v20  ;;  %v3226_v56 = vand.u32 2147483647, %v11525_v11 }
 0x27c   : > { %v4039_v15 = vmul.f32 0.01, %v3255_v46  ;;  %v3271_v10 = vand.u32 2147483647, %v11507_v26  ;;  %8640 = vlog2.f32 %v3283_v18  ;;  %v3267_v38 = vmul.f32 0.6931472, %v8629_v8 }
 0x27d   : > { %v11596_v63 = vpop.eup %8630  ;;  %v4290_v61 = vsel %vm4162_vm12, %v16430_v54, %v4034_v25  ;;  %v4421_v50 = vsel %vm220_vm0, %v4293_v60, %v16423_v44  ;;  %v3241_v1 = vmul.f32 -0.5, %v11560_v16  ;;  %vm4167_vm13 = vcmp.gt.f32.partialorder %v11381_v4, 20.0 }
 0x27e   : > { %v8633_v17 = vpop.eup %8632  ;;  %5012 = vmatmul.mubr.f32.gmra.mrb[104].mxu1 %v4290_v61  ;;  %v2696_v30 = vmul.f32 1.442695, %v11587_v9  ;;  %v3225_v19 = vmul.f32 %v11525_v11, %v3224_v12  ;;  %v3270_v54 = vmul.f32 %v11507_v26, %v3269_v57  ;;  %8642 = vpow2.f32 %v2682_v2  ;;  %v11617_v61 = vpop.f32.mrb[30].mxu1  ;;  %v16465_v2 = vld [vmem:[#allocation31_spill] sm:$0xff] }
 0x27f   : > { %5017 = vmatprep.mubr.f32.mxu1 %v4421_v50  ;;  %v3222_v46 = vmul.f32 0.6931472, %v8633_v17  ;;  %v11607_v18 = vpop.eup %8634  ;;  %v2686_v8 = vmul.f32 1.442695, %v11591_v6  ;;  %vm3227_vm14 = vcmp.lt.f32.partialorder %v3226_v56, 0.0004427343  ;;  %v4295_v44 = vsel %vm4167_vm13, %v16429_v55, %v4039_v15 }
 0x280   : > { %vm11612_vm15 = vcmp.lt.f32.partialorder %v3271_v10, 0.0004427343  ;;  %v3301_v4 = vadd.f32 1.0, %v11596_v63  ;;  %16464 = vst [vmem:[#allocation22_spill] sm:$0xff] %v11617_v61  ;;  %v11624_v12 = vmul.f32 100.0, %v16465_v2  ;;  %v3242_v56 = vadd.f32 1.0, %v3241_v1 }
 0x281   : > { %v3228_v25 = vsel %vm3227_vm14, %v3225_v19, %v3222_v46  ;;  %v11619_v11 = vpop.eup %8636  ;;  %v3273_v26 = vsel %vm11612_vm15, %v3270_v54, %v3267_v38  ;;  %vm4164_vm1 = vcmp.gt.f32.partialorder %v11433_v41, 20.0  ;;  %8644 = vpow2.f32 %v2696_v30  ;;  %v11629_v19 = vpop.f32.mrb[31].mxu1  ;;  %v16467_v50 = vld [vmem:[#allocation26_spill] sm:$0xff] }
 0x282   : > { %v4036_v57 = vmul.f32 0.01, %v3228_v25  ;;  %v3244_v15 = vand.u32 2147483647, %v11560_v16  ;;  %v3256_v10 = vadd.f32 1.0, %v11607_v18  ;;  %16466 = vst [vmem:[#allocation29_spill] sm:$0xff] %v11629_v19  ;;  %8646 = vpow2.f32 %v2686_v8 }
 0x283   : > { %v3286_v17 = vmul.f32 -0.5, %v11564_v34  ;;  %v11633_v46 = vmul.f32 100.0, %v16467_v50  ;;  %v4041_v60 = vmul.f32 0.01, %v3273_v26  ;;  %8648 = vlog2.f32 %v3301_v4 }
 0x284   : > { %v4292_v38 = vsel %vm4164_vm1, %v16438_v24, %v4036_v57  ;;  %v8639_v54 = vpop.eup %8638  ;;  %v3319_v41 = vadd.f32 1.0, %v11619_v11  ;;  %v4423_v30 = vsel %vm220_vm0, %v4295_v44, %v16429_v55  ;;  %v2700_v1 = vmul.f32 1.442695, %v11624_v12 }
 0x285   : > { %5018 = vmatmul.mubr.f32.gmra.mrb[106].mxu1 %v4292_v38  ;;  %v3240_v25 = vmul.f32 0.6931472, %v8639_v54  ;;  %v3243_v8 = vmul.f32 %v11560_v16, %v3242_v56  ;;  %v3289_v19 = vand.u32 2147483647, %v11564_v34  ;;  %vm3245_vm2 = vcmp.lt.f32.partialorder %v3244_v15, 0.0004427343 }
 0x286   : > { %5023 = vmatprep.mubr.f32.mxu1 %v4423_v30  ;;  %v8641_v61 = vpop.eup %8640  ;;  %8650 = vlog2.f32 %v3256_v10  ;;  %vm4169_vm3 = vcmp.gt.f32.partialorder %v11425_v51, 20.0  ;;  %v3287_v24 = vadd.f32 1.0, %v3286_v17  ;;  %v2690_v4 = vmul.f32 1.442695, %v11633_v46  ;;  %v11658_v10 = vpop.f32.mrb[32].mxu1 }
 0x287   : > { %v3246_v26 = vsel %vm3245_vm2, %v3243_v8, %v3240_v25  ;;  %v4297_v57 = vsel %vm4169_vm3, %v16437_v42, %v4041_v60  ;;  %8652 = vlog2.f32 %v3319_v41  ;;  %v11647_v55 = vmul.f32 100.0, %v10979_v33  ;;  %16470 = vst [vmem:[#allocation24_spill] sm:$0xff] %v11658_v10  ;;  %v16471_v60 = vld [vmem:[#allocation28_spill] sm:$0xff] }
 0x288   : > { %v4038_v44 = vmul.f32 0.01, %v3246_v26  ;;  %v11649_v38 = vpop.eup %8642  ;;  %vm4166_vm4 = vcmp.gt.f32.partialorder %v11478_v48, 20.0  ;;  %v3285_v16 = vmul.f32 0.6931472, %v8641_v61  ;;  %8654 = vpow2.f32 %v2700_v1  ;;  %v11668_v61 = vpop.f32.mrb[33].mxu1 }
 0x289   : > { %v3259_v56 = vmul.f32 -0.5, %v11607_v18  ;;  %vm11653_vm5 = vcmp.lt.f32.partialorder %v3289_v19, 0.0004427343  ;;  %v3288_v17 = vmul.f32 %v11564_v34, %v3287_v24  ;;  %v3304_v54 = vmul.f32 -0.5, %v11596_v63  ;;  %16472 = vst [vmem:[#allocation31_spill] sm:$0xff] %v11668_v61  ;;  %v11694_v61 = vpop.f32.mrb[34].mxu1 }
 0x28a   : > { %v4294_v15 = vsel %vm4166_vm4, %v16443_v40, %v4038_v44  ;;  %v11663_v41 = vmul.f32 100.0, %v16471_v60  ;;  %v4425_v48 = vsel %vm220_vm0, %v4297_v57, %v16437_v42  ;;  %v3307_v40 = vand.u32 2147483647, %v11596_v63  ;;  %16475 = vst [vmem:[#allocation26_spill] sm:$0xff] %v11694_v61 }
 0x28b   : > { %5024 = vmatmul.mubr.f32.gmra.mrb[108].mxu1 %v4294_v15  ;;  %v11670_v19 = vpop.eup %8644  ;;  %8656 = vpow2.f32 %v2690_v4  ;;  %v2704_v30 = vmul.f32 1.442695, %v11647_v55  ;;  %v3274_v34 = vadd.f32 1.0, %v11649_v38  ;;  %v3291_v25 = vsel %vm11653_vm5, %v3288_v17, %v3285_v16 }
 0x28c   : > { %5029 = vmatprep.mubr.f32.mxu1 %v4425_v48  ;;  %v11675_v1 = vpop.eup %8646  ;;  %v3260_v8 = vadd.f32 1.0, %v3259_v56  ;;  %vm4168_vm6 = vcmp.gt.f32.partialorder %v11529_v58, 20.0  ;;  %vm4171_vm7 = vcmp.gt.f32.partialorder %v11482_v7, 20.0  ;;  %v11682_v42 = vmul.f32 100.0, %v10993_v43 }
 0x28d   : > { %v8649_v24 = vpop.eup %8648  ;;  %v3262_v4 = vand.u32 2147483647, %v11607_v18  ;;  %v3305_v26 = vadd.f32 1.0, %v3304_v54  ;;  %v2694_v57 = vmul.f32 1.442695, %v11663_v41  ;;  %v3337_v44 = vadd.f32 1.0, %v11670_v19 }
 0x28e   : > { %8658 = vlog2.f32 %v3274_v34  ;;  %v4043_v51 = vmul.f32 0.01, %v3291_v25  ;;  %vm11687_vm8 = vcmp.lt.f32.partialorder %v3307_v40, 0.0004427343  ;;  %v3292_v56 = vadd.f32 1.0, %v11675_v1  ;;  %v11698_v25 = vpop.f32.mrb[35].mxu1 }
 0x28f   : > { %8660 = vpow2.f32 %v2704_v30  ;;  %v3303_v17 = vmul.f32 0.6931472, %v8649_v24  ;;  %v3322_v48 = vmul.f32 -0.5, %v11619_v11  ;;  %v3261_v54 = vmul.f32 %v11607_v18, %v3260_v8  ;;  %16476 = vst [vmem:[#allocation28_spill] sm:$0xff] %v11698_v25  ;;  %v16477_v24 = vld [vmem:[#allocation30_spill] sm:$0xff] }
 0x290   : > { %v8651_v15 = vpop.eup %8650  ;;  %v2708_v34 = vmul.f32 1.442695, %v11682_v42  ;;  %vm3263_vm9 = vcmp.lt.f32.partialorder %v3262_v4, 0.0004427343  ;;  %v3277_v40 = vmul.f32 -0.5, %v11649_v38  ;;  %v3306_v30 = vmul.f32 %v11596_v63, %v3305_v26 }
 0x291   : > { %v3258_v10 = vmul.f32 0.6931472, %v8651_v15  ;;  %v8653_v62 = vpop.eup %8652  ;;  %8662 = vlog2.f32 %v3337_v44  ;;  %v11704_v37 = vmul.f32 100.0, %v16477_v24  ;;  %v4299_v18 = vsel %vm4171_vm7, %v16444_v49, %v4043_v51 }
 0x292   : > { %v11700_v5 = vpop.eup %8654  ;;  %v3325_v8 = vand.u32 2147483647, %v11619_v11  ;;  %8664 = vlog2.f32 %v3292_v56  ;;  %v3309_v61 = vsel %vm11687_vm8, %v3306_v30, %v3303_v17  ;;  %v3321_v25 = vmul.f32 0.6931472, %v8653_v62 }
 0x293   : > { %v3264_v15 = vsel %vm3263_vm9, %v3261_v54, %v3258_v10  ;;  %v3323_v32 = vadd.f32 1.0, %v3322_v48  ;;  %8666 = vpow2.f32 %v2694_v57  ;;  %v3355_v26 = vadd.f32 1.0, %v11700_v5 }
 0x294   : > { %v4040_v4 = vmul.f32 0.01, %v3264_v15  ;;  %8668 = vpow2.f32 %v2708_v34  ;;  %v3278_v10 = vadd.f32 1.0, %v3277_v40  ;;  %v11719_v44 = vmul.f32 100.0, %v11026_v47 }
 0x295   : > { %v11712_v63 = vpop.eup %8656  ;;  %v4427_v62 = vsel %vm220_vm0, %v4299_v18, %v16444_v49  ;;  %v3280_v57 = vand.u32 2147483647, %v11649_v38  ;;  %v3295_v51 = vmul.f32 -0.5, %v11675_v1  ;;  %vm4170_vm10 = vcmp.gt.f32.partialorder %v11567_v45, 20.0  ;;  %v16480_v49 = vld [vmem:[#allocation32_spill] sm:$0xff]  ;;  %v11742_v18 = vpop.f32.mrb[36].mxu1 }
 0x296   : > { %v4296_v7 = vsel %vm4168_vm6, %v16449_v28, %v4040_v4  ;;  %vm4173_vm11 = vcmp.gt.f32.partialorder %v11515_v29, 20.0  ;;  %vm11728_vm12 = vcmp.lt.f32.partialorder %v3325_v8, 0.0004427343  ;;  %v2698_v28 = vmul.f32 1.442695, %v11704_v37  ;;  %16481 = vst [vmem:[#allocation30_spill] sm:$0xff] %v11742_v18 }
 0x297   : > { %5030 = vmatmul.mubr.f32.gmra.mrb[110].mxu1 %v4296_v7  ;;  %v4045_v56 = vmul.f32 0.01, %v3309_v61  ;;  %v3324_v17 = vmul.f32 %v11619_v11, %v3323_v32  ;;  %v11735_v48 = vmul.f32 100.0, %v16480_v49  ;;  %v3310_v54 = vadd.f32 1.0, %v11712_v63  ;;  %v11747_v8 = vpop.f32.mrb[37].mxu1 }
 0x298   : > { %5035 = vmatprep.mubr.f32.mxu1 %v4427_v62  ;;  %v8659_v16 = vpop.eup %8658  ;;  %v3340_v40 = vmul.f32 -0.5, %v11670_v19  ;;  %8670 = vlog2.f32 %v3355_v26  ;;  %v3279_v15 = vmul.f32 %v11649_v38, %v3278_v10  ;;  %v2712_v32 = vmul.f32 1.442695, %v11719_v44  ;;  %v11774_v45 = vpop.f32.mrb[38].mxu1 }
 0x299   : > { %v11738_v34 = vpop.eup %8660  ;;  %v3276_v30 = vmul.f32 0.6931472, %v8659_v16  ;;  %v3327_v61 = vsel %vm11728_vm12, %v3324_v17, %v3321_v25  ;;  %vm3281_vm13 = vcmp.lt.f32.partialorder %v3280_v57, 0.0004427343  ;;  %v3296_v11 = vadd.f32 1.0, %v3295_v51  ;;  %16482 = vst [vmem:[#allocation32_spill] sm:$0xff] %v11774_v45 }
 0x29a   : > { %vm4172_vm14 = vcmp.gt.f32.partialorder %v11591_v6, 20.0  ;;  %v3343_v4 = vand.u32 2147483647, %v11670_v19  ;;  %8672 = vpow2.f32 %v2698_v28  ;;  %v3298_v7 = vand.u32 2147483647, %v11675_v1 }
 0x29b   : > { %v3282_v26 = vsel %vm3281_vm13, %v3279_v15, %v3276_v30  ;;  %v8663_v38 = vpop.eup %8662  ;;  %v4301_v10 = vsel %vm4173_vm11, %v16448_v13, %v4045_v56  ;;  %v3373_v25 = vadd.f32 1.0, %v11738_v34  ;;  %8674 = vlog2.f32 %v3310_v54 }
 0x29c   : > { %v4042_v62 = vmul.f32 0.01, %v3282_v26  ;;  %v8665_v57 = vpop.eup %8664  ;;  %v4047_v51 = vmul.f32 0.01, %v3327_v61  ;;  %v3341_v58 = vadd.f32 1.0, %v3340_v40  ;;  %v11758_v17 = vmul.f32 100.0, %v11001_v22 }
 0x29d   : > { %v2702_v16 = vmul.f32 1.442695, %v11735_v48  ;;  %v11760_v28 = vpop.eup %8666  ;;  %8676 = vpow2.f32 %v2712_v32  ;;  %v3294_v56 = vmul.f32 0.6931472, %v8665_v57  ;;  %v3297_v30 = vmul.f32 %v11675_v1, %v3296_v11 }
 0x29e   : > { %v4298_v29 = vsel %vm4170_vm10, %v16455_v3, %v4042_v62  ;;  %v11766_v15 = vpop.eup %8668  ;;  %v3339_v54 = vmul.f32 0.6931472, %v8663_v38  ;;  %v4429_v40 = vsel %vm220_vm0, %v4301_v10, %v16448_v13  ;;  %vm3299_vm15 = vcmp.lt.f32.partialorder %v3298_v7, 0.0004427343  ;;  %v16485_v13 = vld [vmem:[#allocation6_spill] sm:$0xff]  ;;  %v11784_v7 = vpop.f32.mrb[39].mxu1 }
 0x29f   : > { %5036 = vmatmul.mubr.f32.gmra.mrb[112].mxu1 %v4298_v29  ;;  %v3313_v61 = vmul.f32 -0.5, %v11712_v63  ;;  %vm4175_vm1 = vcmp.gt.f32.partialorder %v11536_v35, 20.0  ;;  %v3358_v32 = vmul.f32 -0.5, %v11700_v5  ;;  %8678 = vlog2.f32 %v3373_v25 }
 0x2a0   : > { %5041 = vmatprep.mubr.f32.mxu1 %v4429_v40  ;;  %v3300_v3 = vsel %vm3299_vm15, %v3297_v30, %v3294_v56  ;;  %v3342_v1 = vmul.f32 %v11670_v19, %v3341_v58  ;;  %vm11777_vm2 = vcmp.lt.f32.partialorder %v3343_v4, 0.0004427343  ;;  %8680 = vpow2.f32 %v2702_v16 }
 0x2a1   : > { %v11782_v26 = vmul.f32 100.0, %v16485_v13  ;;  %v4303_v35 = vsel %vm4175_vm1, %v16450_v27, %v4047_v51  ;;  %v2716_v38 = vmul.f32 1.442695, %v11758_v17  ;;  %v4044_v10 = vmul.f32 0.01, %v3300_v3 }
 0x2a2   : > { %v3328_v25 = vadd.f32 1.0, %v11760_v28  ;;  %v8671_v62 = vpop.eup %8670  ;;  %v3345_v19 = vsel %vm11777_vm2, %v3342_v1, %v3339_v54  ;;  %v3361_v4 = vand.u32 2147483647, %v11700_v5  ;;  %v3391_v57 = vadd.f32 1.0, %v11766_v15 }
 0x2a3   : > { %v3314_v58 = vadd.f32 1.0, %v3313_v61  ;;  %v3359_v16 = vadd.f32 1.0, %v3358_v32  ;;  %v4300_v29 = vsel %vm4172_vm14, %v16460_v20, %v4044_v10  ;;  %v3316_v51 = vand.u32 2147483647, %v11712_v63  ;;  %v11810_v10 = vpop.f32.mrb[40].mxu1 }
 0x2a4   : > { %8682 = vlog2.f32 %v3328_v25  ;;  %v11797_v56 = vpop.eup %8672  ;;  %vm4174_vm3 = vcmp.gt.f32.partialorder %v11633_v46, 20.0  ;;  %v3376_v30 = vmul.f32 -0.5, %v11738_v34  ;;  %v2706_v54 = vmul.f32 1.442695, %v11782_v26  ;;  %5042 = vmatmul.mubr.f32.gmra.mrb[114].mxu1 %v4300_v29  ;;  %16486 = vst [vmem:[#allocation6_spill] sm:$0xff] %v11810_v10 }
 0x2a5   : > { %v4431_v40 = vsel %vm220_vm0, %v4303_v35, %v16450_v27  ;;  %v8675_v61 = vpop.eup %8674  ;;  %v4049_v32 = vmul.f32 0.01, %v3345_v19  ;;  %v3357_v6 = vmul.f32 0.6931472, %v8671_v62  ;;  %8684 = vpow2.f32 %v2716_v38  ;;  %v11820_v38 = vpop.f32.mrb[41].mxu1 }
 0x2a6   : > { %v11806_v20 = vmul.f32 100.0, %v11066_v14  ;;  %5047 = vmatprep.mubr.f32.mxu1 %v4431_v40  ;;  %8686 = vlog2.f32 %v3391_v57  ;;  %v3312_v3 = vmul.f32 0.6931472, %v8675_v61  ;;  %v3315_v1 = vmul.f32 %v11712_v63, %v3314_v58  ;;  %16489 = vst [vmem:[#allocation37_spill] sm:$0xff] %v11820_v38  ;;  %v16490_v63 = vld [vmem:[#allocation7_spill] sm:$0xff] }
 0x2a7   : > { %v3331_v11 = vmul.f32 -0.5, %v11760_v28  ;;  %v11812_v25 = vpop.eup %8676  ;;  %vm4177_vm4 = vcmp.gt.f32.partialorder %v11587_v9, 20.0  ;;  %v3360_v27 = vmul.f32 %v11700_v5, %v3359_v16  ;;  %vm11816_vm5 = vcmp.lt.f32.partialorder %v3361_v4, 0.0004427343 }
 0x2a8   : > { %vm3317_vm6 = vcmp.lt.f32.partialorder %v3316_v51, 0.0004427343  ;;  %v3377_v62 = vadd.f32 1.0, %v3376_v30  ;;  %8688 = vpow2.f32 %v2706_v54  ;;  %v11823_v19 = vmul.f32 100.0, %v16490_v63 }
 0x2a9   : > { %v3318_v57 = vsel %vm3317_vm6, %v3315_v1, %v3312_v3  ;;  %v8679_v58 = vpop.eup %8678  ;;  %v4305_v29 = vsel %vm4177_vm4, %v16459_v53, %v4049_v32  ;;  %v2720_v9 = vmul.f32 1.442695, %v11806_v20  ;;  %v3346_v5 = vadd.f32 1.0, %v11797_v56 }
 0x2aa   : > { %v4046_v40 = vmul.f32 0.01, %v3318_v57  ;;  %v11828_v4 = vpop.eup %8680  ;;  %vm4176_vm7 = vcmp.gt.f32.partialorder %v11663_v41, 20.0  ;;  %v3363_v16 = vsel %vm11816_vm5, %v3360_v27, %v3357_v6  ;;  %vm4179_vm8 = vcmp.gt.f32.partialorder %v11624_v12, 20.0 }
 0x2ab   : > { %v3409_v51 = vadd.f32 1.0, %v11812_v25  ;;  %v3332_v30 = vadd.f32 1.0, %v3331_v11  ;;  %v3379_v54 = vand.u32 2147483647, %v11738_v34  ;;  %v3334_v32 = vand.u32 2147483647, %v11760_v28 }
 0x2ac   : > { %v4302_v61 = vsel %vm4174_vm3, %v16467_v50, %v4046_v40  ;;  %8690 = vlog2.f32 %v3346_v5  ;;  %v3375_v3 = vmul.f32 0.6931472, %v8679_v58  ;;  %v3378_v1 = vmul.f32 %v11738_v34, %v3377_v62 }
 0x2ad   : > { %v2710_v35 = vmul.f32 1.442695, %v11823_v19  ;;  %5048 = vmatmul.mubr.f32.gmra.mrb[116].mxu1 %v4302_v61  ;;  %v4433_v6 = vsel %vm220_vm0, %v4305_v29, %v16459_v53  ;;  %v4051_v27 = vmul.f32 0.01, %v3363_v16  ;;  %v3394_v57 = vmul.f32 -0.5, %v11766_v15  ;;  %v16493_v53 = vld [vmem:[#allocation33_spill] sm:$0xff] }
 0x2ae   : > { %v8683_v11 = vpop.eup %8682  ;;  %8692 = vpow2.f32 %v2720_v9  ;;  %5053 = vmatprep.mubr.f32.mxu1 %v4433_v6  ;;  %v3364_v50 = vadd.f32 1.0, %v11828_v4  ;;  %v3333_v58 = vmul.f32 %v11760_v28, %v3332_v30  ;;  %v3349_v34 = vmul.f32 -0.5, %v11797_v56  ;;  %v11858_v9 = vpop.f32.mrb[42].mxu1 }
 0x2af   : > { %8694 = vlog2.f32 %v3409_v51  ;;  %v3330_v46 = vmul.f32 0.6931472, %v8683_v11  ;;  %v11849_v62 = vpop.eup %8684  ;;  %vm11851_vm9 = vcmp.lt.f32.partialorder %v3379_v54, 0.0004427343  ;;  %v11856_v29 = vmul.f32 100.0, %v16493_v53  ;;  %16494 = vst [vmem:[#allocation7_spill] sm:$0xff] %v11858_v9 }
 0x2b0   : > { %vm3335_vm10 = vcmp.lt.f32.partialorder %v3334_v32, 0.0004427343  ;;  %v8687_v5 = vpop.eup %8686  ;;  %v3381_v16 = vsel %vm11851_vm9, %v3378_v1, %v3375_v3  ;;  %v3397_v28 = vand.u32 2147483647, %v11766_v15  ;;  %v16495_v51 = vld [vmem:[#allocation35_spill] sm:$0xff]  ;;  %v11866_v54 = vpop.f32.mrb[43].mxu1  ;;  %v4307_v6 = vsel %vm4179_vm8, %v16465_v2, %v4051_v27 }
 0x2b1   : > { %v11864_v30 = vmul.f32 100.0, %v16495_v51  ;;  %v3336_v61 = vsel %vm3335_vm10, %v3333_v58, %v3330_v46  ;;  %16496 = vst [vmem:[#allocation33_spill] sm:$0xff] %v11866_v54  ;;  %v3395_v11 = vadd.f32 1.0, %v3394_v57  ;;  %8696 = vlog2.f32 %v3364_v50 }
 0x2b2   : > { %v4048_v32 = vmul.f32 0.01, %v3336_v61  ;;  %v11871_v9 = vpop.eup %8688  ;;  %vm4178_vm11 = vcmp.gt.f32.partialorder %v11704_v37, 20.0  ;;  %vm4181_vm12 = vcmp.gt.f32.partialorder %v11647_v55, 20.0  ;;  %v3427_v3 = vadd.f32 1.0, %v11849_v62  ;;  %v16499_v61 = vld [vmem:[#allocation34_spill] sm:$0xff] }
 0x2b3   : > { %8698 = vpow2.f32 %v2710_v35  ;;  %v3350_v1 = vadd.f32 1.0, %v3349_v34  ;;  %v4053_v46 = vmul.f32 0.01, %v3381_v16  ;;  %v3393_v58 = vmul.f32 0.6931472, %v8687_v5 }
 0x2b4   : > { %v4304_v12 = vsel %vm4176_vm7, %v16471_v60, %v4048_v32  ;;  %v3352_v27 = vand.u32 2147483647, %v11797_v56  ;;  %v2714_v57 = vmul.f32 1.442695, %v11856_v29  ;;  %v2724_v50 = vmul.f32 1.442695, %v11864_v30 }
 0x2b5   : > { %5054 = vmatmul.mubr.f32.gmra.mrb[118].mxu1 %v4304_v12  ;;  %v4435_v40 = vsel %vm220_vm0, %v4307_v6, %v16465_v2  ;;  %v3367_v35 = vmul.f32 -0.5, %v11828_v4  ;;  %v3396_v5 = vmul.f32 %v11766_v15, %v3395_v11  ;;  %vm11887_vm13 = vcmp.lt.f32.partialorder %v3397_v28, 0.0004427343  ;;  %v11907_v11 = vpop.f32.mrb[44].mxu1 }
 0x2b6   : > { %v8691_v34 = vpop.eup %8690  ;;  %v3412_v60 = vmul.f32 -0.5, %v11812_v25  ;;  %5059 = vmatprep.mubr.f32.mxu1 %v4435_v40  ;;  %v3382_v41 = vadd.f32 1.0, %v11871_v9  ;;  %v11894_v32 = vmul.f32 100.0, %v16499_v61  ;;  %v11897_v12 = vmul.f32 100.0, %v11155_v0  ;;  %v11910_v18 = vpop.f32.mrb[45].mxu1 }
 0x2b7   : > { %v3348_v2 = vmul.f32 0.6931472, %v8691_v34  ;;  %v3351_v6 = vmul.f32 %v11797_v56, %v3350_v1  ;;  %v4309_v15 = vsel %vm4181_vm12, %v10979_v33, %v4053_v46  ;;  %v3399_v28 = vsel %vm11887_vm13, %v3396_v5, %v3393_v58  ;;  %v7580_v56 = vld [vmem:[#allocation3] sm:$0xff]  ;;  %v7581_v1 = vld [vmem:[#allocation3 + $0x8] sm:$0xff] }
 0x2b8   : > { %v11900_v10 = vpop.eup %8692  ;;  %8700 = vlog2.f32 %v3427_v3  ;;  %vm3353_vm14 = vcmp.lt.f32.partialorder %v3352_v27, 0.0004427343  ;;  %v3415_v54 = vand.u32 2147483647, %v11812_v25  ;;  %v3368_v45 = vadd.f32 1.0, %v3367_v35 }
 0x2b9   : > { %v8695_v40 = vpop.eup %8694  ;;  %8702 = vpow2.f32 %v2724_v50  ;;  %v3354_v34 = vsel %vm3353_vm14, %v3351_v6, %v3348_v2  ;;  %v3413_v38 = vadd.f32 1.0, %v3412_v60  ;;  %v3370_v46 = vand.u32 2147483647, %v11828_v4 }
 0x2ba   : > { %v4050_v55 = vmul.f32 0.01, %v3354_v34  ;;  %8704 = vlog2.f32 %v3382_v41  ;;  %v4055_v58 = vmul.f32 0.01, %v3399_v28  ;;  %v2728_v3 = vmul.f32 1.442695, %v11897_v12 }
 0x2bb   : > { %8706 = vpow2.f32 %v2714_v57  ;;  %v8697_v27 = vpop.eup %8696  ;;  %v3411_v5 = vmul.f32 0.6931472, %v8695_v40  ;;  %v3445_v16 = vadd.f32 1.0, %v11900_v10  ;;  %v16176_v35 = vmov 0.0|0.0  }
 0x2bc   : > { %v4306_v50 = vsel %vm4178_vm11, %v16477_v24, %v4050_v55  ;;  %8335 = vmatprep.subr.bf16.mxu0 %v16176_v35  ;;  %v8336_v60 = vpack.c.bf16 %v7581_v1, %v7580_v56  ;;  %v4437_v57 = vsel %vm220_vm0, %v4309_v15, %v10979_v33  ;;  %v3366_v41 = vmul.f32 0.6931472, %v8697_v27 }
 0x2bd   : > { %v11919_v2 = vpop.eup %8698  ;;  %5060 = vmatmul.mubr.f32.gmra.mrb[120].mxu1 %v4306_v50  ;;  %v3369_v6 = vmul.f32 %v11828_v4, %v3368_v45  ;;  %v3385_v28 = vmul.f32 -0.5, %v11871_v9  ;;  %vm4183_vm15 = vcmp.gt.f32.partialorder %v11682_v42, 20.0  ;;  %v3414_v37 = vmul.f32 %v11812_v25, %v3413_v38  ;;  %v11935_v45 = vpop.f32.mrb[46].mxu1  ;;  %v16503_v38 = vld [vmem:[#allocation8_spill] sm:$0xff] }
 0x2be   : > { %v2718_v24 = vmul.f32 1.442695, %v11894_v32  ;;  %5065 = vmatprep.mubr.f32.mxu1 %v4437_v57  ;;  %vm3371_vm1 = vcmp.lt.f32.partialorder %v3370_v46, 0.0004427343  ;;  %8337 = vmatpush1.bf16.msra.mxu0 %v8336_v60  ;;  %v3430_v40 = vmul.f32 -0.5, %v11849_v62  ;;  %8708 = vpow2.f32 %v2728_v3  ;;  %16502 = vst [vmem:[#allocation35_spill] sm:$0xff] %v11935_v45 }
 0x2bf   : > { %vm11930_vm2 = vcmp.lt.f32.partialorder %v3415_v54, 0.0004427343  ;;  %v3372_v33 = vsel %vm3371_vm1, %v3369_v6, %v3366_v41  ;;  %8338 = vmatprep.subr.bf16.mxu0 %v16176_v35  ;;  %v4311_v42 = vsel %vm4183_vm15, %v10993_v43, %v4055_v58  ;;  %v11941_v4 = vmul.f32 100.0, %v16503_v38  ;;  %v11946_v54 = vpop.f32.mrb[47].mxu1 }
 0x2c0   : > { %v3417_v25 = vsel %vm11930_vm2, %v3414_v37, %v3411_v5  ;;  %v11944_v15 = vmul.f32 100.0, %v11200_v36  ;;  %8710 = vlog2.f32 %v3445_v16  ;;  %v4052_v56 = vmul.f32 0.01, %v3372_v33 }
 0x2c1   : > { %v3386_v1 = vadd.f32 1.0, %v3385_v28  ;;  %v3400_v55 = vadd.f32 1.0, %v11919_v2  ;;  %vm4180_vm3 = vcmp.gt.f32.partialorder %v11735_v48, 20.0  ;;  %v3388_v58 = vand.u32 2147483647, %v11871_v9 }
 0x2c2   : > { %v8701_v46 = vpop.eup %8700  ;;  %v3433_v27 = vand.u32 2147483647, %v11849_v62  ;;  %v4057_v5 = vmul.f32 0.01, %v3417_v25  ;;  %8712 = vpow2.f32 %v2718_v24  ;;  %v4308_v50 = vsel %vm4180_vm3, %v16480_v49, %v4052_v56 }
 0x2c3   : > { %v11951_v3 = vpop.eup %8702  ;;  %v3431_v57 = vadd.f32 1.0, %v3430_v40  ;;  %v2732_v16 = vmul.f32 1.442695, %v11944_v15  ;;  %5066 = vmatmul.mubr.f32.gmra.mrb[122].mxu1 %v4308_v50  ;;  %v4439_v41 = vsel %vm220_vm0, %v4311_v42, %v10993_v43  ;;  %8714 = vlog2.f32 %v3400_v55  ;;  %v11970_v42 = vpop.f32.mrb[48].mxu1 }
 0x2c4   : > { %v8705_v60 = vpop.eup %8704  ;;  %v2722_v6 = vmul.f32 1.442695, %v11941_v4  ;;  %5071 = vmatprep.mubr.f32.mxu1 %v4439_v41  ;;  %v3387_v37 = vmul.f32 %v11871_v9, %v3386_v1  ;;  %vm4185_vm4 = vcmp.gt.f32.partialorder %v11719_v44, 20.0  ;;  %v3463_v49 = vadd.f32 1.0, %v11951_v3  ;;  %16504 = vst [vmem:[#allocation34_spill] sm:$0xff] %v11970_v42  ;;  %v11978_v25 = vpop.f32.mrb[49].mxu1 }
 0x2c5   : > { %v11959_v48 = vpop.eup %8706  ;;  %v3384_v28 = vmul.f32 0.6931472, %v8705_v60  ;;  %v11966_v24 = vmul.f32 100.0, %v11234_v59  ;;  %vm3389_vm5 = vcmp.lt.f32.partialorder %v3388_v58, 0.0004427343  ;;  %v4313_v43 = vsel %vm4185_vm4, %v11026_v47, %v4057_v5  ;;  %v7582_v58 = vld [vmem:[#allocation3 + $0x10] sm:$0xff] }
 0x2c6   : > { %v3429_v40 = vmul.f32 0.6931472, %v8701_v46  ;;  %v3403_v33 = vmul.f32 -0.5, %v11919_v2  ;;  %vm4182_vm6 = vcmp.gt.f32.partialorder %v11782_v26, 20.0  ;;  %v3432_v9 = vmul.f32 %v11849_v62, %v3431_v57  ;;  %v7583_v5 = vld [vmem:[#allocation3 + $0x18] sm:$0xff]  ;;  %v16508_v44 = vld [vmem:[#allocation36_spill] sm:$0xff] }
 0x2c7   : > { %v3390_v34 = vsel %vm3389_vm5, %v3387_v37, %v3384_v28  ;;  %vm11974_vm7 = vcmp.lt.f32.partialorder %v3433_v27, 0.0004427343  ;;  %8716 = vpow2.f32 %v2732_v16  ;;  %v3448_v1 = vmul.f32 -0.5, %v11900_v10  ;;  %v16507_v16 = vld [vmem:[#allocation10_spill] sm:$0xff] }
 0x2c8   : > { %v11980_v56 = vpop.eup %8708  ;;  %8718 = vpow2.f32 %v2722_v6  ;;  %v11984_v55 = vmul.f32 100.0, %v11150_v52  ;;  %v4054_v46 = vmul.f32 0.01, %v3390_v34  ;;  %v2736_v62 = vmul.f32 1.442695, %v11966_v24 }
 0x2c9   : > { %8720 = vlog2.f32 %v3463_v49  ;;  %v4441_v27 = vsel %vm220_vm0, %v4313_v43, %v11026_v47  ;;  %v3418_v50 = vadd.f32 1.0, %v11959_v48  ;;  %v3435_v57 = vsel %vm11974_vm7, %v3432_v9, %v3429_v40 }
 0x2ca   : > { %v8711_v60 = vpop.eup %8710  ;;  %v11994_v41 = vmul.f32 100.0, %v16507_v16  ;;  %v4310_v6 = vsel %vm4182_vm6, %v16485_v13, %v4054_v46  ;;  %v3404_v28 = vadd.f32 1.0, %v3403_v33  ;;  %v3481_v37 = vadd.f32 1.0, %v11980_v56 }
 0x2cb   : > { %5072 = vmatmul.mubr.f32.gmra.mrb[124].mxu1 %v4310_v6  ;;  %v3406_v49 = vand.u32 2147483647, %v11919_v2  ;;  %8722 = vlog2.f32 %v3418_v50  ;;  %v8339_v47 = vpack.c.bf16 %v7583_v5, %v7582_v58  ;;  %vm4187_vm8 = vcmp.gt.f32.partialorder %v11758_v17, 20.0 }
 0x2cc   : > { %v12001_v43 = vpop.eup %8712  ;;  %v3449_v40 = vadd.f32 1.0, %v3448_v1  ;;  %v3451_v34 = vand.u32 2147483647, %v11900_v10  ;;  %v2726_v9 = vmul.f32 1.442695, %v11984_v55  ;;  %5077 = vmatprep.mubr.f32.mxu1 %v4441_v27  ;;  %v12007_v46 = vmul.f32 100.0, %v16508_v44 }
 0x2cd   : > { %v8715_v26 = vpop.eup %8714  ;;  %v4059_v13 = vmul.f32 0.01, %v3435_v57  ;;  %v3447_v33 = vmul.f32 0.6931472, %v8711_v60  ;;  %8724 = vpow2.f32 %v2736_v62  ;;  %8340 = vmatpush1.bf16.msra.mxu0 %v8339_v47  ;;  %v2740_v58 = vmul.f32 1.442695, %v11994_v41 }
 0x2ce   : > { %v3402_v5 = vmul.f32 0.6931472, %v8715_v26  ;;  %v3405_v50 = vmul.f32 %v11919_v2, %v3404_v28  ;;  %v3421_v1 = vmul.f32 -0.5, %v11959_v48  ;;  %8341 = vmatprep.subr.bf16.mxu0 %v16176_v35  ;;  %v3466_v6 = vmul.f32 -0.5, %v11951_v3  ;;  %v12015_v60 = vpop.f32.mrb[50].mxu1 }
 0x2cf   : > { %8726 = vlog2.f32 %v3481_v37  ;;  %vm3407_vm9 = vcmp.lt.f32.partialorder %v3406_v49, 0.0004427343  ;;  %v3436_v27 = vadd.f32 1.0, %v12001_v43  ;;  %16509 = vst [vmem:[#allocation8_spill] sm:$0xff] %v12015_v60  ;;  %vm4184_vm10 = vcmp.gt.f32.partialorder %v11823_v19, 20.0  ;;  %v12023_v28 = vpop.f32.mrb[51].mxu1 }
 0x2d0   : > { %v3450_v62 = vmul.f32 %v11900_v10, %v3449_v40  ;;  %vm12019_vm11 = vcmp.lt.f32.partialorder %v3451_v34, 0.0004427343  ;;  %v3408_v2 = vsel %vm3407_vm9, %v3405_v50, %v3402_v5  ;;  %16512 = vst [vmem:[#allocation10_spill] sm:$0xff] %v12023_v28  ;;  %v4315_v37 = vsel %vm4187_vm8, %v11001_v22, %v4059_v13  ;;  %v7584_v60 = vld [vmem:[#allocation3 + $0x20] sm:$0xff] }
 0x2d1   : > { %v12025_v47 = vpop.eup %8716  ;;  %v3469_v49 = vand.u32 2147483647, %v11951_v3  ;;  %8728 = vpow2.f32 %v2726_v9  ;;  %v4056_v26 = vmul.f32 0.01, %v3408_v2  ;;  %v2730_v40 = vmul.f32 1.442695, %v12007_v46 }
 0x2d2   : > { %v12031_v35 = vpop.eup %8718  ;;  %v3453_v10 = vsel %vm12019_vm11, %v3450_v62, %v3447_v33  ;;  %8730 = vpow2.f32 %v2740_v58  ;;  %v3422_v34 = vadd.f32 1.0, %v3421_v1  ;;  %v3467_v50 = vadd.f32 1.0, %v3466_v6  ;;  %v16513_v2 = vld [vmem:[#allocation11_spill] sm:$0xff]  ;;  %v12048_v58 = vpop.f32.mrb[52].mxu1 }
 0x2d3   : > { %v8721_v5 = vpop.eup %8720  ;;  %v4312_v17 = vsel %vm4184_vm10, %v16490_v63, %v4056_v26  ;;  %v3424_v13 = vand.u32 2147483647, %v11959_v48  ;;  %8732 = vlog2.f32 %v3436_v27  ;;  %vm4186_vm12 = vcmp.gt.f32.partialorder %v11856_v29, 20.0  ;;  %16514 = vst [vmem:[#allocation36_spill] sm:$0xff] %v12048_v58  ;;  %v16519_v29 = vld [vmem:[#allocation13_spill] sm:$0xff] }
 0x2d4   : > { %v3499_v9 = vadd.f32 1.0, %v12025_v47  ;;  %v12043_v57 = vmul.f32 100.0, %v16513_v2  ;;  %5078 = vmatmul.mubr.f32.gmra.mrb[126].mxu1 %v4312_v17  ;;  %v4443_v33 = vsel %vm220_vm0, %v4315_v37, %v11001_v22  ;;  %v4061_v19 = vmul.f32 0.01, %v3453_v10  ;;  %v7585_v10 = vld [vmem:[#allocation3 + $0x28] sm:$0xff] }
 0x2d5   : > { %v8723_v1 = vpop.eup %8722  ;;  %vm4189_vm13 = vcmp.gt.f32.partialorder %v11806_v20, 20.0  ;;  %v3484_v63 = vmul.f32 -0.5, %v11980_v56  ;;  %5083 = vmatprep.mubr.f32.mxu1 %v4443_v33  ;;  %v3454_v6 = vadd.f32 1.0, %v12031_v35  ;;  %v3465_v27 = vmul.f32 0.6931472, %v8721_v5  ;;  %v12062_v33 = vpop.f32.mrb[53].mxu1 }
 0x2d6   : > { %v3420_v62 = vmul.f32 0.6931472, %v8723_v1  ;;  %v3423_v26 = vmul.f32 %v11959_v48, %v3422_v34  ;;  %v3439_v17 = vmul.f32 -0.5, %v12001_v43  ;;  %v3468_v22 = vmul.f32 %v11951_v3, %v3467_v50  ;;  %16517 = vst [vmem:[#allocation11_spill] sm:$0xff] %v12062_v33  ;;  %v16518_v5 = vld [vmem:[#allocation9_spill] sm:$0xff] }
 0x2d7   : > { %v12055_v42 = vpop.eup %8724  ;;  %vm12058_vm14 = vcmp.lt.f32.partialorder %v3469_v49, 0.0004427343  ;;  %8734 = vpow2.f32 %v2730_v40  ;;  %vm3425_vm15 = vcmp.lt.f32.partialorder %v3424_v13, 0.0004427343  ;;  %v12065_v1 = vmul.f32 100.0, %v16518_v5 }
 0x2d8   : > { %8736 = vlog2.f32 %v3499_v9  ;;  %v2744_v48 = vmul.f32 1.442695, %v12043_v57  ;;  %v3426_v34 = vsel %vm3425_vm15, %v3423_v26, %v3420_v62  ;;  %v4317_v3 = vsel %vm4189_vm13, %v11066_v14, %v4061_v19 }
 0x2d9   : > { %v8727_v58 = vpop.eup %8726  ;;  %v3485_v49 = vadd.f32 1.0, %v3484_v63  ;;  %v4058_v50 = vmul.f32 0.01, %v3426_v34  ;;  %8738 = vlog2.f32 %v3454_v6  ;;  %vm4188_vm1 = vcmp.gt.f32.partialorder %v11894_v32, 20.0 }
 0x2da   : > { %v3471_v40 = vsel %vm12058_vm14, %v3468_v22, %v3465_v27  ;;  %vm4191_vm2 = vcmp.gt.f32.partialorder %v11864_v30, 20.0  ;;  %v3440_v13 = vadd.f32 1.0, %v3439_v17  ;;  %v8342_v9 = vpack.c.bf16 %v7585_v10, %v7584_v60 }
 0x2db   : > { %v12075_v33 = vpop.eup %8728  ;;  %v3487_v62 = vand.u32 2147483647, %v11980_v56  ;;  %v3517_v26 = vadd.f32 1.0, %v12055_v42  ;;  %v4314_v20 = vsel %vm4186_vm12, %v16493_v53, %v4058_v50  ;;  %v3442_v19 = vand.u32 2147483647, %v12001_v43 }
 0x2dc   : > { %v12083_v63 = vpop.eup %8730  ;;  %v3483_v6 = vmul.f32 0.6931472, %v8727_v58  ;;  %8740 = vpow2.f32 %v2744_v48  ;;  %5084 = vmatmul.mubr.f32.gmra.mrb[128].mxu1 %v4314_v20  ;;  %v4445_v60 = vsel %vm220_vm0, %v4317_v3, %v11066_v14  ;;  %v3457_v27 = vmul.f32 -0.5, %v12031_v35  ;;  %8343 = vmatpush1.bf16.msra.mxu0 %v8342_v9  ;;  %v16521_v48 = vld [vmem:[#allocation12_spill] sm:$0xff]  ;;  %v12100_v9 = vpop.f32.mrb[54].mxu1 }
 0x2dd   : > { %v8733_v17 = vpop.eup %8732  ;;  %v4063_v22 = vmul.f32 0.01, %v3471_v40  ;;  %v3486_v37 = vmul.f32 %v11980_v56, %v3485_v49  ;;  %v2734_v53 = vmul.f32 1.442695, %v12065_v1  ;;  %v12092_v10 = vmul.f32 100.0, %v16519_v29  ;;  %5089 = vmatprep.mubr.f32.mxu1 %v4445_v60  ;;  %16522 = vst [vmem:[#allocation9_spill] sm:$0xff] %v12100_v9 }
 0x2de   : > { %v16520_v58 = vmov 0.0|0.0   ;;  %v12096_v34 = vmul.f32 100.0, %v16521_v48  ;;  %v3438_v50 = vmul.f32 0.6931472, %v8733_v17  ;;  %v3441_v14 = vmul.f32 %v12001_v43, %v3440_v13  ;;  %v12108_v40 = vpop.f32.mrb[55].mxu1 }
 0x2df   : > { %8344 = vmatprep.subr.bf16.mxu0 %v16520_v58  ;;  %v3472_v3 = vadd.f32 1.0, %v12075_v33  ;;  %vm12102_vm3 = vcmp.lt.f32.partialorder %v3487_v62, 0.0004427343  ;;  %vm4193_vm4 = vcmp.gt.f32.partialorder %v11897_v12, 20.0  ;;  %v3502_v49 = vmul.f32 -0.5, %v12025_v47  ;;  %16525 = vst [vmem:[#allocation13_spill] sm:$0xff] %v12108_v40 }
 0x2e0   : > { %8742 = vlog2.f32 %v3517_v26  ;;  %vm3443_vm5 = vcmp.lt.f32.partialorder %v3442_v19, 0.0004427343  ;;  %v3489_v20 = vsel %vm12102_vm3, %v3486_v37, %v3483_v6  ;;  %v3535_v43 = vadd.f32 1.0, %v12083_v63  ;;  %v16526_v40 = vld [vmem:[#allocation15_spill] sm:$0xff] }
 0x2e1   : > { %v3444_v13 = vsel %vm3443_vm5, %v3441_v14, %v3438_v50  ;;  %v3458_v60 = vadd.f32 1.0, %v3457_v27  ;;  %v12113_v17 = vpop.eup %8734  ;;  %vm4190_vm6 = vcmp.gt.f32.partialorder %v11941_v4, 20.0  ;;  %v4319_v62 = vsel %vm4191_vm2, %v16495_v51, %v4063_v22  ;;  %v16532_v4 = vld [vmem:[#allocation17_spill] sm:$0xff] }
 0x2e2   : > { %8744 = vpow2.f32 %v2734_v53  ;;  %v4060_v26 = vmul.f32 0.01, %v3444_v13  ;;  %v3460_v19 = vand.u32 2147483647, %v12031_v35  ;;  %v8737_v9 = vpop.eup %8736  ;;  %v3505_v56 = vand.u32 2147483647, %v12025_v47 }
 0x2e3   : > { %v2738_v6 = vmul.f32 1.442695, %v12092_v10  ;;  %v2748_v37 = vmul.f32 1.442695, %v12096_v34  ;;  %8746 = vlog2.f32 %v3472_v3  ;;  %v8739_v27 = vpop.eup %8738  ;;  %v4065_v50 = vmul.f32 0.01, %v3489_v20 }
 0x2e4   : > { %v3503_v14 = vadd.f32 1.0, %v3502_v49  ;;  %v12124_v45 = vmul.f32 100.0, %v16526_v40  ;;  %v4316_v30 = vsel %vm4188_vm1, %v16499_v61, %v4060_v26  ;;  %8748 = vlog2.f32 %v3535_v43  ;;  %v16527_v61 = vld [vmem:[#allocation14_spill] sm:$0xff] }
 0x2e5   : > { %5090 = vmatmul.mubr.f32.gmra.mrb[130].mxu1 %v4316_v30  ;;  %v4447_v22 = vsel %vm220_vm0, %v4319_v62, %v16495_v51  ;;  %v3456_v53 = vmul.f32 0.6931472, %v8739_v27  ;;  %v3459_v13 = vmul.f32 %v12031_v35, %v3458_v60  ;;  %v3501_v3 = vmul.f32 0.6931472, %v8737_v9  ;;  %v7586_v60 = vld [vmem:[#allocation3 + $0x30] sm:$0xff]  ;;  %v12147_v62 = vpop.f32.mrb[56].mxu1 }
 0x2e6   : > { %v3520_v20 = vmul.f32 -0.5, %v12055_v42  ;;  %5095 = vmatprep.mubr.f32.mxu1 %v4447_v22  ;;  %vm3461_vm7 = vcmp.lt.f32.partialorder %v3460_v19, 0.0004427343  ;;  %v3475_v49 = vmul.f32 -0.5, %v12075_v33  ;;  %v12135_v28 = vpop.eup %8740  ;;  %8750 = vpow2.f32 %v2748_v37  ;;  %16530 = vst [vmem:[#allocation12_spill] sm:$0xff] %v12147_v62  ;;  %v7587_v30 = vld [vmem:[#allocation3 + $0x38] sm:$0xff] }
 0x2e7   : > { %v12138_v32 = vmul.f32 100.0, %v16527_v61  ;;  %v3462_v43 = vsel %vm3461_vm7, %v3459_v13, %v3456_v53  ;;  %v3490_v26 = vadd.f32 1.0, %v12113_v17  ;;  %v3504_v51 = vmul.f32 %v12025_v47, %v3503_v14  ;;  %v12153_v22 = vpop.f32.mrb[57].mxu1 }
 0x2e8   : > { %vm12142_vm8 = vcmp.lt.f32.partialorder %v3505_v56, 0.0004427343  ;;  %8752 = vpow2.f32 %v2738_v6  ;;  %v2742_v9 = vmul.f32 1.442695, %v12124_v45  ;;  %v4321_v19 = vsel %vm4193_vm4, %v11155_v0, %v4065_v50  ;;  %16531 = vst [vmem:[#allocation15_spill] sm:$0xff] %v12153_v22 }
 0x2e9   : > { %v3523_v37 = vand.u32 2147483647, %v12055_v42  ;;  %v4062_v27 = vmul.f32 0.01, %v3462_v43  ;;  %vm4192_vm9 = vcmp.gt.f32.partialorder %v11984_v55, 20.0  ;;  %v3507_v56 = vsel %vm12142_vm8, %v3504_v51, %v3501_v3 }
 0x2ea   : > { %v8743_v47 = vpop.eup %8742  ;;  %v3521_v6 = vadd.f32 1.0, %v3520_v20  ;;  %v3553_v14 = vadd.f32 1.0, %v12135_v28  ;;  %v3476_v53 = vadd.f32 1.0, %v3475_v49  ;;  %v2752_v13 = vmul.f32 1.442695, %v12138_v32 }
 0x2eb   : > { %v4318_v12 = vsel %vm4190_vm6, %v16503_v38, %v4062_v27  ;;  %v3478_v50 = vand.u32 2147483647, %v12075_v33  ;;  %8754 = vlog2.f32 %v3490_v26  ;;  %v12167_v62 = vmul.f32 100.0, %v11442_v31 }
 0x2ec   : > { %v12164_v43 = vpop.eup %8744  ;;  %8756 = vpow2.f32 %v2742_v9  ;;  %5096 = vmatmul.mubr.f32.gmra.mrb[132].mxu1 %v4318_v12  ;;  %v4449_v3 = vsel %vm220_vm0, %v4321_v19, %v11155_v0  ;;  %v8345_v20 = vpack.c.bf16 %v7587_v30, %v7586_v60  ;;  %v4067_v51 = vmul.f32 0.01, %v3507_v56  ;;  %v12184_v60 = vpop.f32.mrb[58].mxu1 }
 0x2ed   : > { %v8747_v49 = vpop.eup %8746  ;;  %v3519_v35 = vmul.f32 0.6931472, %v8743_v47  ;;  %v3538_v38 = vmul.f32 -0.5, %v12083_v63  ;;  %v12174_v27 = vmul.f32 100.0, %v16532_v4  ;;  %5101 = vmatprep.mubr.f32.mxu1 %v4449_v3  ;;  %8758 = vlog2.f32 %v3553_v14  ;;  %16535 = vst [vmem:[#allocation14_spill] sm:$0xff] %v12184_v60  ;;  %v12189_v56 = vpop.f32.mrb[59].mxu1 }
 0x2ee   : > { %v3474_v26 = vmul.f32 0.6931472, %v8747_v49  ;;  %v3477_v9 = vmul.f32 %v12075_v33, %v3476_v53  ;;  %v3493_v12 = vmul.f32 -0.5, %v12113_v17  ;;  %8346 = vmatpush1.bf16.msra.mxu0 %v8345_v20  ;;  %v8749_v22 = vpop.eup %8748  ;;  %vm4195_vm10 = vcmp.gt.f32.partialorder %v11944_v15, 20.0 }
 0x2ef   : > { %vm12179_vm11 = vcmp.lt.f32.partialorder %v3523_v37, 0.0004427343  ;;  %8760 = vpow2.f32 %v2752_v13  ;;  %vm3479_vm12 = vcmp.lt.f32.partialorder %v3478_v50, 0.0004427343  ;;  %8347 = vmatprep.subr.bf16.mxu0 %v16520_v58  ;;  %v3522_v19 = vmul.f32 %v12055_v42, %v3521_v6 }
 0x2f0   : > { %v3541_v33 = vand.u32 2147483647, %v12083_v63  ;;  %v2756_v30 = vmul.f32 1.442695, %v12167_v62  ;;  %v3480_v47 = vsel %vm3479_vm12, %v3477_v9, %v3474_v26  ;;  %v12191_v15 = vpop.eup %8750  ;;  %v4323_v37 = vsel %vm4195_vm10, %v11200_v36, %v4067_v51 }
 0x2f1   : > { %v3539_v14 = vadd.f32 1.0, %v3538_v38  ;;  %v4064_v53 = vmul.f32 0.01, %v3480_v47  ;;  %v3508_v13 = vadd.f32 1.0, %v12164_v43  ;;  %v3525_v42 = vsel %vm12179_vm11, %v3522_v19, %v3519_v35 }
 0x2f2   : > { %v12195_v50 = vpop.eup %8752  ;;  %v3537_v6 = vmul.f32 0.6931472, %v8749_v22  ;;  %v2746_v3 = vmul.f32 1.442695, %v12174_v27  ;;  %v3494_v20 = vadd.f32 1.0, %v3493_v12  ;;  %v12201_v49 = vmul.f32 100.0, %v11474_v21 }
 0x2f3   : > { %v4320_v51 = vsel %vm4192_vm9, %v11150_v52, %v4064_v53  ;;  %v3496_v38 = vand.u32 2147483647, %v12113_v17  ;;  %8762 = vlog2.f32 %v3508_v13  ;;  %vm12207_vm13 = vcmp.lt.f32.partialorder %v3541_v33, 0.0004427343  ;;  %v16538_v52 = vld [vmem:[#allocation19_spill] sm:$0xff] }
 0x2f4   : > { %v3571_v35 = vadd.f32 1.0, %v12191_v15  ;;  %8764 = vpow2.f32 %v2756_v30  ;;  %5102 = vmatmul.mubr.f32.gmra.mrb[134].mxu1 %v4320_v51  ;;  %v4451_v22 = vsel %vm220_vm0, %v4323_v37, %v11200_v36  ;;  %v4069_v12 = vmul.f32 0.01, %v3525_v42  ;;  %v7588_v51 = vld [vmem:[#allocation3 + $0x40] sm:$0xff] }
 0x2f5   : > { %v8755_v9 = vpop.eup %8754  ;;  %v3540_v55 = vmul.f32 %v12083_v63, %v3539_v14  ;;  %v12217_v0 = vmul.f32 100.0, %v16538_v52  ;;  %5107 = vmatprep.mubr.f32.mxu1 %v4451_v22  ;;  %v3526_v19 = vadd.f32 1.0, %v12195_v50  ;;  %v3556_v47 = vmul.f32 -0.5, %v12135_v28  ;;  %v7589_v22 = vld [vmem:[#allocation3 + $0x48] sm:$0xff] }
 0x2f6   : > { %v12220_v33 = vpop.eup %8756  ;;  %v3492_v30 = vmul.f32 0.6931472, %v8755_v9  ;;  %v3495_v53 = vmul.f32 %v12113_v17, %v3494_v20  ;;  %v3511_v13 = vmul.f32 -0.5, %v12164_v43  ;;  %vm4194_vm14 = vcmp.gt.f32.partialorder %v12007_v46, 20.0  ;;  %v12231_v17 = vpop.f32.mrb[60].mxu1 }
 0x2f7   : > { %v3543_v36 = vsel %vm12207_vm13, %v3540_v55, %v3537_v6  ;;  %v2760_v63 = vmul.f32 1.442695, %v12201_v49  ;;  %vm3497_vm15 = vcmp.lt.f32.partialorder %v3496_v38, 0.0004427343  ;;  %v8759_v37 = vpop.eup %8758  ;;  %vm4197_vm1 = vcmp.gt.f32.partialorder %v11966_v24, 20.0  ;;  %16539 = vst [vmem:[#allocation17_spill] sm:$0xff] %v12231_v17 }
 0x2f8   : > { %v3559_v14 = vand.u32 2147483647, %v12135_v28  ;;  %8766 = vlog2.f32 %v3571_v35  ;;  %v3498_v42 = vsel %vm3497_vm15, %v3495_v53, %v3492_v30  ;;  %v4325_v9 = vsel %vm4197_vm1, %v11234_v59, %v4069_v12  ;;  %v12237_v38 = vpop.f32.mrb[61].mxu1 }
 0x2f9   : > { %v12233_v20 = vpop.eup %8760  ;;  %v2750_v6 = vmul.f32 1.442695, %v12217_v0  ;;  %v4066_v26 = vmul.f32 0.01, %v3498_v42  ;;  %8768 = vlog2.f32 %v3526_v19  ;;  %16540 = vst [vmem:[#allocation19_spill] sm:$0xff] %v12237_v38  ;;  %v3557_v24 = vadd.f32 1.0, %v3556_v47 }
 0x2fa   : > { %v4071_v55 = vmul.f32 0.01, %v3543_v36  ;;  %8770 = vpow2.f32 %v2746_v3  ;;  %v3512_v60 = vadd.f32 1.0, %v3511_v13  ;;  %v3514_v30 = vand.u32 2147483647, %v12164_v43  ;;  %v16544_v42 = vld [vmem:[#allocation21_spill] sm:$0xff] }
 0x2fb   : > { %8772 = vpow2.f32 %v2760_v63  ;;  %v4322_v35 = vsel %vm4194_vm14, %v16508_v44, %v4066_v26  ;;  %v8348_v53 = vpack.c.bf16 %v7589_v22, %v7588_v51  ;;  %v3555_v17 = vmul.f32 0.6931472, %v8759_v37 }
 0x2fc   : > { %v3589_v12 = vadd.f32 1.0, %v12233_v20  ;;  %5108 = vmatmul.mubr.f32.gmra.mrb[136].mxu1 %v4322_v35  ;;  %v4453_v19 = vsel %vm220_vm0, %v4325_v9, %v11234_v59  ;;  %v3529_v47 = vmul.f32 -0.5, %v12195_v50  ;;  %vm4199_vm2 = vcmp.gt.f32.partialorder %v11994_v41, 20.0  ;;  %v12261_v41 = vpop.f32.mrb[62].mxu1 }
 0x2fd   : > { %v8763_v3 = vpop.eup %8762  ;;  %vm12249_vm3 = vcmp.lt.f32.partialorder %v3559_v14, 0.0004427343  ;;  %8774 = vpow2.f32 %v2750_v6  ;;  %5113 = vmatprep.mubr.f32.mxu1 %v4453_v19  ;;  %8349 = vmatpush1.bf16.msra.mxu0 %v8348_v53  ;;  %v3558_v46 = vmul.f32 %v12135_v28, %v3557_v24  ;;  %v12257_v36 = vmul.f32 100.0, %v11518_v23  ;;  %16543 = vst [vmem:[#allocation38_spill] sm:$0xff] %v12261_v41  ;;  %v12268_v22 = vpop.f32.mrb[63].mxu1  ;;  %v16551_v41 = vld [vmem:[#allocation18_spill] sm:$0xff] }
 0x2fe   : > { %v12253_v44 = vpop.eup %8764  ;;  %v3510_v59 = vmul.f32 0.6931472, %v8763_v3  ;;  %v3513_v63 = vmul.f32 %v12164_v43, %v3512_v60  ;;  %8350 = vmatprep.subr.bf16.mxu0 %v16520_v58  ;;  %v4327_v37 = vsel %vm4199_vm2, %v16507_v16, %v4071_v55  ;;  %v3574_v14 = vmul.f32 -0.5, %v12191_v15  ;;  %16545 = vst [vmem:[#allocation21_spill] sm:$0xff] %v12268_v22 }
 0x2ff   : > { %v12266_v51 = vmul.f32 100.0, %v16544_v42  ;;  %vm3515_vm4 = vcmp.lt.f32.partialorder %v3514_v30, 0.0004427343  ;;  %v3561_v28 = vsel %vm12249_vm3, %v3558_v46, %v3555_v17  ;;  %8776 = vlog2.f32 %v3589_v12 }
 0x300   : > { %v3516_v9 = vsel %vm3515_vm4, %v3513_v63, %v3510_v59  ;;  %v3530_v43 = vadd.f32 1.0, %v3529_v47  ;;  %v3607_v60 = vadd.f32 1.0, %v12253_v44  ;;  %v3532_v26 = vand.u32 2147483647, %v12195_v50 }
 0x301   : > { %v4068_v6 = vmul.f32 0.01, %v3516_v9  ;;  %v3544_v55 = vadd.f32 1.0, %v12220_v33  ;;  %vm4196_vm5 = vcmp.gt.f32.partialorder %v12065_v1, 20.0  ;;  %v3577_v35 = vand.u32 2147483647, %v12191_v15 }
 0x302   : > { %v8767_v24 = vpop.eup %8766  ;;  %v2764_v30 = vmul.f32 1.442695, %v12257_v36  ;;  %v3575_v19 = vadd.f32 1.0, %v3574_v14  ;;  %v2754_v17 = vmul.f32 1.442695, %v12266_v51  ;;  %v4455_v13 = vsel %vm220_vm0, %v4327_v37, %v16507_v16  ;;  %v16546_v14 = vld [vmem:[#allocation25_spill] sm:$0xff] }
 0x303   : > { %v8769_v53 = vpop.eup %8768  ;;  %v4324_v12 = vsel %vm4196_vm5, %v16518_v5, %v4068_v6  ;;  %8778 = vlog2.f32 %v3544_v55  ;;  %v4073_v3 = vmul.f32 0.01, %v3561_v28  ;;  %v3531_v46 = vmul.f32 %v12195_v50, %v3530_v43  ;;  %v12293_v55 = vpop.f32.mrb[64].mxu1 }
 0x304   : > { %v12280_v47 = vpop.eup %8770  ;;  %5114 = vmatmul.mubr.f32.gmra.mrb[138].mxu1 %v4324_v12  ;;  %v3528_v1 = vmul.f32 0.6931472, %v8769_v53  ;;  %v3573_v63 = vmul.f32 0.6931472, %v8767_v24  ;;  %8780 = vlog2.f32 %v3607_v60  ;;  %v12289_v9 = vmul.f32 100.0, %v16546_v14  ;;  %16547 = vst [vmem:[#allocation25_spill] sm:$0xff] %v12293_v55 }
 0x305   : > { %v12286_v59 = vpop.eup %8772  ;;  %5119 = vmatprep.mubr.f32.mxu1 %v4455_v13  ;;  %vm3533_vm6 = vcmp.lt.f32.partialorder %v3532_v26, 0.0004427343  ;;  %v3592_v5 = vmul.f32 -0.5, %v12233_v20  ;;  %8782 = vpow2.f32 %v2764_v30  ;;  %v3547_v6 = vmul.f32 -0.5, %v12220_v33  ;;  %v16550_v60 = vld [vmem:[#allocation16_spill] sm:$0xff]  ;;  %v7591_v12 = vld [vmem:[#allocation3 + $0x58] sm:$0xff] }
 0x306   : > { %v3534_v28 = vsel %vm3533_vm6, %v3531_v46, %v3528_v1  ;;  %vm4201_vm7 = vcmp.gt.f32.partialorder %v12043_v57, 20.0  ;;  %v3576_v50 = vmul.f32 %v12191_v15, %v3575_v19  ;;  %vm12299_vm8 = vcmp.lt.f32.partialorder %v3577_v35, 0.0004427343  ;;  %v7590_v53 = vld [vmem:[#allocation3 + $0x50] sm:$0xff]  ;;  %v12313_v19 = vpop.f32.mrb[65].mxu1  ;;  %v16557_v55 = vld [vmem:[#allocation29_spill] sm:$0xff] }
 0x307   : > { %v12295_v16 = vpop.eup %8774  ;;  %8784 = vpow2.f32 %v2754_v17  ;;  %v4329_v43 = vsel %vm4201_vm7, %v16513_v2, %v4073_v3  ;;  %v12305_v26 = vmul.f32 100.0, %v16550_v60  ;;  %v3625_v24 = vadd.f32 1.0, %v12286_v59 }
 0x308   : > { %v4070_v30 = vmul.f32 0.01, %v3534_v28  ;;  %vm4198_vm9 = vcmp.gt.f32.partialorder %v12092_v10, 20.0  ;;  %v3579_v57 = vsel %vm12299_vm8, %v3576_v50, %v3573_v63  ;;  %v2768_v15 = vmul.f32 1.442695, %v12289_v9 }
 0x309   : > { %v3562_v35 = vadd.f32 1.0, %v12280_v47  ;;  %v8777_v17 = vpop.eup %8776  ;;  %vm4200_vm10 = vcmp.gt.f32.partialorder %v12124_v45, 20.0  ;;  %v3593_v3 = vadd.f32 1.0, %v3592_v5  ;;  %v3595_v13 = vand.u32 2147483647, %v12233_v20 }
 0x30a   : > { %v4326_v1 = vsel %vm4198_vm9, %v16519_v29, %v4070_v30  ;;  %v3548_v46 = vadd.f32 1.0, %v3547_v6  ;;  %v4457_v10 = vsel %vm220_vm0, %v4329_v43, %v16513_v2  ;;  %v3550_v63 = vand.u32 2147483647, %v12220_v33  ;;  %v16552_v43 = vld [vmem:[#allocation27_spill] sm:$0xff] }
 0x30b   : > { %5120 = vmatmul.mubr.f32.gmra.mrb[140].mxu1 %v4326_v1  ;;  %8786 = vlog2.f32 %v3562_v35  ;;  %v8351_v28 = vpack.c.bf16 %v7591_v12, %v7590_v53  ;;  %v4075_v50 = vmul.f32 0.01, %v3579_v57  ;;  %v2758_v37 = vmul.f32 1.442695, %v12305_v26  ;;  %v12334_v57 = vpop.f32.mrb[66].mxu1 }
 0x30c   : > { %8788 = vlog2.f32 %v3625_v24  ;;  %v12324_v5 = vmul.f32 100.0, %v16551_v41  ;;  %5125 = vmatprep.mubr.f32.mxu1 %v4457_v10  ;;  %v3591_v29 = vmul.f32 0.6931472, %v8777_v17  ;;  %v3610_v6 = vmul.f32 -0.5, %v12253_v44  ;;  %16553 = vst [vmem:[#allocation16_spill] sm:$0xff] %v12334_v57  ;;  %v12342_v1 = vpop.f32.mrb[67].mxu1 }
 0x30d   : > { %v8779_v22 = vpop.eup %8778  ;;  %8790 = vpow2.f32 %v2768_v15  ;;  %8352 = vmatpush1.bf16.msra.mxu0 %v8351_v28  ;;  %v3580_v2 = vadd.f32 1.0, %v12295_v16  ;;  %v12329_v30 = vmul.f32 100.0, %v16552_v43  ;;  %v3549_v12 = vmul.f32 %v12220_v33, %v3548_v46  ;;  %16556 = vst [vmem:[#allocation18_spill] sm:$0xff] %v12342_v1 }
 0x30e   : > { %v3546_v53 = vmul.f32 0.6931472, %v8779_v22  ;;  %v3565_v24 = vmul.f32 -0.5, %v12280_v47  ;;  %8353 = vmatprep.subr.bf16.mxu0 %v16520_v58  ;;  %v8781_v35 = vpop.eup %8780  ;;  %vm4203_vm11 = vcmp.gt.f32.partialorder %v12096_v34, 20.0  ;;  %v3594_v15 = vmul.f32 %v12233_v20, %v3593_v3 }
 0x30f   : > { %vm12338_vm12 = vcmp.lt.f32.partialorder %v3595_v13, 0.0004427343  ;;  %vm3551_vm13 = vcmp.lt.f32.partialorder %v3550_v63, 0.0004427343  ;;  %v12344_v22 = vpop.eup %8782  ;;  %v4331_v33 = vsel %vm4203_vm11, %v16521_v48, %v4075_v50  ;;  %v3613_v46 = vand.u32 2147483647, %v12253_v44 }
 0x310   : > { %v2762_v10 = vmul.f32 1.442695, %v12324_v5  ;;  %v3552_v28 = vsel %vm3551_vm13, %v3549_v12, %v3546_v53  ;;  %v3597_v34 = vsel %vm12338_vm12, %v3594_v15, %v3591_v29  ;;  %v3611_v20 = vadd.f32 1.0, %v3610_v6 }
 0x311   : > { %v12349_v57 = vpop.eup %8784  ;;  %v4072_v3 = vmul.f32 0.01, %v3552_v28  ;;  %8792 = vlog2.f32 %v3580_v2  ;;  %vm4202_vm14 = vcmp.gt.f32.partialorder %v12174_v27, 20.0  ;;  %v3609_v13 = vmul.f32 0.6931472, %v8781_v35  ;;  %v12381_v28 = vpop.f32.mrb[68].mxu1 }
 0x312   : > { %8794 = vpow2.f32 %v2758_v37  ;;  %v2772_v63 = vmul.f32 1.442695, %v12329_v30  ;;  %v3566_v50 = vadd.f32 1.0, %v3565_v24  ;;  %v3643_v1 = vadd.f32 1.0, %v12344_v22  ;;  %16560 = vst [vmem:[#allocation27_spill] sm:$0xff] %v12381_v28 }
 0x313   : > { %v12357_v38 = vmul.f32 100.0, %v16557_v55  ;;  %v4328_v53 = vsel %vm4200_vm10, %v16526_v40, %v4072_v3  ;;  %v3568_v29 = vand.u32 2147483647, %v12280_v47  ;;  %v4077_v6 = vmul.f32 0.01, %v3597_v34  ;;  %v16561_v34 = vld [vmem:[#allocation23_spill] sm:$0xff] }
 0x314   : > { %vm4205_vm15 = vcmp.gt.f32.partialorder %v12138_v32, 20.0  ;;  %5126 = vmatmul.mubr.f32.gmra.mrb[142].mxu1 %v4328_v53  ;;  %v4459_v37 = vsel %vm220_vm0, %v4331_v33, %v16521_v48  ;;  %v3583_v2 = vmul.f32 -0.5, %v12295_v16  ;;  %v3612_v24 = vmul.f32 %v12253_v44, %v3611_v20  ;;  %v12389_v53 = vpop.f32.mrb[69].mxu1 }
 0x315   : > { %v8787_v12 = vpop.eup %8786  ;;  %v3628_v35 = vmul.f32 -0.5, %v12286_v59  ;;  %8796 = vpow2.f32 %v2762_v10  ;;  %5131 = vmatprep.mubr.f32.mxu1 %v4459_v37  ;;  %v3598_v45 = vadd.f32 1.0, %v12349_v57  ;;  %vm12371_vm1 = vcmp.lt.f32.partialorder %v3613_v46, 0.0004427343  ;;  %16562 = vst [vmem:[#allocation29_spill] sm:$0xff] %v12389_v53  ;;  %v16621_v53 = vld [vmem:[#allocation13_spill] sm:$0xff] }
 0x316   : > { %v8789_v40 = vpop.eup %8788  ;;  %8798 = vpow2.f32 %v2772_v63  ;;  %v3564_v17 = vmul.f32 0.6931472, %v8787_v12  ;;  %v3567_v48 = vmul.f32 %v12280_v47, %v3566_v50  ;;  %v3615_v44 = vsel %vm12371_vm1, %v3612_v24, %v3609_v13  ;;  %v7592_v63 = vld [vmem:[#allocation3 + $0x60] sm:$0xff]  ;;  %v7593_v50 = vld [vmem:[#allocation3 + $0x68] sm:$0xff] }
 0x317   : > { %v12376_v33 = vpop.eup %8790  ;;  %8800 = vlog2.f32 %v3643_v1  ;;  %v2776_v10 = vmul.f32 1.442695, %v12357_v38  ;;  %vm3569_vm2 = vcmp.lt.f32.partialorder %v3568_v29, 0.0004427343  ;;  %v4333_v46 = vsel %vm4205_vm15, %v16527_v61, %v4077_v6 }
 0x318   : > { %v12387_v20 = vmul.f32 100.0, %v16561_v34  ;;  %v3570_v3 = vsel %vm3569_vm2, %v3567_v48, %v3564_v17  ;;  %v3584_v47 = vadd.f32 1.0, %v3583_v2  ;;  %v3629_v13 = vadd.f32 1.0, %v3628_v35 }
 0x319   : > { %v4074_v1 = vmul.f32 0.01, %v3570_v3  ;;  %v3586_v37 = vand.u32 2147483647, %v12295_v16  ;;  %8802 = vlog2.f32 %v3598_v45  ;;  %v4079_v29 = vmul.f32 0.01, %v3615_v44 }
 0x31a   : > { %v3627_v12 = vmul.f32 0.6931472, %v8789_v40  ;;  %v3631_v24 = vand.u32 2147483647, %v12286_v59  ;;  %v3661_v6 = vadd.f32 1.0, %v12376_v33  ;;  %8804 = vpow2.f32 %v2776_v10  ;;  %v16563_v3 = vld [vmem:[#allocation31_spill] sm:$0xff] }
 0x31b   : > { %v8793_v32 = vpop.eup %8792  ;;  %v4330_v2 = vsel %vm4202_vm14, %v16532_v4, %v4074_v1  ;;  %v8354_v15 = vpack.c.bf16 %v7593_v50, %v7592_v63  ;;  %v4461_v35 = vsel %vm220_vm0, %v4333_v46, %v16527_v61  ;;  %v3585_v40 = vmul.f32 %v12295_v16, %v3584_v47 }
 0x31c   : > { %v12397_v17 = vpop.eup %8794  ;;  %5132 = vmatmul.mubr.f32.gmra.mrb[144].mxu1 %v4330_v2  ;;  %v3582_v45 = vmul.f32 0.6931472, %v8793_v32  ;;  %v3601_v48 = vmul.f32 -0.5, %v12349_v57  ;;  %v3630_v44 = vmul.f32 %v12286_v59, %v3629_v13  ;;  %v2766_v10 = vmul.f32 1.442695, %v12387_v20  ;;  %v12431_v32 = vpop.f32.mrb[70].mxu1 }
 0x31d   : > { %v12407_v27 = vmul.f32 100.0, %v16563_v3  ;;  %5137 = vmatprep.mubr.f32.mxu1 %v4461_v35  ;;  %vm3587_vm3 = vcmp.lt.f32.partialorder %v3586_v37, 0.0004427343  ;;  %8355 = vmatpush1.bf16.msra.mxu0 %v8354_v15  ;;  %vm4204_vm4 = vcmp.gt.f32.partialorder %v12217_v0, 20.0  ;;  %vm4207_vm5 = vcmp.gt.f32.partialorder %v12167_v62, 20.0  ;;  %v16566_v62 = vld [vmem:[#allocation28_spill] sm:$0xff] }
 0x31e   : > { %vm12411_vm6 = vcmp.lt.f32.partialorder %v3631_v24, 0.0004427343  ;;  %v3588_v4 = vsel %vm3587_vm3, %v3585_v40, %v3582_v45  ;;  %8356 = vmatprep.subr.bf16.mxu0 %v16520_v58  ;;  %v4335_v16 = vsel %vm4207_vm5, %v11442_v31, %v4079_v29  ;;  %v3646_v47 = vmul.f32 -0.5, %v12344_v22  ;;  %16567 = vst [vmem:[#allocation23_spill] sm:$0xff] %v12431_v32  ;;  %v16568_v2 = vld [vmem:[#allocation20_spill] sm:$0xff]  ;;  %v12440_v45 = vpop.f32.mrb[71].mxu1 }
 0x31f   : > { %v12416_v59 = vpop.eup %8796  ;;  %v3633_v46 = vsel %vm12411_vm6, %v3630_v44, %v3627_v12  ;;  %8806 = vlog2.f32 %v3661_v6  ;;  %v12425_v50 = vmul.f32 100.0, %v16566_v62  ;;  %v4076_v13 = vmul.f32 0.01, %v3588_v4  ;;  %16569 = vst [vmem:[#allocation31_spill] sm:$0xff] %v12440_v45 }
 0x320   : > { %v12422_v63 = vpop.eup %8798  ;;  %v3602_v1 = vadd.f32 1.0, %v3601_v48  ;;  %v3616_v37 = vadd.f32 1.0, %v12397_v17  ;;  %vm4206_vm7 = vcmp.gt.f32.partialorder %v12266_v51, 20.0  ;;  %8808 = vpow2.f32 %v2766_v10 }
 0x321   : > { %v8801_v24 = vpop.eup %8800  ;;  %v2780_v29 = vmul.f32 1.442695, %v12407_v27  ;;  %v3604_v12 = vand.u32 2147483647, %v12349_v57  ;;  %v3649_v6 = vand.u32 2147483647, %v12344_v22  ;;  %v4332_v35 = vsel %vm4204_vm4, %v16538_v52, %v4076_v13 }
 0x322   : > { %v12435_v15 = vmul.f32 100.0, %v16568_v2  ;;  %8810 = vlog2.f32 %v3616_v37  ;;  %v4081_v48 = vmul.f32 0.01, %v3633_v46  ;;  %v3647_v44 = vadd.f32 1.0, %v3646_v47  ;;  %5138 = vmatmul.mubr.f32.gmra.mrb[146].mxu1 %v4332_v35  ;;  %v7594_v35 = vld [vmem:[#allocation3 + $0x70] sm:$0xff] }
 0x323   : > { %v8803_v40 = vpop.eup %8802  ;;  %v3679_v10 = vadd.f32 1.0, %v12422_v63  ;;  %v4463_v61 = vsel %vm220_vm0, %v4335_v16, %v11442_v31  ;;  %v3645_v4 = vmul.f32 0.6931472, %v8801_v24  ;;  %v2784_v32 = vmul.f32 1.442695, %v12425_v50  ;;  %v16570_v31 = vld [vmem:[#allocation22_spill] sm:$0xff] }
 0x324   : > { %5143 = vmatprep.mubr.f32.mxu1 %v4463_v61  ;;  %v3600_v28 = vmul.f32 0.6931472, %v8803_v40  ;;  %v3603_v52 = vmul.f32 %v12349_v57, %v3602_v1  ;;  %v12448_v0 = vpop.eup %8804  ;;  %8812 = vpow2.f32 %v2780_v29  ;;  %vm3605_vm8 = vcmp.lt.f32.partialorder %v3604_v12, 0.0004427343  ;;  %v7595_v40 = vld [vmem:[#allocation3 + $0x78] sm:$0xff] }
 0x325   : > { %v3619_v46 = vmul.f32 -0.5, %v12397_v17  ;;  %v3634_v47 = vadd.f32 1.0, %v12416_v59  ;;  %vm4209_vm9 = vcmp.gt.f32.partialorder %v12201_v49, 20.0  ;;  %v2770_v13 = vmul.f32 1.442695, %v12435_v15 }
 0x326   : > { %v12455_v16 = vmul.f32 100.0, %v16570_v31  ;;  %v3606_v37 = vsel %vm3605_vm8, %v3603_v52, %v3600_v28  ;;  %v3648_v24 = vmul.f32 %v12344_v22, %v3647_v44  ;;  %vm12458_vm10 = vcmp.lt.f32.partialorder %v3649_v6, 0.0004427343  ;;  %v12468_v44 = vpop.f32.mrb[72].mxu1 }
 0x327   : > { %v3664_v1 = vmul.f32 -0.5, %v12376_v33  ;;  %8814 = vlog2.f32 %v3679_v10  ;;  %v4337_v29 = vsel %vm4209_vm9, %v11474_v21, %v4081_v48  ;;  %v3697_v12 = vadd.f32 1.0, %v12448_v0  ;;  %16573 = vst [vmem:[#allocation28_spill] sm:$0xff] %v12468_v44  ;;  %v12475_v52 = vpop.f32.mrb[73].mxu1 }
 0x328   : > { %8816 = vpow2.f32 %v2784_v32  ;;  %v4078_v49 = vmul.f32 0.01, %v3606_v37  ;;  %v3651_v28 = vsel %vm12458_vm10, %v3648_v24, %v3645_v4  ;;  %v3667_v22 = vand.u32 2147483647, %v12376_v33  ;;  %16574 = vst [vmem:[#allocation20_spill] sm:$0xff] %v12475_v52 }
 0x329   : > { %v8807_v61 = vpop.eup %8806  ;;  %v3620_v6 = vadd.f32 1.0, %v3619_v46  ;;  %8818 = vlog2.f32 %v3634_v47  ;;  %v2774_v10 = vmul.f32 1.442695, %v12455_v16  ;;  %v3622_v48 = vand.u32 2147483647, %v12397_v17 }
 0x32a   : > { %8820 = vpow2.f32 %v2770_v13  ;;  %v4334_v32 = vsel %vm4206_vm7, %v16544_v42, %v4078_v49  ;;  %v12477_v37 = vpop.eup %8808  ;;  %v3665_v4 = vadd.f32 1.0, %v3664_v1  ;;  %v12480_v24 = vmul.f32 100.0, %v11747_v8  ;;  %v16575_v49 = vld [vmem:[#allocation24_spill] sm:$0xff] }
 0x32b   : > { %5144 = vmatmul.mubr.f32.gmra.mrb[148].mxu1 %v4334_v32  ;;  %v4465_v46 = vsel %vm220_vm0, %v4337_v29, %v11474_v21  ;;  %v8357_v47 = vpack.c.bf16 %v7595_v40, %v7594_v35  ;;  %vm4208_vm11 = vcmp.gt.f32.partialorder %v12305_v26, 20.0  ;;  %v4083_v42 = vmul.f32 0.01, %v3651_v28 }
 0x32c   : > { %v8811_v13 = vpop.eup %8810  ;;  %8822 = vlog2.f32 %v3697_v12  ;;  %5149 = vmatprep.mubr.f32.mxu1 %v4465_v46  ;;  %v3637_v51 = vmul.f32 -0.5, %v12416_v59  ;;  %v3663_v57 = vmul.f32 0.6931472, %v8807_v61  ;;  %v12488_v1 = vmul.f32 100.0, %v16575_v49 }
 0x32d   : > { %v3618_v44 = vmul.f32 0.6931472, %v8811_v13  ;;  %v3621_v32 = vmul.f32 %v12397_v17, %v3620_v6  ;;  %8358 = vmatpush1.bf16.msra.mxu0 %v8357_v47  ;;  %vm4211_vm12 = vcmp.gt.f32.partialorder %v12257_v36, 20.0  ;;  %vm12492_vm13 = vcmp.lt.f32.partialorder %v3667_v22, 0.0004427343  ;;  %v12505_v6 = vpop.f32.mrb[74].mxu1 }
 0x32e   : > { %v3682_v29 = vmul.f32 -0.5, %v12422_v63  ;;  %vm3623_vm14 = vcmp.lt.f32.partialorder %v3622_v48, 0.0004427343  ;;  %8359 = vmatprep.subr.bf16.mxu0 %v16520_v58  ;;  %v12498_v12 = vpop.eup %8812  ;;  %v3666_v35 = vmul.f32 %v12376_v33, %v3665_v4  ;;  %vm4213_vm15 = vcmp.gt.f32.partialorder %v12289_v9, 20.0  ;;  %16578 = vst [vmem:[#allocation22_spill] sm:$0xff] %v12505_v6 }
 0x32f   : > { %8824 = vpow2.f32 %v2774_v10  ;;  %v2788_v17 = vmul.f32 1.442695, %v12480_v24  ;;  %v3624_v40 = vsel %vm3623_vm14, %v3621_v32, %v3618_v44  ;;  %v4339_v36 = vsel %vm4211_vm12, %v11518_v23, %v4083_v42 }
 0x330   : > { %v4080_v61 = vmul.f32 0.01, %v3624_v40  ;;  %v3638_v28 = vadd.f32 1.0, %v3637_v51  ;;  %v3652_v22 = vadd.f32 1.0, %v12477_v37  ;;  %vm4210_vm1 = vcmp.gt.f32.partialorder %v12324_v5, 20.0  ;;  %v12519_v51 = vpop.f32.mrb[75].mxu1 }
 0x331   : > { %v8815_v48 = vpop.eup %8814  ;;  %v3669_v33 = vsel %vm12492_vm13, %v3666_v35, %v3663_v57  ;;  %v3685_v4 = vand.u32 2147483647, %v12422_v63  ;;  %v2778_v10 = vmul.f32 1.442695, %v12488_v1  ;;  %v3640_v44 = vand.u32 2147483647, %v12416_v59 }
 0x332   : > { %v12513_v46 = vpop.eup %8816  ;;  %v3683_v47 = vadd.f32 1.0, %v3682_v29  ;;  %v3715_v13 = vadd.f32 1.0, %v12498_v12  ;;  %v4336_v42 = vsel %vm4208_vm11, %v16550_v60, %v4080_v61  ;;  %8826 = vlog2.f32 %v3652_v22  ;;  %16579 = vst [vmem:[#allocation24_spill] sm:$0xff] %v12519_v51  ;;  %v12555_v52 = vpop.f32.mrb[76].mxu1 }
 0x333   : > { %v8819_v32 = vpop.eup %8818  ;;  %v3700_v57 = vmul.f32 -0.5, %v12448_v0  ;;  %8828 = vpow2.f32 %v2788_v17  ;;  %v12523_v21 = vmul.f32 100.0, %v11784_v7  ;;  %5150 = vmatmul.mubr.f32.gmra.mrb[150].mxu1 %v4336_v42  ;;  %v4467_v29 = vsel %vm220_vm0, %v4339_v36, %v11518_v23  ;;  %v7596_v36 = vld [vmem:[#allocation3 + $0x80] sm:$0xff] }
 0x334   : > { %v12528_v35 = vpop.eup %8820  ;;  %v4085_v40 = vmul.f32 0.01, %v3669_v33  ;;  %v3681_v26 = vmul.f32 0.6931472, %v8815_v48  ;;  %5155 = vmatprep.mubr.f32.mxu1 %v4467_v29  ;;  %v3636_v60 = vmul.f32 0.6931472, %v8819_v32  ;;  %v3639_v61 = vmul.f32 %v12416_v59, %v3638_v28 }
 0x335   : > { %8830 = vpow2.f32 %v2778_v10  ;;  %v3733_v22 = vadd.f32 1.0, %v12513_v46  ;;  %vm3641_vm2 = vcmp.lt.f32.partialorder %v3640_v44, 0.0004427343  ;;  %v3655_v17 = vmul.f32 -0.5, %v12477_v37  ;;  %v7597_v48 = vld [vmem:[#allocation3 + $0x88] sm:$0xff]  ;;  %v16582_v28 = vld [vmem:[#allocation26_spill] sm:$0xff] }
 0x336   : > { %v8823_v6 = vpop.eup %8822  ;;  %v3684_v42 = vmul.f32 %v12422_v63, %v3683_v47  ;;  %vm12534_vm3 = vcmp.lt.f32.partialorder %v3685_v4, 0.0004427343  ;;  %8832 = vlog2.f32 %v3715_v13  ;;  %v3642_v23 = vsel %vm3641_vm2, %v3639_v61, %v3636_v60  ;;  %v16583_v29 = vld [vmem:[#allocation37_spill] sm:$0xff]  ;;  %16584 = vst [vmem:[#allocation26_spill] sm:$0xff] %v12555_v52 }
 0x337   : > { %v3701_v33 = vadd.f32 1.0, %v3700_v57  ;;  %v3703_v59 = vand.u32 2147483647, %v12448_v0  ;;  %v12540_v10 = vmul.f32 100.0, %v16582_v28  ;;  %v2792_v44 = vmul.f32 1.442695, %v12523_v21 }
 0x338   : > { %v4341_v63 = vsel %vm4213_vm15, %v16546_v14, %v4085_v40  ;;  %v3687_v4 = vsel %vm12534_vm3, %v3684_v42, %v3681_v26  ;;  %v4082_v47 = vmul.f32 0.01, %v3642_v23  ;;  %v3670_v13 = vadd.f32 1.0, %v12528_v35  ;;  %v12561_v26 = vpop.f32.mrb[77].mxu1 }
 0x339   : > { %v12549_v32 = vpop.eup %8824  ;;  %vm4212_vm4 = vcmp.gt.f32.partialorder %v12387_v20, 20.0  ;;  %v3699_v57 = vmul.f32 0.6931472, %v8823_v6  ;;  %8834 = vlog2.f32 %v3733_v22  ;;  %v12553_v60 = vmul.f32 100.0, %v16583_v29  ;;  %16585 = vst [vmem:[#allocation37_spill] sm:$0xff] %v12561_v26  ;;  %v16586_v6 = vld [vmem:[#allocation30_spill] sm:$0xff] }
 0x33a   : > { %v3656_v61 = vadd.f32 1.0, %v3655_v17  ;;  %v4338_v9 = vsel %vm4210_vm1, %v16551_v41, %v4082_v47  ;;  %v3658_v51 = vand.u32 2147483647, %v12477_v37  ;;  %8836 = vlog2.f32 %v3670_v13  ;;  %v16594_v20 = vld [vmem:[#allocation33_spill] sm:$0xff] }
 0x33b   : > { %v8360_v40 = vpack.c.bf16 %v7597_v48, %v7596_v36  ;;  %v2782_v42 = vmul.f32 1.442695, %v12540_v10  ;;  %v12565_v22 = vmul.f32 100.0, %v16586_v6  ;;  %8838 = vpow2.f32 %v2792_v44  ;;  %5156 = vmatmul.mubr.f32.gmra.mrb[152].mxu1 %v4338_v9  ;;  %v16590_v36 = vld [vmem:[#allocation32_spill] sm:$0xff] }
 0x33c   : > { %v4469_v17 = vsel %vm220_vm0, %v4341_v63, %v16546_v14  ;;  %v8827_v23 = vpop.eup %8826  ;;  %v4087_v5 = vmul.f32 0.01, %v3687_v4  ;;  %vm4215_vm5 = vcmp.gt.f32.partialorder %v12329_v30, 20.0  ;;  %v3702_v41 = vmul.f32 %v12448_v0, %v3701_v33 }
 0x33d   : > { %vm12572_vm6 = vcmp.lt.f32.partialorder %v3703_v59, 0.0004427343  ;;  %5161 = vmatprep.mubr.f32.mxu1 %v4469_v17  ;;  %8361 = vmatpush1.bf16.msra.mxu0 %v8360_v40  ;;  %v12576_v48 = vpop.eup %8828  ;;  %v3718_v44 = vmul.f32 -0.5, %v12498_v12  ;;  %v2796_v47 = vmul.f32 1.442695, %v12553_v60  ;;  %v3657_v14 = vmul.f32 %v12477_v37, %v3656_v61  ;;  %v12595_v17 = vpop.f32.mrb[78].mxu1 }
 0x33e   : > { %v3654_v13 = vmul.f32 0.6931472, %v8827_v23  ;;  %8362 = vmatprep.subr.bf16.mxu0 %v16520_v58  ;;  %v3705_v0 = vsel %vm12572_vm6, %v3702_v41, %v3699_v57  ;;  %vm3659_vm7 = vcmp.lt.f32.partialorder %v3658_v51, 0.0004427343  ;;  %v3673_v33 = vmul.f32 -0.5, %v12528_v35  ;;  %16589 = vst [vmem:[#allocation30_spill] sm:$0xff] %v12595_v17 }
 0x33f   : > { %v3688_v59 = vadd.f32 1.0, %v12549_v32  ;;  %v12586_v63 = vpop.eup %8830  ;;  %vm4217_vm8 = vcmp.gt.f32.partialorder %v12357_v38, 20.0  ;;  %8840 = vpow2.f32 %v2782_v42  ;;  %v2786_v4 = vmul.f32 1.442695, %v12565_v22  ;;  %v12600_v42 = vpop.f32.mrb[79].mxu1 }
 0x340   : > { %v3660_v9 = vsel %vm3659_vm7, %v3657_v14, %v3654_v13  ;;  %v8833_v40 = vpop.eup %8832  ;;  %v4343_v37 = vsel %vm4215_vm5, %v16552_v43, %v4087_v5  ;;  %v3721_v57 = vand.u32 2147483647, %v12498_v12  ;;  %v3751_v61 = vadd.f32 1.0, %v12576_v48  ;;  %16591 = vst [vmem:[#allocation32_spill] sm:$0xff] %v12600_v42  ;;  %v7599_v42 = vld [vmem:[#allocation3 + $0x98] sm:$0xff] }
 0x341   : > { %v4084_v51 = vmul.f32 0.01, %v3660_v9  ;;  %v4089_v23 = vmul.f32 0.01, %v3705_v0  ;;  %v3719_v41 = vadd.f32 1.0, %v3718_v44  ;;  %v12598_v52 = vmul.f32 100.0, %v16590_v36 }
 0x342   : > { %8842 = vpow2.f32 %v2796_v47  ;;  %vm4214_vm9 = vcmp.gt.f32.partialorder %v12435_v15, 20.0  ;;  %v3736_v30 = vmul.f32 -0.5, %v12513_v46  ;;  %v3674_v13 = vadd.f32 1.0, %v3673_v33 }
 0x343   : > { %v4340_v5 = vsel %vm4212_vm4, %v16561_v34, %v4084_v51  ;;  %8844 = vlog2.f32 %v3688_v59  ;;  %v8835_v14 = vpop.eup %8834  ;;  %v3717_v9 = vmul.f32 0.6931472, %v8833_v40  ;;  %v4471_v44 = vsel %vm220_vm0, %v4343_v37, %v16552_v43 }
 0x344   : > { %8846 = vpow2.f32 %v2786_v4  ;;  %5162 = vmatmul.mubr.f32.gmra.mrb[154].mxu1 %v4340_v5  ;;  %v3676_v47 = vand.u32 2147483647, %v12528_v35  ;;  %v8837_v0 = vpop.eup %8836  ;;  %vm12611_vm10 = vcmp.lt.f32.partialorder %v3721_v57, 0.0004427343  ;;  %v12616_v34 = vmul.f32 100.0, %v16594_v20 }
 0x345   : > { %8848 = vlog2.f32 %v3751_v61  ;;  %5167 = vmatprep.mubr.f32.mxu1 %v4471_v44  ;;  %v3706_v33 = vadd.f32 1.0, %v12586_v63  ;;  %v12619_v59 = vpop.eup %8838  ;;  %v3720_v4 = vmul.f32 %v12498_v12, %v3719_v41  ;;  %v3739_v43 = vand.u32 2147483647, %v12513_v46  ;;  %v7598_v44 = vld [vmem:[#allocation3 + $0x90] sm:$0xff]  ;;  %v12633_v41 = vpop.f32.mrb[80].mxu1 }
 0x346   : > { %v2790_v40 = vmul.f32 1.442695, %v12598_v52  ;;  %v3691_v37 = vmul.f32 -0.5, %v12549_v32  ;;  %v4345_v57 = vsel %vm4217_vm8, %v16557_v55, %v4089_v23  ;;  %v3737_v61 = vadd.f32 1.0, %v3736_v30  ;;  %16595 = vst [vmem:[#allocation33_spill] sm:$0xff] %v12633_v41 }
 0x347   : > { %v3672_v51 = vmul.f32 0.6931472, %v8837_v0  ;;  %v3675_v5 = vmul.f32 %v12528_v35, %v3674_v13  ;;  %v3723_v26 = vsel %vm12611_vm10, %v3720_v4, %v3717_v9  ;;  %vm4219_vm11 = vcmp.gt.f32.partialorder %v12407_v27, 20.0  ;;  %v12637_v35 = vpop.f32.mrb[81].mxu1 }
 0x348   : > { %v3754_v12 = vmul.f32 -0.5, %v12576_v48  ;;  %vm3677_vm12 = vcmp.lt.f32.partialorder %v3676_v47, 0.0004427343  ;;  %8850 = vlog2.f32 %v3706_v33  ;;  %v3735_v45 = vmul.f32 0.6931472, %v8835_v14  ;;  %16596 = vst [vmem:[#allocation39_spill] sm:$0xff] %v12637_v35 }
 0x349   : > { %v3769_v38 = vadd.f32 1.0, %v12619_v59  ;;  %v2800_v23 = vmul.f32 1.442695, %v12616_v34  ;;  %v3678_v30 = vsel %vm3677_vm12, %v3675_v5, %v3672_v51  ;;  %v12639_v13 = vpop.eup %8840  ;;  %vm4216_vm13 = vcmp.gt.f32.partialorder %v12455_v16, 20.0  ;;  %v16599_v35 = vld [vmem:[#allocation6_spill] sm:$0xff] }
 0x34a   : > { %v12643_v17 = vmul.f32 100.0, %v11910_v18  ;;  %v4086_v9 = vmul.f32 0.01, %v3678_v30  ;;  %v3692_v47 = vadd.f32 1.0, %v3691_v37  ;;  %v8363_v0 = vpack.c.bf16 %v7599_v42, %v7598_v44 }
 0x34b   : > { %v3738_v33 = vmul.f32 %v12513_v46, %v3737_v61  ;;  %vm12646_vm14 = vcmp.lt.f32.partialorder %v3739_v43, 0.0004427343  ;;  %v3694_v4 = vand.u32 2147483647, %v12549_v32  ;;  %v3709_v51 = vmul.f32 -0.5, %v12586_v63 }
 0x34c   : > { %v12652_v5 = vpop.eup %8842  ;;  %v4091_v41 = vmul.f32 0.01, %v3723_v26  ;;  %vm4221_vm15 = vcmp.gt.f32.partialorder %v12425_v50, 20.0  ;;  %8852 = vpow2.f32 %v2790_v40  ;;  %v12656_v30 = vmul.f32 100.0, %v16599_v35  ;;  %8364 = vmatpush1.bf16.msra.mxu0 %v8363_v0  ;;  %v12677_v0 = vpop.f32.mrb[82].mxu1 }
 0x34d   : > { %v4342_v46 = vsel %vm4214_vm9, %v16568_v2, %v4086_v9  ;;  %v8845_v42 = vpop.eup %8844  ;;  %v3741_v43 = vsel %vm12646_vm14, %v3738_v33, %v3735_v45  ;;  %v3755_v37 = vadd.f32 1.0, %v3754_v12  ;;  %8854 = vpow2.f32 %v2800_v23  ;;  %8365 = vmatprep.subr.bf16.mxu0 %v16520_v58  ;;  %16600 = vst [vmem:[#allocation6_spill] sm:$0xff] %v12677_v0  ;;  %v7602_v0 = vld [vmem:[#allocation3 + $0xb0] sm:$0xff] }
 0x34e   : > { %5168 = vmatmul.mubr.f32.gmra.mrb[156].mxu1 %v4342_v46  ;;  %v4473_v26 = vsel %vm220_vm0, %v4345_v57, %v16557_v55  ;;  %v12667_v40 = vpop.eup %8846  ;;  %8856 = vlog2.f32 %v3769_v38  ;;  %v2804_v15 = vmul.f32 1.442695, %v12643_v17  ;;  %v3690_v2 = vmul.f32 0.6931472, %v8845_v42  ;;  %v16602_v42 = vld [vmem:[#allocation7_spill] sm:$0xff] }
 0x34f   : > { %5173 = vmatprep.mubr.f32.mxu1 %v4473_v26  ;;  %v3693_v61 = vmul.f32 %v12549_v32, %v3692_v47  ;;  %v8849_v44 = vpop.eup %8848  ;;  %vm4218_vm1 = vcmp.gt.f32.partialorder %v12488_v1, 20.0  ;;  %v3757_v45 = vand.u32 2147483647, %v12576_v48  ;;  %vm3695_vm2 = vcmp.lt.f32.partialorder %v3694_v4, 0.0004427343  ;;  %v12683_v4 = vpop.f32.mrb[83].mxu1 }
 0x350   : > { %v3710_v12 = vadd.f32 1.0, %v3709_v51  ;;  %v3724_v55 = vadd.f32 1.0, %v12639_v13  ;;  %v2794_v57 = vmul.f32 1.442695, %v12656_v30  ;;  %v3787_v23 = vadd.f32 1.0, %v12652_v5  ;;  %16601 = vst [vmem:[#allocation40_spill] sm:$0xff] %v12683_v4 }
 0x351   : > { %v3696_v38 = vsel %vm3695_vm2, %v3693_v61, %v3690_v2  ;;  %v3712_v9 = vand.u32 2147483647, %v12586_v63  ;;  %v4347_v32 = vsel %vm4219_vm11, %v16563_v3, %v4091_v41  ;;  %v4093_v47 = vmul.f32 0.01, %v3741_v43 }
 0x352   : > { %v3756_v33 = vmul.f32 %v12576_v48, %v3755_v37  ;;  %v4088_v14 = vmul.f32 0.01, %v3696_v38  ;;  %v8851_v51 = vpop.eup %8850  ;;  %v3753_v46 = vmul.f32 0.6931472, %v8849_v44  ;;  %v12686_v26 = vmul.f32 100.0, %v16602_v42 }
 0x353   : > { %8858 = vpow2.f32 %v2804_v15  ;;  %v12689_v2 = vmul.f32 100.0, %v11946_v54  ;;  %v3708_v41 = vmul.f32 0.6931472, %v8851_v51  ;;  %v3711_v43 = vmul.f32 %v12586_v63, %v3710_v12  ;;  %v7601_v51 = vld [vmem:[#allocation3 + $0xa8] sm:$0xff] }
 0x354   : > { %v4344_v27 = vsel %vm4216_vm13, %v16570_v31, %v4088_v14  ;;  %8860 = vlog2.f32 %v3724_v55  ;;  %v3772_v48 = vmul.f32 -0.5, %v12619_v59  ;;  %v4475_v37 = vsel %vm220_vm0, %v4347_v32, %v16563_v3  ;;  %v7600_v14 = vld [vmem:[#allocation3 + $0xa0] sm:$0xff] }
 0x355   : > { %8862 = vlog2.f32 %v3787_v23  ;;  %5174 = vmatmul.mubr.f32.gmra.mrb[158].mxu1 %v4344_v27  ;;  %vm3713_vm3 = vcmp.lt.f32.partialorder %v3712_v9, 0.0004427343  ;;  %v4349_v15 = vsel %vm4221_vm15, %v16566_v62, %v4093_v47  ;;  %vm12702_vm4 = vcmp.lt.f32.partialorder %v3757_v45, 0.0004427343 }
 0x356   : > { %v3775_v31 = vand.u32 2147483647, %v12619_v59  ;;  %5179 = vmatprep.mubr.f32.mxu1 %v4475_v37  ;;  %v3714_v63 = vsel %vm3713_vm3, %v3711_v43, %v3708_v41  ;;  %v12707_v61 = vpop.eup %8852  ;;  %v3759_v44 = vsel %vm12702_vm4, %v3756_v33, %v3753_v46  ;;  %v12712_v3 = vmul.f32 100.0, %v11907_v11  ;;  %v12735_v43 = vpop.f32.mrb[84].mxu1 }
 0x357   : > { %v4090_v12 = vmul.f32 0.01, %v3714_v63  ;;  %v3727_v50 = vmul.f32 -0.5, %v12639_v13  ;;  %v12715_v55 = vpop.eup %8854  ;;  %vm4223_vm5 = vcmp.gt.f32.partialorder %v12480_v24, 20.0  ;;  %8864 = vpow2.f32 %v2794_v57  ;;  %16607 = vst [vmem:[#allocation7_spill] sm:$0xff] %v12735_v43  ;;  %v12740_v37 = vpop.f32.mrb[85].mxu1 }
 0x358   : > { %v2798_v45 = vmul.f32 1.442695, %v12686_v26  ;;  %v2808_v23 = vmul.f32 1.442695, %v12689_v2  ;;  %v8857_v38 = vpop.eup %8856  ;;  %v3773_v9 = vadd.f32 1.0, %v3772_v48  ;;  %v12721_v32 = vmul.f32 100.0, %v11978_v25 }
 0x359   : > { %v4346_v47 = vsel %vm4218_vm1, %v16575_v49, %v4090_v12  ;;  %v3742_v33 = vadd.f32 1.0, %v12667_v40  ;;  %v4095_v46 = vmul.f32 0.01, %v3759_v44  ;;  %vm12727_vm6 = vcmp.lt.f32.partialorder %v3775_v31, 0.0004427343  ;;  %16608 = vst [vmem:[#allocation41_spill] sm:$0xff] %v12740_v37 }
 0x35a   : > { %v3790_v27 = vmul.f32 -0.5, %v12652_v5  ;;  %5180 = vmatmul.mubr.f32.gmra.mrb[160].mxu1 %v4346_v47  ;;  %v4477_v41 = vsel %vm220_vm0, %v4349_v15, %v16566_v62  ;;  %vm4220_vm7 = vcmp.gt.f32.partialorder %v12540_v10, 20.0  ;;  %v3805_v49 = vadd.f32 1.0, %v12715_v55 }
 0x35b   : > { %v2802_v1 = vmul.f32 1.442695, %v12712_v3  ;;  %5185 = vmatprep.mubr.f32.mxu1 %v4477_v41  ;;  %v3728_v48 = vadd.f32 1.0, %v3727_v50  ;;  %8866 = vlog2.f32 %v3742_v33  ;;  %v3771_v16 = vmul.f32 0.6931472, %v8857_v38  ;;  %v16612_v41 = vld [vmem:[#allocation35_spill] sm:$0xff] }
 0x35c   : > { %8868 = vpow2.f32 %v2808_v23  ;;  %v3730_v31 = vand.u32 2147483647, %v12639_v13  ;;  %v8366_v63 = vpack.c.bf16 %v7601_v51, %v7600_v14  ;;  %v3774_v62 = vmul.f32 %v12619_v59, %v3773_v9  ;;  %v16609_v59 = vld [vmem:[#allocation10_spill] sm:$0xff] }
 0x35d   : > { %v12743_v44 = vpop.eup %8858  ;;  %v3793_v15 = vand.u32 2147483647, %v12652_v5  ;;  %8870 = vpow2.f32 %v2798_v45  ;;  %v2812_v12 = vmul.f32 1.442695, %v12721_v32  ;;  %v4351_v50 = vsel %vm4223_vm5, %v11747_v8, %v4095_v46 }
 0x35e   : > { %v8861_v47 = vpop.eup %8860  ;;  %v3791_v33 = vadd.f32 1.0, %v3790_v27  ;;  %v3745_v23 = vmul.f32 -0.5, %v12667_v40  ;;  %8367 = vmatpush1.bf16.msra.mxu0 %v8366_v63  ;;  %v3760_v38 = vadd.f32 1.0, %v12707_v61  ;;  %vm4225_vm8 = vcmp.gt.f32.partialorder %v12523_v21, 20.0 }
 0x35f   : > { %v8863_v14 = vpop.eup %8862  ;;  %8872 = vlog2.f32 %v3805_v49  ;;  %v12755_v9 = vmul.f32 100.0, %v16609_v59  ;;  %v3726_v45 = vmul.f32 0.6931472, %v8861_v47  ;;  %v3729_v51 = vmul.f32 %v12639_v13, %v3728_v48  ;;  %8368 = vmatprep.subr.bf16.mxu0 %v16520_v58  ;;  %v12769_v47 = vpop.f32.mrb[86].mxu1 }
 0x360   : > { %v3777_v24 = vsel %vm12727_vm6, %v3774_v62, %v3771_v16  ;;  %8874 = vpow2.f32 %v2802_v1  ;;  %v3823_v46 = vadd.f32 1.0, %v12743_v44  ;;  %vm3731_vm9 = vcmp.lt.f32.partialorder %v3730_v31, 0.0004427343  ;;  %16613 = vst [vmem:[#allocation10_spill] sm:$0xff] %v12769_v47  ;;  %v12774_v16 = vpop.f32.mrb[87].mxu1 }
 0x361   : > { %vm12762_vm10 = vcmp.lt.f32.partialorder %v3793_v15, 0.0004427343  ;;  %v12767_v49 = vmul.f32 100.0, %v16612_v41  ;;  %8876 = vpow2.f32 %v2812_v12  ;;  %v3732_v63 = vsel %vm3731_vm9, %v3729_v51, %v3726_v45  ;;  %v12771_v13 = vpop.eup %8864  ;;  %16614 = vst [vmem:[#allocation42_spill] sm:$0xff] %v12774_v16 }
 0x362   : > { %vm4222_vm11 = vcmp.gt.f32.partialorder %v12565_v22, 20.0  ;;  %v3789_v57 = vmul.f32 0.6931472, %v8863_v14  ;;  %v4092_v1 = vmul.f32 0.01, %v3732_v63  ;;  %v3746_v48 = vadd.f32 1.0, %v3745_v23 }
 0x363   : > { %8878 = vlog2.f32 %v3760_v38  ;;  %v4097_v31 = vmul.f32 0.01, %v3777_v24  ;;  %v3792_v62 = vmul.f32 %v12652_v5, %v3791_v33  ;;  %v2816_v15 = vmul.f32 1.442695, %v12755_v9  ;;  %v16615_v63 = vld [vmem:[#allocation34_spill] sm:$0xff] }
 0x364   : > { %v3748_v12 = vand.u32 2147483647, %v12667_v40  ;;  %v3808_v45 = vmul.f32 -0.5, %v12715_v55  ;;  %v3811_v51 = vand.u32 2147483647, %v12715_v55  ;;  %8880 = vlog2.f32 %v3823_v46 }
 0x365   : > { %v4348_v14 = vsel %vm4220_vm7, %v16582_v28, %v4092_v1  ;;  %v8867_v23 = vpop.eup %8866  ;;  %v2806_v38 = vmul.f32 1.442695, %v12767_v49  ;;  %v12786_v24 = vmul.f32 100.0, %v16615_v63  ;;  %v4479_v5 = vsel %vm220_vm0, %v4351_v50, %v11747_v8 }
 0x366   : > { %5186 = vmatmul.mubr.f32.gmra.mrb[162].mxu1 %v4348_v14  ;;  %v3763_v33 = vmul.f32 -0.5, %v12707_v61  ;;  %v12792_v47 = vpop.eup %8868  ;;  %v3795_v46 = vsel %vm12762_vm10, %v3792_v62, %v3789_v57  ;;  %v3826_v28 = vmul.f32 -0.5, %v12743_v44  ;;  %v3744_v10 = vmul.f32 0.6931472, %v8867_v23  ;;  %v16616_v14 = vld [vmem:[#allocation11_spill] sm:$0xff]  ;;  %v7603_v62 = vld [vmem:[#allocation3 + $0xb8] sm:$0xff] }
 0x367   : > { %5191 = vmatprep.mubr.f32.mxu1 %v4479_v5  ;;  %v3747_v1 = vmul.f32 %v12667_v40, %v3746_v48  ;;  %v12798_v43 = vpop.eup %8870  ;;  %vm4227_vm12 = vcmp.gt.f32.partialorder %v12553_v60, 20.0  ;;  %8882 = vpow2.f32 %v2816_v15  ;;  %v12802_v8 = vmul.f32 100.0, %v16616_v14  ;;  %v12813_v15 = vpop.f32.mrb[88].mxu1  ;;  %v16629_v57 = vld [vmem:[#allocation36_spill] sm:$0xff] }
 0x368   : > { %vm3749_vm13 = vcmp.lt.f32.partialorder %v3748_v12, 0.0004427343  ;;  %v3778_v50 = vadd.f32 1.0, %v12771_v13  ;;  %v4353_v27 = vsel %vm4225_vm8, %v11784_v7, %v4097_v31  ;;  %vm12808_vm14 = vcmp.lt.f32.partialorder %v3811_v51, 0.0004427343  ;;  %16619 = vst [vmem:[#allocation43_spill] sm:$0xff] %v12813_v15 }
 0x369   : > { %v3829_v40 = vand.u32 2147483647, %v12743_v44  ;;  %v3750_v48 = vsel %vm3749_vm13, %v3747_v1, %v3744_v10  ;;  %v8873_v23 = vpop.eup %8872  ;;  %v3809_v5 = vadd.f32 1.0, %v3808_v45  ;;  %v3841_v12 = vadd.f32 1.0, %v12792_v47  ;;  %v12816_v4 = vpop.f32.mrb[89].mxu1 }
 0x36a   : > { %v4094_v16 = vmul.f32 0.01, %v3750_v48  ;;  %v3764_v37 = vadd.f32 1.0, %v3763_v33  ;;  %16620 = vst [vmem:[#allocation44_spill] sm:$0xff] %v12816_v4  ;;  %v12818_v21 = vpop.eup %8874  ;;  %vm4224_vm15 = vcmp.gt.f32.partialorder %v12598_v52, 20.0  ;;  %8884 = vpow2.f32 %v2806_v38 }
 0x36b   : > { %v4099_v31 = vmul.f32 0.01, %v3795_v46  ;;  %v2810_v51 = vmul.f32 1.442695, %v12786_v24  ;;  %v3766_v10 = vand.u32 2147483647, %v12707_v61  ;;  %v12823_v1 = vpop.eup %8876  ;;  %8886 = vlog2.f32 %v3778_v50 }
 0x36c   : > { %v3827_v15 = vadd.f32 1.0, %v3826_v28  ;;  %v2820_v45 = vmul.f32 1.442695, %v12802_v8  ;;  %v4350_v33 = vsel %vm4222_vm11, %v16586_v6, %v4094_v16  ;;  %v3807_v4 = vmul.f32 0.6931472, %v8873_v23  ;;  %v16622_v28 = vld [vmem:[#allocation8_spill] sm:$0xff] }
 0x36d   : > { %v8879_v48 = vpop.eup %8878  ;;  %v12830_v63 = vmul.f32 100.0, %v16621_v53  ;;  %5192 = vmatmul.mubr.f32.gmra.mrb[164].mxu1 %v4350_v33  ;;  %v4481_v38 = vsel %vm220_vm0, %v4353_v27, %v11784_v7  ;;  %v8369_v46 = vpack.c.bf16 %v7603_v62, %v7602_v0  ;;  %8888 = vlog2.f32 %v3841_v12 }
 0x36e   : > { %v12836_v14 = vmul.f32 100.0, %v16622_v28  ;;  %5197 = vmatprep.mubr.f32.mxu1 %v4481_v38  ;;  %v3762_v41 = vmul.f32 0.6931472, %v8879_v48  ;;  %v3765_v6 = vmul.f32 %v12707_v61, %v3764_v37  ;;  %v8881_v22 = vpop.eup %8880  ;;  %v3810_v16 = vmul.f32 %v12715_v55, %v3809_v5  ;;  %v12855_v37 = vpop.f32.mrb[90].mxu1 }
 0x36f   : > { %vm4229_vm1 = vcmp.gt.f32.partialorder %v12616_v34, 20.0  ;;  %v3859_v50 = vadd.f32 1.0, %v12823_v1  ;;  %vm12842_vm2 = vcmp.lt.f32.partialorder %v3766_v10, 0.0004427343  ;;  %v3781_v7 = vmul.f32 -0.5, %v12771_v13  ;;  %8370 = vmatpush1.bf16.msra.mxu0 %v8369_v46  ;;  %16627 = vst [vmem:[#allocation13_spill] sm:$0xff] %v12855_v37 }
 0x370   : > { %vm12847_vm3 = vcmp.lt.f32.partialorder %v3829_v40, 0.0004427343  ;;  %8890 = vpow2.f32 %v2820_v45  ;;  %v3768_v61 = vsel %vm12842_vm2, %v3765_v6, %v3762_v41  ;;  %v3796_v55 = vadd.f32 1.0, %v12798_v43  ;;  %8371 = vmatprep.subr.bf16.mxu0 %v16520_v58  ;;  %v12863_v5 = vpop.f32.mrb[91].mxu1 }
 0x371   : > { %v4355_v27 = vsel %vm4227_vm12, %v16583_v29, %v4099_v31  ;;  %v3813_v40 = vsel %vm12808_vm14, %v3810_v16, %v3807_v4  ;;  %8892 = vpow2.f32 %v2810_v51  ;;  %v2824_v62 = vmul.f32 1.442695, %v12830_v63  ;;  %16628 = vst [vmem:[#allocation8_spill] sm:$0xff] %v12863_v5  ;;  %v12865_v12 = vpop.eup %8882  ;;  %v16630_v16 = vld [vmem:[#allocation15_spill] sm:$0xff] }
 0x372   : > { %v3825_v41 = vmul.f32 0.6931472, %v8881_v22  ;;  %v3828_v10 = vmul.f32 %v12743_v44, %v3827_v15  ;;  %v2814_v45 = vmul.f32 1.442695, %v12836_v14  ;;  %v4096_v33 = vmul.f32 0.01, %v3768_v61 }
 0x373   : > { %vm4226_vm4 = vcmp.gt.f32.partialorder %v12656_v30, 20.0  ;;  %v3844_v60 = vmul.f32 -0.5, %v12792_v47  ;;  %8894 = vlog2.f32 %v3859_v50  ;;  %v12872_v4 = vmul.f32 100.0, %v16629_v57 }
 0x374   : > { %v3782_v31 = vadd.f32 1.0, %v3781_v7  ;;  %v4101_v51 = vmul.f32 0.01, %v3813_v40  ;;  %v4352_v48 = vsel %vm4224_vm15, %v16590_v36, %v4096_v33  ;;  %v3784_v38 = vand.u32 2147483647, %v12771_v13  ;;  %v12878_v44 = vpop.eup %8884  ;;  %v12893_v7 = vpop.f32.mrb[92].mxu1 }
 0x375   : > { %8896 = vlog2.f32 %v3796_v55  ;;  %vm4231_vm5 = vcmp.gt.f32.partialorder %v12643_v17, 20.0  ;;  %v3847_v15 = vand.u32 2147483647, %v12792_v47  ;;  %v3877_v46 = vadd.f32 1.0, %v12865_v12  ;;  %5198 = vmatmul.mubr.f32.gmra.mrb[166].mxu1 %v4352_v48  ;;  %v8887_v22 = vpop.eup %8886  ;;  %16631 = vst [vmem:[#allocation36_spill] sm:$0xff] %v12893_v7  ;;  %v7604_v48 = vld [vmem:[#allocation3 + $0xc0] sm:$0xff] }
 0x376   : > { %8898 = vpow2.f32 %v2824_v62  ;;  %v4483_v6 = vsel %vm220_vm0, %v4355_v27, %v16583_v29  ;;  %v3831_v52 = vsel %vm12847_vm3, %v3828_v10, %v3825_v41  ;;  %v3862_v36 = vmul.f32 -0.5, %v12823_v1  ;;  %v12897_v27 = vpop.f32.mrb[93].mxu1 }
 0x377   : > { %v12890_v50 = vmul.f32 100.0, %v16630_v16  ;;  %5203 = vmatprep.mubr.f32.mxu1 %v4483_v6  ;;  %v3814_v23 = vadd.f32 1.0, %v12818_v21  ;;  %v3845_v61 = vadd.f32 1.0, %v3844_v60  ;;  %v2818_v55 = vmul.f32 1.442695, %v12872_v4  ;;  %16632 = vst [vmem:[#allocation15_spill] sm:$0xff] %v12897_v27  ;;  %v8889_v0 = vpop.eup %8888 }
 0x378   : > { %v3780_v40 = vmul.f32 0.6931472, %v8887_v22  ;;  %v3783_v29 = vmul.f32 %v12771_v13, %v3782_v31  ;;  %v4357_v62 = vsel %vm4229_vm1, %v16594_v20, %v4101_v51  ;;  %8900 = vpow2.f32 %v2814_v45  ;;  %v7605_v6 = vld [vmem:[#allocation3 + $0xc8] sm:$0xff] }
 0x379   : > { %vm3785_vm6 = vcmp.lt.f32.partialorder %v3784_v38, 0.0004427343  ;;  %v3799_v41 = vmul.f32 -0.5, %v12798_v43  ;;  %v4103_v10 = vmul.f32 0.01, %v3831_v52  ;;  %8902 = vlog2.f32 %v3877_v46 }
 0x37a   : > { %v3865_v33 = vand.u32 2147483647, %v12823_v1  ;;  %v3786_v60 = vsel %vm3785_vm6, %v3783_v29, %v3780_v40  ;;  %v12904_v22 = vpop.eup %8890  ;;  %v3863_v13 = vadd.f32 1.0, %v3862_v36  ;;  %v2828_v31 = vmul.f32 1.442695, %v12890_v50 }
 0x37b   : > { %v4098_v7 = vmul.f32 0.01, %v3786_v60  ;;  %8904 = vlog2.f32 %v3814_v23  ;;  %v12907_v34 = vpop.eup %8892  ;;  %v3843_v45 = vmul.f32 0.6931472, %v8889_v0  ;;  %v3846_v51 = vmul.f32 %v12792_v47, %v3845_v61 }
 0x37c   : > { %vm12910_vm7 = vcmp.lt.f32.partialorder %v3847_v15, 0.0004427343  ;;  %8906 = vpow2.f32 %v2818_v55  ;;  %vm4228_vm8 = vcmp.gt.f32.partialorder %v12686_v26, 20.0  ;;  %v12916_v46 = vmul.f32 100.0, %v12189_v56 }
 0x37d   : > { %v4354_v52 = vsel %vm4226_vm4, %v16599_v35, %v4098_v7  ;;  %v3800_v36 = vadd.f32 1.0, %v3799_v41  ;;  %v8372_v23 = vpack.c.bf16 %v7605_v6, %v7604_v48  ;;  %v8895_v40 = vpop.eup %8894  ;;  %v3895_v29 = vadd.f32 1.0, %v12904_v22  ;;  %v16638_v41 = vld [vmem:[#allocation9_spill] sm:$0xff] }
 0x37e   : > { %5204 = vmatmul.mubr.f32.gmra.mrb[168].mxu1 %v4354_v52  ;;  %v4485_v47 = vsel %vm220_vm0, %v4357_v62, %v16594_v20  ;;  %v3802_v15 = vand.u32 2147483647, %v12798_v43  ;;  %v3817_v61 = vmul.f32 -0.5, %v12818_v21  ;;  %v4359_v30 = vsel %vm4231_vm5, %v11910_v18, %v4103_v10  ;;  %v12936_v20 = vpop.f32.mrb[94].mxu1 }
 0x37f   : > { %v8897_v55 = vpop.eup %8896  ;;  %vm4233_vm9 = vcmp.gt.f32.partialorder %v12689_v2, 20.0  ;;  %v3864_v35 = vmul.f32 %v12823_v1, %v3863_v13  ;;  %vm12932_vm10 = vcmp.lt.f32.partialorder %v3865_v33, 0.0004427343  ;;  %8908 = vpow2.f32 %v2828_v31  ;;  %5209 = vmatprep.mubr.f32.mxu1 %v4485_v47  ;;  %8373 = vmatpush1.bf16.msra.mxu0 %v8372_v23  ;;  %16637 = vst [vmem:[#allocation45_spill] sm:$0xff] %v12936_v20  ;;  %v16639_v1 = vld [vmem:[#allocation12_spill] sm:$0xff]  ;;  %v12950_v60 = vpop.f32.mrb[95].mxu1 }
 0x380   : > { %v12938_v0 = vpop.eup %8898  ;;  %v3849_v62 = vsel %vm12910_vm7, %v3846_v51, %v3843_v45  ;;  %v3880_v17 = vmul.f32 -0.5, %v12865_v12  ;;  %v12944_v10 = vmul.f32 100.0, %v16638_v41  ;;  %v12947_v33 = vmul.f32 100.0, %v16639_v1  ;;  %8374 = vmatprep.subr.bf16.mxu0 %v16520_v58  ;;  %16640 = vst [vmem:[#allocation9_spill] sm:$0xff] %v12950_v60 }
 0x381   : > { %v3861_v48 = vmul.f32 0.6931472, %v8895_v40  ;;  %v2832_v6 = vmul.f32 1.442695, %v12916_v46  ;;  %v3798_v13 = vmul.f32 0.6931472, %v8897_v55  ;;  %v3801_v31 = vmul.f32 %v12798_v43, %v3800_v36 }
 0x382   : > { %v3883_v45 = vand.u32 2147483647, %v12865_v12  ;;  %8910 = vlog2.f32 %v3895_v29  ;;  %vm3803_vm11 = vcmp.lt.f32.partialorder %v3802_v15, 0.0004427343  ;;  %v3818_v51 = vadd.f32 1.0, %v3817_v61  ;;  %v12955_v38 = vpop.eup %8900 }
 0x383   : > { %vm4230_vm12 = vcmp.gt.f32.partialorder %v12712_v3, 20.0  ;;  %v4105_v52 = vmul.f32 0.01, %v3849_v62  ;;  %v3913_v23 = vadd.f32 1.0, %v12938_v0  ;;  %v3804_v47 = vsel %vm3803_vm11, %v3801_v31, %v3798_v13  ;;  %v8903_v20 = vpop.eup %8902 }
 0x384   : > { %v3820_v40 = vand.u32 2147483647, %v12818_v21  ;;  %v3881_v60 = vadd.f32 1.0, %v3880_v17  ;;  %v3898_v55 = vmul.f32 -0.5, %v12904_v22  ;;  %v2822_v43 = vmul.f32 1.442695, %v12944_v10 }
 0x385   : > { %v4100_v36 = vmul.f32 0.01, %v3804_v47  ;;  %v8905_v29 = vpop.eup %8904  ;;  %v3867_v15 = vsel %vm12932_vm10, %v3864_v35, %v3861_v48  ;;  %vm4235_vm13 = vcmp.gt.f32.partialorder %v12721_v32, 20.0  ;;  %v3901_v61 = vand.u32 2147483647, %v12904_v22  ;;  %v7608_v32 = vld [vmem:[#allocation3 + $0xe0] sm:$0xff] }
 0x386   : > { %v2826_v62 = vmul.f32 1.442695, %v12947_v33  ;;  %8912 = vpow2.f32 %v2832_v6  ;;  %v12967_v13 = vpop.eup %8906  ;;  %v3816_v31 = vmul.f32 0.6931472, %v8905_v29  ;;  %v3819_v47 = vmul.f32 %v12818_v21, %v3818_v51  ;;  %v16648_v29 = vld [vmem:[#allocation19_spill] sm:$0xff] }
 0x387   : > { %v4356_v17 = vsel %vm4228_vm8, %v16602_v42, %v4100_v36  ;;  %v3832_v37 = vadd.f32 1.0, %v12878_v44  ;;  %v3879_v7 = vmul.f32 0.6931472, %v8903_v20  ;;  %8914 = vlog2.f32 %v3913_v23  ;;  %v12985_v20 = vpop.f32.mrb[96].mxu1 }
 0x388   : > { %5210 = vmatmul.mubr.f32.gmra.mrb[170].mxu1 %v4356_v17  ;;  %v4487_v35 = vsel %vm220_vm0, %v4359_v30, %v11910_v18  ;;  %vm3821_vm14 = vcmp.lt.f32.partialorder %v3820_v40, 0.0004427343  ;;  %v4361_v48 = vsel %vm4233_vm9, %v11946_v54, %v4105_v52  ;;  %v3882_v26 = vmul.f32 %v12865_v12, %v3881_v60  ;;  %16643 = vst [vmem:[#allocation12_spill] sm:$0xff] %v12985_v20  ;;  %v12992_v2 = vpop.f32.mrb[97].mxu1  ;;  %v16647_v30 = vld [vmem:[#allocation14_spill] sm:$0xff]  ;;  %v16649_v17 = vld [vmem:[#allocation25_spill] sm:$0xff] }
 0x389   : > { %vm12981_vm15 = vcmp.lt.f32.partialorder %v3883_v45, 0.0004427343  ;;  %5215 = vmatprep.mubr.f32.mxu1 %v4487_v35  ;;  %v3822_v21 = vsel %vm3821_vm14, %v3819_v47, %v3816_v31  ;;  %v12987_v6 = vpop.eup %8908  ;;  %v4107_v51 = vmul.f32 0.01, %v3867_v15  ;;  %v3899_v23 = vadd.f32 1.0, %v3898_v55  ;;  %16644 = vst [vmem:[#allocation46_spill] sm:$0xff] %v12992_v2 }
 0x38a   : > { %8916 = vpow2.f32 %v2822_v43  ;;  %v12990_v18 = vmul.f32 100.0, %v12313_v19  ;;  %vm12994_vm1 = vcmp.lt.f32.partialorder %v3901_v61, 0.0004427343  ;;  %v12999_v60 = vmul.f32 100.0, %v16647_v30  ;;  %v7606_v35 = vld [vmem:[#allocation3 + $0xd0] sm:$0xff] }
 0x38b   : > { %v4102_v45 = vmul.f32 0.01, %v3822_v21  ;;  %8918 = vlog2.f32 %v3832_v37  ;;  %v3885_v52 = vsel %vm12981_vm15, %v3882_v26, %v3879_v7  ;;  %v3916_v40 = vmul.f32 -0.5, %v12938_v0  ;;  %v7607_v26 = vld [vmem:[#allocation3 + $0xd8] sm:$0xff] }
 0x38c   : > { %v3919_v55 = vand.u32 2147483647, %v12938_v0  ;;  %8920 = vpow2.f32 %v2826_v62  ;;  %v8911_v43 = vpop.eup %8910  ;;  %v3931_v36 = vadd.f32 1.0, %v12987_v6  ;;  %v13007_v15 = vmul.f32 100.0, %v16648_v29 }
 0x38d   : > { %v4358_v61 = vsel %vm4230_vm12, %v11907_v11, %v4102_v45  ;;  %v3850_v37 = vadd.f32 1.0, %v12907_v34  ;;  %v13014_v31 = vmul.f32 100.0, %v16649_v17  ;;  %v5406_v47 = vmul.f32 1.442695, %v12990_v18 }
 0x38e   : > { %5216 = vmatmul.mubr.f32.gmra.mrb[172].mxu1 %v4358_v61  ;;  %v4489_v62 = vsel %vm220_vm0, %v4361_v48, %v11946_v54  ;;  %v3835_v7 = vmul.f32 -0.5, %v12878_v44  ;;  %v13024_v11 = vsel %vm4235_vm13, %v11978_v25, %v4107_v51  ;;  %v3900_v3 = vmul.f32 %v12904_v22, %v3899_v23  ;;  %v16650_v61 = vld [vmem:[#allocation21_spill] sm:$0xff]  ;;  %v13039_v23 = vpop.f32.mrb[98].mxu1 }
 0x38f   : > { %v2830_v42 = vmul.f32 1.442695, %v12999_v60  ;;  %5221 = vmatprep.mubr.f32.mxu1 %v4489_v62  ;;  %8922 = vlog2.f32 %v3850_v37  ;;  %v4109_v45 = vmul.f32 0.01, %v3885_v52  ;;  %vm4237_vm2 = vcmp.gt.f32.partialorder %v12755_v9, 20.0  ;;  %16653 = vst [vmem:[#allocation25_spill] sm:$0xff] %v13039_v23 }
 0x390   : > { %v13028_v21 = vpop.eup %8912  ;;  %v3897_v54 = vmul.f32 0.6931472, %v8911_v43  ;;  %v3917_v48 = vadd.f32 1.0, %v3916_v40  ;;  %v13032_v20 = vmul.f32 100.0, %v16650_v61  ;;  %vm13034_vm3 = vcmp.lt.f32.partialorder %v3919_v55, 0.0004427343 }
 0x391   : > { %8924 = vlog2.f32 %v3931_v36  ;;  %v2836_v22 = vmul.f32 1.442695, %v13007_v15  ;;  %v8375_v51 = vpack.c.bf16 %v7607_v26, %v7606_v35  ;;  %v8915_v37 = vpop.eup %8914  ;;  %vm4232_vm4 = vcmp.gt.f32.partialorder %v12767_v49, 20.0  ;;  %v13044_v62 = vpop.f32.mrb[99].mxu1  ;;  %v16655_v36 = vld [vmem:[#allocation18_spill] sm:$0xff] }
 0x392   : > { %v5404_v52 = vmul.f32 1.442695, %v13014_v31  ;;  %8926 = vpow2.f32 %v5406_v47  ;;  %v3836_v40 = vadd.f32 1.0, %v3835_v7  ;;  %v3853_v43 = vmul.f32 -0.5, %v12907_v34  ;;  %16654 = vst [vmem:[#allocation47_spill] sm:$0xff] %v13044_v62  ;;  %v16656_v7 = vld [vmem:[#allocation17_spill] sm:$0xff] }
 0x393   : > { %8928 = vpow2.f32 %v2830_v42  ;;  %v3949_v55 = vadd.f32 1.0, %v13028_v21  ;;  %v13048_v2 = vmul.f32 100.0, %v16655_v36  ;;  %v3838_v35 = vand.u32 2147483647, %v12878_v44  ;;  %8376 = vmatpush1.bf16.msra.mxu0 %v8375_v51  ;;  %v13074_v36 = vpop.f32.mrb[100].mxu1 }
 0x394   : > { %v13051_v26 = vpop.eup %8916  ;;  %v3903_v23 = vsel %vm12994_vm1, %v3900_v3, %v3897_v54  ;;  %v3918_v47 = vmul.f32 %v12938_v0, %v3917_v48  ;;  %v13057_v27 = vmul.f32 100.0, %v16656_v7  ;;  %v2840_v42 = vmul.f32 1.442695, %v13032_v20  ;;  %8377 = vmatprep.subr.bf16.mxu0 %v16520_v58 }
 0x395   : > { %v8919_v62 = vpop.eup %8918  ;;  %vm4239_vm5 = vcmp.gt.f32.partialorder %v12802_v8, 20.0  ;;  %v3915_v5 = vmul.f32 0.6931472, %v8915_v37  ;;  %v3934_v51 = vmul.f32 -0.5, %v12987_v6  ;;  %8930 = vpow2.f32 %v2836_v22  ;;  %v16657_v22 = vld [vmem:[#allocation38_spill] sm:$0xff] }
 0x396   : > { %v3868_v30 = vadd.f32 1.0, %v12955_v38  ;;  %v13064_v12 = vpop.eup %8920  ;;  %vm4234_vm6 = vcmp.gt.f32.partialorder %v12786_v24, 20.0  ;;  %8932 = vpow2.f32 %v5404_v52  ;;  %v3834_v0 = vmul.f32 0.6931472, %v8919_v62  ;;  %16658 = vst [vmem:[#allocation38_spill] sm:$0xff] %v13074_v36  ;;  %v13080_v62 = vpop.f32.mrb[101].mxu1 }
 0x397   : > { %v3837_v3 = vmul.f32 %v12878_v44, %v3836_v40  ;;  %v3854_v54 = vadd.f32 1.0, %v3853_v43  ;;  %8934 = vlog2.f32 %v3949_v55  ;;  %v5410_v48 = vmul.f32 1.442695, %v13048_v2  ;;  %16659 = vst [vmem:[#allocation48_spill] sm:$0xff] %v13080_v62  ;;  %v16660_v36 = vld [vmem:[#allocation35_spill] sm:$0xff] }
 0x398   : > { %vm3839_vm7 = vcmp.lt.f32.partialorder %v3838_v35, 0.0004427343  ;;  %v3856_v37 = vand.u32 2147483647, %v12907_v34  ;;  %v4111_v7 = vmul.f32 0.01, %v3903_v23  ;;  %8936 = vpow2.f32 %v2840_v42 }
 0x399   : > { %vm4241_vm8 = vcmp.gt.f32.partialorder %v12830_v63, 20.0  ;;  %v13072_v61 = vmul.f32 100.0, %v16657_v22  ;;  %v3840_v29 = vsel %vm3839_vm7, %v3837_v3, %v3834_v0  ;;  %v8923_v52 = vpop.eup %8922  ;;  %v4365_v44 = vsel %vm4237_vm2, %v16609_v59, %v4109_v45 }
 0x39a   : > { %v3937_v40 = vand.u32 2147483647, %v12987_v6  ;;  %v4104_v43 = vmul.f32 0.01, %v3840_v29  ;;  %8938 = vlog2.f32 %v3868_v30  ;;  %v3921_v23 = vsel %vm13034_vm3, %v3918_v47, %v3915_v5  ;;  %v7609_v47 = vld [vmem:[#allocation3 + $0xe8] sm:$0xff] }
 0x39b   : > { %v2834_v55 = vmul.f32 1.442695, %v13057_v27  ;;  %v3852_v35 = vmul.f32 0.6931472, %v8923_v52  ;;  %v3855_v42 = vmul.f32 %v12907_v34, %v3854_v54  ;;  %v8925_v0 = vpop.eup %8924  ;;  %v3935_v3 = vadd.f32 1.0, %v3934_v51 }
 0x39c   : > { %8940 = vpow2.f32 %v5410_v48  ;;  %v4360_v9 = vsel %vm4232_vm4, %v16660_v36, %v4104_v43  ;;  %vm3857_vm9 = vcmp.lt.f32.partialorder %v3856_v37, 0.0004427343  ;;  %v13089_v29 = vpop.eup %8926  ;;  %v2838_v30 = vmul.f32 1.442695, %v13072_v61  ;;  %v16661_v37 = vld [vmem:[#allocation11_spill] sm:$0xff] }
 0x39d   : > { %5222 = vmatmul.mubr.f32.gmra.mrb[174].mxu1 %v4360_v9  ;;  %v4491_v5 = vsel %vm220_vm0, %v13024_v11, %v11978_v25  ;;  %v3858_v45 = vsel %vm3857_vm9, %v3855_v42, %v3852_v35  ;;  %v3871_v34 = vmul.f32 -0.5, %v12955_v38  ;;  %v13097_v51 = vpop.eup %8928  ;;  %v4113_v49 = vmul.f32 0.01, %v3921_v23  ;;  %v16664_v9 = vld [vmem:[#allocation34_spill] sm:$0xff] }
 0x39e   : > { %v3952_v36 = vmul.f32 -0.5, %v13028_v21  ;;  %5227 = vmatprep.mubr.f32.mxu1 %v4491_v5  ;;  %v4106_v54 = vmul.f32 0.01, %v3858_v45  ;;  %v3886_v48 = vadd.f32 1.0, %v12967_v13  ;;  %v13104_v52 = vsel %vm4239_vm5, %v16661_v37, %v4111_v7  ;;  %v13118_v7 = vpop.f32.mrb[102].mxu1 }
 0x39f   : > { %v3933_v25 = vmul.f32 0.6931472, %v8925_v0  ;;  %vm13106_vm10 = vcmp.lt.f32.partialorder %v3937_v40, 0.0004427343  ;;  %v3955_v43 = vand.u32 2147483647, %v13028_v21  ;;  %v13111_v35 = vpop.eup %8930  ;;  %v3936_v23 = vmul.f32 %v12987_v6, %v3935_v3 }
 0x3a0   : > { %8942 = vpow2.f32 %v2834_v55  ;;  %v5669_v42 = vadd.f32 1.0, %v13089_v29  ;;  %v4362_v8 = vsel %vm4234_vm6, %v16664_v9, %v4106_v54  ;;  %16665 = vst [vmem:[#allocation35_spill] sm:$0xff] %v13118_v7  ;;  %v13120_v0 = vpop.eup %8932  ;;  %vm4236_vm11 = vcmp.gt.f32.partialorder %v12836_v14, 20.0  ;;  %v13126_v3 = vpop.f32.mrb[103].mxu1  ;;  %v16670_v7 = vld [vmem:[#allocation16_spill] sm:$0xff] }
 0x3a1   : > { %8944 = vpow2.f32 %v2838_v30  ;;  %5228 = vmatmul.mubr.f32.gmra.mrb[176].mxu1 %v4362_v8  ;;  %v4493_v40 = vsel %vm220_vm0, %v4365_v44, %v16609_v59  ;;  %v3872_v6 = vadd.f32 1.0, %v3871_v34  ;;  %v8378_v55 = vpack.c.bf16 %v7609_v47, %v7608_v32  ;;  %16666 = vst [vmem:[#allocation11_spill] sm:$0xff] %v13126_v3  ;;  %v8935_v5 = vpop.eup %8934 }
 0x3a2   : > { %v13131_v24 = vsel %vm4241_vm8, %v16621_v53, %v4113_v49  ;;  %v3953_v45 = vadd.f32 1.0, %v3952_v36  ;;  %5233 = vmatprep.mubr.f32.mxu1 %v4493_v40  ;;  %v3874_v54 = vand.u32 2147483647, %v12955_v38  ;;  %8946 = vlog2.f32 %v3886_v48  ;;  %v13134_v30 = vpop.eup %8936  ;;  %v16669_v36 = vld [vmem:[#allocation29_spill] sm:$0xff] }
 0x3a3   : > { %v3939_v59 = vsel %vm13106_vm10, %v3936_v23, %v3933_v25  ;;  %vm13138_vm12 = vcmp.lt.f32.partialorder %v3955_v43, 0.0004427343  ;;  %v3967_v34 = vadd.f32 1.0, %v13111_v35  ;;  %8379 = vmatpush1.bf16.msra.mxu0 %v8378_v55  ;;  %v3904_v63 = vadd.f32 1.0, %v13051_v26 }
 0x3a4   : > { %v8939_v32 = vpop.eup %8938  ;;  %v3970_v47 = vmul.f32 -0.5, %v13111_v35  ;;  %v5660_v49 = vadd.f32 1.0, %v13120_v0  ;;  %8948 = vlog2.f32 %v5669_v42  ;;  %v13147_v48 = vmul.f32 100.0, %v16669_v36  ;;  %8380 = vmatprep.subr.bf16.mxu0 %v16520_v58 }
 0x3a5   : > { %vm4243_vm13 = vcmp.gt.f32.partialorder %v12890_v50, 20.0  ;;  %v3870_v25 = vmul.f32 0.6931472, %v8939_v32  ;;  %v3873_v11 = vmul.f32 %v12955_v38, %v3872_v6  ;;  %v3889_v43 = vmul.f32 -0.5, %v12967_v13 }
 0x3a6   : > { %8950 = vlog2.f32 %v3904_v63  ;;  %v13153_v23 = vpop.eup %8940  ;;  %v4115_v9 = vmul.f32 0.01, %v3939_v59  ;;  %v3954_v8 = vmul.f32 %v13028_v21, %v3953_v45  ;;  %vm3875_vm14 = vcmp.lt.f32.partialorder %v3874_v54, 0.0004427343 }
 0x3a7   : > { %v3951_v40 = vmul.f32 0.6931472, %v8935_v5  ;;  %8952 = vlog2.f32 %v3967_v34  ;;  %v3985_v58 = vadd.f32 1.0, %v13134_v30  ;;  %v3876_v55 = vsel %vm3875_vm14, %v3873_v11, %v3870_v25  ;;  %v13165_v5 = vpop.f32.mrb[104].mxu1 }
 0x3a8   : > { %v13159_v32 = vmul.f32 100.0, %v16670_v7  ;;  %v5414_v38 = vmul.f32 1.442695, %v13147_v48  ;;  %v4108_v6 = vmul.f32 0.01, %v3876_v55  ;;  %v3907_v63 = vmul.f32 -0.5, %v13051_v26 }
 0x3a9   : > { %vm4238_vm15 = vcmp.gt.f32.partialorder %v12872_v4, 20.0  ;;  %v3971_v59 = vadd.f32 1.0, %v3970_v47  ;;  %8954 = vlog2.f32 %v5660_v49  ;;  %v5687_v21 = vadd.f32 1.0, %v13153_v23  ;;  %16671 = vst [vmem:[#allocation34_spill] sm:$0xff] %v13165_v5  ;;  %v13175_v42 = vpop.f32.mrb[105].mxu1  ;;  %v16673_v5 = vld [vmem:[#allocation31_spill] sm:$0xff] }
 0x3aa   : > { %v3890_v45 = vadd.f32 1.0, %v3889_v43  ;;  %v13167_v54 = vpop.eup %8942  ;;  %v3988_v34 = vmul.f32 -0.5, %v13134_v30  ;;  %v4364_v11 = vsel %vm4236_vm11, %v16622_v28, %v4108_v6  ;;  %v3892_v55 = vand.u32 2147483647, %v12967_v13  ;;  %16672 = vst [vmem:[#allocation29_spill] sm:$0xff] %v13175_v42  ;;  %v13201_v50 = vpop.f32.mrb[106].mxu1 }
 0x3ab   : > { %v13177_v47 = vpop.eup %8944  ;;  %v3957_v49 = vsel %vm13138_vm12, %v3954_v8, %v3951_v40  ;;  %8956 = vlog2.f32 %v3985_v58  ;;  %v5672_v43 = vmul.f32 -0.5, %v13089_v29  ;;  %5234 = vmatmul.mubr.f32.gmra.mrb[178].mxu1 %v4364_v11  ;;  %v4495_v25 = vsel %vm220_vm0, %v13104_v52, %v16661_v37  ;;  %16674 = vst [vmem:[#allocation49_spill] sm:$0xff] %v13201_v50 }
 0x3ac   : > { %v8947_v14 = vpop.eup %8946  ;;  %vm4245_vm1 = vcmp.gt.f32.partialorder %v12916_v46, 20.0  ;;  %v5408_v28 = vmul.f32 1.442695, %v13159_v32  ;;  %8958 = vpow2.f32 %v5414_v38  ;;  %5239 = vmatprep.mubr.f32.mxu1 %v4495_v25  ;;  %v3908_v6 = vadd.f32 1.0, %v3907_v63 }
 0x3ad   : > { %v3922_v44 = vadd.f32 1.0, %v13064_v12  ;;  %vm4240_vm2 = vcmp.gt.f32.partialorder %v12944_v10, 20.0  ;;  %8960 = vlog2.f32 %v5687_v21  ;;  %v3888_v8 = vmul.f32 0.6931472, %v8947_v14 }
 0x3ae   : > { %v3891_v40 = vmul.f32 %v12967_v13, %v3890_v45  ;;  %v3910_v58 = vand.u32 2147483647, %v13051_v26  ;;  %v8949_v11 = vpop.eup %8948  ;;  %v4371_v37 = vsel %vm4243_vm13, %v16630_v16, %v4115_v9  ;;  %v4117_v52 = vmul.f32 0.01, %v3957_v49  ;;  %v7610_v13 = vld [vmem:[#allocation3 + $0xf0] sm:$0xff]  ;;  %v7611_v45 = vld [vmem:[#allocation3 + $0xf8] sm:$0xff] }
 0x3af   : > { %v13196_v38 = vmul.f32 100.0, %v16673_v5  ;;  %vm3893_vm3 = vcmp.lt.f32.partialorder %v3892_v55, 0.0004427343  ;;  %v5663_v25 = vmul.f32 -0.5, %v13120_v0  ;;  %v5673_v42 = vadd.f32 1.0, %v5672_v43  ;;  %v13206_v43 = vpop.f32.mrb[107].mxu1 }
 0x3b0   : > { %v8951_v63 = vpop.eup %8950  ;;  %v5675_v21 = vand.u32 2147483647, %v13089_v29  ;;  %v3894_v14 = vsel %vm3893_vm3, %v3891_v40, %v3888_v8  ;;  %v3909_v7 = vmul.f32 %v13051_v26, %v3908_v6  ;;  %8962 = vlog2.f32 %v3922_v44  ;;  %v16675_v44 = vld [vmem:[#allocation20_spill] sm:$0xff] }
 0x3b1   : > { %v4110_v3 = vmul.f32 0.01, %v3894_v14  ;;  %v3906_v62 = vmul.f32 0.6931472, %v8951_v63  ;;  %v8953_v9 = vpop.eup %8952  ;;  %v13204_v49 = vmul.f32 %v13111_v35, %v3971_v59  ;;  %v3989_v55 = vadd.f32 1.0, %v3988_v34 }
 0x3b2   : > { %v5671_v5 = vmul.f32 0.6931472, %v8949_v11  ;;  %vm3911_vm4 = vcmp.lt.f32.partialorder %v3910_v58, 0.0004427343  ;;  %v5418_v8 = vmul.f32 1.442695, %v13196_v38  ;;  %v8381_v26 = vpack.c.bf16 %v7611_v45, %v7610_v13 }
 0x3b3   : > { %v4366_v40 = vsel %vm4238_vm15, %v16629_v57, %v4110_v3  ;;  %v3912_v63 = vsel %vm3911_vm4, %v3909_v7, %v3906_v62  ;;  %v8955_v6 = vpop.eup %8954  ;;  %v13213_v14 = vmul.f32 100.0, %v16675_v44  ;;  %v4497_v59 = vsel %vm220_vm0, %v13131_v24, %v16621_v53 }
 0x3b4   : > { %5240 = vmatmul.mubr.f32.gmra.mrb[180].mxu1 %v4366_v40  ;;  %v4112_v34 = vmul.f32 0.01, %v3912_v63  ;;  %v3925_v58 = vmul.f32 -0.5, %v13064_v12  ;;  %v5664_v11 = vadd.f32 1.0, %v5663_v25  ;;  %v5666_v50 = vand.u32 2147483647, %v13120_v0  ;;  %8382 = vmatpush1.bf16.msra.mxu0 %v8381_v26 }
 0x3b5   : > { %v5674_v57 = vmul.f32 %v13089_v29, %v5673_v42  ;;  %vm6941_vm5 = vcmp.gt.f32.partialorder %v12990_v18, 20.0  ;;  %v5690_v4 = vmul.f32 -0.5, %v13153_v23  ;;  %5245 = vmatprep.mubr.f32.mxu1 %v4497_v59  ;;  %v8957_v62 = vpop.eup %8956  ;;  %v13227_v7 = vsel %vm4245_vm1, %v12189_v56, %v4117_v52  ;;  %v13267_v63 = vpop.f32.mrb[108].mxu1 }
 0x3b6   : > { %v13229_v53 = vmul.f32 0.6931472, %v8953_v9  ;;  %v16676_v3 = vand.u32 2147483647, %v13111_v35  ;;  %vm13237_vm7 = vcmp.lt.f32.partialorder %v5675_v21, 0.0004427343  ;;  %8964 = vpow2.f32 %v5408_v28  ;;  %v13241_v42 = vpop.eup %8958 }
 0x3b7   : > { %v16681_v25 = vand.u32 2147483647, %v13134_v30  ;;  %v5662_v52 = vmul.f32 0.6931472, %v8955_v6  ;;  %v5677_v35 = vsel %vm13237_vm7, %v5674_v57, %v5671_v5  ;;  %8966 = vpow2.f32 %v5418_v8  ;;  %v8961_v13 = vpop.eup %8960  ;;  %v16688_v57 = vld [vmem:[#allocation24_spill] sm:$0xff] }
 0x3b8   : > { %vm13233_vm6 = vcmp.lt.f32.partialorder %v16676_v3, 0.0004427343  ;;  %v4368_v21 = vsel %vm4240_vm2, %v16638_v41, %v4112_v34  ;;  %vm4242_vm9 = vcmp.gt.f32.partialorder %v12947_v33, 20.0  ;;  %v5422_v28 = vmul.f32 1.442695, %v13213_v14 }
 0x3b9   : > { %vm13245_vm8 = vcmp.lt.f32.partialorder %v16681_v25, 0.0004427343  ;;  %5246 = vmatmul.mubr.f32.gmra.mrb[182].mxu1 %v4368_v21  ;;  %v4499_v45 = vsel %vm220_vm0, %v4371_v37, %v16630_v16  ;;  %v3926_v9 = vadd.f32 1.0, %v3925_v58  ;;  %v3940_v40 = vadd.f32 1.0, %v13097_v51  ;;  %v16686_v37 = vld [vmem:[#allocation27_spill] sm:$0xff] }
 0x3ba   : > { %v5665_v5 = vmul.f32 %v13120_v0, %v5664_v11  ;;  %vm13261_vm10 = vcmp.lt.f32.partialorder %v5666_v50, 0.0004427343  ;;  %vm6940_vm11 = vcmp.gt.f32.partialorder %v13014_v31, 20.0  ;;  %v5691_v41 = vadd.f32 1.0, %v5690_v4  ;;  %5251 = vmatprep.mubr.f32.mxu1 %v4499_v45  ;;  %v13273_v0 = vpop.f32.mrb[109].mxu1  ;;  %v8963_v50 = vpop.eup %8962 }
 0x3bb   : > { %v3928_v10 = vand.u32 2147483647, %v13064_v12  ;;  %v6813_v26 = vmul.f32 0.01, %v5677_v35  ;;  %v5693_v16 = vand.u32 2147483647, %v13153_v23  ;;  %8968 = vlog2.f32 %v3940_v40 }
 0x3bc   : > { %v13271_v6 = vmul.f32 100.0, %v16686_v37  ;;  %16687 = vst [vmem:[#allocation20_spill] sm:$0xff] %v13273_v0  ;;  %v3987_v59 = vmul.f32 0.6931472, %v8957_v62  ;;  %v5668_v34 = vsel %vm13261_vm10, %v5665_v5, %v5662_v52  ;;  %v5689_v58 = vmul.f32 0.6931472, %v8961_v13 }
 0x3bd   : > { %v5705_v11 = vadd.f32 1.0, %v13241_v42  ;;  %8970 = vpow2.f32 %v5422_v28  ;;  %v13279_v4 = vmul.f32 100.0, %v16688_v57  ;;  %v3924_v3 = vmul.f32 0.6931472, %v8963_v50 }
 0x3be   : > { %v3927_v29 = vmul.f32 %v13064_v12, %v3926_v9  ;;  %v3990_v25 = vmul.f32 %v13134_v30, %v3989_v55  ;;  %v5692_v35 = vmul.f32 %v13153_v23, %v5691_v41  ;;  %vm3929_vm12 = vcmp.lt.f32.partialorder %v3928_v10, 0.0004427343 }
 0x3bf   : > { %v3943_v62 = vmul.f32 -0.5, %v13097_v51  ;;  %v6812_v21 = vmul.f32 0.01, %v5668_v34  ;;  %v7069_v52 = vsel %vm6941_vm5, %v12313_v19, %v6813_v26  ;;  %vm13288_vm13 = vcmp.lt.f32.partialorder %v5693_v16, 0.0004427343 }
 0x3c0   : > { %v3930_v28 = vsel %vm3929_vm12, %v3927_v29, %v3924_v3  ;;  %v3975_v12 = vsel %vm13233_vm6, %v13204_v49, %v13229_v53  ;;  %v5695_v30 = vsel %vm13288_vm13, %v5692_v35, %v5689_v58  ;;  %v3958_v55 = vadd.f32 1.0, %v13167_v54  ;;  %v13299_v45 = vpop.eup %8964  ;;  %v16693_v58 = vld [vmem:[#allocation18_spill] sm:$0xff]  ;;  %v16694_v3 = vld [vmem:[#allocation37_spill] sm:$0xff] }
 0x3c1   : > { %v4114_v23 = vmul.f32 0.01, %v3930_v28  ;;  %v3993_v18 = vsel %vm13245_vm8, %v3990_v25, %v3987_v59  ;;  %v5412_v9 = vmul.f32 1.442695, %v13271_v6  ;;  %8972 = vlog2.f32 %v5705_v11  ;;  %v13305_v5 = vpop.eup %8966  ;;  %v16697_v28 = vld [vmem:[#allocation28_spill] sm:$0xff] }
 0x3c2   : > { %v5426_v40 = vmul.f32 1.442695, %v13279_v4  ;;  %vm4244_vm14 = vcmp.gt.f32.partialorder %v12999_v60, 20.0  ;;  %v3944_v53 = vadd.f32 1.0, %v3943_v62  ;;  %8974 = vlog2.f32 %v3958_v55 }
 0x3c3   : > { %v4370_v49 = vsel %vm4242_vm9, %v16639_v1, %v4114_v23  ;;  %v7197_v24 = vsel %vm220_vm0, %v7069_v52, %v12313_v19  ;;  %v7068_v46 = vsel %vm6940_vm11, %v16649_v17, %v6812_v21  ;;  %v6815_v8 = vmul.f32 0.01, %v5695_v30  ;;  %v13322_v1 = vpop.f32.mrb[110].mxu1  ;;  %v16692_v19 = vld [vmem:[#allocation23_spill] sm:$0xff] }
 0x3c4   : > { %5252 = vmatmul.mubr.f32.gmra.mrb[184].mxu1 %v4370_v49  ;;  %v4501_v41 = vsel %vm220_vm0, %v13227_v7, %v12189_v56  ;;  %v3946_v33 = vand.u32 2147483647, %v13097_v51  ;;  %7676 = vmatprep.mubr.f32.mxu0 %v7197_v24  ;;  %16691 = vst [vmem:[#allocation27_spill] sm:$0xff] %v13322_v1  ;;  %v4119_v10 = vmul.f32 0.01, %v3975_v12  ;;  %vm4247_vm15 = vcmp.gt.f32.partialorder %v13007_v15, 20.0 }
 0x3c5   : > { %vm4249_vm1 = vcmp.gt.f32.partialorder %v13032_v20, 20.0  ;;  %v13327_v31 = vmul.f32 100.0, %v16692_v19  ;;  %5257 = vmatprep.mubr.f32.mxu1 %v4501_v41  ;;  %7677 = vmatmul.mubr.f32.vlgmr.msra.gmra.mrb[64].mxu0 %v7068_v46  ;;  %v13329_v17 = vpop.f32.mrb[111].mxu1  ;;  %v8969_v26 = vpop.eup %8968  ;;  %v4121_v16 = vmul.f32 0.01, %v3993_v18  ;;  %vm6943_vm2 = vcmp.gt.f32.partialorder %v13048_v2, 20.0 }
 0x3c6   : > { %8976 = vpow2.f32 %v5426_v40  ;;  %v3961_v56 = vmul.f32 -0.5, %v13167_v54  ;;  %v5723_v7 = vadd.f32 1.0, %v13305_v5  ;;  %v3942_v50 = vmul.f32 0.6931472, %v8969_v26  ;;  %v16695_v2 = vld [vmem:[#allocation19_spill] sm:$0xff]  ;;  %v16699_v49 = vld [vmem:[#allocation14_spill] sm:$0xff] }
 0x3c7   : > { %8978 = vpow2.f32 %v5412_v9  ;;  %v3945_v59 = vmul.f32 %v13097_v51, %v3944_v53  ;;  %v13335_v34 = vpop.eup %8970  ;;  %v7071_v11 = vsel %vm6943_vm2, %v16693_v58, %v6815_v8  ;;  %v13339_v29 = vmul.f32 100.0, %v16694_v3  ;;  %v16696_v51 = vld [vmem:[#allocation21_spill] sm:$0xff]  ;;  %v13358_v9 = vpop.f32.mrb[112].mxu1 }
 0x3c8   : > { %vm3947_vm3 = vcmp.lt.f32.partialorder %v3946_v33, 0.0004427343  ;;  %v3976_v25 = vadd.f32 1.0, %v13177_v47  ;;  %v4375_v35 = vsel %vm4247_vm15, %v16695_v2, %v4119_v10  ;;  %v5708_v62 = vmul.f32 -0.5, %v13241_v42  ;;  %16698 = vst [vmem:[#allocation24_spill] sm:$0xff] %v13358_v9  ;;  %v13365_v46 = vpop.f32.mrb[113].mxu1 }
 0x3c9   : > { %v5416_v21 = vmul.f32 1.442695, %v13327_v31  ;;  %v3948_v52 = vsel %vm3947_vm3, %v3945_v59, %v3942_v50  ;;  %v4377_v13 = vsel %vm4249_vm1, %v16696_v51, %v4121_v16  ;;  %v13351_v12 = vmul.f32 100.0, %v16697_v28 }
 0x3ca   : > { %v4116_v30 = vmul.f32 0.01, %v3948_v52  ;;  %v3962_v23 = vadd.f32 1.0, %v3961_v56  ;;  %8980 = vlog2.f32 %v5723_v7  ;;  %v5741_v55 = vadd.f32 1.0, %v13335_v34 }
 0x3cb   : > { %v3964_v15 = vand.u32 2147483647, %v13167_v54  ;;  %v7199_v18 = vsel %vm220_vm0, %v7071_v11, %v16693_v58  ;;  %v8973_v40 = vpop.eup %8972  ;;  %v5430_v20 = vmul.f32 1.442695, %v13339_v29  ;;  %8982 = vlog2.f32 %v3976_v25  ;;  %v16700_v58 = vld [vmem:[#allocation32_spill] sm:$0xff] }
 0x3cc   : > { %v4372_v53 = vsel %vm4244_vm14, %v16699_v49, %v4116_v30  ;;  %7681 = vmatprep.mubr.f32.mxu0 %v7199_v18  ;;  %v5678_v24 = vadd.f32 1.0, %v13299_v45  ;;  %v8975_v8 = vpop.eup %8974  ;;  %v5709_v41 = vadd.f32 1.0, %v5708_v62  ;;  %v5711_v33 = vand.u32 2147483647, %v13241_v42  ;;  %v16705_v18 = vld [vmem:[#allocation17_spill] sm:$0xff] }
 0x3cd   : > { %8984 = vpow2.f32 %v5416_v21  ;;  %5258 = vmatmul.mubr.f32.gmra.mrb[186].mxu1 %v4372_v53  ;;  %v4503_v10 = vsel %vm220_vm0, %v4375_v35, %v16695_v2  ;;  %v5420_v26 = vmul.f32 1.442695, %v13351_v12  ;;  %v3960_v60 = vmul.f32 0.6931472, %v8975_v8 }
 0x3ce   : > { %5263 = vmatprep.mubr.f32.mxu1 %v4503_v10  ;;  %v3963_v16 = vmul.f32 %v13167_v54, %v3962_v23  ;;  %8986 = vlog2.f32 %v5678_v24  ;;  %v5707_v56 = vmul.f32 0.6931472, %v8973_v40  ;;  %vm3965_vm4 = vcmp.lt.f32.partialorder %v3964_v15, 0.0004427343  ;;  %v16701_v54 = vld [vmem:[#allocation22_spill] sm:$0xff] }
 0x3cf   : > { %8988 = vlog2.f32 %v5741_v55  ;;  %v3979_v7 = vmul.f32 -0.5, %v13177_v47  ;;  %v5726_v59 = vmul.f32 -0.5, %v13305_v5  ;;  %v13378_v11 = vmul.f32 100.0, %v16700_v58  ;;  %v13393_v55 = vpop.f32.mrb[114].mxu1 }
 0x3d0   : > { %v13374_v50 = vpop.eup %8976  ;;  %8990 = vpow2.f32 %v5430_v20  ;;  %v3966_v25 = vsel %vm3965_vm4, %v3963_v16, %v3960_v60  ;;  %v5710_v35 = vmul.f32 %v13241_v42, %v5709_v41  ;;  %v13384_v62 = vmul.f32 100.0, %v16701_v54  ;;  %16704 = vst [vmem:[#allocation23_spill] sm:$0xff] %v13393_v55 }
 0x3d1   : > { %v13380_v2 = vpop.eup %8978  ;;  %v4118_v21 = vmul.f32 0.01, %v3966_v25  ;;  %v5681_v52 = vmul.f32 -0.5, %v13299_v45  ;;  %vm4246_vm5 = vcmp.gt.f32.partialorder %v13057_v27, 20.0  ;;  %vm13388_vm6 = vcmp.lt.f32.partialorder %v5711_v33, 0.0004427343 }
 0x3d2   : > { %v5729_v23 = vand.u32 2147483647, %v13305_v5  ;;  %8992 = vpow2.f32 %v5420_v26  ;;  %vm4248_vm7 = vcmp.gt.f32.partialorder %v13072_v61, 20.0  ;;  %v5713_v42 = vsel %vm13388_vm6, %v5710_v35, %v5707_v56  ;;  %v13400_v27 = vpop.f32.mrb[115].mxu1  ;;  %v16713_v61 = vld [vmem:[#allocation16_spill] sm:$0xff] }
 0x3d3   : > { %v5759_v15 = vadd.f32 1.0, %v13374_v50  ;;  %v4374_v40 = vsel %vm4246_vm5, %v16705_v18, %v4118_v21  ;;  %v3980_v20 = vadd.f32 1.0, %v3979_v7  ;;  %v5727_v49 = vadd.f32 1.0, %v5726_v59 }
 0x3d4   : > { %v5434_v53 = vmul.f32 1.442695, %v13378_v11  ;;  %5264 = vmatmul.mubr.f32.gmra.mrb[188].mxu1 %v4374_v40  ;;  %v4505_v24 = vsel %vm220_vm0, %v4377_v13, %v16696_v51  ;;  %v3982_v8 = vand.u32 2147483647, %v13177_v47  ;;  %v8981_v41 = vpop.eup %8980  ;;  %vm6942_vm8 = vcmp.gt.f32.partialorder %v13159_v32, 20.0 }
 0x3d5   : > { %vm6945_vm9 = vcmp.gt.f32.partialorder %v13147_v48, 20.0  ;;  %v5424_v33 = vmul.f32 1.442695, %v13384_v62  ;;  %5269 = vmatprep.mubr.f32.mxu1 %v4505_v24  ;;  %v5682_v10 = vadd.f32 1.0, %v5681_v52  ;;  %v5696_v26 = vadd.f32 1.0, %v13380_v2  ;;  %v8983_v60 = vpop.eup %8982  ;;  %v16708_v24 = vld [vmem:[#allocation39_spill] sm:$0xff] }
 0x3d6   : > { %v6817_v16 = vmul.f32 0.01, %v5713_v42  ;;  %vm13411_vm10 = vcmp.lt.f32.partialorder %v5729_v23, 0.0004427343  ;;  %v5684_v51 = vand.u32 2147483647, %v13299_v45  ;;  %8994 = vlog2.f32 %v5759_v15 }
 0x3d7   : > { %v13416_v13 = vpop.eup %8984  ;;  %v5744_v7 = vmul.f32 -0.5, %v13335_v34  ;;  %v3978_v59 = vmul.f32 0.6931472, %v8983_v60  ;;  %v3981_v25 = vmul.f32 %v13177_v47, %v3980_v20  ;;  %v5725_v21 = vmul.f32 0.6931472, %v8981_v41 }
 0x3d8   : > { %v8987_v35 = vpop.eup %8986  ;;  %v5728_v52 = vmul.f32 %v13305_v5, %v5727_v49  ;;  %8996 = vpow2.f32 %v5434_v53  ;;  %vm3983_vm11 = vcmp.lt.f32.partialorder %v3982_v8, 0.0004427343  ;;  %v5683_v18 = vmul.f32 %v13299_v45, %v5682_v10  ;;  %v13430_v5 = vpop.f32.mrb[116].mxu1  ;;  %v16710_v8 = vld [vmem:[#allocation26_spill] sm:$0xff] }
 0x3d9   : > { %v8989_v30 = vpop.eup %8988  ;;  %v3984_v23 = vsel %vm3983_vm11, %v3981_v25, %v3978_v59  ;;  %v5680_v42 = vmul.f32 0.6931472, %v8987_v35  ;;  %8998 = vlog2.f32 %v5696_v26  ;;  %v7073_v15 = vsel %vm6945_vm9, %v16669_v36, %v6817_v16  ;;  %16709 = vst [vmem:[#allocation18_spill] sm:$0xff] %v13430_v5  ;;  %v13436_v10 = vpop.f32.mrb[117].mxu1 }
 0x3da   : > { %v13422_v40 = vpop.eup %8990  ;;  %v13428_v47 = vmul.f32 100.0, %v16708_v24  ;;  %v4120_v20 = vmul.f32 0.01, %v3984_v23  ;;  %vm5685_vm12 = vcmp.lt.f32.partialorder %v5684_v51, 0.0004427343  ;;  %v5745_v49 = vadd.f32 1.0, %v5744_v7 }
 0x3db   : > { %v5747_v53 = vand.u32 2147483647, %v13335_v34  ;;  %v13434_v41 = vmul.f32 100.0, %v16710_v8  ;;  %v5686_v45 = vsel %vm5685_vm12, %v5683_v18, %v5680_v42  ;;  %16711 = vst [vmem:[#allocation37_spill] sm:$0xff] %v13436_v10  ;;  %v5731_v48 = vsel %vm13411_vm10, %v5728_v52, %v5725_v21  ;;  %v16712_v21 = vld [vmem:[#allocation40_spill] sm:$0xff] }
 0x3dc   : > { %v13438_v26 = vpop.eup %8992  ;;  %v4376_v60 = vsel %vm4248_vm7, %v16657_v22, %v4120_v20  ;;  %v6814_v16 = vmul.f32 0.01, %v5686_v45  ;;  %v5699_v51 = vmul.f32 -0.5, %v13380_v2  ;;  %v5743_v7 = vmul.f32 0.6931472, %v8989_v30 }
 0x3dd   : > { %v5777_v59 = vadd.f32 1.0, %v13422_v40  ;;  %5270 = vmatmul.mubr.f32.gmra.mrb[190].mxu1 %v4376_v60  ;;  %v7201_v25 = vsel %vm220_vm0, %v7073_v15, %v16669_v36  ;;  %v5714_v35 = vadd.f32 1.0, %v13416_v13  ;;  %9000 = vpow2.f32 %v5424_v33 }
 0x3de   : > { %v5438_v56 = vmul.f32 1.442695, %v13428_v47  ;;  %v13453_v52 = vmul.f32 100.0, %v16712_v21  ;;  %v7070_v22 = vsel %vm6942_vm8, %v16713_v61, %v6814_v16  ;;  %v5746_v30 = vmul.f32 %v13335_v34, %v5745_v49 }
 0x3df   : > { %v5762_v23 = vmul.f32 -0.5, %v13374_v50  ;;  %v5428_v42 = vmul.f32 1.442695, %v13434_v41  ;;  %7682 = vmatmul.mubr.f32.gmra.mrb[66].mxu0 %v7070_v22  ;;  %9002 = vlog2.f32 %v5714_v35  ;;  %vm6944_vm13 = vcmp.gt.f32.partialorder %v13271_v6, 20.0 }
 0x3e0   : > { %v6819_v36 = vmul.f32 0.01, %v5731_v48  ;;  %vm13462_vm14 = vcmp.lt.f32.partialorder %v5747_v53, 0.0004427343  ;;  %7686 = vmatprep.mubr.f32.mxu0 %v7201_v25  ;;  %v5700_v18 = vadd.f32 1.0, %v5699_v51  ;;  %v8995_v15 = vpop.eup %8994  ;;  %9004 = vlog2.f32 %v5777_v59  ;;  %v16716_v51 = vld [vmem:[#allocation30_spill] sm:$0xff] }
 0x3e1   : > { %v5749_v32 = vsel %vm13462_vm14, %v5746_v30, %v5743_v7  ;;  %v5702_v34 = vand.u32 2147483647, %v13380_v2  ;;  %v5732_v20 = vadd.f32 1.0, %v13438_v26  ;;  %vm6947_vm15 = vcmp.gt.f32.partialorder %v13196_v38, 20.0  ;;  %v13479_v59 = vpop.f32.mrb[118].mxu1  ;;  %v16718_v25 = vld [vmem:[#allocation31_spill] sm:$0xff] }
 0x3e2   : > { %v13470_v49 = vpop.eup %8996  ;;  %9006 = vpow2.f32 %v5438_v56  ;;  %v5442_v53 = vmul.f32 1.442695, %v13453_v52  ;;  %v5717_v45 = vmul.f32 -0.5, %v13416_v13  ;;  %v5763_v60 = vadd.f32 1.0, %v5762_v23  ;;  %16717 = vst [vmem:[#allocation19_spill] sm:$0xff] %v13479_v59  ;;  %v13483_v56 = vpop.f32.mrb[119].mxu1 }
 0x3e3   : > { %v8999_v48 = vpop.eup %8998  ;;  %v5765_v16 = vand.u32 2147483647, %v13374_v50  ;;  %9008 = vpow2.f32 %v5428_v42  ;;  %v13477_v7 = vmul.f32 100.0, %v16716_v51  ;;  %v7075_v35 = vsel %vm6947_vm15, %v16718_v25, %v6819_v36  ;;  %16719 = vst [vmem:[#allocation21_spill] sm:$0xff] %v13483_v56  ;;  %v16720_v36 = vld [vmem:[#allocation41_spill] sm:$0xff]  ;;  %v13515_v55 = vpop.f32.mrb[120].mxu1 }
 0x3e4   : > { %v6821_v61 = vmul.f32 0.01, %v5749_v32  ;;  %v5698_v22 = vmul.f32 0.6931472, %v8999_v48  ;;  %v5701_v38 = vmul.f32 %v13380_v2, %v5700_v18  ;;  %v5780_v30 = vmul.f32 -0.5, %v13422_v40  ;;  %16724 = vst [vmem:[#allocation28_spill] sm:$0xff] %v13515_v55 }
 0x3e5   : > { %v5795_v23 = vadd.f32 1.0, %v13470_v49  ;;  %vm5703_vm1 = vcmp.lt.f32.partialorder %v5702_v34, 0.0004427343  ;;  %9010 = vlog2.f32 %v5732_v20  ;;  %vm6946_vm2 = vcmp.gt.f32.partialorder %v13327_v31, 20.0  ;;  %v16721_v34 = vld [vmem:[#allocation33_spill] sm:$0xff]  ;;  %v13522_v6 = vpop.f32.mrb[121].mxu1 }
 0x3e6   : > { %v5761_v42 = vmul.f32 0.6931472, %v8995_v15  ;;  %9012 = vpow2.f32 %v5442_v53  ;;  %v5704_v33 = vsel %vm5703_vm1, %v5701_v38, %v5698_v22  ;;  %v5718_v59 = vadd.f32 1.0, %v5717_v45  ;;  %16725 = vst [vmem:[#allocation14_spill] sm:$0xff] %v13522_v6 }
 0x3e7   : > { %vm6949_vm3 = vcmp.gt.f32.partialorder %v13213_v14, 20.0  ;;  %v13490_v32 = vmul.f32 100.0, %v16720_v36  ;;  %v6816_v2 = vmul.f32 0.01, %v5704_v33  ;;  %v5720_v18 = vand.u32 2147483647, %v13416_v13  ;;  %v13493_v48 = vpop.eup %9000 }
 0x3e8   : > { %v5764_v5 = vmul.f32 %v13374_v50, %v5763_v60  ;;  %vm6951_vm4 = vcmp.gt.f32.partialorder %v13279_v4, 20.0  ;;  %v13498_v20 = vmul.f32 100.0, %v16721_v34  ;;  %v7203_v15 = vsel %vm220_vm0, %v7075_v35, %v16718_v25 }
 0x3e9   : > { %v5735_v53 = vmul.f32 -0.5, %v13438_v26  ;;  %v9003_v45 = vpop.eup %9002  ;;  %vm13504_vm5 = vcmp.lt.f32.partialorder %v5765_v16, 0.0004427343  ;;  %v5432_v38 = vmul.f32 1.442695, %v13477_v7  ;;  %9014 = vlog2.f32 %v5795_v23 }
 0x3ea   : > { %v7072_v50 = vsel %vm6944_vm13, %v16686_v37, %v6816_v2  ;;  %v5767_v60 = vsel %vm13504_vm5, %v5764_v5, %v5761_v42  ;;  %v5781_v33 = vadd.f32 1.0, %v5780_v30  ;;  %v5716_v25 = vmul.f32 0.6931472, %v9003_v45  ;;  %v9005_v16 = vpop.eup %9004 }
 0x3eb   : > { %7687 = vmatmul.mubr.f32.gmra.mrb[68].mxu0 %v7072_v50  ;;  %v5719_v35 = vmul.f32 %v13416_v13, %v5718_v59  ;;  %v7077_v56 = vsel %vm6949_vm3, %v16675_v44, %v6821_v61  ;;  %v5446_v23 = vmul.f32 1.442695, %v13490_v32  ;;  %vm5721_vm6 = vcmp.lt.f32.partialorder %v5720_v18, 0.0004427343 }
 0x3ec   : > { %7691 = vmatprep.mubr.f32.mxu0 %v7203_v15  ;;  %v5750_v37 = vadd.f32 1.0, %v13493_v48  ;;  %v13524_v5 = vpop.eup %9006  ;;  %vm6948_vm7 = vcmp.gt.f32.partialorder %v13351_v12, 20.0  ;;  %v5783_v13 = vand.u32 2147483647, %v13422_v40  ;;  %v5436_v59 = vmul.f32 1.442695, %v13498_v20 }
 0x3ed   : > { %v5722_v30 = vsel %vm5721_vm6, %v5719_v35, %v5716_v25  ;;  %v5736_v42 = vadd.f32 1.0, %v5735_v53  ;;  %v13529_v14 = vpop.eup %9008  ;;  %v6823_v61 = vmul.f32 0.01, %v5767_v60  ;;  %v5738_v18 = vand.u32 2147483647, %v13438_v26  ;;  %v16726_v35 = vld [vmem:[#allocation42_spill] sm:$0xff] }
 0x3ee   : > { %v6818_v2 = vmul.f32 0.01, %v5722_v30  ;;  %9016 = vlog2.f32 %v5750_v37  ;;  %v5779_v15 = vmul.f32 0.6931472, %v9005_v16  ;;  %v5798_v45 = vmul.f32 -0.5, %v13470_v49 }
 0x3ef   : > { %9018 = vpow2.f32 %v5432_v38  ;;  %v7205_v22 = vsel %vm220_vm0, %v7077_v56, %v16675_v44  ;;  %v9011_v50 = vpop.eup %9010  ;;  %v5782_v55 = vmul.f32 %v13422_v40, %v5781_v33  ;;  %v5813_v53 = vadd.f32 1.0, %v13524_v5 }
 0x3f0   : > { %9020 = vpow2.f32 %v5446_v23  ;;  %v7074_v60 = vsel %vm6946_vm2, %v16692_v19, %v6818_v2  ;;  %v13541_v25 = vpop.eup %9012  ;;  %v13544_v38 = vmul.f32 100.0, %v16726_v35  ;;  %v5734_v16 = vmul.f32 0.6931472, %v9011_v50  ;;  %v13555_v19 = vpop.f32.mrb[122].mxu1 }
 0x3f1   : > { %7692 = vmatmul.mubr.f32.gmra.mrb[70].mxu0 %v7074_v60  ;;  %v5737_v37 = vmul.f32 %v13438_v26, %v5736_v42  ;;  %v5753_v44 = vmul.f32 -0.5, %v13493_v48  ;;  %v7079_v40 = vsel %vm6951_vm4, %v16688_v57, %v6823_v61  ;;  %vm13551_vm8 = vcmp.lt.f32.partialorder %v5783_v13, 0.0004427343  ;;  %16729 = vst [vmem:[#allocation32_spill] sm:$0xff] %v13555_v19  ;;  %v16730_v26 = vld [vmem:[#allocation6_spill] sm:$0xff]  ;;  %v13562_v42 = vpop.f32.mrb[123].mxu1 }
 0x3f2   : > { %9022 = vpow2.f32 %v5436_v59  ;;  %7696 = vmatprep.mubr.f32.mxu0 %v7205_v22  ;;  %vm5739_vm9 = vcmp.lt.f32.partialorder %v5738_v18, 0.0004427343  ;;  %v5785_v31 = vsel %vm13551_vm8, %v5782_v55, %v5779_v15  ;;  %v5799_v33 = vadd.f32 1.0, %v5798_v45  ;;  %16731 = vst [vmem:[#allocation22_spill] sm:$0xff] %v13562_v42  ;;  %v16732_v18 = vld [vmem:[#allocation44_spill] sm:$0xff] }
 0x3f3   : > { %v13560_v23 = vmul.f32 100.0, %v16730_v26  ;;  %v5740_v30 = vsel %vm5739_vm9, %v5737_v37, %v5734_v16  ;;  %v9015_v4 = vpop.eup %9014  ;;  %9024 = vlog2.f32 %v5813_v53  ;;  %v5831_v13 = vadd.f32 1.0, %v13541_v25 }
 0x3f4   : > { %v6820_v61 = vmul.f32 0.01, %v5740_v30  ;;  %v5768_v59 = vadd.f32 1.0, %v13529_v14  ;;  %v5450_v2 = vmul.f32 1.442695, %v13544_v38  ;;  %v13568_v22 = vmul.f32 100.0, %v16732_v18 }
 0x3f5   : > { %v7207_v55 = vsel %vm220_vm0, %v7079_v40, %v16688_v57  ;;  %v5754_v15 = vadd.f32 1.0, %v5753_v44  ;;  %v6825_v45 = vmul.f32 0.01, %v5785_v31  ;;  %v5801_v50 = vand.u32 2147483647, %v13470_v49 }
 0x3f6   : > { %v7076_v53 = vsel %vm6948_vm7, %v16697_v28, %v6820_v61  ;;  %v5756_v60 = vand.u32 2147483647, %v13493_v48  ;;  %vm6950_vm10 = vcmp.gt.f32.partialorder %v13384_v62, 20.0  ;;  %v5797_v16 = vmul.f32 0.6931472, %v9015_v4  ;;  %v16736_v61 = vld [vmem:[#allocation7_spill] sm:$0xff] }
 0x3f7   : > { %v5440_v37 = vmul.f32 1.442695, %v13560_v23  ;;  %7697 = vmatmul.mubr.f32.gmra.mrb[72].mxu0 %v7076_v53  ;;  %9026 = vlog2.f32 %v5768_v59  ;;  %vm6953_vm11 = vcmp.gt.f32.partialorder %v13339_v29, 20.0  ;;  %v5800_v57 = vmul.f32 %v13470_v49, %v5799_v33  ;;  %v13595_v33 = vpop.f32.mrb[124].mxu1 }
 0x3f8   : > { %v9017_v56 = vpop.eup %9016  ;;  %v5816_v44 = vmul.f32 -0.5, %v13524_v5  ;;  %9028 = vlog2.f32 %v5831_v13  ;;  %7701 = vmatprep.mubr.f32.mxu0 %v7207_v55  ;;  %v5454_v28 = vmul.f32 1.442695, %v13568_v22  ;;  %v5755_v31 = vmul.f32 %v13493_v48, %v5754_v15  ;;  %16735 = vst [vmem:[#allocation17_spill] sm:$0xff] %v13595_v33 }
 0x3f9   : > { %v13583_v12 = vpop.eup %9018  ;;  %9030 = vpow2.f32 %v5450_v2  ;;  %v5752_v40 = vmul.f32 0.6931472, %v9017_v56  ;;  %v7081_v4 = vsel %vm6953_vm11, %v16694_v3, %v6825_v45  ;;  %vm13590_vm12 = vcmp.lt.f32.partialorder %v5801_v50, 0.0004427343  ;;  %v13602_v2 = vpop.f32.mrb[125].mxu1  ;;  %v16738_v50 = vld [vmem:[#allocation8_spill] sm:$0xff] }
 0x3fa   : > { %v13587_v30 = vpop.eup %9020  ;;  %vm5757_vm13 = vcmp.lt.f32.partialorder %v5756_v60, 0.0004427343  ;;  %v5771_v49 = vmul.f32 -0.5, %v13529_v14  ;;  %v5803_v13 = vsel %vm13590_vm12, %v5800_v57, %v5797_v16  ;;  %9032 = vpow2.f32 %v5440_v37  ;;  %16737 = vst [vmem:[#allocation39_spill] sm:$0xff] %v13602_v2 }
 0x3fb   : > { %v13600_v59 = vmul.f32 100.0, %v16736_v61  ;;  %v5758_v48 = vsel %vm5757_vm13, %v5755_v31, %v5752_v40  ;;  %v5817_v15 = vadd.f32 1.0, %v5816_v44  ;;  %v5819_v45 = vand.u32 2147483647, %v13524_v5 }
 0x3fc   : > { %v13604_v55 = vpop.eup %9022  ;;  %v13608_v53 = vmul.f32 100.0, %v16738_v50  ;;  %v6822_v60 = vmul.f32 0.01, %v5758_v48  ;;  %v5849_v56 = vadd.f32 1.0, %v13587_v30  ;;  %9034 = vpow2.f32 %v5454_v28  ;;  %v16741_v48 = vld [vmem:[#allocation10_spill] sm:$0xff] }
 0x3fd   : > { %v7209_v16 = vsel %vm220_vm0, %v7081_v4, %v16694_v3  ;;  %v5786_v37 = vadd.f32 1.0, %v13583_v12  ;;  %v9025_v57 = vpop.eup %9024  ;;  %v6827_v40 = vmul.f32 0.01, %v5803_v13  ;;  %v5834_v31 = vmul.f32 -0.5, %v13541_v25 }
 0x3fe   : > { %v7078_v44 = vsel %vm6950_vm10, %v16701_v54, %v6822_v60  ;;  %v5772_v29 = vadd.f32 1.0, %v5771_v49  ;;  %vm6952_vm14 = vcmp.gt.f32.partialorder %v13434_v41, 20.0  ;;  %vm6955_vm15 = vcmp.gt.f32.partialorder %v13378_v11, 20.0 }
 0x3ff   : > { %7702 = vmatmul.mubr.f32.gmra.mrb[74].mxu0 %v7078_v44  ;;  %v5774_v28 = vand.u32 2147483647, %v13529_v14  ;;  %9036 = vlog2.f32 %v5786_v37  ;;  %vm13622_vm1 = vcmp.lt.f32.partialorder %v5819_v45, 0.0004427343  ;;  %v5444_v4 = vmul.f32 1.442695, %v13600_v59 }
 0x400   : > { %v5458_v13 = vmul.f32 1.442695, %v13608_v53  ;;  %7706 = vmatprep.mubr.f32.mxu0 %v7209_v16  ;;  %v5815_v54 = vmul.f32 0.6931472, %v9025_v57  ;;  %v5818_v49 = vmul.f32 %v13524_v5, %v5817_v15  ;;  %9038 = vlog2.f32 %v5849_v56  ;;  %v16742_v16 = vld [vmem:[#allocation15_spill] sm:$0xff]  ;;  %v13642_v56 = vpop.f32.mrb[126].mxu1 }
 0x401   : > { %v9027_v62 = vpop.eup %9026  ;;  %v13630_v11 = vmul.f32 100.0, %v16741_v48  ;;  %v7083_v37 = vsel %vm6955_vm15, %v16700_v58, %v6827_v40  ;;  %v5835_v45 = vadd.f32 1.0, %v5834_v31  ;;  %v5773_v33 = vmul.f32 %v13529_v14, %v5772_v29  ;;  %16743 = vst [vmem:[#allocation26_spill] sm:$0xff] %v13642_v56  ;;  %v13646_v31 = vpop.f32.mrb[127].mxu1 }
 0x402   : > { %v9029_v60 = vpop.eup %9028  ;;  %v5770_v44 = vmul.f32 0.6931472, %v9027_v62  ;;  %vm6957_vm2 = vcmp.gt.f32.partialorder %v13428_v47, 20.0  ;;  %v13638_v2 = vmul.f32 100.0, %v16742_v16  ;;  %vm5775_vm3 = vcmp.lt.f32.partialorder %v5774_v28, 0.0004427343 }
 0x403   : > { %v13634_v19 = vpop.eup %9030  ;;  %v5789_v5 = vmul.f32 -0.5, %v13583_v12  ;;  %v5804_v15 = vadd.f32 1.0, %v13604_v55  ;;  %v5837_v57 = vand.u32 2147483647, %v13541_v25  ;;  %v5852_v40 = vmul.f32 -0.5, %v13587_v30  ;;  %16744 = vst [vmem:[#allocation40_spill] sm:$0xff] %v13646_v31 }
 0x404   : > { %9040 = vpow2.f32 %v5458_v13  ;;  %v5776_v14 = vsel %vm5775_vm3, %v5773_v33, %v5770_v44  ;;  %v13648_v29 = vpop.eup %9032  ;;  %v5821_v62 = vsel %vm13622_vm1, %v5818_v49, %v5815_v54  ;;  %v5448_v28 = vmul.f32 1.442695, %v13630_v11 }
 0x405   : > { %v6824_v42 = vmul.f32 0.01, %v5776_v14  ;;  %9042 = vlog2.f32 %v5804_v15  ;;  %v5833_v6 = vmul.f32 0.6931472, %v9029_v60  ;;  %v5867_v56 = vadd.f32 1.0, %v13634_v19 }
 0x406   : > { %9044 = vpow2.f32 %v5444_v4  ;;  %v7211_v13 = vsel %vm220_vm0, %v7083_v37, %v16700_v58  ;;  %v13657_v33 = vpop.eup %9034  ;;  %vm6954_vm4 = vcmp.gt.f32.partialorder %v13477_v7, 20.0  ;;  %v5836_v44 = vmul.f32 %v13541_v25, %v5835_v45  ;;  %v16747_v25 = vld [vmem:[#allocation43_spill] sm:$0xff] }
 0x407   : > { %v5462_v3 = vmul.f32 1.442695, %v13638_v2  ;;  %v7080_v54 = vsel %vm6952_vm14, %v16710_v8, %v6824_v42  ;;  %v5790_v49 = vadd.f32 1.0, %v5789_v5  ;;  %v6829_v4 = vmul.f32 0.01, %v5821_v62  ;;  %v16749_v62 = vld [vmem:[#allocation13_spill] sm:$0xff] }
 0x408   : > { %vm6959_vm5 = vcmp.gt.f32.partialorder %v13453_v52, 20.0  ;;  %v5853_v60 = vadd.f32 1.0, %v5852_v40  ;;  %7707 = vmatmul.mubr.f32.gmra.mrb[76].mxu0 %v7080_v54  ;;  %v5792_v58 = vand.u32 2147483647, %v13583_v12  ;;  %v5807_v37 = vmul.f32 -0.5, %v13604_v55  ;;  %v13680_v40 = vpop.f32.mrb[128].mxu1 }
 0x409   : > { %v9037_v15 = vpop.eup %9036  ;;  %vm13668_vm6 = vcmp.lt.f32.partialorder %v5837_v57, 0.0004427343  ;;  %9046 = vpow2.f32 %v5448_v28  ;;  %v13673_v45 = vmul.f32 100.0, %v16747_v25  ;;  %7711 = vmatprep.mubr.f32.mxu0 %v7211_v13  ;;  %v5822_v8 = vadd.f32 1.0, %v13648_v29  ;;  %16748 = vst [vmem:[#allocation16_spill] sm:$0xff] %v13680_v40  ;;  %v13686_v31 = vpop.f32.mrb[129].mxu1 }
 0x40a   : > { %v5839_v41 = vsel %vm13668_vm6, %v5836_v44, %v5833_v6  ;;  %v5855_v42 = vand.u32 2147483647, %v13587_v30  ;;  %9048 = vlog2.f32 %v5867_v56  ;;  %v5885_v5 = vadd.f32 1.0, %v13657_v33  ;;  %v9039_v57 = vpop.eup %9038  ;;  %16750 = vst [vmem:[#allocation30_spill] sm:$0xff] %v13686_v31 }
 0x40b   : > { %v13683_v54 = vmul.f32 100.0, %v16749_v62  ;;  %9050 = vpow2.f32 %v5462_v3  ;;  %v5788_v28 = vmul.f32 0.6931472, %v9037_v15  ;;  %v5791_v13 = vmul.f32 %v13583_v12, %v5790_v49 }
 0x40c   : > { %vm6956_vm7 = vcmp.gt.f32.partialorder %v13498_v20, 20.0  ;;  %v7085_v6 = vsel %vm6957_vm2, %v16708_v24, %v6829_v4  ;;  %v5854_v56 = vmul.f32 %v13587_v30, %v5853_v60  ;;  %vm5793_vm8 = vcmp.lt.f32.partialorder %v5792_v58, 0.0004427343  ;;  %v16751_v30 = vld [vmem:[#allocation9_spill] sm:$0xff] }
 0x40d   : > { %v5808_v44 = vadd.f32 1.0, %v5807_v37  ;;  %v6831_v14 = vmul.f32 0.01, %v5839_v41  ;;  %v5794_v40 = vsel %vm5793_vm8, %v5791_v13, %v5788_v28  ;;  %v5810_v10 = vand.u32 2147483647, %v13604_v55  ;;  %v13720_v13 = vpop.f32.mrb[130].mxu1 }
 0x40e   : > { %9052 = vlog2.f32 %v5822_v8  ;;  %v13694_v3 = vpop.eup %9040  ;;  %v5851_v12 = vmul.f32 0.6931472, %v9039_v57  ;;  %v5452_v49 = vmul.f32 1.442695, %v13673_v45  ;;  %v6826_v15 = vmul.f32 0.01, %v5794_v40 }
 0x40f   : > { %9054 = vlog2.f32 %v5885_v5  ;;  %v9043_v31 = vpop.eup %9042  ;;  %v5870_v47 = vmul.f32 -0.5, %v13634_v19  ;;  %v5456_v4 = vmul.f32 1.442695, %v13683_v54  ;;  %v13700_v60 = vmul.f32 100.0, %v16751_v30  ;;  %16754 = vst [vmem:[#allocation31_spill] sm:$0xff] %v13720_v13  ;;  %v13725_v52 = vpop.f32.mrb[131].mxu1 }
 0x410   : > { %v7213_v58 = vsel %vm220_vm0, %v7085_v6, %v16708_v24  ;;  %v13705_v37 = vpop.eup %9044  ;;  %v7082_v8 = vsel %vm6954_vm4, %v16716_v51, %v6826_v15  ;;  %v5806_v41 = vmul.f32 0.6931472, %v9043_v31  ;;  %v5809_v5 = vmul.f32 %v13604_v55, %v5808_v44  ;;  %16755 = vst [vmem:[#allocation41_spill] sm:$0xff] %v13725_v52  ;;  %v16768_v52 = vld [vmem:[#allocation12_spill] sm:$0xff] }
 0x411   : > { %v5825_v40 = vmul.f32 -0.5, %v13648_v29  ;;  %v7087_v57 = vsel %vm6959_vm5, %v16712_v21, %v6831_v14  ;;  %vm13715_vm9 = vcmp.lt.f32.partialorder %v5855_v42, 0.0004427343  ;;  %v5903_v24 = vadd.f32 1.0, %v13694_v3  ;;  %7712 = vmatmul.mubr.f32.gmra.mrb[78].mxu0 %v7082_v8 }
 0x412   : > { %vm5811_vm10 = vcmp.lt.f32.partialorder %v5810_v10, 0.0004427343  ;;  %v5857_v51 = vsel %vm13715_vm9, %v5854_v56, %v5851_v12  ;;  %v5873_v7 = vand.u32 2147483647, %v13634_v19  ;;  %9056 = vpow2.f32 %v5452_v49  ;;  %7716 = vmatprep.mubr.f32.mxu0 %v7213_v58 }
 0x413   : > { %v5812_v55 = vsel %vm5811_vm10, %v5809_v5, %v5806_v41  ;;  %v13727_v31 = vpop.eup %9046  ;;  %v5888_v42 = vmul.f32 -0.5, %v13657_v33  ;;  %9058 = vpow2.f32 %v5456_v4  ;;  %v5466_v6 = vmul.f32 1.442695, %v13700_v60  ;;  %v16757_v5 = vld [vmem:[#allocation46_spill] sm:$0xff] }
 0x414   : > { %v6828_v10 = vmul.f32 0.01, %v5812_v55  ;;  %v9049_v44 = vpop.eup %9048  ;;  %v5871_v14 = vadd.f32 1.0, %v5870_v47  ;;  %v7215_v56 = vsel %vm220_vm0, %v7087_v57, %v16712_v21  ;;  %v5826_v12 = vadd.f32 1.0, %v5825_v40  ;;  %v16756_v47 = vld [vmem:[#allocation36_spill] sm:$0xff] }
 0x415   : > { %v5840_v49 = vadd.f32 1.0, %v13705_v37  ;;  %v13735_v15 = vpop.eup %9050  ;;  %v6833_v58 = vmul.f32 0.01, %v5857_v51  ;;  %9060 = vlog2.f32 %v5903_v24  ;;  %v5828_v8 = vand.u32 2147483647, %v13648_v29 }
 0x416   : > { %v7084_v4 = vsel %vm6956_vm7, %v16721_v34, %v6828_v10  ;;  %vm6958_vm11 = vcmp.gt.f32.partialorder %v13560_v23, 20.0  ;;  %v13743_v41 = vmul.f32 100.0, %v16756_v47  ;;  %v13746_v21 = vmul.f32 100.0, %v16757_v5 }
 0x417   : > { %7717 = vmatmul.mubr.f32.gmra.mrb[80].mxu0 %v7084_v4  ;;  %9062 = vlog2.f32 %v5840_v49  ;;  %vm6961_vm12 = vcmp.gt.f32.partialorder %v13490_v32, 20.0  ;;  %vm13749_vm13 = vcmp.lt.f32.partialorder %v5873_v7, 0.0004427343  ;;  %v5889_v34 = vadd.f32 1.0, %v5888_v42  ;;  %v13758_v7 = vpop.f32.mrb[132].mxu1 }
 0x418   : > { %v9053_v40 = vpop.eup %9052  ;;  %9064 = vpow2.f32 %v5466_v6  ;;  %7721 = vmatprep.mubr.f32.mxu0 %v7215_v56  ;;  %v5869_v28 = vmul.f32 0.6931472, %v9049_v44  ;;  %v5921_v24 = vadd.f32 1.0, %v13735_v15  ;;  %v5827_v55 = vmul.f32 %v13648_v29, %v5826_v12  ;;  %16760 = vst [vmem:[#allocation33_spill] sm:$0xff] %v13758_v7  ;;  %v13763_v4 = vpop.f32.mrb[133].mxu1 }
 0x419   : > { %v9055_v20 = vpop.eup %9054  ;;  %v5824_v51 = vmul.f32 0.6931472, %v9053_v40  ;;  %v7089_v10 = vsel %vm6961_vm12, %v16720_v36, %v6833_v58  ;;  %v5872_v49 = vmul.f32 %v13634_v19, %v5871_v14  ;;  %v5891_v32 = vand.u32 2147483647, %v13657_v33  ;;  %16761 = vst [vmem:[#allocation42_spill] sm:$0xff] %v13763_v4  ;;  %v13808_v13 = vpop.f32.mrb[134].mxu1 }
 0x41a   : > { %vm5829_vm14 = vcmp.lt.f32.partialorder %v5828_v8, 0.0004427343  ;;  %v5460_v42 = vmul.f32 1.442695, %v13743_v41  ;;  %v5470_v6 = vmul.f32 1.442695, %v13746_v21  ;;  %v5890_v29 = vmul.f32 %v13657_v33, %v5889_v34 }
 0x41b   : > { %v5830_v56 = vsel %vm5829_vm14, %v5827_v55, %v5824_v51  ;;  %v5843_v44 = vmul.f32 -0.5, %v13705_v37  ;;  %v5887_v40 = vmul.f32 0.6931472, %v9055_v20  ;;  %v5858_v19 = vadd.f32 1.0, %v13727_v31  ;;  %v16762_v8 = vld [vmem:[#allocation45_spill] sm:$0xff]  ;;  %v16763_v34 = vld [vmem:[#allocation47_spill] sm:$0xff] }
 0x41c   : > { %v6830_v12 = vmul.f32 0.01, %v5830_v56  ;;  %v13767_v14 = vpop.eup %9056  ;;  %v5875_v58 = vsel %vm13749_vm13, %v5872_v49, %v5869_v28  ;;  %9066 = vlog2.f32 %v5921_v24  ;;  %v13772_v7 = vmul.f32 100.0, %v16762_v8  ;;  %16767 = vst [vmem:[#allocation6_spill] sm:$0xff] %v13808_v13  ;;  %v13816_v1 = vpop.f32.mrb[135].mxu1 }
 0x41d   : > { %v7217_v51 = vsel %vm220_vm0, %v7089_v10, %v16720_v36  ;;  %v13777_v55 = vpop.eup %9058  ;;  %v5906_v33 = vmul.f32 -0.5, %v13694_v3  ;;  %v13781_v20 = vmul.f32 100.0, %v16763_v34  ;;  %9068 = vlog2.f32 %v5858_v19  ;;  %16769 = vst [vmem:[#allocation44_spill] sm:$0xff] %v13816_v1 }
 0x41e   : > { %v7086_v57 = vsel %vm6958_vm11, %v16730_v26, %v6830_v12  ;;  %vm6960_vm15 = vcmp.gt.f32.partialorder %v13600_v59, 20.0  ;;  %vm13787_vm1 = vcmp.lt.f32.partialorder %v5891_v32, 0.0004427343  ;;  %9070 = vpow2.f32 %v5470_v6 }
 0x41f   : > { %7722 = vmatmul.mubr.f32.gmra.mrb[82].mxu0 %v7086_v57  ;;  %v5844_v36 = vadd.f32 1.0, %v5843_v44  ;;  %v9061_v24 = vpop.eup %9060  ;;  %v6835_v10 = vmul.f32 0.01, %v5875_v58  ;;  %vm6963_vm2 = vcmp.gt.f32.partialorder %v13544_v38, 20.0  ;;  %v5893_v49 = vsel %vm13787_vm1, %v5890_v29, %v5887_v40  ;;  %v16766_v29 = vld [vmem:[#allocation48_spill] sm:$0xff] }
 0x420   : > { %7726 = vmatprep.mubr.f32.mxu0 %v7217_v51  ;;  %v5846_v26 = vand.u32 2147483647, %v13705_v37  ;;  %vm6965_vm3 = vcmp.gt.f32.partialorder %v13568_v22, 20.0  ;;  %v5909_v32 = vand.u32 2147483647, %v13694_v3  ;;  %9072 = vpow2.f32 %v5460_v42 }
 0x421   : > { %v9063_v23 = vpop.eup %9062  ;;  %v5464_v6 = vmul.f32 1.442695, %v13772_v7  ;;  %v5861_v56 = vmul.f32 -0.5, %v13727_v31  ;;  %v5907_v12 = vadd.f32 1.0, %v5906_v33  ;;  %v5924_v19 = vmul.f32 -0.5, %v13735_v15 }
 0x422   : > { %v13799_v44 = vpop.eup %9064  ;;  %v5474_v40 = vmul.f32 1.442695, %v13781_v20  ;;  %v13804_v58 = vmul.f32 100.0, %v16766_v29  ;;  %v6837_v51 = vmul.f32 0.01, %v5893_v49  ;;  %v5845_v28 = vmul.f32 %v13705_v37, %v5844_v36 }
 0x423   : > { %v5842_v57 = vmul.f32 0.6931472, %v9063_v23  ;;  %v5876_v42 = vadd.f32 1.0, %v13767_v14  ;;  %v7091_v4 = vsel %vm6963_vm2, %v16726_v35, %v6835_v10  ;;  %v5905_v33 = vmul.f32 0.6931472, %v9061_v24 }
 0x424   : > { %v13814_v9 = vmul.f32 100.0, %v16768_v52  ;;  %vm5847_vm4 = vcmp.lt.f32.partialorder %v5846_v26, 0.0004427343  ;;  %vm6962_vm5 = vcmp.gt.f32.partialorder %v13630_v11, 20.0  ;;  %v5939_v49 = vadd.f32 1.0, %v13799_v44 }
 0x425   : > { %v5848_v37 = vsel %vm5847_vm4, %v5845_v28, %v5842_v57  ;;  %v5862_v36 = vadd.f32 1.0, %v5861_v56  ;;  %9074 = vlog2.f32 %v5876_v42  ;;  %v5478_v23 = vmul.f32 1.442695, %v13804_v58 }
 0x426   : > { %9076 = vpow2.f32 %v5474_v40  ;;  %v6832_v13 = vmul.f32 0.01, %v5848_v37  ;;  %v5864_v38 = vand.u32 2147483647, %v13727_v31  ;;  %v9067_v24 = vpop.eup %9066  ;;  %v5908_v10 = vmul.f32 %v13694_v3, %v5907_v12  ;;  %v16772_v37 = vld [vmem:[#allocation25_spill] sm:$0xff] }
 0x427   : > { %vm13823_vm6 = vcmp.lt.f32.partialorder %v5909_v32, 0.0004427343  ;;  %v5925_v1 = vadd.f32 1.0, %v5924_v19  ;;  %v7219_v57 = vsel %vm220_vm0, %v7091_v4, %v16726_v35  ;;  %v9069_v56 = vpop.eup %9068  ;;  %v5927_v40 = vand.u32 2147483647, %v13735_v15 }
 0x428   : > { %v5468_v28 = vmul.f32 1.442695, %v13814_v9  ;;  %v7088_v42 = vsel %vm6960_vm15, %v16736_v61, %v6832_v13  ;;  %v5879_v3 = vmul.f32 -0.5, %v13767_v14  ;;  %v13836_v32 = vpop.eup %9070  ;;  %v5911_v12 = vsel %vm13823_vm6, %v5908_v10, %v5905_v33  ;;  %v13847_v61 = vpop.f32.mrb[136].mxu1 }
 0x429   : > { %9078 = vlog2.f32 %v5939_v49  ;;  %7727 = vmatmul.mubr.f32.gmra.mrb[84].mxu0 %v7088_v42  ;;  %v5860_v19 = vmul.f32 0.6931472, %v9069_v56  ;;  %v5863_v35 = vmul.f32 %v13727_v31, %v5862_v36  ;;  %v7093_v4 = vsel %vm6965_vm3, %v16732_v18, %v6837_v51  ;;  %16773 = vst [vmem:[#allocation7_spill] sm:$0xff] %v13847_v61  ;;  %v13853_v36 = vpop.f32.mrb[137].mxu1 }
 0x42a   : > { %v13845_v29 = vmul.f32 100.0, %v16772_v37  ;;  %9080 = vpow2.f32 %v5478_v23  ;;  %7731 = vmatprep.mubr.f32.mxu0 %v7219_v57  ;;  %vm5865_vm7 = vcmp.lt.f32.partialorder %v5864_v38, 0.0004427343  ;;  %v13849_v59 = vpop.eup %9072  ;;  %v5923_v13 = vmul.f32 0.6931472, %v9067_v24  ;;  %16774 = vst [vmem:[#allocation8_spill] sm:$0xff] %v13853_v36 }
 0x42b   : > { %v5926_v33 = vmul.f32 %v13735_v15, %v5925_v1  ;;  %v5866_v49 = vsel %vm5865_vm7, %v5863_v35, %v5860_v19  ;;  %v5894_v31 = vadd.f32 1.0, %v13777_v55  ;;  %v6839_v22 = vmul.f32 0.01, %v5911_v12  ;;  %v16775_v23 = vld [vmem:[#allocation11_spill] sm:$0xff]  ;;  %v13881_v11 = vpop.f32.mrb[138].mxu1 }
 0x42c   : > { %v5957_v51 = vadd.f32 1.0, %v13836_v32  ;;  %v6834_v10 = vmul.f32 0.01, %v5866_v49  ;;  %v5880_v26 = vadd.f32 1.0, %v5879_v3  ;;  %v13857_v57 = vmul.f32 100.0, %v16775_v23  ;;  %16778 = vst [vmem:[#allocation10_spill] sm:$0xff] %v13881_v11 }
 0x42d   : > { %v7221_v38 = vsel %vm220_vm0, %v7093_v4, %v16732_v18  ;;  %v5882_v24 = vand.u32 2147483647, %v13767_v14  ;;  %9082 = vlog2.f32 %v5894_v31  ;;  %vm13863_vm8 = vcmp.lt.f32.partialorder %v5927_v40, 0.0004427343 }
 0x42e   : > { %9084 = vpow2.f32 %v5464_v6  ;;  %v5472_v15 = vmul.f32 1.442695, %v13845_v29  ;;  %v7090_v56 = vsel %vm6962_vm5, %v16741_v48, %v6834_v10  ;;  %vm6967_vm9 = vcmp.gt.f32.partialorder %v13608_v53, 20.0 }
 0x42f   : > { %v9075_v42 = vpop.eup %9074  ;;  %v5929_v18 = vsel %vm13863_vm8, %v5926_v33, %v5923_v13  ;;  %v5942_v3 = vmul.f32 -0.5, %v13799_v44  ;;  %7732 = vmatmul.mubr.f32.gmra.mrb[86].mxu0 %v7090_v56  ;;  %9086 = vlog2.f32 %v5957_v51  ;;  %v5881_v12 = vmul.f32 %v13767_v14, %v5880_v26  ;;  %v13885_v13 = vpop.f32.mrb[139].mxu1  ;;  %v16780_v51 = vld [vmem:[#allocation29_spill] sm:$0xff] }
 0x430   : > { %v13875_v40 = vpop.eup %9076  ;;  %7736 = vmatprep.mubr.f32.mxu0 %v7221_v38  ;;  %v5878_v6 = vmul.f32 0.6931472, %v9075_v42  ;;  %v5897_v19 = vmul.f32 -0.5, %v13777_v55  ;;  %v7095_v48 = vsel %vm6967_vm9, %v16738_v50, %v6839_v22  ;;  %9088 = vpow2.f32 %v5468_v28  ;;  %16779 = vst [vmem:[#allocation15_spill] sm:$0xff] %v13885_v13 }
 0x431   : > { %v5482_v53 = vmul.f32 1.442695, %v13857_v57  ;;  %vm5883_vm10 = vcmp.lt.f32.partialorder %v5882_v24, 0.0004427343  ;;  %vm6964_vm11 = vcmp.gt.f32.partialorder %v13673_v45, 20.0  ;;  %9090 = vpow2.f32 %v5472_v15 }
 0x432   : > { %v5945_v35 = vand.u32 2147483647, %v13799_v44  ;;  %v5884_v4 = vsel %vm5883_vm10, %v5881_v12, %v5878_v6  ;;  %v6841_v14 = vmul.f32 0.01, %v5929_v18  ;;  %v5943_v49 = vadd.f32 1.0, %v5942_v3  ;;  %v16783_v6 = vld [vmem:[#allocation38_spill] sm:$0xff] }
 0x433   : > { %v9079_v33 = vpop.eup %9078  ;;  %v5975_v31 = vadd.f32 1.0, %v13875_v40  ;;  %v6836_v22 = vmul.f32 0.01, %v5884_v4  ;;  %v13891_v10 = vmul.f32 100.0, %v16780_v51  ;;  %v7223_v26 = vsel %vm220_vm0, %v7095_v48, %v16738_v50  ;;  %v13919_v4 = vpop.f32.mrb[140].mxu1 }
 0x434   : > { %v13888_v28 = vpop.eup %9080  ;;  %v5898_v38 = vadd.f32 1.0, %v5897_v19  ;;  %v5912_v24 = vadd.f32 1.0, %v13849_v59  ;;  %v5960_v1 = vmul.f32 -0.5, %v13836_v32  ;;  %9092 = vpow2.f32 %v5482_v53  ;;  %16784 = vst [vmem:[#allocation43_spill] sm:$0xff] %v13919_v4 }
 0x435   : > { %v7092_v15 = vsel %vm6964_vm11, %v16747_v25, %v6836_v22  ;;  %v5900_v56 = vand.u32 2147483647, %v13777_v55  ;;  %vm6966_vm12 = vcmp.gt.f32.partialorder %v13683_v54, 20.0  ;;  %vm6969_vm13 = vcmp.gt.f32.partialorder %v13638_v2, 20.0  ;;  %v16785_v22 = vld [vmem:[#allocation35_spill] sm:$0xff] }
 0x436   : > { %v5941_v42 = vmul.f32 0.6931472, %v9079_v33  ;;  %7737 = vmatmul.mubr.f32.gmra.mrb[88].mxu0 %v7092_v15  ;;  %9094 = vlog2.f32 %v5912_v24  ;;  %v5944_v18 = vmul.f32 %v13799_v44, %v5943_v49  ;;  %vm13905_vm14 = vcmp.lt.f32.partialorder %v5945_v35, 0.0004427343  ;;  %v13927_v15 = vpop.f32.mrb[141].mxu1 }
 0x437   : > { %v9083_v50 = vpop.eup %9082  ;;  %v13910_v12 = vmul.f32 100.0, %v16783_v6  ;;  %v5993_v25 = vadd.f32 1.0, %v13888_v28  ;;  %7741 = vmatprep.mubr.f32.mxu0 %v7223_v26  ;;  %9096 = vlog2.f32 %v5975_v31  ;;  %v5486_v2 = vmul.f32 1.442695, %v13891_v10  ;;  %16786 = vst [vmem:[#allocation13_spill] sm:$0xff] %v13927_v15  ;;  %v13978_v61 = vpop.f32.mrb[142].mxu1 }
 0x438   : > { %v13913_v45 = vpop.eup %9084  ;;  %v5896_v19 = vmul.f32 0.6931472, %v9083_v50  ;;  %v5899_v48 = vmul.f32 %v13777_v55, %v5898_v38  ;;  %v7097_v44 = vsel %vm6969_vm13, %v16742_v16, %v6841_v14  ;;  %v5961_v53 = vadd.f32 1.0, %v5960_v1  ;;  %16792 = vst [vmem:[#allocation9_spill] sm:$0xff] %v13978_v61 }
 0x439   : > { %v5963_v35 = vand.u32 2147483647, %v13836_v32  ;;  %vm5901_vm15 = vcmp.lt.f32.partialorder %v5900_v56, 0.0004427343  ;;  %v9087_v33 = vpop.eup %9086  ;;  %v5947_v49 = vsel %vm13905_vm14, %v5944_v18, %v5941_v42  ;;  %v13924_v26 = vmul.f32 100.0, %v16785_v22 }
 0x43a   : > { %v5902_v31 = vsel %vm5901_vm15, %v5899_v48, %v5896_v19  ;;  %v5915_v24 = vmul.f32 -0.5, %v13849_v59  ;;  %v13929_v55 = vpop.eup %9088  ;;  %9098 = vlog2.f32 %v5993_v25  ;;  %v13932_v14 = vmul.f32 100.0, %v13206_v43 }
 0x43b   : > { %v6838_v38 = vmul.f32 0.01, %v5902_v31  ;;  %v5930_v1 = vadd.f32 1.0, %v13913_v45  ;;  %v13935_v56 = vpop.eup %9090  ;;  %v5978_v42 = vmul.f32 -0.5, %v13875_v40  ;;  %v5981_v50 = vand.u32 2147483647, %v13875_v40 }
 0x43c   : > { %9100 = vpow2.f32 %v5486_v2  ;;  %v7225_v18 = vsel %vm220_vm0, %v7097_v44, %v16742_v16  ;;  %v6843_v3 = vmul.f32 0.01, %v5947_v49  ;;  %v5959_v19 = vmul.f32 0.6931472, %v9087_v33 }
 0x43d   : > { %v7094_v25 = vsel %vm6966_vm12, %v16749_v62, %v6838_v38  ;;  %9102 = vlog2.f32 %v5930_v1  ;;  %vm6968_vm1 = vcmp.gt.f32.partialorder %v13743_v41, 20.0  ;;  %vm6971_vm2 = vcmp.gt.f32.partialorder %v13700_v60, 20.0  ;;  %v16791_v1 = vld [vmem:[#allocation34_spill] sm:$0xff] }
 0x43e   : > { %v5476_v48 = vmul.f32 1.442695, %v13910_v12  ;;  %7742 = vmatmul.mubr.f32.gmra.mrb[90].mxu0 %v7094_v25  ;;  %v5916_v31 = vadd.f32 1.0, %v5915_v24  ;;  %v13948_v2 = vpop.eup %9092  ;;  %v5962_v4 = vmul.f32 %v13836_v32, %v5961_v53  ;;  %vm13951_vm3 = vcmp.lt.f32.partialorder %v5963_v35, 0.0004427343 }
 0x43f   : > { %v5490_v54 = vmul.f32 1.442695, %v13932_v14  ;;  %7746 = vmatprep.mubr.f32.mxu0 %v7225_v18  ;;  %v5918_v62 = vand.u32 2147483647, %v13849_v59  ;;  %vm6973_vm4 = vcmp.gt.f32.partialorder %v13746_v21, 20.0  ;;  %v5979_v33 = vadd.f32 1.0, %v5978_v42 }
 0x440   : > { %v9095_v44 = vpop.eup %9094  ;;  %vm13958_vm5 = vcmp.lt.f32.partialorder %v5981_v50, 0.0004427343  ;;  %v5480_v24 = vmul.f32 1.442695, %v13924_v26  ;;  %v5933_v32 = vmul.f32 -0.5, %v13913_v45  ;;  %v7099_v53 = vsel %vm6971_vm2, %v16751_v30, %v6843_v3  ;;  %v13982_v3 = vpop.f32.mrb[143].mxu1 }
 0x441   : > { %v5965_v35 = vsel %vm13951_vm3, %v5962_v4, %v5959_v19  ;;  %v5996_v38 = vmul.f32 -0.5, %v13888_v28  ;;  %v13971_v18 = vmul.f32 100.0, %v16791_v1  ;;  %v9097_v42 = vpop.eup %9096  ;;  %v13974_v50 = vmul.f32 100.0, %v13273_v0 }
 0x442   : > { %v5914_v25 = vmul.f32 0.6931472, %v9095_v44  ;;  %v5917_v11 = vmul.f32 %v13849_v59, %v5916_v31  ;;  %v5948_v15 = vadd.f32 1.0, %v13929_v55  ;;  %v5999_v60 = vand.u32 2147483647, %v13888_v28 }
 0x443   : > { %v6011_v4 = vadd.f32 1.0, %v13948_v2  ;;  %9104 = vpow2.f32 %v5490_v54  ;;  %vm5919_vm6 = vcmp.lt.f32.partialorder %v5918_v62, 0.0004427343  ;;  %vm6970_vm7 = vcmp.gt.f32.partialorder %v13772_v7, 20.0 }
 0x444   : > { %v6845_v19 = vmul.f32 0.01, %v5965_v35  ;;  %v5920_v16 = vsel %vm5919_vm6, %v5917_v11, %v5914_v25  ;;  %v5934_v13 = vadd.f32 1.0, %v5933_v32  ;;  %9106 = vlog2.f32 %v5948_v15  ;;  %v9099_v44 = vpop.eup %9098 }
 0x445   : > { %v5977_v59 = vmul.f32 0.6931472, %v9097_v42  ;;  %9108 = vpow2.f32 %v5476_v48  ;;  %v6840_v31 = vmul.f32 0.01, %v5920_v16  ;;  %v5936_v61 = vand.u32 2147483647, %v13913_v45 }
 0x446   : > { %v13986_v36 = vpop.eup %9100  ;;  %v5980_v0 = vmul.f32 %v13875_v40, %v5979_v33  ;;  %9110 = vpow2.f32 %v5480_v24  ;;  %v5494_v54 = vmul.f32 1.442695, %v13974_v50  ;;  %v7227_v62 = vsel %vm220_vm0, %v7099_v53, %v16751_v30  ;;  %v14008_v53 = vpop.f32.mrb[144].mxu1 }
 0x447   : > { %v9103_v11 = vpop.eup %9102  ;;  %v5997_v32 = vadd.f32 1.0, %v5996_v38  ;;  %9112 = vlog2.f32 %v6011_v4  ;;  %v7096_v15 = vsel %vm6968_vm1, %v16756_v47, %v6840_v31  ;;  %v5951_v48 = vmul.f32 -0.5, %v13929_v55  ;;  %16795 = vst [vmem:[#allocation36_spill] sm:$0xff] %v14008_v53  ;;  %v16837_v53 = vld [vmem:[#allocation32_spill] sm:$0xff] }
 0x448   : > { %vm13997_vm8 = vcmp.lt.f32.partialorder %v5999_v60, 0.0004427343  ;;  %v5484_v40 = vmul.f32 1.442695, %v13971_v18  ;;  %7747 = vmatmul.mubr.f32.gmra.mrb[92].mxu0 %v7096_v15  ;;  %v5932_v33 = vmul.f32 0.6931472, %v9103_v11  ;;  %v5935_v24 = vmul.f32 %v13913_v45, %v5934_v13 }
 0x449   : > { %v7101_v30 = vsel %vm6973_vm4, %v16757_v5, %v6845_v19  ;;  %v5983_v41 = vsel %vm13958_vm5, %v5980_v0, %v5977_v59  ;;  %v5995_v47 = vmul.f32 0.6931472, %v9099_v44  ;;  %7751 = vmatprep.mubr.f32.mxu0 %v7227_v62  ;;  %vm5937_vm9 = vcmp.lt.f32.partialorder %v5936_v61, 0.0004427343  ;;  %v14012_v60 = vpop.f32.mrb[145].mxu1  ;;  %v16796_v44 = vld [vmem:[#allocation49_spill] sm:$0xff] }
 0x44a   : > { %v6029_v38 = vadd.f32 1.0, %v13986_v36  ;;  %9114 = vpow2.f32 %v5494_v54  ;;  %v5938_v42 = vsel %vm5937_vm9, %v5935_v24, %v5932_v33  ;;  %v5966_v25 = vadd.f32 1.0, %v13935_v56  ;;  %v14045_v35 = vpop.f32.mrb[146].mxu1 }
 0x44b   : > { %v5998_v13 = vmul.f32 %v13888_v28, %v5997_v32  ;;  %v14016_v21 = vmul.f32 100.0, %v13329_v17  ;;  %v6842_v45 = vmul.f32 0.01, %v5938_v42  ;;  %v5952_v0 = vadd.f32 1.0, %v5951_v48  ;;  %16797 = vst [vmem:[#allocation46_spill] sm:$0xff] %v14045_v35 }
 0x44c   : > { %v6847_v49 = vmul.f32 0.01, %v5983_v41  ;;  %v7229_v61 = vsel %vm220_vm0, %v7101_v30, %v16757_v5  ;;  %v5954_v4 = vand.u32 2147483647, %v13929_v55  ;;  %9116 = vlog2.f32 %v5966_v25  ;;  %v14051_v41 = vpop.f32.mrb[147].mxu1 }
 0x44d   : > { %v14022_v19 = vpop.eup %9104  ;;  %v6014_v16 = vmul.f32 -0.5, %v13948_v2  ;;  %9118 = vpow2.f32 %v5484_v40  ;;  %v14026_v28 = vmul.f32 100.0, %v16796_v44  ;;  %v7098_v59 = vsel %vm6970_vm7, %v16762_v8, %v6842_v45  ;;  %16798 = vst [vmem:[#allocation45_spill] sm:$0xff] %v14051_v41 }
 0x44e   : > { %v9107_v31 = vpop.eup %9106  ;;  %vm6972_vm10 = vcmp.gt.f32.partialorder %v13814_v9, 20.0  ;;  %vm6975_vm11 = vcmp.gt.f32.partialorder %v13781_v20, 20.0  ;;  %v6001_v5 = vsel %vm13997_vm8, %v5998_v13, %v5995_v47  ;;  %9120 = vlog2.f32 %v6029_v38  ;;  %7752 = vmatmul.mubr.f32.gmra.mrb[94].mxu0 %v7098_v59 }
 0x44f   : > { %v14035_v54 = vpop.eup %9108  ;;  %v5498_v62 = vmul.f32 1.442695, %v14016_v21  ;;  %7756 = vmatprep.mubr.f32.mxu0 %v7229_v61  ;;  %v5950_v11 = vmul.f32 0.6931472, %v9107_v31  ;;  %v5953_v32 = vmul.f32 %v13929_v55, %v5952_v0  ;;  %v5969_v7 = vmul.f32 -0.5, %v13935_v56 }
 0x450   : > { %v14040_v8 = vpop.eup %9110  ;;  %v7103_v15 = vsel %vm6975_vm11, %v16763_v34, %v6847_v49  ;;  %v6017_v20 = vand.u32 2147483647, %v13948_v2  ;;  %v6047_v48 = vadd.f32 1.0, %v14022_v19  ;;  %vm5955_vm12 = vcmp.lt.f32.partialorder %v5954_v4, 0.0004427343 }
 0x451   : > { %v9113_v40 = vpop.eup %9112  ;;  %v6015_v33 = vadd.f32 1.0, %v6014_v16  ;;  %v5488_v24 = vmul.f32 1.442695, %v14026_v28  ;;  %v14049_v30 = vmul.f32 100.0, %v13365_v46  ;;  %v5956_v55 = vsel %vm5955_vm12, %v5953_v32, %v5950_v11 }
 0x452   : > { %v6849_v47 = vmul.f32 0.01, %v6001_v5  ;;  %v6032_v38 = vmul.f32 -0.5, %v13986_v36  ;;  %v14055_v42 = vmul.f32 100.0, %v13267_v63  ;;  %v6844_v25 = vmul.f32 0.01, %v5956_v55 }
 0x453   : > { %vm6974_vm13 = vcmp.gt.f32.partialorder %v13845_v29, 20.0  ;;  %9122 = vpow2.f32 %v5498_v62  ;;  %v7231_v13 = vsel %vm220_vm0, %v7103_v15, %v16763_v34  ;;  %v5970_v45 = vadd.f32 1.0, %v5969_v7 }
 0x454   : > { %v5984_v0 = vadd.f32 1.0, %v14035_v54  ;;  %v14062_v49 = vpop.eup %9114  ;;  %v6013_v61 = vmul.f32 0.6931472, %v9113_v40  ;;  %9124 = vlog2.f32 %v6047_v48  ;;  %v7100_v4 = vsel %vm6972_vm10, %v16768_v52, %v6844_v25  ;;  %v16801_v48 = vld [vmem:[#allocation48_spill] sm:$0xff] }
 0x455   : > { %v5972_v16 = vand.u32 2147483647, %v13935_v56  ;;  %vm6977_vm14 = vcmp.gt.f32.partialorder %v13804_v58, 20.0  ;;  %vm14069_vm15 = vcmp.lt.f32.partialorder %v6017_v20, 0.0004427343  ;;  %7757 = vmatmul.mubr.f32.gmra.mrb[96].mxu0 %v7100_v4  ;;  %v6016_v5 = vmul.f32 %v13948_v2, %v6015_v33 }
 0x456   : > { %v5502_v34 = vmul.f32 1.442695, %v14049_v30  ;;  %9126 = vlog2.f32 %v5984_v0  ;;  %v9117_v31 = vpop.eup %9116  ;;  %v6035_v62 = vand.u32 2147483647, %v13986_v36  ;;  %v5492_v9 = vmul.f32 1.442695, %v14055_v42  ;;  %7761 = vmatprep.mubr.f32.mxu0 %v7231_v13 }
 0x457   : > { %9128 = vpow2.f32 %v5488_v24  ;;  %v14077_v52 = vpop.eup %9118  ;;  %v6065_v11 = vadd.f32 1.0, %v14062_v49  ;;  %v14081_v32 = vmul.f32 100.0, %v13400_v27  ;;  %v5968_v7 = vmul.f32 0.6931472, %v9117_v31  ;;  %v14089_v24 = vpop.f32.mrb[148].mxu1 }
 0x458   : > { %v5971_v15 = vmul.f32 %v13935_v56, %v5970_v45  ;;  %v9121_v20 = vpop.eup %9120  ;;  %v7105_v2 = vsel %vm6977_vm14, %v16801_v48, %v6849_v47  ;;  %v6019_v40 = vsel %vm14069_vm15, %v6016_v5, %v6013_v61  ;;  %v6033_v33 = vadd.f32 1.0, %v6032_v38  ;;  %16802 = vst [vmem:[#allocation47_spill] sm:$0xff] %v14089_v24  ;;  %v14093_v0 = vpop.f32.mrb[149].mxu1  ;;  %v16804_v45 = vld [vmem:[#allocation27_spill] sm:$0xff] }
 0x459   : > { %vm5973_vm1 = vcmp.lt.f32.partialorder %v5972_v16, 0.0004427343  ;;  %v6050_v55 = vmul.f32 -0.5, %v14022_v19  ;;  %9130 = vpow2.f32 %v5502_v34  ;;  %v5987_v13 = vmul.f32 -0.5, %v14035_v54  ;;  %16803 = vst [vmem:[#allocation12_spill] sm:$0xff] %v14093_v0 }
 0x45a   : > { %v5974_v25 = vsel %vm5973_vm1, %v5971_v15, %v5968_v7  ;;  %v6053_v56 = vand.u32 2147483647, %v14022_v19  ;;  %v14097_v58 = vmul.f32 100.0, %v16804_v45  ;;  %v6002_v61 = vadd.f32 1.0, %v14040_v8 }
 0x45b   : > { %v6846_v47 = vmul.f32 0.01, %v5974_v25  ;;  %v6031_v38 = vmul.f32 0.6931472, %v9121_v20  ;;  %9132 = vlog2.f32 %v6065_v11  ;;  %v5506_v4 = vmul.f32 1.442695, %v14081_v32 }
 0x45c   : > { %v7233_v16 = vsel %vm220_vm0, %v7105_v2, %v16801_v48  ;;  %v6851_v59 = vmul.f32 0.01, %v6019_v40  ;;  %vm6979_vm2 = vcmp.gt.f32.partialorder %v13857_v57, 20.0  ;;  %9134 = vlog2.f32 %v6002_v61  ;;  %v16809_v25 = vld [vmem:[#allocation24_spill] sm:$0xff] }
 0x45d   : > { %v7102_v34 = vsel %vm6974_vm13, %v16772_v37, %v6846_v47  ;;  %v14108_v31 = vpop.eup %9122  ;;  %vm6976_vm3 = vcmp.gt.f32.partialorder %v13910_v12, 20.0  ;;  %v6034_v5 = vmul.f32 %v13986_v36, %v6033_v33  ;;  %vm14112_vm4 = vcmp.lt.f32.partialorder %v6035_v62, 0.0004427343 }
 0x45e   : > { %v6051_v7 = vadd.f32 1.0, %v6050_v55  ;;  %7762 = vmatmul.mubr.f32.gmra.mrb[98].mxu0 %v7102_v34  ;;  %v5988_v15 = vadd.f32 1.0, %v5987_v13  ;;  %v9125_v20 = vpop.eup %9124  ;;  %vm6981_vm5 = vcmp.gt.f32.partialorder %v13891_v10, 20.0  ;;  %vm14117_vm6 = vcmp.lt.f32.partialorder %v6053_v56, 0.0004427343  ;;  %v16810_v56 = vld [vmem:[#allocation37_spill] sm:$0xff] }
 0x45f   : > { %9136 = vpow2.f32 %v5492_v9  ;;  %v5496_v37 = vmul.f32 1.442695, %v14097_v58  ;;  %7766 = vmatprep.mubr.f32.mxu0 %v7233_v16  ;;  %v5990_v36 = vand.u32 2147483647, %v14035_v54  ;;  %v6037_v48 = vsel %vm14112_vm4, %v6034_v5, %v6031_v38  ;;  %v14141_v34 = vpop.f32.mrb[150].mxu1 }
 0x460   : > { %v9127_v62 = vpop.eup %9126  ;;  %v6068_v2 = vmul.f32 -0.5, %v14062_v49  ;;  %9138 = vpow2.f32 %v5506_v4  ;;  %v6005_v40 = vmul.f32 -0.5, %v14040_v8  ;;  %v7107_v9 = vsel %vm6979_vm2, %v16775_v23, %v6851_v59  ;;  %16811 = vst [vmem:[#allocation25_spill] sm:$0xff] %v14141_v34  ;;  %v14144_v59 = vpop.f32.mrb[151].mxu1 }
 0x461   : > { %v14127_v33 = vpop.eup %9128  ;;  %v6083_v55 = vadd.f32 1.0, %v14108_v31  ;;  %v14134_v13 = vmul.f32 100.0, %v16809_v25  ;;  %v14137_v47 = vmul.f32 100.0, %v16810_v56  ;;  %v6049_v61 = vmul.f32 0.6931472, %v9125_v20  ;;  %16812 = vst [vmem:[#allocation11_spill] sm:$0xff] %v14144_v59 }
 0x462   : > { %v5986_v38 = vmul.f32 0.6931472, %v9127_v62  ;;  %v5989_v4 = vmul.f32 %v14035_v54, %v5988_v15  ;;  %v6020_v16 = vadd.f32 1.0, %v14077_v52  ;;  %v6853_v5 = vmul.f32 0.01, %v6037_v48 }
 0x463   : > { %v6052_v57 = vmul.f32 %v14022_v19, %v6051_v7  ;;  %9140 = vpow2.f32 %v5496_v37  ;;  %vm5991_vm7 = vcmp.lt.f32.partialorder %v5990_v36, 0.0004427343  ;;  %v14146_v11 = vpop.eup %9130  ;;  %vm6978_vm8 = vcmp.gt.f32.partialorder %v13924_v26, 20.0 }
 0x464   : > { %v6069_v24 = vadd.f32 1.0, %v6068_v2  ;;  %v5992_v20 = vsel %vm5991_vm7, %v5989_v4, %v5986_v38  ;;  %v6006_v62 = vadd.f32 1.0, %v6005_v40  ;;  %9142 = vlog2.f32 %v6020_v16  ;;  %v16814_v16 = vld [vmem:[#allocation23_spill] sm:$0xff] }
 0x465   : > { %9144 = vlog2.f32 %v6083_v55  ;;  %v5510_v54 = vmul.f32 1.442695, %v14137_v47  ;;  %v6848_v15 = vmul.f32 0.01, %v5992_v20  ;;  %v6008_v48 = vand.u32 2147483647, %v14040_v8  ;;  %v9133_v34 = vpop.eup %9132 }
 0x466   : > { %v6055_v19 = vsel %vm14117_vm6, %v6052_v57, %v6049_v61  ;;  %v6071_v7 = vand.u32 2147483647, %v14062_v49  ;;  %v5500_v37 = vmul.f32 1.442695, %v14134_v13  ;;  %v7235_v36 = vsel %vm220_vm0, %v7107_v9, %v16775_v23  ;;  %v9135_v2 = vpop.eup %9134  ;;  %v16813_v55 = vld [vmem:[#allocation21_spill] sm:$0xff] }
 0x467   : > { %vm6983_vm9 = vcmp.gt.f32.partialorder %v13932_v14, 20.0  ;;  %v6101_v40 = vadd.f32 1.0, %v14146_v11  ;;  %v14161_v38 = vmul.f32 100.0, %v16813_v55  ;;  %v7104_v29 = vsel %vm6976_vm3, %v16783_v6, %v6848_v15  ;;  %v14177_v6 = vpop.f32.mrb[152].mxu1 }
 0x468   : > { %v6023_v61 = vmul.f32 -0.5, %v14077_v52  ;;  %v7109_v4 = vsel %vm6981_vm5, %v16780_v51, %v6853_v5  ;;  %v14171_v23 = vmul.f32 100.0, %v16814_v16  ;;  %7767 = vmatmul.mubr.f32.gmra.mrb[100].mxu0 %v7104_v29  ;;  %v6004_v9 = vmul.f32 0.6931472, %v9135_v2  ;;  %16815 = vst [vmem:[#allocation29_spill] sm:$0xff] %v14177_v6  ;;  %v14183_v29 = vpop.f32.mrb[153].mxu1 }
 0x469   : > { %v6007_v57 = vmul.f32 %v14040_v8, %v6006_v62  ;;  %v14174_v20 = vpop.eup %9136  ;;  %v6855_v59 = vmul.f32 0.01, %v6055_v19  ;;  %v6070_v35 = vmul.f32 %v14062_v49, %v6069_v24  ;;  %9146 = vpow2.f32 %v5510_v54  ;;  %7771 = vmatprep.mubr.f32.mxu0 %v7235_v36  ;;  %16816 = vst [vmem:[#allocation38_spill] sm:$0xff] %v14183_v29 }
 0x46a   : > { %vm6009_vm10 = vcmp.lt.f32.partialorder %v6008_v48, 0.0004427343  ;;  %v14179_v12 = vpop.eup %9138  ;;  %v6067_v10 = vmul.f32 0.6931472, %v9133_v34  ;;  %v6086_v5 = vmul.f32 -0.5, %v14108_v31  ;;  %v6038_v2 = vadd.f32 1.0, %v14127_v33 }
 0x46b   : > { %v6010_v15 = vsel %vm6009_vm10, %v6007_v57, %v6004_v9  ;;  %vm6980_vm11 = vcmp.gt.f32.partialorder %v13971_v18, 20.0  ;;  %9148 = vlog2.f32 %v6101_v40  ;;  %v5514_v8 = vmul.f32 1.442695, %v14161_v38  ;;  %v16819_v57 = vld [vmem:[#allocation14_spill] sm:$0xff]  ;;  %v16826_v18 = vld [vmem:[#allocation19_spill] sm:$0xff] }
 0x46c   : > { %v6850_v49 = vmul.f32 0.01, %v6010_v15  ;;  %v6024_v24 = vadd.f32 1.0, %v6023_v61  ;;  %v5504_v62 = vmul.f32 1.442695, %v14171_v23  ;;  %v7237_v34 = vsel %vm220_vm0, %v7109_v4, %v16780_v51 }
 0x46d   : > { %v6026_v54 = vand.u32 2147483647, %v14077_v52  ;;  %9150 = vlog2.f32 %v6038_v2  ;;  %v14192_v48 = vpop.eup %9140  ;;  %vm14194_vm12 = vcmp.lt.f32.partialorder %v6071_v7, 0.0004427343  ;;  %v6119_v36 = vadd.f32 1.0, %v14179_v12 }
 0x46e   : > { %9152 = vpow2.f32 %v5500_v37  ;;  %v7106_v40 = vsel %vm6978_vm8, %v16785_v22, %v6850_v49  ;;  %v9143_v61 = vpop.eup %9142  ;;  %v6073_v51 = vsel %vm14194_vm12, %v6070_v35, %v6067_v10  ;;  %v6087_v4 = vadd.f32 1.0, %v6086_v5  ;;  %v14214_v10 = vpop.f32.mrb[154].mxu1  ;;  %v16821_v49 = vld [vmem:[#allocation18_spill] sm:$0xff] }
 0x46f   : > { %v6089_v9 = vand.u32 2147483647, %v14108_v31  ;;  %v14206_v15 = vmul.f32 100.0, %v16819_v57  ;;  %7772 = vmatmul.mubr.f32.gmra.mrb[102].mxu0 %v7106_v40  ;;  %v9145_v7 = vpop.eup %9144  ;;  %9154 = vpow2.f32 %v5514_v8  ;;  %v6022_v37 = vmul.f32 0.6931472, %v9143_v61  ;;  %16820 = vst [vmem:[#allocation35_spill] sm:$0xff] %v14214_v10 }
 0x470   : > { %7776 = vmatprep.mubr.f32.mxu0 %v7237_v34  ;;  %v6025_v2 = vmul.f32 %v14077_v52, %v6024_v24  ;;  %v6041_v26 = vmul.f32 -0.5, %v14127_v33  ;;  %v7111_v22 = vsel %vm6983_vm9, %v13206_v43, %v6855_v59  ;;  %v6104_v35 = vmul.f32 -0.5, %v14146_v11  ;;  %v14219_v19 = vpop.f32.mrb[155].mxu1 }
 0x471   : > { %9156 = vpow2.f32 %v5504_v62  ;;  %vm6027_vm13 = vcmp.lt.f32.partialorder %v6026_v54, 0.0004427343  ;;  %v6857_v5 = vmul.f32 0.01, %v6073_v51  ;;  %v14217_v8 = vmul.f32 100.0, %v16821_v49  ;;  %16822 = vst [vmem:[#allocation34_spill] sm:$0xff] %v14219_v19 }
 0x472   : > { %9158 = vlog2.f32 %v6119_v36  ;;  %v6028_v34 = vsel %vm6027_vm13, %v6025_v2, %v6022_v37  ;;  %v6085_v52 = vmul.f32 0.6931472, %v9145_v7  ;;  %v6088_v24 = vmul.f32 %v14108_v31, %v6087_v4  ;;  %v16823_v62 = vld [vmem:[#allocation22_spill] sm:$0xff] }
 0x473   : > { %v5518_v14 = vmul.f32 1.442695, %v14206_v15  ;;  %v6852_v59 = vmul.f32 0.01, %v6028_v34  ;;  %v14223_v40 = vpop.eup %9146  ;;  %vm6982_vm14 = vcmp.gt.f32.partialorder %v14026_v28, 20.0  ;;  %v14227_v54 = vmul.f32 100.0, %v16823_v62 }
 0x474   : > { %v7239_v36 = vsel %vm220_vm0, %v7111_v22, %v13206_v43  ;;  %v6042_v61 = vadd.f32 1.0, %v6041_v26  ;;  %v6056_v51 = vadd.f32 1.0, %v14174_v20  ;;  %v6105_v7 = vadd.f32 1.0, %v6104_v35  ;;  %v16827_v34 = vld [vmem:[#allocation20_spill] sm:$0xff] }
 0x475   : > { %v6107_v31 = vand.u32 2147483647, %v14146_v11  ;;  %v7108_v4 = vsel %vm6980_vm11, %v16791_v1, %v6852_v59  ;;  %v6044_v37 = vand.u32 2147483647, %v14127_v33  ;;  %v9149_v2 = vpop.eup %9148  ;;  %vm6985_vm15 = vcmp.gt.f32.partialorder %v13974_v50, 20.0 }
 0x476   : > { %vm14239_vm1 = vcmp.lt.f32.partialorder %v6089_v9, 0.0004427343  ;;  %v5508_v43 = vmul.f32 1.442695, %v14217_v8  ;;  %7777 = vmatmul.mubr.f32.gmra.mrb[104].mxu0 %v7108_v4  ;;  %9160 = vlog2.f32 %v6056_v51  ;;  %vm6987_vm2 = vcmp.gt.f32.partialorder %v14016_v21, 20.0 }
 0x477   : > { %v9151_v26 = vpop.eup %9150  ;;  %v6091_v22 = vsel %vm14239_vm1, %v6088_v24, %v6085_v52  ;;  %v6137_v1 = vadd.f32 1.0, %v14223_v40  ;;  %v14249_v35 = vmul.f32 100.0, %v16826_v18  ;;  %9162 = vpow2.f32 %v5518_v14  ;;  %7781 = vmatprep.mubr.f32.mxu0 %v7239_v36  ;;  %v14264_v14 = vpop.f32.mrb[156].mxu1 }
 0x478   : > { %v14251_v9 = vpop.eup %9152  ;;  %v6122_v59 = vmul.f32 -0.5, %v14179_v12  ;;  %v5522_v4 = vmul.f32 1.442695, %v14227_v54  ;;  %v6040_v51 = vmul.f32 0.6931472, %v9151_v26  ;;  %v6043_v10 = vmul.f32 %v14127_v33, %v6042_v61  ;;  %16830 = vst [vmem:[#allocation49_spill] sm:$0xff] %v14264_v14 }
 0x479   : > { %v7113_v52 = vsel %vm6985_vm15, %v16827_v34, %v6857_v5  ;;  %v6106_v24 = vmul.f32 %v14146_v11, %v6105_v7  ;;  %vm14260_vm3 = vcmp.lt.f32.partialorder %v6107_v31, 0.0004427343  ;;  %vm6045_vm4 = vcmp.lt.f32.partialorder %v6044_v37, 0.0004427343  ;;  %v14266_v36 = vpop.eup %9154  ;;  %v14270_v61 = vpop.f32.mrb[157].mxu1  ;;  %v16832_v14 = vld [vmem:[#allocation39_spill] sm:$0xff] }
 0x47a   : > { %v6103_v19 = vmul.f32 0.6931472, %v9149_v2  ;;  %v6125_v26 = vand.u32 2147483647, %v14179_v12  ;;  %v6046_v29 = vsel %vm6045_vm4, %v6043_v10, %v6040_v51  ;;  %v6059_v33 = vmul.f32 -0.5, %v14174_v20  ;;  %16831 = vst [vmem:[#allocation48_spill] sm:$0xff] %v14270_v61 }
 0x47b   : > { %v14272_v50 = vpop.eup %9156  ;;  %v6859_v11 = vmul.f32 0.01, %v6091_v22  ;;  %9164 = vlog2.f32 %v6137_v1  ;;  %v6854_v5 = vmul.f32 0.01, %v6046_v29  ;;  %v6074_v7 = vadd.f32 1.0, %v14192_v48 }
 0x47c   : > { %v9159_v31 = vpop.eup %9158  ;;  %vm6989_vm5 = vcmp.gt.f32.partialorder %v14049_v30, 20.0  ;;  %v6123_v37 = vadd.f32 1.0, %v6122_v59  ;;  %v5512_v2 = vmul.f32 1.442695, %v14249_v35  ;;  %9166 = vpow2.f32 %v5522_v4  ;;  %v16835_v59 = vld [vmem:[#allocation28_spill] sm:$0xff] }
 0x47d   : > { %v7241_v10 = vsel %vm220_vm0, %v7113_v52, %v16827_v34  ;;  %v6155_v51 = vadd.f32 1.0, %v14266_v36  ;;  %v14282_v61 = vmul.f32 100.0, %v16832_v14  ;;  %v7110_v29 = vsel %vm6982_vm14, %v16796_v44, %v6854_v5 }
 0x47e   : > { %9168 = vlog2.f32 %v6074_v7  ;;  %vm6984_vm6 = vcmp.gt.f32.partialorder %v14055_v42, 20.0  ;;  %v6109_v22 = vsel %vm14260_vm3, %v6106_v24, %v6103_v19  ;;  %vm14290_vm7 = vcmp.lt.f32.partialorder %v6125_v26, 0.0004427343  ;;  %7782 = vmatmul.mubr.f32.gmra.mrb[106].mxu0 %v7110_v29 }
 0x47f   : > { %v14295_v4 = vmul.f32 100.0, %v16835_v59  ;;  %v6060_v34 = vadd.f32 1.0, %v6059_v33  ;;  %v6121_v52 = vmul.f32 0.6931472, %v9159_v31  ;;  %9170 = vpow2.f32 %v5508_v43  ;;  %7786 = vmatprep.mubr.f32.mxu0 %v7241_v10 }
 0x480   : > { %v6140_v28 = vmul.f32 -0.5, %v14223_v40  ;;  %v6062_v44 = vand.u32 2147483647, %v14174_v20  ;;  %v9161_v5 = vpop.eup %9160  ;;  %v7115_v6 = vsel %vm6987_vm2, %v13329_v17, %v6859_v11  ;;  %v6143_v19 = vand.u32 2147483647, %v14223_v40 }
 0x481   : > { %9172 = vpow2.f32 %v5512_v2  ;;  %v6077_v24 = vmul.f32 -0.5, %v14192_v48  ;;  %v14304_v26 = vpop.eup %9162  ;;  %v6861_v33 = vmul.f32 0.01, %v6109_v22  ;;  %v6124_v43 = vmul.f32 %v14179_v12, %v6123_v37  ;;  %v14312_v2 = vpop.f32.mrb[158].mxu1 }
 0x482   : > { %9174 = vlog2.f32 %v6155_v51  ;;  %v5526_v7 = vmul.f32 1.442695, %v14282_v61  ;;  %vm6991_vm8 = vcmp.gt.f32.partialorder %v14081_v32, 20.0  ;;  %v5516_v31 = vmul.f32 1.442695, %v14295_v4  ;;  %16836 = vst [vmem:[#allocation27_spill] sm:$0xff] %v14312_v2 }
 0x483   : > { %v6058_v10 = vmul.f32 0.6931472, %v9161_v5  ;;  %v6061_v21 = vmul.f32 %v14174_v20, %v6060_v34  ;;  %v6092_v11 = vadd.f32 1.0, %v14251_v9  ;;  %v6127_v29 = vsel %vm14290_vm7, %v6124_v43, %v6121_v52  ;;  %v14319_v37 = vpop.f32.mrb[159].mxu1  ;;  %v16841_v2 = vld [vmem:[#allocation40_spill] sm:$0xff] }
 0x484   : > { %v6141_v22 = vadd.f32 1.0, %v6140_v28  ;;  %v14317_v12 = vmul.f32 100.0, %v16837_v53  ;;  %vm6063_vm9 = vcmp.lt.f32.partialorder %v6062_v44, 0.0004427343  ;;  %16838 = vst [vmem:[#allocation24_spill] sm:$0xff] %v14319_v37  ;;  %vm6986_vm10 = vcmp.gt.f32.partialorder %v14097_v58, 20.0 }
 0x485   : > { %vm14322_vm11 = vcmp.lt.f32.partialorder %v6143_v19, 0.0004427343  ;;  %v6173_v20 = vadd.f32 1.0, %v14304_v26  ;;  %v6064_v34 = vsel %vm6063_vm9, %v6061_v21, %v6058_v10  ;;  %v6078_v5 = vadd.f32 1.0, %v6077_v24  ;;  %v9165_v1 = vpop.eup %9164  ;;  %v14351_v42 = vpop.f32.mrb[160].mxu1 }
 0x486   : > { %9176 = vlog2.f32 %v6092_v11  ;;  %v7117_v52 = vsel %vm6989_vm5, %v13365_v46, %v6861_v33  ;;  %v6856_v28 = vmul.f32 0.01, %v6064_v34  ;;  %v6080_v44 = vand.u32 2147483647, %v14192_v48  ;;  %v14331_v43 = vpop.eup %9166  ;;  %16842 = vst [vmem:[#allocation37_spill] sm:$0xff] %v14351_v42 }
 0x487   : > { %9178 = vpow2.f32 %v5526_v7  ;;  %v6863_v19 = vmul.f32 0.01, %v6127_v29  ;;  %v14334_v37 = vmul.f32 100.0, %v16841_v2  ;;  %v7243_v24 = vsel %vm220_vm0, %v7115_v6, %v13329_v17 }
 0x488   : > { %9180 = vpow2.f32 %v5516_v31  ;;  %v9169_v10 = vpop.eup %9168  ;;  %v6158_v21 = vmul.f32 -0.5, %v14266_v36  ;;  %v6161_v30 = vand.u32 2147483647, %v14266_v36  ;;  %v7112_v33 = vsel %vm6984_vm6, %v13267_v63, %v6856_v28 }
 0x489   : > { %v6095_v7 = vmul.f32 -0.5, %v14251_v9  ;;  %9182 = vlog2.f32 %v6173_v20  ;;  %v5520_v31 = vmul.f32 1.442695, %v14317_v12  ;;  %7787 = vmatmul.mubr.f32.gmra.mrb[108].mxu0 %v7112_v33  ;;  %v6076_v11 = vmul.f32 0.6931472, %v9169_v10  ;;  %v14347_v34 = vpop.eup %9170  ;;  %v16843_v20 = vld [vmem:[#allocation17_spill] sm:$0xff] }
 0x48a   : > { %v6079_v29 = vmul.f32 %v14192_v48, %v6078_v5  ;;  %v6139_v17 = vmul.f32 0.6931472, %v9165_v1  ;;  %v6142_v6 = vmul.f32 %v14223_v40, %v6141_v22  ;;  %v6191_v0 = vadd.f32 1.0, %v14331_v43  ;;  %7791 = vmatprep.mubr.f32.mxu0 %v7243_v24  ;;  %v14360_v5 = vpop.f32.mrb[161].mxu1  ;;  %v16845_v22 = vld [vmem:[#allocation30_spill] sm:$0xff] }
 0x48b   : > { %vm6081_vm12 = vcmp.lt.f32.partialorder %v6080_v44, 0.0004427343  ;;  %v14353_v63 = vpop.eup %9172  ;;  %v14356_v28 = vmul.f32 100.0, %v16843_v20  ;;  %v5530_v10 = vmul.f32 1.442695, %v14334_v37  ;;  %v6110_v48 = vadd.f32 1.0, %v14272_v50 }
 0x48c   : > { %v6082_v33 = vsel %vm6081_vm12, %v6079_v29, %v6076_v11  ;;  %16844 = vst [vmem:[#allocation21_spill] sm:$0xff] %v14360_v5  ;;  %v9175_v1 = vpop.eup %9174  ;;  %vm6988_vm13 = vcmp.gt.f32.partialorder %v14134_v13, 20.0  ;;  %v7119_v40 = vsel %vm6991_vm8, %v13400_v27, %v6863_v19  ;;  %v14367_v44 = vmul.f32 100.0, %v16845_v22 }
 0x48d   : > { %v6858_v24 = vmul.f32 0.01, %v6082_v33  ;;  %v6096_v42 = vadd.f32 1.0, %v6095_v7  ;;  %v6159_v41 = vadd.f32 1.0, %v6158_v21  ;;  %v7245_v11 = vsel %vm220_vm0, %v7117_v52, %v13365_v46 }
 0x48e   : > { %v6098_v29 = vand.u32 2147483647, %v14251_v9  ;;  %9184 = vlog2.f32 %v6110_v48  ;;  %v6145_v5 = vsel %vm14322_vm11, %v6142_v6, %v6139_v17  ;;  %v6176_v20 = vmul.f32 -0.5, %v14304_v26 }
 0x48f   : > { %9186 = vlog2.f32 %v6191_v0  ;;  %v7114_v32 = vsel %vm6986_vm10, %v16804_v45, %v6858_v24  ;;  %v6157_v7 = vmul.f32 0.6931472, %v9175_v1  ;;  %vm14379_vm14 = vcmp.lt.f32.partialorder %v6161_v30, 0.0004427343  ;;  %v16849_v1 = vld [vmem:[#allocation41_spill] sm:$0xff] }
 0x490   : > { %v9177_v19 = vpop.eup %9176  ;;  %v5524_v46 = vmul.f32 1.442695, %v14356_v28  ;;  %9188 = vpow2.f32 %v5530_v10  ;;  %7792 = vmatmul.mubr.f32.gmra.mrb[110].mxu0 %v7114_v32  ;;  %vm6993_vm15 = vcmp.gt.f32.partialorder %v14137_v47, 20.0  ;;  %v5534_v0 = vmul.f32 1.442695, %v14367_v44  ;;  %v14393_v10 = vpop.f32.mrb[162].mxu1 }
 0x491   : > { %v14384_v52 = vpop.eup %9178  ;;  %7796 = vmatprep.mubr.f32.mxu0 %v7245_v11  ;;  %v6094_v51 = vmul.f32 0.6931472, %v9177_v19  ;;  %v6097_v45 = vmul.f32 %v14251_v9, %v6096_v42  ;;  %v6113_v58 = vmul.f32 -0.5, %v14272_v50  ;;  %v6865_v17 = vmul.f32 0.01, %v6145_v5  ;;  %16848 = vst [vmem:[#allocation23_spill] sm:$0xff] %v14393_v10 }
 0x492   : > { %v14390_v30 = vpop.eup %9180  ;;  %v6160_v6 = vmul.f32 %v14266_v36, %v6159_v41  ;;  %9190 = vpow2.f32 %v5520_v31  ;;  %vm6099_vm1 = vcmp.lt.f32.partialorder %v6098_v29, 0.0004427343  ;;  %v6177_v33 = vadd.f32 1.0, %v6176_v20  ;;  %v14399_v32 = vpop.f32.mrb[163].mxu1  ;;  %v16851_v19 = vld [vmem:[#allocation26_spill] sm:$0xff] }
 0x493   : > { %v6179_v48 = vand.u32 2147483647, %v14304_v26  ;;  %v14397_v24 = vmul.f32 100.0, %v16849_v1  ;;  %v6100_v11 = vsel %vm6099_vm1, %v6097_v45, %v6094_v51  ;;  %16850 = vst [vmem:[#allocation14_spill] sm:$0xff] %v14399_v32  ;;  %v9183_v9 = vpop.eup %9182  ;;  %v6194_v5 = vmul.f32 -0.5, %v14331_v43 }
 0x494   : > { %v6163_v42 = vsel %vm14379_vm14, %v6160_v6, %v6157_v7  ;;  %v6209_v41 = vadd.f32 1.0, %v14384_v52  ;;  %v6860_v36 = vmul.f32 0.01, %v6100_v11  ;;  %vm6990_vm2 = vcmp.gt.f32.partialorder %v14171_v23, 20.0 }
 0x495   : > { %9192 = vpow2.f32 %v5534_v0  ;;  %v7247_v31 = vsel %vm220_vm0, %v7119_v40, %v13400_v27  ;;  %v6114_v20 = vadd.f32 1.0, %v6113_v58  ;;  %v6128_v29 = vadd.f32 1.0, %v14347_v34 }
 0x496   : > { %9194 = vpow2.f32 %v5524_v46  ;;  %v14411_v51 = vmul.f32 100.0, %v16851_v19  ;;  %v7116_v7 = vsel %vm6988_vm13, %v16809_v25, %v6860_v36  ;;  %v6116_v21 = vand.u32 2147483647, %v14272_v50 }
 0x497   : > { %vm6995_vm3 = vcmp.gt.f32.partialorder %v14161_v38, 20.0  ;;  %v6175_v0 = vmul.f32 0.6931472, %v9183_v9  ;;  %v5538_v45 = vmul.f32 1.442695, %v14397_v24  ;;  %7797 = vmatmul.mubr.f32.gmra.mrb[112].mxu0 %v7116_v7  ;;  %9196 = vlog2.f32 %v6128_v29 }
 0x498   : > { %v9185_v27 = vpop.eup %9184  ;;  %v6867_v40 = vmul.f32 0.01, %v6163_v42  ;;  %v6178_v46 = vmul.f32 %v14304_v26, %v6177_v33  ;;  %vm14420_vm4 = vcmp.lt.f32.partialorder %v6179_v48, 0.0004427343  ;;  %v6197_v13 = vand.u32 2147483647, %v14331_v43  ;;  %7801 = vmatprep.mubr.f32.mxu0 %v7247_v31 }
 0x499   : > { %v9187_v25 = vpop.eup %9186  ;;  %vm6997_vm5 = vcmp.gt.f32.partialorder %v14206_v15, 20.0  ;;  %v6195_v6 = vadd.f32 1.0, %v6194_v5  ;;  %9198 = vlog2.f32 %v6209_v41  ;;  %v6112_v11 = vmul.f32 0.6931472, %v9185_v27  ;;  %v16854_v48 = vld [vmem:[#allocation42_spill] sm:$0xff]  ;;  %v14436_v31 = vpop.f32.mrb[164].mxu1 }
 0x49a   : > { %v6115_v9 = vmul.f32 %v14272_v50, %v6114_v20  ;;  %v14427_v36 = vpop.eup %9188  ;;  %v7121_v26 = vsel %vm6993_vm15, %v16810_v56, %v6865_v17  ;;  %v5528_v33 = vmul.f32 1.442695, %v14411_v51  ;;  %v14434_v42 = vmul.f32 100.0, %v16854_v48  ;;  %16855 = vst [vmem:[#allocation18_spill] sm:$0xff] %v14436_v31  ;;  %v14441_v20 = vpop.f32.mrb[165].mxu1  ;;  %v16857_v17 = vld [vmem:[#allocation16_spill] sm:$0xff] }
 0x49b   : > { %vm6117_vm6 = vcmp.lt.f32.partialorder %v6116_v21, 0.0004427343  ;;  %v6181_v5 = vsel %vm14420_vm4, %v6178_v46, %v6175_v0  ;;  %9200 = vpow2.f32 %v5538_v45  ;;  %v6131_v50 = vmul.f32 -0.5, %v14347_v34  ;;  %16856 = vst [vmem:[#allocation22_spill] sm:$0xff] %v14441_v20 }
 0x49c   : > { %v6118_v41 = vsel %vm6117_vm6, %v6115_v9, %v6112_v11  ;;  %v14443_v29 = vpop.eup %9190  ;;  %v6212_v47 = vmul.f32 -0.5, %v14384_v52  ;;  %v14447_v7 = vmul.f32 100.0, %v16857_v17  ;;  %v6146_v21 = vadd.f32 1.0, %v14353_v63 }
 0x49d   : > { %v6862_v27 = vmul.f32 0.01, %v6118_v41  ;;  %v6193_v31 = vmul.f32 0.6931472, %v9187_v25  ;;  %v6215_v58 = vand.u32 2147483647, %v14384_v52  ;;  %v7249_v45 = vsel %vm220_vm0, %v7121_v26, %v16810_v56 }
 0x49e   : > { %v6227_v0 = vadd.f32 1.0, %v14427_v36  ;;  %v6869_v46 = vmul.f32 0.01, %v6181_v5  ;;  %v5542_v11 = vmul.f32 1.442695, %v14434_v42  ;;  %9202 = vlog2.f32 %v6146_v21 }
 0x49f   : > { %v7118_v9 = vsel %vm6990_vm2, %v16814_v16, %v6862_v27  ;;  %v14459_v41 = vpop.eup %9192  ;;  %vm6992_vm7 = vcmp.gt.f32.partialorder %v14217_v8, 20.0  ;;  %v7123_v25 = vsel %vm6995_vm3, %v16813_v55, %v6867_v40  ;;  %v6196_v10 = vmul.f32 %v14331_v43, %v6195_v6 }
 0x4a0   : > { %vm14466_vm8 = vcmp.lt.f32.partialorder %v6197_v13, 0.0004427343  ;;  %7802 = vmatmul.mubr.f32.gmra.mrb[114].mxu0 %v7118_v9  ;;  %v6132_v26 = vadd.f32 1.0, %v6131_v50  ;;  %v14470_v5 = vpop.eup %9194  ;;  %vm6999_vm9 = vcmp.gt.f32.partialorder %v14227_v54, 20.0  ;;  %v6213_v16 = vadd.f32 1.0, %v6212_v47  ;;  %v16862_v47 = vld [vmem:[#allocation31_spill] sm:$0xff] }
 0x4a1   : > { %9204 = vpow2.f32 %v5528_v33  ;;  %v5532_v23 = vmul.f32 1.442695, %v14447_v7  ;;  %7806 = vmatprep.mubr.f32.mxu0 %v7249_v45  ;;  %v6134_v38 = vand.u32 2147483647, %v14347_v34  ;;  %v9197_v40 = vpop.eup %9196  ;;  %v6199_v43 = vsel %vm14466_vm8, %v6196_v10, %v6193_v31  ;;  %v16863_v45 = vld [vmem:[#allocation44_spill] sm:$0xff]  ;;  %v14494_v9 = vpop.f32.mrb[166].mxu1 }
 0x4a2   : > { %vm14477_vm10 = vcmp.lt.f32.partialorder %v6215_v58, 0.0004427343  ;;  %9206 = vlog2.f32 %v6227_v0  ;;  %v6149_v6 = vmul.f32 -0.5, %v14353_v63  ;;  %v7125_v33 = vsel %vm6997_vm5, %v16819_v57, %v6869_v46  ;;  %16864 = vst [vmem:[#allocation19_spill] sm:$0xff] %v14494_v9  ;;  %v14497_v46 = vpop.f32.mrb[167].mxu1 }
 0x4a3   : > { %v6245_v50 = vadd.f32 1.0, %v14459_v41  ;;  %v14487_v27 = vmul.f32 100.0, %v16862_v47  ;;  %9208 = vpow2.f32 %v5542_v11  ;;  %v9199_v21 = vpop.eup %9198  ;;  %v14490_v10 = vmul.f32 100.0, %v16863_v45  ;;  %16865 = vst [vmem:[#allocation20_spill] sm:$0xff] %v14497_v46  ;;  %v14535_v54 = vpop.f32.mrb[168].mxu1 }
 0x4a4   : > { %v6130_v31 = vmul.f32 0.6931472, %v9197_v40  ;;  %v6133_v58 = vmul.f32 %v14347_v34, %v6132_v26  ;;  %v6164_v0 = vadd.f32 1.0, %v14390_v30  ;;  %v6871_v56 = vmul.f32 0.01, %v6199_v43  ;;  %16870 = vst [vmem:[#allocation39_spill] sm:$0xff] %v14535_v54 }
 0x4a5   : > { %v6230_v15 = vmul.f32 -0.5, %v14427_v36  ;;  %9210 = vpow2.f32 %v5532_v23  ;;  %vm6135_vm11 = vcmp.lt.f32.partialorder %v6134_v38, 0.0004427343  ;;  %v14499_v20 = vpop.eup %9200  ;;  %vm6994_vm12 = vcmp.gt.f32.partialorder %v14249_v35, 20.0  ;;  %v14539_v13 = vpop.f32.mrb[169].mxu1 }
 0x4a6   : > { %v6233_v11 = vand.u32 2147483647, %v14427_v36  ;;  %v6136_v40 = vsel %vm6135_vm11, %v6133_v58, %v6130_v31  ;;  %v6150_v32 = vadd.f32 1.0, %v6149_v6  ;;  %9212 = vlog2.f32 %v6164_v0  ;;  %v16866_v6 = vld [vmem:[#allocation33_spill] sm:$0xff]  ;;  %16871 = vst [vmem:[#allocation28_spill] sm:$0xff] %v14539_v13 }
 0x4a7   : > { %v6211_v34 = vmul.f32 0.6931472, %v9199_v21  ;;  %9214 = vlog2.f32 %v6245_v50  ;;  %v6864_v26 = vmul.f32 0.01, %v6136_v40  ;;  %v6152_v43 = vand.u32 2147483647, %v14353_v63 }
 0x4a8   : > { %v6214_v9 = vmul.f32 %v14384_v52, %v6213_v16  ;;  %v5536_v23 = vmul.f32 1.442695, %v14487_v27  ;;  %v5546_v38 = vmul.f32 1.442695, %v14490_v10  ;;  %v7251_v46 = vsel %vm220_vm0, %v7123_v25, %v16813_v55  ;;  %v9203_v47 = vpop.eup %9202 }
 0x4a9   : > { %v6263_v31 = vadd.f32 1.0, %v14499_v20  ;;  %v14512_v58 = vmul.f32 100.0, %v16866_v6  ;;  %v7120_v50 = vsel %vm6992_vm7, %v16821_v49, %v6864_v26  ;;  %v6167_v52 = vmul.f32 -0.5, %v14390_v30  ;;  %v16869_v49 = vld [vmem:[#allocation8_spill] sm:$0xff] }
 0x4aa   : > { %v14521_v16 = vsel %vm6999_vm9, %v16823_v62, %v6871_v56  ;;  %v6231_v21 = vadd.f32 1.0, %v6230_v15  ;;  %7807 = vmatmul.mubr.f32.gmra.mrb[116].mxu0 %v7120_v50  ;;  %v6148_v55 = vmul.f32 0.6931472, %v9203_v47  ;;  %v6151_v25 = vmul.f32 %v14353_v63, %v6150_v32 }
 0x4ab   : > { %v14524_v0 = vpop.eup %9204  ;;  %v6217_v40 = vsel %vm14477_vm10, %v6214_v9, %v6211_v34  ;;  %vm14528_vm13 = vcmp.lt.f32.partialorder %v6233_v11, 0.0004427343  ;;  %v14533_v26 = vmul.f32 100.0, %v16869_v49  ;;  %7811 = vmatprep.mubr.f32.mxu0 %v7251_v46  ;;  %vm6153_vm14 = vcmp.lt.f32.partialorder %v6152_v43, 0.0004427343  ;;  %v16872_v34 = vld [vmem:[#allocation15_spill] sm:$0xff] }
 0x4ac   : > { %v9207_v56 = vpop.eup %9206  ;;  %v6248_v47 = vmul.f32 -0.5, %v14459_v41  ;;  %9216 = vpow2.f32 %v5546_v38  ;;  %v6154_v63 = vsel %vm6153_vm14, %v6151_v25, %v6148_v55  ;;  %v6182_v32 = vadd.f32 1.0, %v14443_v29 }
 0x4ad   : > { %v14541_v9 = vpop.eup %9208  ;;  %vm6996_vm15 = vcmp.gt.f32.partialorder %v14295_v4, 20.0  ;;  %9218 = vlog2.f32 %v6263_v31  ;;  %v5540_v15 = vmul.f32 1.442695, %v14512_v58  ;;  %v6866_v46 = vmul.f32 0.01, %v6154_v63 }
 0x4ae   : > { %v6168_v11 = vadd.f32 1.0, %v6167_v52  ;;  %vm7001_vm1 = vcmp.gt.f32.partialorder %v14282_v61, 20.0  ;;  %v14547_v43 = vmul.f32 100.0, %v16872_v34  ;;  %v7253_v38 = vsel %vm220_vm0, %v7125_v33, %v16819_v57 }
 0x4af   : > { %v6170_v50 = vand.u32 2147483647, %v14390_v30  ;;  %9220 = vlog2.f32 %v6182_v32  ;;  %v14553_v55 = vpop.eup %9210  ;;  %v6229_v25 = vmul.f32 0.6931472, %v9207_v56  ;;  %v5550_v31 = vmul.f32 1.442695, %v14533_v26 }
 0x4b0   : > { %9222 = vpow2.f32 %v5536_v23  ;;  %v7122_v52 = vsel %vm6994_vm12, %v16826_v18, %v6866_v46  ;;  %v9213_v63 = vpop.eup %9212  ;;  %v6873_v54 = vmul.f32 0.01, %v6217_v40  ;;  %v6232_v13 = vmul.f32 %v14427_v36, %v6231_v21  ;;  %v16873_v18 = vld [vmem:[#allocation6_spill] sm:$0xff]  ;;  %v14569_v21 = vpop.f32.mrb[170].mxu1 }
 0x4b1   : > { %v6249_v6 = vadd.f32 1.0, %v6248_v47  ;;  %v6251_v57 = vand.u32 2147483647, %v14459_v41  ;;  %7812 = vmatmul.mubr.f32.gmra.mrb[118].mxu0 %v7122_v52  ;;  %v9215_v33 = vpop.eup %9214  ;;  %vm7003_vm2 = vcmp.gt.f32.partialorder %v14334_v37, 20.0  ;;  %v6281_v56 = vadd.f32 1.0, %v14541_v9  ;;  %16874 = vst [vmem:[#allocation32_spill] sm:$0xff] %v14569_v21 }
 0x4b2   : > { %7816 = vmatprep.mubr.f32.mxu0 %v7253_v38  ;;  %v6166_v23 = vmul.f32 0.6931472, %v9213_v63  ;;  %v6169_v32 = vmul.f32 %v14390_v30, %v6168_v11  ;;  %v6185_v35 = vmul.f32 -0.5, %v14443_v29  ;;  %9224 = vpow2.f32 %v5540_v15  ;;  %v14574_v52 = vpop.f32.mrb[171].mxu1 }
 0x4b3   : > { %v14566_v40 = vmul.f32 100.0, %v16873_v18  ;;  %v5554_v36 = vmul.f32 1.442695, %v14547_v43  ;;  %vm6171_vm3 = vcmp.lt.f32.partialorder %v6170_v50, 0.0004427343  ;;  %v6235_v47 = vsel %vm14528_vm13, %v6232_v13, %v6229_v25  ;;  %16875 = vst [vmem:[#allocation40_spill] sm:$0xff] %v14574_v52 }
 0x4b4   : > { %v6266_v46 = vmul.f32 -0.5, %v14499_v20  ;;  %9226 = vpow2.f32 %v5550_v31  ;;  %v6172_v38 = vsel %vm6171_vm3, %v6169_v32, %v6166_v23  ;;  %v6247_v30 = vmul.f32 0.6931472, %v9215_v33 }
 0x4b5   : > { %v6250_v15 = vmul.f32 %v14459_v41, %v6249_v6  ;;  %v6269_v11 = vand.u32 2147483647, %v14499_v20  ;;  %v6868_v63 = vmul.f32 0.01, %v6172_v38  ;;  %vm6998_vm4 = vcmp.gt.f32.partialorder %v14317_v12, 20.0 }
 0x4b6   : > { %9228 = vlog2.f32 %v6281_v56  ;;  %v7255_v8 = vsel %vm220_vm0, %v14521_v16, %v16823_v62  ;;  %v6186_v13 = vadd.f32 1.0, %v6185_v35  ;;  %v6200_v50 = vadd.f32 1.0, %v14470_v5  ;;  %v14584_v25 = vpop.eup %9216 }
 0x4b7   : > { %v6875_v31 = vmul.f32 0.01, %v6235_v47  ;;  %9230 = vpow2.f32 %v5554_v36  ;;  %v7124_v41 = vsel %vm6996_vm15, %v16835_v59, %v6868_v63  ;;  %v6188_v6 = vand.u32 2147483647, %v14443_v29  ;;  %v9219_v33 = vpop.eup %9218  ;;  %v14621_v63 = vpop.f32.mrb[172].mxu1 }
 0x4b8   : > { %v7129_v56 = vsel %vm7001_vm1, %v16832_v14, %v6873_v54  ;;  %vm14593_vm5 = vcmp.lt.f32.partialorder %v6251_v57, 0.0004427343  ;;  %vm7005_vm6 = vcmp.gt.f32.partialorder %v14367_v44, 20.0  ;;  %v6267_v16 = vadd.f32 1.0, %v6266_v46  ;;  %7817 = vmatmul.mubr.f32.gmra.mrb[120].mxu0 %v7124_v41  ;;  %v16880_v54 = vld [vmem:[#allocation7_spill] sm:$0xff]  ;;  %16882 = vst [vmem:[#allocation30_spill] sm:$0xff] %v14621_v63 }
 0x4b9   : > { %9232 = vlog2.f32 %v6200_v50  ;;  %v9221_v23 = vpop.eup %9220  ;;  %v6253_v59 = vsel %vm14593_vm5, %v6250_v15, %v6247_v30  ;;  %vm14600_vm7 = vcmp.lt.f32.partialorder %v6269_v11, 0.0004427343  ;;  %v5544_v61 = vmul.f32 1.442695, %v14566_v40  ;;  %7821 = vmatprep.mubr.f32.mxu0 %v7255_v8  ;;  %v16881_v15 = vld [vmem:[#allocation13_spill] sm:$0xff] }
 0x4ba   : > { %v14606_v57 = vmul.f32 100.0, %v16880_v54  ;;  %v14608_v32 = vpop.eup %9222  ;;  %v6284_v35 = vmul.f32 -0.5, %v14541_v9  ;;  %v6299_v36 = vadd.f32 1.0, %v14584_v25  ;;  %v6184_v47 = vmul.f32 0.6931472, %v9221_v23  ;;  %v14625_v23 = vpop.f32.mrb[173].mxu1 }
 0x4bb   : > { %v6187_v46 = vmul.f32 %v14443_v29, %v6186_v13  ;;  %v14616_v38 = vsel %vm7003_vm2, %v16841_v2, %v6875_v31  ;;  %v6265_v30 = vmul.f32 0.6931472, %v9219_v33  ;;  %v14619_v11 = vmul.f32 100.0, %v16881_v15  ;;  %16883 = vst [vmem:[#allocation41_spill] sm:$0xff] %v14625_v23 }
 0x4bc   : > { %vm6189_vm8 = vcmp.lt.f32.partialorder %v6188_v6, 0.0004427343  ;;  %v6877_v8 = vmul.f32 0.01, %v6253_v59  ;;  %v6287_v50 = vand.u32 2147483647, %v14541_v9  ;;  %v14627_v29 = vpop.eup %9224  ;;  %v6268_v37 = vmul.f32 %v14499_v20, %v6267_v16 }
 0x4bd   : > { %v6190_v41 = vsel %vm6189_vm8, %v6187_v46, %v6184_v47  ;;  %v6203_v62 = vmul.f32 -0.5, %v14470_v5  ;;  %vm7007_vm9 = vcmp.gt.f32.partialorder %v14397_v24, 20.0  ;;  %v5548_v13 = vmul.f32 1.442695, %v14606_v57  ;;  %v16884_v47 = vld [vmem:[#allocation10_spill] sm:$0xff] }
 0x4be   : > { %v6870_v31 = vmul.f32 0.01, %v6190_v41  ;;  %v6218_v6 = vadd.f32 1.0, %v14524_v0  ;;  %v14633_v33 = vpop.eup %9226  ;;  %v6285_v59 = vadd.f32 1.0, %v6284_v35  ;;  %9234 = vlog2.f32 %v6299_v36 }
 0x4bf   : > { %v14636_v46 = vmul.f32 100.0, %v16884_v47  ;;  %v7257_v63 = vsel %vm220_vm0, %v7129_v56, %v16832_v14  ;;  %v6271_v20 = vsel %vm14600_vm7, %v6268_v37, %v6265_v30  ;;  %v5558_v16 = vmul.f32 1.442695, %v14619_v11 }
 0x4c0   : > { %v7126_v41 = vsel %vm6998_vm4, %v16837_v53, %v6870_v31  ;;  %9236 = vlog2.f32 %v6218_v6  ;;  %v9229_v21 = vpop.eup %9228  ;;  %vm7000_vm10 = vcmp.gt.f32.partialorder %v14356_v28, 20.0  ;;  %vm14648_vm11 = vcmp.lt.f32.partialorder %v6287_v50, 0.0004427343 }
 0x4c1   : > { %9238 = vpow2.f32 %v5544_v61  ;;  %7822 = vmatmul.mubr.f32.gmra.mrb[122].mxu0 %v7126_v41  ;;  %v14653_v14 = vmul.f32 100.0, %v13982_v3  ;;  %v6204_v56 = vadd.f32 1.0, %v6203_v62  ;;  %v14655_v4 = vpop.eup %9230  ;;  %v14660_v53 = vsel %vm7005_vm6, %v16845_v22, %v6877_v8 }
 0x4c2   : > { %9240 = vpow2.f32 %v5548_v13  ;;  %v6317_v12 = vadd.f32 1.0, %v14633_v33  ;;  %7826 = vmatprep.mubr.f32.mxu0 %v7257_v63  ;;  %v6206_v36 = vand.u32 2147483647, %v14470_v5  ;;  %v6879_v61 = vmul.f32 0.01, %v6271_v20  ;;  %v14672_v20 = vpop.f32.mrb[174].mxu1 }
 0x4c3   : > { %v9233_v30 = vpop.eup %9232  ;;  %v6286_v50 = vmul.f32 %v14541_v9, %v6285_v59  ;;  %v6302_v37 = vmul.f32 -0.5, %v14584_v25  ;;  %v6221_v62 = vmul.f32 -0.5, %v14524_v0  ;;  %v6283_v31 = vmul.f32 0.6931472, %v9229_v21  ;;  %16887 = vst [vmem:[#allocation26_spill] sm:$0xff] %v14672_v20  ;;  %v16888_v59 = vld [vmem:[#allocation43_spill] sm:$0xff] }
 0x4c4   : > { %v6305_v6 = vand.u32 2147483647, %v14584_v25  ;;  %v5552_v44 = vmul.f32 1.442695, %v14636_v46  ;;  %9242 = vpow2.f32 %v5558_v16  ;;  %v5562_v8 = vmul.f32 1.442695, %v14653_v14 }
 0x4c5   : > { %v6202_v13 = vmul.f32 0.6931472, %v9233_v30  ;;  %v6205_v63 = vmul.f32 %v14470_v5, %v6204_v56  ;;  %v6236_v41 = vadd.f32 1.0, %v14553_v55  ;;  %9244 = vlog2.f32 %v6317_v12  ;;  %v14678_v21 = vpop.f32.mrb[175].mxu1 }
 0x4c6   : > { %v6335_v9 = vadd.f32 1.0, %v14655_v4  ;;  %v14676_v23 = vmul.f32 100.0, %v16888_v59  ;;  %vm6207_vm12 = vcmp.lt.f32.partialorder %v6206_v36, 0.0004427343  ;;  %16889 = vst [vmem:[#allocation42_spill] sm:$0xff] %v14678_v21  ;;  %vm7002_vm13 = vcmp.gt.f32.partialorder %v14411_v51, 20.0 }
 0x4c7   : > { %v14684_v16 = vsel %vm7007_vm9, %v16849_v1, %v6879_v61  ;;  %vm7009_vm14 = vcmp.gt.f32.partialorder %v14434_v42, 20.0  ;;  %v6208_v5 = vsel %vm6207_vm12, %v6205_v63, %v6202_v13  ;;  %v6222_v56 = vadd.f32 1.0, %v6221_v62 }
 0x4c8   : > { %9246 = vlog2.f32 %v6236_v41  ;;  %v6289_v12 = vsel %vm14648_vm11, %v6286_v50, %v6283_v31  ;;  %v6303_v30 = vadd.f32 1.0, %v6302_v37  ;;  %v6872_v20 = vmul.f32 0.01, %v6208_v5  ;;  %v9235_v21 = vpop.eup %9234  ;;  %v16892_v37 = vld [vmem:[#allocation17_spill] sm:$0xff] }
 0x4c9   : > { %v6224_v36 = vand.u32 2147483647, %v14524_v0  ;;  %vm14690_vm15 = vcmp.lt.f32.partialorder %v6305_v6, 0.0004427343  ;;  %9248 = vpow2.f32 %v5562_v8  ;;  %v14695_v24 = vmul.f32 100.0, %v14012_v60 }
 0x4ca   : > { %v7259_v61 = vsel %vm220_vm0, %v14616_v38, %v16841_v2  ;;  %v9237_v35 = vpop.eup %9236  ;;  %9250 = vlog2.f32 %v6335_v9  ;;  %v5556_v50 = vmul.f32 1.442695, %v14676_v23  ;;  %v7128_v62 = vsel %vm7000_vm10, %v16892_v37, %v6872_v20  ;;  %v16893_v9 = vld [vmem:[#allocation45_spill] sm:$0xff]  ;;  %v14715_v20 = vpop.f32.mrb[176].mxu1 }
 0x4cb   : > { %v6239_v31 = vmul.f32 -0.5, %v14553_v55  ;;  %v14706_v6 = vpop.eup %9238  ;;  %v6881_v8 = vmul.f32 0.01, %v6289_v12  ;;  %v6320_v13 = vmul.f32 -0.5, %v14633_v33  ;;  %7827 = vmatmul.mubr.f32.gmra.mrb[124].mxu0 %v7128_v62  ;;  %v6220_v63 = vmul.f32 0.6931472, %v9237_v35 }
 0x4cc   : > { %v6223_v41 = vmul.f32 %v14524_v0, %v6222_v56  ;;  %v14710_v2 = vpop.eup %9240  ;;  %v6301_v38 = vmul.f32 0.6931472, %v9235_v21  ;;  %9252 = vpow2.f32 %v5552_v44  ;;  %7831 = vmatprep.mubr.f32.mxu0 %v7259_v61  ;;  %vm6225_vm1 = vcmp.lt.f32.partialorder %v6224_v36, 0.0004427343  ;;  %16894 = vst [vmem:[#allocation16_spill] sm:$0xff] %v14715_v20  ;;  %v14720_v62 = vpop.f32.mrb[177].mxu1 }
 0x4cd   : > { %v14713_v28 = vmul.f32 100.0, %v16893_v9  ;;  %v6304_v5 = vmul.f32 %v14584_v25, %v6303_v30  ;;  %v5566_v12 = vmul.f32 1.442695, %v14695_v24  ;;  %v6254_v35 = vadd.f32 1.0, %v14608_v32  ;;  %16895 = vst [vmem:[#allocation44_spill] sm:$0xff] %v14720_v62 }
 0x4ce   : > { %v6226_v37 = vsel %vm6225_vm1, %v6223_v41, %v6220_v63  ;;  %v14722_v0 = vpop.eup %9242  ;;  %vm7004_vm2 = vcmp.gt.f32.partialorder %v14447_v7, 20.0  ;;  %v6323_v44 = vand.u32 2147483647, %v14633_v33  ;;  %9254 = vpow2.f32 %v5556_v50 }
 0x4cf   : > { %v6874_v21 = vmul.f32 0.01, %v6226_v37  ;;  %v6240_v56 = vadd.f32 1.0, %v6239_v31  ;;  %v6321_v36 = vadd.f32 1.0, %v6320_v13  ;;  %v7261_v25 = vsel %vm220_vm0, %v14660_v53, %v16845_v22  ;;  %v9245_v61 = vpop.eup %9244 }
 0x4d0   : > { %v6242_v30 = vand.u32 2147483647, %v14553_v55  ;;  %9256 = vlog2.f32 %v6254_v35  ;;  %v14734_v63 = vsel %vm7009_vm14, %v16854_v48, %v6881_v8  ;;  %v6307_v50 = vsel %vm14690_vm15, %v6304_v5, %v6301_v38  ;;  %v16898_v35 = vld [vmem:[#allocation9_spill] sm:$0xff] }
 0x4d1   : > { %vm7011_vm3 = vcmp.gt.f32.partialorder %v14490_v10, 20.0  ;;  %v7130_v31 = vsel %vm7002_vm13, %v16851_v19, %v6874_v21  ;;  %v5570_v22 = vmul.f32 1.442695, %v14713_v28  ;;  %v6338_v13 = vmul.f32 -0.5, %v14655_v4 }
 0x4d2   : > { %v9247_v53 = vpop.eup %9246  ;;  %v6341_v41 = vand.u32 2147483647, %v14655_v4  ;;  %v6353_v42 = vadd.f32 1.0, %v14722_v0  ;;  %9258 = vpow2.f32 %v5566_v12  ;;  %7832 = vmatmul.mubr.f32.gmra.mrb[126].mxu0 %v7130_v31  ;;  %vm14746_vm4 = vcmp.lt.f32.partialorder %v6323_v44, 0.0004427343  ;;  %v14758_v12 = vpop.f32.mrb[178].mxu1 }
 0x4d3   : > { %7836 = vmatprep.mubr.f32.mxu0 %v7261_v25  ;;  %v6238_v8 = vmul.f32 0.6931472, %v9247_v53  ;;  %v6241_v51 = vmul.f32 %v14553_v55, %v6240_v56  ;;  %v6257_v19 = vmul.f32 -0.5, %v14608_v32  ;;  %v14752_v38 = vpop.eup %9248  ;;  %v6883_v5 = vmul.f32 0.01, %v6307_v50  ;;  %16899 = vst [vmem:[#allocation8_spill] sm:$0xff] %v14758_v12 }
 0x4d4   : > { %v6322_v37 = vmul.f32 %v14633_v33, %v6321_v36  ;;  %v14756_v21 = vmul.f32 100.0, %v16898_v35  ;;  %vm6243_vm5 = vcmp.lt.f32.partialorder %v6242_v30, 0.0004427343  ;;  %v9251_v44 = vpop.eup %9250  ;;  %v6319_v31 = vmul.f32 0.6931472, %v9245_v61  ;;  %v16900_v53 = vld [vmem:[#allocation12_spill] sm:$0xff] }
 0x4d5   : > { %9260 = vpow2.f32 %v5570_v22  ;;  %v6244_v25 = vsel %vm6243_vm5, %v6241_v51, %v6238_v8  ;;  %v14761_v20 = vmul.f32 100.0, %v16900_v53  ;;  %v14763_v55 = vpop.f32.mrb[179].mxu1  ;;  %v6339_v56 = vadd.f32 1.0, %v6338_v13 }
 0x4d6   : > { %16901 = vst [vmem:[#allocation15_spill] sm:$0xff] %v14763_v55  ;;  %vm14765_vm6 = vcmp.lt.f32.partialorder %v6341_v41, 0.0004427343  ;;  %9262 = vlog2.f32 %v6353_v42  ;;  %v6876_v33 = vmul.f32 0.01, %v6244_v25  ;;  %v14769_v36 = vpop.eup %9252  ;;  %vm7006_vm7 = vcmp.gt.f32.partialorder %v14487_v27, 20.0 }
 0x4d7   : > { %v6371_v30 = vadd.f32 1.0, %v14752_v38  ;;  %v7263_v61 = vsel %vm220_vm0, %v14684_v16, %v16849_v1  ;;  %v6258_v22 = vadd.f32 1.0, %v6257_v19  ;;  %v6272_v13 = vadd.f32 1.0, %v14627_v29  ;;  %v16904_v1 = vld [vmem:[#allocation36_spill] sm:$0xff]  ;;  %v14812_v62 = vpop.f32.mrb[180].mxu1 }
 0x4d8   : > { %vm7013_vm8 = vcmp.gt.f32.partialorder %v14533_v26, 20.0  ;;  %v6337_v41 = vmul.f32 0.6931472, %v9251_v44  ;;  %v5560_v42 = vmul.f32 1.442695, %v14756_v21  ;;  %v7132_v8 = vsel %vm7004_vm2, %v16857_v17, %v6876_v33  ;;  %v14784_v25 = vpop.eup %9254  ;;  %16908 = vst [vmem:[#allocation7_spill] sm:$0xff] %v14812_v62 }
 0x4d9   : > { %v6260_v51 = vand.u32 2147483647, %v14608_v32  ;;  %v6325_v12 = vsel %vm14746_vm4, %v6322_v37, %v6319_v31  ;;  %v14789_v16 = vmul.f32 100.0, %v16904_v1  ;;  %7837 = vmatmul.mubr.f32.gmra.mrb[128].mxu0 %v7132_v8  ;;  %v5574_v19 = vmul.f32 1.442695, %v14761_v20  ;;  %v16905_v37 = vld [vmem:[#allocation46_spill] sm:$0xff] }
 0x4da   : > { %9264 = vlog2.f32 %v6272_v13  ;;  %v9257_v44 = vpop.eup %9256  ;;  %v14795_v7 = vsel %vm7011_vm3, %v16863_v45, %v6883_v5  ;;  %v6340_v17 = vmul.f32 %v14655_v4, %v6339_v56  ;;  %vm7015_vm9 = vcmp.gt.f32.partialorder %v14547_v43, 20.0  ;;  %7841 = vmatprep.mubr.f32.mxu0 %v7263_v61  ;;  %v16907_v5 = vld [vmem:[#allocation11_spill] sm:$0xff]  ;;  %v16915_v1 = vld [vmem:[#allocation38_spill] sm:$0xff] }
 0x4db   : > { %v6356_v52 = vmul.f32 -0.5, %v14722_v0  ;;  %v14801_v31 = vmul.f32 100.0, %v16905_v37  ;;  %v6359_v33 = vand.u32 2147483647, %v14722_v0  ;;  %9266 = vlog2.f32 %v6371_v30 }
 0x4dc   : > { %v6256_v13 = vmul.f32 0.6931472, %v9257_v44  ;;  %v6259_v8 = vmul.f32 %v14608_v32, %v6258_v22  ;;  %v14805_v55 = vpop.eup %9258  ;;  %v6885_v10 = vmul.f32 0.01, %v6325_v12  ;;  %v6343_v4 = vsel %vm14765_vm6, %v6340_v17, %v6337_v41  ;;  %v14816_v44 = vpop.f32.mrb[181].mxu1 }
 0x4dd   : > { %16906 = vst [vmem:[#allocation6_spill] sm:$0xff] %v14801_v31  ;;  %vm6261_vm10 = vcmp.lt.f32.partialorder %v6260_v51, 0.0004427343  ;;  %v14810_v56 = vmul.f32 100.0, %v16907_v5  ;;  %v5564_v61 = vmul.f32 1.442695, %v14789_v16  ;;  %9268 = vpow2.f32 %v5574_v19 }
 0x4de   : > { %v6262_v37 = vsel %vm6261_vm10, %v6259_v8, %v6256_v13  ;;  %v6275_v30 = vmul.f32 -0.5, %v14627_v29  ;;  %16909 = vst [vmem:[#allocation13_spill] sm:$0xff] %v14816_v44  ;;  %9270 = vpow2.f32 %v5560_v42  ;;  %v5568_v32 = vmul.f32 1.442695, %v14801_v31  ;;  %v16910_v42 = vld [vmem:[#allocation31_spill] sm:$0xff] }
 0x4df   : > { %v6878_v12 = vmul.f32 0.01, %v6262_v37  ;;  %v6290_v50 = vadd.f32 1.0, %v14706_v6  ;;  %v14820_v22 = vpop.eup %9260  ;;  %v6887_v41 = vmul.f32 0.01, %v6343_v4  ;;  %v6357_v51 = vadd.f32 1.0, %v6356_v52 }
 0x4e0   : > { %v6389_v17 = vadd.f32 1.0, %v14805_v55  ;;  %v7265_v19 = vsel %vm220_vm0, %v14734_v63, %v16854_v48  ;;  %v9263_v13 = vpop.eup %9262  ;;  %v6374_v8 = vmul.f32 -0.5, %v14752_v38  ;;  %v5578_v62 = vmul.f32 1.442695, %v14810_v56  ;;  %v16920_v4 = vld [vmem:[#allocation33_spill] sm:$0xff] }
 0x4e1   : > { %v7134_v37 = vsel %vm7006_vm7, %v16910_v42, %v6878_v12  ;;  %9272 = vlog2.f32 %v6290_v50  ;;  %vm7008_vm11 = vcmp.gt.f32.partialorder %v14512_v58, 20.0  ;;  %v14836_v52 = vsel %vm7013_vm8, %v16869_v49, %v6885_v10  ;;  %v16913_v42 = vld [vmem:[#allocation47_spill] sm:$0xff] }
 0x4e2   : > { %vm14838_vm12 = vcmp.lt.f32.partialorder %v6359_v33, 0.0004427343  ;;  %9274 = vpow2.f32 %v5564_v61  ;;  %7842 = vmatmul.mubr.f32.gmra.mrb[130].mxu0 %v7134_v37  ;;  %v6276_v48 = vadd.f32 1.0, %v6275_v30  ;;  %v6377_v27 = vand.u32 2147483647, %v14752_v38 }
 0x4e3   : > { %9276 = vpow2.f32 %v5568_v32  ;;  %v6407_v63 = vadd.f32 1.0, %v14820_v22  ;;  %7846 = vmatprep.mubr.f32.mxu0 %v7265_v19  ;;  %v6278_v12 = vand.u32 2147483647, %v14627_v29  ;;  %v14848_v26 = vsel %vm7015_vm9, %v16872_v34, %v6887_v41  ;;  %v14860_v41 = vpop.f32.mrb[182].mxu1 }
 0x4e4   : > { %v9265_v50 = vpop.eup %9264  ;;  %v6358_v33 = vmul.f32 %v14722_v0, %v6357_v51  ;;  %9278 = vlog2.f32 %v6389_v17  ;;  %v6293_v10 = vmul.f32 -0.5, %v14706_v6  ;;  %v6355_v61 = vmul.f32 0.6931472, %v9263_v13  ;;  %16916 = vst [vmem:[#allocation43_spill] sm:$0xff] %v14860_v41 }
 0x4e5   : > { %v6375_v30 = vadd.f32 1.0, %v6374_v8  ;;  %v14853_v32 = vmul.f32 100.0, %v16913_v42  ;;  %9280 = vpow2.f32 %v5578_v62  ;;  %v9267_v19 = vpop.eup %9266  ;;  %v6274_v37 = vmul.f32 0.6931472, %v9265_v50  ;;  %v14867_v62 = vpop.f32.mrb[183].mxu1 }
 0x4e6   : > { %v6277_v44 = vmul.f32 %v14627_v29, %v6276_v48  ;;  %v14857_v31 = vmul.f32 100.0, %v16915_v1  ;;  %v6308_v43 = vadd.f32 1.0, %v14710_v2  ;;  %vm14862_vm13 = vcmp.lt.f32.partialorder %v6377_v27, 0.0004427343  ;;  %16919 = vst [vmem:[#allocation17_spill] sm:$0xff] %v14867_v62 }
 0x4e7   : > { %16914 = vst [vmem:[#allocation10_spill] sm:$0xff] %v14853_v32  ;;  %v6392_v51 = vmul.f32 -0.5, %v14805_v55  ;;  %9282 = vlog2.f32 %v6407_v63  ;;  %vm6279_vm14 = vcmp.lt.f32.partialorder %v6278_v12, 0.0004427343  ;;  %v14869_v17 = vpop.eup %9268  ;;  %vm7010_vm15 = vcmp.gt.f32.partialorder %v14566_v40, 20.0 }
 0x4e8   : > { %v6395_v29 = vand.u32 2147483647, %v14805_v55  ;;  %v6280_v13 = vsel %vm6279_vm14, %v6277_v44, %v6274_v37  ;;  %v6294_v8 = vadd.f32 1.0, %v6293_v10  ;;  %9284 = vlog2.f32 %v6308_v43  ;;  %v14873_v48 = vpop.eup %9270 }
 0x4e9   : > { %v6361_v27 = vsel %vm14838_vm12, %v6358_v33, %v6355_v61  ;;  %v6373_v50 = vmul.f32 0.6931472, %v9267_v19  ;;  %v6880_v41 = vmul.f32 0.01, %v6280_v13  ;;  %v6296_v63 = vand.u32 2147483647, %v14706_v6 }
 0x4ea   : > { %v6376_v12 = vmul.f32 %v14752_v38, %v6375_v30  ;;  %v5572_v62 = vmul.f32 1.442695, %v14853_v32  ;;  %v5582_v42 = vmul.f32 1.442695, %v14857_v31  ;;  %v7267_v44 = vsel %vm220_vm0, %v14795_v7, %v16863_v45  ;;  %v16921_v61 = vld [vmem:[#allocation34_spill] sm:$0xff] }
 0x4eb   : > { %v9273_v10 = vpop.eup %9272  ;;  %v6425_v37 = vadd.f32 1.0, %v14869_v17  ;;  %v7136_v33 = vsel %vm7008_vm11, %v16920_v4, %v6880_v41  ;;  %v14890_v19 = vmul.f32 100.0, %v16921_v61  ;;  %v6311_v38 = vmul.f32 -0.5, %v14710_v2 }
 0x4ec   : > { %v14893_v30 = vpop.eup %9274  ;;  %v14895_v43 = vmul.f32 0.01, %v6361_v27  ;;  %v6393_v13 = vadd.f32 1.0, %v6392_v51  ;;  %7847 = vmatmul.mubr.f32.gmra.mrb[132].mxu0 %v7136_v33  ;;  %v6292_v32 = vmul.f32 0.6931472, %v9273_v10  ;;  %v6295_v45 = vmul.f32 %v14706_v6, %v6294_v8  ;;  %v14907_v27 = vpop.f32.mrb[184].mxu1 }
 0x4ed   : > { %v14898_v7 = vpop.eup %9276  ;;  %v6379_v58 = vsel %vm14862_vm13, %v6376_v12, %v6373_v50  ;;  %vm14902_vm1 = vcmp.lt.f32.partialorder %v6395_v29, 0.0004427343  ;;  %v6410_v4 = vmul.f32 -0.5, %v14820_v22  ;;  %7851 = vmatprep.mubr.f32.mxu0 %v7267_v44  ;;  %vm6297_vm2 = vcmp.lt.f32.partialorder %v6296_v63, 0.0004427343  ;;  %16924 = vst [vmem:[#allocation45_spill] sm:$0xff] %v14907_v27 }
 0x4ee   : > { %v9279_v51 = vpop.eup %9278  ;;  %v6413_v10 = vand.u32 2147483647, %v14820_v22  ;;  %9286 = vpow2.f32 %v5582_v42  ;;  %v6298_v6 = vsel %vm6297_vm2, %v6295_v45, %v6292_v32  ;;  %v6326_v8 = vadd.f32 1.0, %v14769_v36  ;;  %v14911_v33 = vpop.f32.mrb[185].mxu1  ;;  %v16926_v12 = vld [vmem:[#allocation48_spill] sm:$0xff]  ;;  %v16927_v27 = vld [vmem:[#allocation25_spill] sm:$0xff] }
 0x4ef   : > { %16925 = vst [vmem:[#allocation9_spill] sm:$0xff] %v14911_v33  ;;  %v14913_v0 = vpop.eup %9280  ;;  %vm7012_vm3 = vcmp.gt.f32.partialorder %v14606_v57, 20.0  ;;  %9288 = vlog2.f32 %v6425_v37  ;;  %v6882_v29 = vmul.f32 0.01, %v6298_v6  ;;  %v5586_v50 = vmul.f32 1.442695, %v14890_v19 }
 0x4f0   : > { %v6312_v63 = vadd.f32 1.0, %v6311_v38  ;;  %vm7017_vm4 = vcmp.gt.f32.partialorder %v14619_v11, 20.0  ;;  %vm7019_vm5 = vcmp.gt.f32.partialorder %v14653_v14, 20.0  ;;  %v7269_v42 = vsel %vm220_vm0, %v14836_v52, %v16869_v49 }
 0x4f1   : > { %v6314_v32 = vand.u32 2147483647, %v14710_v2  ;;  %v14925_v44 = vmul.f32 100.0, %v16926_v12  ;;  %9290 = vlog2.f32 %v6326_v8  ;;  %v9283_v37 = vpop.eup %9282  ;;  %v6891_v45 = vmul.f32 0.01, %v6379_v58 }
 0x4f2   : > { %v6411_v6 = vadd.f32 1.0, %v6410_v4  ;;  %v14928_v38 = vmul.f32 100.0, %v16927_v27  ;;  %v7138_v33 = vsel %vm7010_vm15, %v16873_v18, %v6882_v29  ;;  %v9285_v61 = vpop.eup %9284  ;;  %v6391_v1 = vmul.f32 0.6931472, %v9279_v51  ;;  %v16930_v18 = vld [vmem:[#allocation29_spill] sm:$0xff] }
 0x4f3   : > { %vm14933_vm6 = vcmp.lt.f32.partialorder %v6413_v10, 0.0004427343  ;;  %9292 = vpow2.f32 %v5572_v62  ;;  %v6443_v52 = vadd.f32 1.0, %v14913_v0  ;;  %7852 = vmatmul.mubr.f32.gmra.mrb[134].mxu0 %v7138_v33  ;;  %v6310_v58 = vmul.f32 0.6931472, %v9285_v61  ;;  %v14945_v10 = vpop.f32.mrb[186].mxu1 }
 0x4f4   : > { %9294 = vpow2.f32 %v5586_v50  ;;  %7856 = vmatprep.mubr.f32.mxu0 %v7269_v42  ;;  %v6313_v4 = vmul.f32 %v14710_v2, %v6312_v63  ;;  %v6329_v8 = vmul.f32 -0.5, %v14769_v36  ;;  %v6394_v40 = vmul.f32 %v14805_v55, %v6393_v13  ;;  %16931 = vst [vmem:[#allocation12_spill] sm:$0xff] %v14945_v10  ;;  %v14949_v42 = vpop.f32.mrb[187].mxu1 }
 0x4f5   : > { %v14942_v29 = vmul.f32 100.0, %v16930_v18  ;;  %vm6315_vm7 = vcmp.lt.f32.partialorder %v6314_v32, 0.0004427343  ;;  %v5590_v51 = vmul.f32 1.442695, %v14925_v44  ;;  %v6412_v33 = vmul.f32 %v14820_v22, %v6411_v6  ;;  %16932 = vst [vmem:[#allocation11_spill] sm:$0xff] %v14949_v42 }
 0x4f6   : > { %v6409_v62 = vmul.f32 0.6931472, %v9283_v37  ;;  %v5576_v50 = vmul.f32 1.442695, %v14928_v38  ;;  %v6316_v61 = vsel %vm6315_vm7, %v6313_v4, %v6310_v58  ;;  %v6397_v2 = vsel %vm14902_vm1, %v6394_v40, %v6391_v1 }
 0x4f7   : > { %v6428_v55 = vmul.f32 -0.5, %v14869_v17  ;;  %v6431_v13 = vand.u32 2147483647, %v14869_v17  ;;  %v6884_v63 = vmul.f32 0.01, %v6316_v61  ;;  %vm7014_vm8 = vcmp.gt.f32.partialorder %v14636_v46, 20.0 }
 0x4f8   : > { %vm7021_vm9 = vcmp.gt.f32.partialorder %v14695_v24, 20.0  ;;  %9296 = vlog2.f32 %v6443_v52  ;;  %v7271_v22 = vsel %vm220_vm0, %v14848_v26, %v16872_v34  ;;  %v6330_v32 = vadd.f32 1.0, %v6329_v8  ;;  %v14962_v41 = vpop.eup %9286 }
 0x4f9   : > { %v6344_v37 = vadd.f32 1.0, %v14784_v25  ;;  %v5580_v1 = vmul.f32 1.442695, %v14942_v29  ;;  %v7140_v6 = vsel %vm7012_vm3, %v16880_v54, %v6884_v63  ;;  %9298 = vpow2.f32 %v5590_v51  ;;  %v9289_v52 = vpop.eup %9288 }
 0x4fa   : > { %v6332_v58 = vand.u32 2147483647, %v14769_v36  ;;  %v7145_v34 = vsel %vm7017_vm4, %v16881_v15, %v14895_v43  ;;  %v14976_v26 = vsel %vm7019_vm5, %v13982_v3, %v6891_v45  ;;  %v6415_v4 = vsel %vm14933_vm6, %v6412_v33, %v6409_v62  ;;  %7857 = vmatmul.mubr.f32.gmra.mrb[136].mxu0 %v7140_v6  ;;  %v16935_v45 = vld [vmem:[#allocation24_spill] sm:$0xff]  ;;  %v16936_v33 = vld [vmem:[#allocation35_spill] sm:$0xff] }
 0x4fb   : > { %vm7023_vm10 = vcmp.gt.f32.partialorder %v14713_v28, 20.0  ;;  %9300 = vlog2.f32 %v6344_v37  ;;  %v9291_v54 = vpop.eup %9290  ;;  %v6893_v57 = vmul.f32 0.01, %v6397_v2  ;;  %v6429_v8 = vadd.f32 1.0, %v6428_v55  ;;  %7861 = vmatprep.mubr.f32.mxu0 %v7271_v22  ;;  %v14995_v2 = vpop.f32.mrb[188].mxu1 }
 0x4fc   : > { %vm14981_vm11 = vcmp.lt.f32.partialorder %v6431_v13, 0.0004427343  ;;  %9302 = vpow2.f32 %v5576_v50  ;;  %v6461_v11 = vadd.f32 1.0, %v14962_v41  ;;  %v6328_v14 = vmul.f32 0.6931472, %v9291_v54  ;;  %16937 = vst [vmem:[#allocation31_spill] sm:$0xff] %v14995_v2 }
 0x4fd   : > { %v6331_v43 = vmul.f32 %v14769_v36, %v6330_v32  ;;  %v14988_v49 = vmul.f32 100.0, %v16935_v45  ;;  %v14990_v51 = vpop.eup %9292  ;;  %v6895_v62 = vmul.f32 0.01, %v6415_v4  ;;  %9304 = vpow2.f32 %v5580_v1  ;;  %v15001_v22 = vpop.f32.mrb[189].mxu1  ;;  %v16940_v54 = vld [vmem:[#allocation49_spill] sm:$0xff] }
 0x4fe   : > { %v14993_v61 = vmul.f32 100.0, %v16936_v33  ;;  %vm6333_vm12 = vcmp.lt.f32.partialorder %v6332_v58, 0.0004427343  ;;  %v14997_v50 = vpop.eup %9294  ;;  %v6427_v55 = vmul.f32 0.6931472, %v9289_v52  ;;  %v6446_v13 = vmul.f32 -0.5, %v14913_v0 }
 0x4ff   : > { %v6334_v63 = vsel %vm6333_vm12, %v6331_v43, %v6328_v14  ;;  %v6347_v36 = vmul.f32 -0.5, %v14784_v25  ;;  %16938 = vst [vmem:[#allocation33_spill] sm:$0xff] %v15001_v22  ;;  %v15003_v32 = vpop.f32.mrb[64].mxu0  ;;  %v6430_v37 = vmul.f32 %v14869_v17, %v6429_v8  ;;  %v6449_v1 = vand.u32 2147483647, %v14913_v0 }
 0x500   : > { %16939 = vst [vmem:[#allocation48_spill] sm:$0xff] %v15003_v32  ;;  %v6886_v6 = vmul.f32 0.01, %v6334_v63  ;;  %v6362_v58 = vadd.f32 1.0, %v14873_v48  ;;  %v7680_v4 = vpop.f32.mrb[65].mxu0  ;;  %9306 = vlog2.f32 %v6461_v11  ;;  %v15009_v52 = vmul.f32 100.0, %v16940_v54 }
 0x501   : > { %v5594_v14 = vmul.f32 1.442695, %v14988_v49  ;;  %v7273_v43 = vsel %vm220_vm0, %v7145_v34, %v16881_v15  ;;  %v15018_v17 = vsel %vm7021_vm9, %v14012_v60, %v6893_v57  ;;  %vm7025_vm13 = vcmp.gt.f32.partialorder %v14761_v20, 20.0 }
 0x502   : > { %16941 = vst [vmem:[#allocation25_spill] sm:$0xff] %v15009_v52  ;;  %v6479_v8 = vadd.f32 1.0, %v14997_v50  ;;  %v7142_v11 = vsel %vm7014_vm8, %v16884_v47, %v6886_v6  ;;  %9308 = vlog2.f32 %v6362_v58  ;;  %v9297_v63 = vpop.eup %9296  ;;  %vm7016_vm14 = vcmp.gt.f32.partialorder %v14676_v23, 20.0  ;;  %v16952_v6 = vld [vmem:[#allocation27_spill] sm:$0xff] }
 0x503   : > { %v6433_v15 = vsel %vm14981_vm11, %v6430_v37, %v6427_v55  ;;  %v6464_v34 = vmul.f32 -0.5, %v14962_v41  ;;  %v5584_v24 = vmul.f32 1.442695, %v14993_v61  ;;  %7862 = vmatmul.mubr.f32.gmra.mrb[138].mxu0 %v7142_v11  ;;  %v6348_v57 = vadd.f32 1.0, %v6347_v36  ;;  %v15030_v4 = vpop.eup %9298  ;;  %v16944_v36 = vld [vmem:[#allocation21_spill] sm:$0xff] }
 0x504   : > { %v15035_v46 = vsel %vm7023_vm10, %v16893_v9, %v6895_v62  ;;  %v6447_v47 = vadd.f32 1.0, %v6446_v13  ;;  %vm15037_vm15 = vcmp.lt.f32.partialorder %v6449_v1, 0.0004427343  ;;  %7866 = vmatprep.mubr.f32.mxu0 %v7273_v43  ;;  %v6350_v40 = vand.u32 2147483647, %v14784_v25  ;;  %v16945_v1 = vld [vmem:[#allocation14_spill] sm:$0xff] }
 0x505   : > { %v9301_v55 = vpop.eup %9300  ;;  %v5588_v37 = vmul.f32 1.442695, %v15009_v52  ;;  %9310 = vpow2.f32 %v5594_v14  ;;  %v15044_v58 = vmul.f32 100.0, %v16944_v36  ;;  %v6365_v11 = vmul.f32 -0.5, %v14873_v48 }
 0x506   : > { %v15047_v28 = vpop.eup %9302  ;;  %v6897_v62 = vmul.f32 0.01, %v6433_v15  ;;  %v6467_v13 = vand.u32 2147483647, %v14962_v41  ;;  %9312 = vlog2.f32 %v6479_v8  ;;  %v15051_v2 = vmul.f32 100.0, %v16945_v1  ;;  %v15058_v15 = vpop.f32.mrb[190].mxu1 }
 0x507   : > { %v6465_v43 = vadd.f32 1.0, %v6464_v34  ;;  %v6346_v10 = vmul.f32 0.6931472, %v9301_v55  ;;  %v6349_v32 = vmul.f32 %v14784_v25, %v6348_v57  ;;  %v6380_v14 = vadd.f32 1.0, %v14893_v30  ;;  %v15055_v22 = vpop.eup %9304  ;;  %16946 = vst [vmem:[#allocation29_spill] sm:$0xff] %v15058_v15  ;;  %v15062_v55 = vpop.f32.mrb[191].mxu1 }
 0x508   : > { %v6445_v42 = vmul.f32 0.6931472, %v9297_v63  ;;  %9314 = vpow2.f32 %v5584_v24  ;;  %v6497_v54 = vadd.f32 1.0, %v15030_v4  ;;  %vm6351_vm1 = vcmp.lt.f32.partialorder %v6350_v40, 0.0004427343  ;;  %16947 = vst [vmem:[#allocation24_spill] sm:$0xff] %v15062_v55 }
 0x509   : > { %vm7018_vm2 = vcmp.gt.f32.partialorder %v14756_v21, 20.0  ;;  %v6352_v8 = vsel %vm6351_vm1, %v6349_v32, %v6346_v10  ;;  %v5598_v52 = vmul.f32 1.442695, %v15044_v58  ;;  %v6366_v34 = vadd.f32 1.0, %v6365_v11  ;;  %v15064_v25 = vpop.f32.mrb[66].mxu0 }
 0x50a   : > { %9316 = vlog2.f32 %v6380_v14  ;;  %16948 = vst [vmem:[#allocation21_spill] sm:$0xff] %v15064_v25  ;;  %v6448_v57 = vmul.f32 %v14913_v0, %v6447_v47  ;;  %v6888_v63 = vmul.f32 0.01, %v6352_v8  ;;  %v6368_v24 = vand.u32 2147483647, %v14873_v48  ;;  %v9307_v33 = vpop.eup %9306  ;;  %v7685_v47 = vpop.f32.mrb[67].mxu0 }
 0x50b   : > { %v5602_v40 = vmul.f32 1.442695, %v15051_v2  ;;  %v15072_v10 = vsel %vm7025_vm13, %v16900_v53, %v6897_v62  ;;  %vm15074_vm3 = vcmp.lt.f32.partialorder %v6467_v13, 0.0004427343  ;;  %9318 = vpow2.f32 %v5588_v37 }
 0x50c   : > { %v7275_v0 = vsel %vm220_vm0, %v14976_v26, %v13982_v3  ;;  %v9309_v11 = vpop.eup %9308  ;;  %v6451_v14 = vsel %vm15037_vm15, %v6448_v57, %v6445_v42  ;;  %vm7027_vm4 = vcmp.gt.f32.partialorder %v14810_v56, 20.0  ;;  %9320 = vlog2.f32 %v6497_v54  ;;  %v15093_v54 = vpop.f32.mrb[68].mxu0 }
 0x50d   : > { %v7144_v20 = vsel %vm7016_vm14, %v16888_v59, %v6888_v63  ;;  %v6383_v62 = vmul.f32 -0.5, %v14893_v30  ;;  %v6482_v37 = vmul.f32 -0.5, %v14997_v50  ;;  %9322 = vpow2.f32 %v5598_v52  ;;  %16951 = vst [vmem:[#allocation14_spill] sm:$0xff] %v15093_v54  ;;  %v7690_v63 = vpop.f32.mrb[69].mxu0 }
 0x50e   : > { %7867 = vmatmul.mubr.f32.gmra.mrb[140].mxu0 %v7144_v20  ;;  %v6364_v13 = vmul.f32 0.6931472, %v9309_v11  ;;  %v6367_v3 = vmul.f32 %v14873_v48, %v6366_v34  ;;  %v6466_v26 = vmul.f32 %v14962_v41, %v6465_v43  ;;  %v6485_v42 = vand.u32 2147483647, %v14997_v50 }
 0x50f   : > { %7871 = vmatprep.mubr.f32.mxu0 %v7275_v0  ;;  %vm6369_vm5 = vcmp.lt.f32.partialorder %v6368_v24, 0.0004427343  ;;  %9324 = vpow2.f32 %v5602_v40  ;;  %v15095_v23 = vpop.eup %9310  ;;  %v6463_v59 = vmul.f32 0.6931472, %v9307_v33  ;;  %v15098_v8 = vmul.f32 100.0, %v16952_v6  ;;  %v16953_v24 = vld [vmem:[#allocation22_spill] sm:$0xff] }
 0x510   : > { %v6370_v57 = vsel %vm6369_vm5, %v6367_v3, %v6364_v13  ;;  %v6398_v52 = vadd.f32 1.0, %v14898_v7  ;;  %v9313_v48 = vpop.eup %9312  ;;  %vm7020_vm6 = vcmp.gt.f32.partialorder %v14789_v16, 20.0  ;;  %v6899_v41 = vmul.f32 0.01, %v6451_v14 }
 0x511   : > { %v6890_v43 = vmul.f32 0.01, %v6370_v57  ;;  %v6384_v34 = vadd.f32 1.0, %v6383_v62  ;;  %v15103_v40 = vmul.f32 100.0, %v16953_v24  ;;  %v6483_v0 = vadd.f32 1.0, %v6482_v37  ;;  %v16956_v57 = vld [vmem:[#allocation37_spill] sm:$0xff] }
 0x512   : > { %v7277_v33 = vsel %vm220_vm0, %v15018_v17, %v14012_v60  ;;  %v6386_v47 = vand.u32 2147483647, %v14893_v30  ;;  %9326 = vlog2.f32 %v6398_v52  ;;  %v15110_v11 = vpop.eup %9314  ;;  %vm15112_vm7 = vcmp.lt.f32.partialorder %v6485_v42, 0.0004427343  ;;  %v15127_v52 = vpop.f32.mrb[70].mxu0 }
 0x513   : > { %v6500_v14 = vmul.f32 -0.5, %v15030_v4  ;;  %v6515_v62 = vadd.f32 1.0, %v15095_v23  ;;  %v7146_v37 = vsel %vm7018_vm2, %v16898_v35, %v6890_v43  ;;  %v6469_v60 = vsel %vm15074_vm3, %v6466_v26, %v6463_v59  ;;  %16957 = vst [vmem:[#allocation27_spill] sm:$0xff] %v15127_v52 }
 0x514   : > { %v9317_v13 = vpop.eup %9316  ;;  %v6481_v17 = vmul.f32 0.6931472, %v9313_v48  ;;  %v5592_v3 = vmul.f32 1.442695, %v15098_v8  ;;  %v15125_v42 = vmul.f32 100.0, %v16956_v57  ;;  %7872 = vmatmul.mubr.f32.gmra.mrb[142].mxu0 %v7146_v37  ;;  %vm7029_vm8 = vcmp.gt.f32.partialorder %v14857_v31, 20.0 }
 0x515   : > { %7876 = vmatprep.mubr.f32.mxu0 %v7277_v33  ;;  %v6382_v63 = vmul.f32 0.6931472, %v9317_v13  ;;  %v6385_v21 = vmul.f32 %v14893_v30, %v6384_v34  ;;  %v5606_v35 = vmul.f32 1.442695, %v15103_v40  ;;  %v6401_v32 = vmul.f32 -0.5, %v14898_v7  ;;  %v15133_v26 = vpop.eup %9318  ;;  %v7695_v33 = vpop.f32.mrb[71].mxu0 }
 0x516   : > { %v15138_v59 = vsel %vm7027_vm4, %v16907_v5, %v6899_v41  ;;  %v6484_v48 = vmul.f32 %v14997_v50, %v6483_v0  ;;  %v6503_v43 = vand.u32 2147483647, %v15030_v4  ;;  %vm6387_vm9 = vcmp.lt.f32.partialorder %v6386_v47, 0.0004427343  ;;  %v9321_v37 = vpop.eup %9320  ;;  %v15142_v15 = vpop.f32.mrb[72].mxu0  ;;  %v16962_v33 = vld [vmem:[#allocation36_spill] sm:$0xff] }
 0x517   : > { %v6901_v13 = vmul.f32 0.01, %v6469_v60  ;;  %v6501_v30 = vadd.f32 1.0, %v6500_v14  ;;  %9328 = vlog2.f32 %v6515_v62  ;;  %v6388_v34 = vsel %vm6387_vm9, %v6385_v21, %v6382_v63  ;;  %16958 = vst [vmem:[#allocation22_spill] sm:$0xff] %v15142_v15  ;;  %v15144_v55 = vpop.eup %9322  ;;  %v7700_v47 = vpop.f32.mrb[73].mxu0  ;;  %v16959_v62 = vld [vmem:[#allocation6_spill] sm:$0xff] }
 0x518   : > { %v6487_v56 = vsel %vm15112_vm7, %v6484_v48, %v6481_v17  ;;  %v15149_v41 = vmul.f32 1.442695, %v15125_v42  ;;  %v6892_v50 = vmul.f32 0.01, %v6388_v34  ;;  %v7279_v0 = vsel %vm220_vm0, %v15035_v46, %v16893_v9  ;;  %v16960_v63 = vld [vmem:[#allocation20_spill] sm:$0xff]  ;;  %v15162_v17 = vpop.f32.mrb[74].mxu0 }
 0x519   : > { %v15155_v14 = vpop.eup %9324  ;;  %vm7022_vm10 = vcmp.gt.f32.partialorder %v16959_v62, 20.0  ;;  %9330 = vpow2.f32 %v5606_v35  ;;  %v6402_v60 = vadd.f32 1.0, %v6401_v32  ;;  %v15159_v21 = vmul.f32 100.0, %v16960_v63  ;;  %16961 = vst [vmem:[#allocation6_spill] sm:$0xff] %v15162_v17  ;;  %v7705_v34 = vpop.f32.mrb[75].mxu0 }
 0x51a   : > { %v6416_v20 = vadd.f32 1.0, %v14990_v51  ;;  %vm7031_vm11 = vcmp.gt.f32.partialorder %v14890_v19, 20.0  ;;  %v6499_v48 = vmul.f32 0.6931472, %v9321_v37  ;;  %9332 = vpow2.f32 %v5592_v3  ;;  %v15175_v17 = vpop.f32.mrb[76].mxu0 }
 0x51b   : > { %v7148_v9 = vsel %vm7020_vm6, %v16962_v33, %v6892_v50  ;;  %v6404_v46 = vand.u32 2147483647, %v14898_v7  ;;  %v6502_v35 = vmul.f32 %v15030_v4, %v6501_v30  ;;  %vm15170_vm12 = vcmp.lt.f32.partialorder %v6503_v43, 0.0004427343  ;;  %16965 = vst [vmem:[#allocation20_spill] sm:$0xff] %v15175_v17  ;;  %v16966_v50 = vld [vmem:[#allocation23_spill] sm:$0xff] }
 0x51c   : > { %v6533_v47 = vadd.f32 1.0, %v15144_v55  ;;  %7877 = vmatmul.mubr.f32.gmra.mrb[144].mxu0 %v7148_v9  ;;  %9334 = vlog2.f32 %v6416_v20  ;;  %v9327_v3 = vpop.eup %9326  ;;  %v6903_v37 = vmul.f32 0.01, %v6487_v56  ;;  %v6518_v16 = vmul.f32 -0.5, %v15095_v23  ;;  %v7710_v4 = vpop.f32.mrb[77].mxu0  ;;  %v16967_v43 = vld [vmem:[#allocation18_spill] sm:$0xff] }
 0x51d   : > { %v15179_v33 = vmul.f32 100.0, %v16966_v50  ;;  %v6551_v34 = vadd.f32 1.0, %v15155_v14  ;;  %7881 = vmatprep.mubr.f32.mxu0 %v7279_v0  ;;  %vm7033_vm13 = vcmp.gt.f32.partialorder %v14925_v44, 20.0  ;;  %v15184_v30 = vmul.f32 100.0, %v16967_v43  ;;  %v16969_v56 = vld [vmem:[#allocation38_spill] sm:$0xff]  ;;  %v15196_v4 = vpop.f32.mrb[78].mxu0 }
 0x51e   : > { %v6400_v9 = vmul.f32 0.6931472, %v9327_v3  ;;  %v6403_v20 = vmul.f32 %v14898_v7, %v6402_v60  ;;  %v5610_v17 = vmul.f32 1.442695, %v15159_v21  ;;  %v15191_v15 = vsel %vm7029_vm8, %v16969_v56, %v6901_v13  ;;  %16970 = vst [vmem:[#allocation38_spill] sm:$0xff] %v15196_v4  ;;  %v16971_v7 = vld [vmem:[#allocation28_spill] sm:$0xff] }
 0x51f   : > { %16968 = vst [vmem:[#allocation36_spill] sm:$0xff] %v15184_v30  ;;  %v6505_v52 = vsel %vm15170_vm12, %v6502_v35, %v6499_v48  ;;  %v6521_v0 = vand.u32 2147483647, %v15095_v23  ;;  %vm6405_vm14 = vcmp.lt.f32.partialorder %v6404_v46, 0.0004427343  ;;  %9336 = vlog2.f32 %v6533_v47  ;;  %v7715_v25 = vpop.f32.mrb[79].mxu0 }
 0x520   : > { %v6406_v54 = vsel %vm6405_vm14, %v6403_v20, %v6400_v9  ;;  %v6419_v3 = vmul.f32 -0.5, %v14990_v51  ;;  %v15200_v60 = vmul.f32 100.0, %v16971_v7  ;;  %v5600_v31 = vmul.f32 1.442695, %v15179_v33  ;;  %v15209_v9 = vpop.f32.mrb[80].mxu0  ;;  %v16973_v4 = vld [vmem:[#allocation46_spill] sm:$0xff] }
 0x521   : > { %9338 = vlog2.f32 %v6551_v34  ;;  %v6894_v13 = vmul.f32 0.01, %v6406_v54  ;;  %v6434_v32 = vadd.f32 1.0, %v15047_v28  ;;  %v9329_v48 = vpop.eup %9328  ;;  %v6519_v35 = vadd.f32 1.0, %v6518_v16  ;;  %16972 = vst [vmem:[#allocation28_spill] sm:$0xff] %v15209_v9  ;;  %v7720_v34 = vpop.f32.mrb[81].mxu0 }
 0x522   : > { %v5604_v46 = vmul.f32 1.442695, %v15184_v30  ;;  %9340 = vpow2.f32 %v5610_v17  ;;  %v7281_v47 = vsel %vm220_vm0, %v15072_v10, %v16900_v53  ;;  %v6905_v20 = vmul.f32 0.01, %v6505_v52  ;;  %v16974_v43 = vld [vmem:[#allocation10_spill] sm:$0xff]  ;;  %v16979_v50 = vld [vmem:[#allocation19_spill] sm:$0xff] }
 0x523   : > { %v6536_v25 = vmul.f32 -0.5, %v15144_v55  ;;  %v7150_v54 = vsel %vm7022_vm10, %v16973_v4, %v6894_v13  ;;  %9342 = vlog2.f32 %v6434_v32  ;;  %v15215_v16 = vpop.eup %9330  ;;  %vm7024_vm15 = vcmp.gt.f32.partialorder %v16974_v43, 20.0  ;;  %v16975_v17 = vld [vmem:[#allocation34_spill] sm:$0xff]  ;;  %v16982_v4 = vld [vmem:[#allocation40_spill] sm:$0xff] }
 0x524   : > { %v15221_v30 = vsel %vm7031_vm11, %v16975_v17, %v6903_v37  ;;  %9344 = vpow2.f32 %v15149_v41  ;;  %7882 = vmatmul.mubr.f32.gmra.mrb[146].mxu0 %v7150_v54  ;;  %v6420_v53 = vadd.f32 1.0, %v6419_v3  ;;  %v5614_v10 = vmul.f32 1.442695, %v15200_v60  ;;  %v15225_v52 = vpop.eup %9332  ;;  %v15236_v54 = vpop.f32.mrb[82].mxu0 }
 0x525   : > { %v6517_v62 = vmul.f32 0.6931472, %v9329_v48  ;;  %vm15227_vm1 = vcmp.lt.f32.partialorder %v6521_v0, 0.0004427343  ;;  %9346 = vpow2.f32 %v5600_v31  ;;  %7886 = vmatprep.mubr.f32.mxu0 %v7281_v47  ;;  %v6422_v13 = vand.u32 2147483647, %v14990_v51 }
 0x526   : > { %v9335_v19 = vpop.eup %9334  ;;  %v6520_v37 = vmul.f32 %v15095_v23, %v6519_v35  ;;  %v6539_v41 = vand.u32 2147483647, %v15144_v55  ;;  %v6554_v3 = vmul.f32 -0.5, %v15155_v14  ;;  %v6437_v32 = vmul.f32 -0.5, %v15047_v28  ;;  %16978 = vst [vmem:[#allocation46_spill] sm:$0xff] %v15236_v54  ;;  %v7725_v47 = vpop.f32.mrb[83].mxu0 }
 0x527   : > { %v15241_v0 = vsel %vm7033_vm13, %v16926_v12, %v6905_v20  ;;  %v6537_v31 = vadd.f32 1.0, %v6536_v25  ;;  %9348 = vpow2.f32 %v5604_v46  ;;  %v6569_v48 = vadd.f32 1.0, %v15215_v16 }
 0x528   : > { %v6418_v34 = vmul.f32 0.6931472, %v9335_v19  ;;  %v6421_v23 = vmul.f32 %v14990_v51, %v6420_v53  ;;  %9350 = vpow2.f32 %v5614_v10  ;;  %v6452_v35 = vadd.f32 1.0, %v15055_v22  ;;  %v15253_v51 = vpop.f32.mrb[84].mxu0 }
 0x529   : > { %v6523_v9 = vsel %vm15227_vm1, %v6520_v37, %v6517_v62  ;;  %v6557_v54 = vand.u32 2147483647, %v15155_v14  ;;  %v15250_v44 = vmul.f32 100.0, %v16979_v50  ;;  %vm6423_vm2 = vcmp.lt.f32.partialorder %v6422_v13, 0.0004427343  ;;  %v9337_v20 = vpop.eup %9336  ;;  %16981 = vst [vmem:[#allocation34_spill] sm:$0xff] %v15253_v51 }
 0x52a   : > { %vm7026_vm3 = vcmp.gt.f32.partialorder %v14928_v38, 20.0  ;;  %v6555_v46 = vadd.f32 1.0, %v6554_v3  ;;  %v6424_v25 = vsel %vm6423_vm2, %v6421_v23, %v6418_v34  ;;  %v6438_v19 = vadd.f32 1.0, %v6437_v32 }
 0x52b   : > { %16980 = vst [vmem:[#allocation10_spill] sm:$0xff] %v15250_v44  ;;  %9352 = vlog2.f32 %v6452_v35  ;;  %v9339_v53 = vpop.eup %9338  ;;  %v6896_v10 = vmul.f32 0.01, %v6424_v25  ;;  %v6440_v62 = vand.u32 2147483647, %v15047_v28  ;;  %v15257_v37 = vmul.f32 100.0, %v16982_v4 }
 0x52c   : > { %9354 = vlog2.f32 %v6569_v48  ;;  %v15259_v47 = vpop.eup %9340  ;;  %v15261_v13 = vmul.f32 0.01, %v6523_v9  ;;  %v6538_v50 = vmul.f32 %v15144_v55, %v6537_v31  ;;  %vm15264_vm4 = vcmp.lt.f32.partialorder %v6539_v41, 0.0004427343  ;;  %v7730_v48 = vpop.f32.mrb[85].mxu0  ;;  %v16987_v9 = vld [vmem:[#allocation47_spill] sm:$0xff] }
 0x52d   : > { %v7283_v32 = vsel %vm220_vm0, %v15138_v59, %v16907_v5  ;;  %v9343_v34 = vpop.eup %9342  ;;  %v6535_v23 = vmul.f32 0.6931472, %v9337_v20  ;;  %vm15272_vm5 = vcmp.lt.f32.partialorder %v6557_v54, 0.0004427343  ;;  %v7152_v55 = vsel %vm7024_vm15, %v16987_v9, %v6896_v10  ;;  %v15285_v54 = vpop.f32.mrb[86].mxu0  ;;  %v16989_v10 = vld [vmem:[#allocation41_spill] sm:$0xff] }
 0x52e   : > { %v6455_v41 = vmul.f32 -0.5, %v15055_v22  ;;  %v15280_v31 = vpop.eup %9344  ;;  %v6572_v25 = vmul.f32 -0.5, %v15215_v16  ;;  %v5608_v51 = vmul.f32 1.442695, %v15250_v44  ;;  %7887 = vmatmul.mubr.f32.gmra.mrb[148].mxu0 %v7152_v55  ;;  %v6436_v5 = vmul.f32 0.6931472, %v9343_v34 }
 0x52f   : > { %v6439_v59 = vmul.f32 %v15047_v28, %v6438_v19  ;;  %16988 = vst [vmem:[#allocation47_spill] sm:$0xff] %v15285_v54  ;;  %v15287_v20 = vpop.eup %9346  ;;  %v6556_v48 = vmul.f32 %v15155_v14, %v6555_v46  ;;  %7891 = vmatprep.mubr.f32.mxu0 %v7283_v32  ;;  %vm6441_vm6 = vcmp.lt.f32.partialorder %v6440_v62, 0.0004427343  ;;  %v5618_v43 = vmul.f32 1.442695, %v15257_v37  ;;  %v7735_v4 = vpop.f32.mrb[87].mxu0 }
 0x530   : > { %v15292_v9 = vmul.f32 100.0, %v16989_v10  ;;  %v6553_v57 = vmul.f32 0.6931472, %v9339_v53  ;;  %v6587_v55 = vadd.f32 1.0, %v15259_v47  ;;  %v6470_v28 = vadd.f32 1.0, %v15110_v11  ;;  %v15296_v19 = vpop.f32.mrb[88].mxu0 }
 0x531   : > { %v6442_v34 = vsel %vm6441_vm6, %v6439_v59, %v6436_v5  ;;  %16990 = vst [vmem:[#allocation50_spill] sm:$0xff] %v15296_v19  ;;  %v15298_v54 = vpop.eup %9348  ;;  %vm7028_vm7 = vcmp.gt.f32.partialorder %v14942_v29, 20.0  ;;  %v6541_v14 = vsel %vm15264_vm4, %v6538_v50, %v6535_v23  ;;  %v16991_v46 = vld [vmem:[#allocation39_spill] sm:$0xff]  ;;  %v6456_v4 = vadd.f32 1.0, %v6455_v41  ;;  %v7740_v53 = vpop.f32.mrb[89].mxu0 }
 0x532   : > { %v15304_v62 = vmul.f32 100.0, %v16991_v46  ;;  %v6898_v32 = vmul.f32 0.01, %v6442_v34  ;;  %v15306_v44 = vpop.eup %9350  ;;  %vm7035_vm8 = vcmp.gt.f32.partialorder %v14988_v49, 20.0  ;;  %v6575_v5 = vand.u32 2147483647, %v15215_v16 }
 0x533   : > { %v7285_v59 = vsel %vm220_vm0, %v15191_v15, %v16969_v56  ;;  %v6458_v3 = vand.u32 2147483647, %v15055_v22  ;;  %9356 = vlog2.f32 %v6470_v28  ;;  %v15315_v50 = vpop.f32.mrb[90].mxu0  ;;  %vm7037_vm9 = vcmp.gt.f32.partialorder %v15044_v58, 20.0  ;;  %v16993_v34 = vld [vmem:[#allocation42_spill] sm:$0xff] }
 0x534   : > { %16992 = vst [vmem:[#allocation51_spill] sm:$0xff] %v15315_v50  ;;  %v7154_v23 = vsel %vm7026_vm3, %v16927_v27, %v6898_v32  ;;  %9358 = vpow2.f32 %v5618_v43  ;;  %v5622_v41 = vmul.f32 1.442695, %v15292_v9  ;;  %v15323_v53 = vmul.f32 100.0, %v16993_v34  ;;  %v7745_v46 = vpop.f32.mrb[91].mxu0 }
 0x535   : > { %v9353_v19 = vpop.eup %9352  ;;  %v6909_v15 = vmul.f32 0.01, %v6541_v14  ;;  %v6559_v56 = vsel %vm15272_vm5, %v6556_v48, %v6553_v57  ;;  %v6573_v28 = vadd.f32 1.0, %v6572_v25  ;;  %9360 = vlog2.f32 %v6587_v55  ;;  %7892 = vmatmul.mubr.f32.gmra.mrb[150].mxu0 %v7154_v23  ;;  %v15327_v50 = vpop.f32.mrb[92].mxu0  ;;  %v16994_v57 = vld [vmem:[#allocation32_spill] sm:$0xff] }
 0x536   : > { %v9355_v10 = vpop.eup %9354  ;;  %vm7039_vm10 = vcmp.gt.f32.partialorder %v15051_v2, 20.0  ;;  %v6605_v27 = vadd.f32 1.0, %v15306_v44  ;;  %7896 = vmatprep.mubr.f32.mxu0 %v7285_v59  ;;  %v6454_v38 = vmul.f32 0.6931472, %v9353_v19  ;;  %v6457_v43 = vmul.f32 %v15055_v22, %v6456_v4  ;;  %v7750_v48 = vpop.f32.mrb[93].mxu0 }
 0x537   : > { %v6473_v46 = vmul.f32 -0.5, %v15110_v11  ;;  %9362 = vpow2.f32 %v5608_v51  ;;  %v5612_v35 = vmul.f32 1.442695, %v15304_v62  ;;  %v15335_v25 = vmul.f32 100.0, %v16994_v57  ;;  %v15338_v23 = vpop.f32.mrb[94].mxu0  ;;  %v17004_v57 = vld [vmem:[#allocation25_spill] sm:$0xff] }
 0x538   : > { %vm6459_vm11 = vcmp.lt.f32.partialorder %v6458_v3, 0.0004427343  ;;  %v6911_v55 = vmul.f32 0.01, %v6559_v56  ;;  %9364 = vpow2.f32 %v5622_v41  ;;  %v5626_v32 = vmul.f32 1.442695, %v15323_v53 }
 0x539   : > { %16995 = vst [vmem:[#allocation42_spill] sm:$0xff] %v15335_v25  ;;  %v6460_v14 = vsel %vm6459_vm11, %v6457_v43, %v6454_v38  ;;  %v6571_v19 = vmul.f32 0.6931472, %v9355_v10  ;;  %v6574_v22 = vmul.f32 %v15215_v16, %v6573_v28  ;;  %v6590_v4 = vmul.f32 -0.5, %v15259_v47  ;;  %v7755_v59 = vpop.f32.mrb[95].mxu0  ;;  %v16998_v43 = vld [vmem:[#allocation30_spill] sm:$0xff] }
 0x53a   : > { %v6900_v51 = vmul.f32 0.01, %v6460_v14  ;;  %vm7030_vm12 = vcmp.gt.f32.partialorder %v14993_v61, 20.0  ;;  %9366 = vlog2.f32 %v6605_v27  ;;  %v7287_v3 = vsel %vm220_vm0, %v15221_v30, %v16975_v17  ;;  %v15348_v38 = vpop.f32.mrb[96].mxu0 }
 0x53b   : > { %v6474_v41 = vadd.f32 1.0, %v6473_v46  ;;  %v6488_v56 = vadd.f32 1.0, %v15133_v26  ;;  %vm7041_vm13 = vcmp.gt.f32.partialorder %v15103_v40, 20.0  ;;  %v6593_v16 = vand.u32 2147483647, %v15259_v47  ;;  %v7760_v27 = vpop.f32.mrb[97].mxu0 }
 0x53c   : > { %v7156_v10 = vsel %vm7028_vm7, %v16930_v18, %v6900_v51  ;;  %v6476_v28 = vand.u32 2147483647, %v15110_v11  ;;  %9368 = vpow2.f32 %v5626_v32  ;;  %v15360_v30 = vsel %vm7035_vm8, %v16935_v45, %v15261_v13  ;;  %v17000_v51 = vld [vmem:[#allocation44_spill] sm:$0xff] }
 0x53d   : > { %vm15362_vm14 = vcmp.lt.f32.partialorder %v6575_v5, 0.0004427343  ;;  %7897 = vmatmul.mubr.f32.gmra.mrb[152].mxu0 %v7156_v10  ;;  %v15367_v46 = vmul.f32 100.0, %v16998_v43  ;;  %9370 = vlog2.f32 %v6488_v56  ;;  %v9357_v18 = vpop.eup %9356  ;;  %v15372_v29 = vsel %vm7037_vm9, %v16944_v36, %v6909_v15 }
 0x53e   : > { %v6577_v49 = vsel %vm15362_vm14, %v6574_v22, %v6571_v19  ;;  %9372 = vpow2.f32 %v5612_v35  ;;  %v5616_v13 = vmul.f32 1.442695, %v15335_v25  ;;  %7901 = vmatprep.mubr.f32.mxu0 %v7287_v3  ;;  %v15377_v5 = vpop.eup %9358  ;;  %v6591_v48 = vadd.f32 1.0, %v6590_v4  ;;  %v15393_v19 = vpop.f32.mrb[98].mxu0 }
 0x53f   : > { %16999 = vst [vmem:[#allocation52_spill] sm:$0xff] %v15367_v46  ;;  %v6472_v14 = vmul.f32 0.6931472, %v9357_v18  ;;  %v6475_v32 = vmul.f32 %v15110_v11, %v6474_v41  ;;  %v15381_v59 = vmul.f32 100.0, %v17000_v51  ;;  %v9361_v56 = vpop.eup %9360  ;;  %v15386_v58 = vsel %vm7039_vm10, %v16945_v1, %v6911_v55  ;;  %v7765_v41 = vpop.f32.mrb[99].mxu0  ;;  %v17010_v51 = vld [vmem:[#allocation13_spill] sm:$0xff] }
 0x540   : > { %vm15388_vm15 = vcmp.lt.f32.partialorder %v6593_v16, 0.0004427343  ;;  %v6608_v35 = vmul.f32 -0.5, %v15306_v44  ;;  %vm6477_vm1 = vcmp.lt.f32.partialorder %v6476_v28, 0.0004427343  ;;  %v6491_v3 = vmul.f32 -0.5, %v15133_v26 }
 0x541   : > { %v6913_v22 = vmul.f32 0.01, %v6577_v49  ;;  %v5620_v11 = vmul.f32 1.442695, %v15367_v46  ;;  %v6478_v4 = vsel %vm6477_vm1, %v6475_v32, %v6472_v14  ;;  %v15397_v10 = vpop.eup %9362  ;;  %v6611_v2 = vand.u32 2147483647, %v15306_v44 }
 0x542   : > { %v6623_v55 = vadd.f32 1.0, %v15377_v5  ;;  %v6902_v16 = vmul.f32 0.01, %v6478_v4  ;;  %v6506_v27 = vadd.f32 1.0, %v15225_v52  ;;  %v15402_v17 = vpop.eup %9364  ;;  %v6589_v28 = vmul.f32 0.6931472, %v9361_v56 }
 0x543   : > { %9374 = vpow2.f32 %v5616_v13  ;;  %v7289_v18 = vsel %vm220_vm0, %v15241_v0, %v16926_v12  ;;  %v5630_v49 = vmul.f32 1.442695, %v15381_v59  ;;  %v6592_v14 = vmul.f32 %v15259_v47, %v6591_v48  ;;  %v17003_v41 = vld [vmem:[#allocation35_spill] sm:$0xff] }
 0x544   : > { %v6609_v32 = vadd.f32 1.0, %v6608_v35  ;;  %v7158_v4 = vsel %vm7030_vm12, %v17003_v41, %v6902_v16  ;;  %9376 = vlog2.f32 %v6506_v27  ;;  %v9367_v43 = vpop.eup %9366  ;;  %vm7032_vm2 = vcmp.gt.f32.partialorder %v17004_v57, 20.0  ;;  %v17005_v0 = vld [vmem:[#allocation15_spill] sm:$0xff] }
 0x545   : > { %v15417_v13 = vsel %vm7041_vm13, %v16953_v24, %v6913_v22  ;;  %9378 = vpow2.f32 %v5620_v11  ;;  %7902 = vmatmul.mubr.f32.gmra.mrb[154].mxu0 %v7158_v4  ;;  %v6492_v12 = vadd.f32 1.0, %v6491_v3  ;;  %v15420_v56 = vmul.f32 100.0, %v17005_v0  ;;  %v17008_v11 = vld [vmem:[#allocation26_spill] sm:$0xff] }
 0x546   : > { %v15422_v47 = vpop.eup %9368  ;;  %vm7043_vm3 = vcmp.gt.f32.partialorder %v15159_v21, 20.0  ;;  %vm15425_vm4 = vcmp.lt.f32.partialorder %v6611_v2, 0.0004427343  ;;  %9380 = vlog2.f32 %v6623_v55  ;;  %v6641_v48 = vadd.f32 1.0, %v15402_v17  ;;  %7906 = vmatprep.mubr.f32.mxu0 %v7289_v18 }
 0x547   : > { %v6494_v40 = vand.u32 2147483647, %v15133_v26  ;;  %v9371_v35 = vpop.eup %9370  ;;  %v6595_v22 = vsel %vm15388_vm15, %v6592_v14, %v6589_v28  ;;  %v15434_v3 = vmul.f32 100.0, %v17008_v11  ;;  %9382 = vpow2.f32 %v5630_v49  ;;  %v15445_v14 = vpop.f32.mrb[100].mxu0 }
 0x548   : > { %v6509_v16 = vmul.f32 -0.5, %v15225_v52  ;;  %v15437_v2 = vpop.eup %9372  ;;  %v6607_v27 = vmul.f32 0.6931472, %v9367_v43  ;;  %v6610_v55 = vmul.f32 %v15306_v44, %v6609_v32  ;;  %v6626_v41 = vmul.f32 -0.5, %v15377_v5  ;;  %v7770_v43 = vpop.f32.mrb[101].mxu0 }
 0x549   : > { %17009 = vst [vmem:[#allocation35_spill] sm:$0xff] %v15434_v3  ;;  %v6629_v18 = vand.u32 2147483647, %v15377_v5  ;;  %v6490_v4 = vmul.f32 0.6931472, %v9371_v35  ;;  %v6493_v46 = vmul.f32 %v15133_v26, %v6492_v12  ;;  %v6524_v28 = vadd.f32 1.0, %v15280_v31 }
 0x54a   : > { %v5634_v15 = vmul.f32 1.442695, %v15420_v56  ;;  %v6915_v49 = vmul.f32 0.01, %v6595_v22  ;;  %9384 = vlog2.f32 %v6641_v48  ;;  %v6659_v11 = vadd.f32 1.0, %v15422_v47  ;;  %v17011_v43 = vld [vmem:[#allocation16_spill] sm:$0xff] }
 0x54b   : > { %vm6495_vm5 = vcmp.lt.f32.partialorder %v6494_v40, 0.0004427343  ;;  %vm7034_vm6 = vcmp.gt.f32.partialorder %v15098_v8, 20.0  ;;  %v5624_v44 = vmul.f32 1.442695, %v15434_v3  ;;  %v6510_v35 = vadd.f32 1.0, %v6509_v16 }
 0x54c   : > { %v6496_v32 = vsel %vm6495_vm5, %v6493_v46, %v6490_v4  ;;  %9386 = vlog2.f32 %v6524_v28  ;;  %vm7045_vm7 = vcmp.gt.f32.partialorder %v15200_v60, 20.0  ;;  %v6627_v26 = vadd.f32 1.0, %v6626_v41  ;;  %v17015_v28 = vld [vmem:[#allocation49_spill] sm:$0xff]  ;;  %v17020_v3 = vld [vmem:[#allocation7_spill] sm:$0xff] }
 0x54d   : > { %v6904_v12 = vmul.f32 0.01, %v6496_v32  ;;  %v6512_v0 = vand.u32 2147483647, %v15225_v52  ;;  %v15453_v22 = vmul.f32 100.0, %v17010_v51  ;;  %v15455_v48 = vpop.eup %9374  ;;  %v6613_v40 = vsel %vm15425_vm4, %v6610_v55, %v6607_v27 }
 0x54e   : > { %v15460_v25 = vmul.f32 100.0, %v17011_v43  ;;  %v7291_v46 = vsel %vm220_vm0, %v15360_v30, %v16935_v45  ;;  %9388 = vpow2.f32 %v5634_v15  ;;  %v9377_v16 = vpop.eup %9376  ;;  %vm15466_vm8 = vcmp.lt.f32.partialorder %v6629_v18, 0.0004427343 }
 0x54f   : > { %v6644_v4 = vmul.f32 -0.5, %v15402_v17  ;;  %9390 = vlog2.f32 %v6659_v11  ;;  %v7160_v61 = vsel %vm7032_vm2, %v17015_v28, %v6904_v12  ;;  %v6527_v27 = vmul.f32 -0.5, %v15280_v31  ;;  %v15475_v55 = vpop.eup %9378  ;;  %v15484_v11 = vpop.f32.mrb[102].mxu0 }
 0x550   : > { %17012 = vst [vmem:[#allocation25_spill] sm:$0xff] %v15460_v25  ;;  %v15480_v45 = vsel %vm7043_vm3, %v16960_v63, %v6915_v49  ;;  %v6647_v30 = vand.u32 2147483647, %v15402_v17  ;;  %7907 = vmatmul.mubr.f32.gmra.mrb[156].mxu0 %v7160_v61  ;;  %v6508_v18 = vmul.f32 0.6931472, %v9377_v16  ;;  %v6511_v15 = vmul.f32 %v15225_v52, %v6510_v35  ;;  %v9381_v32 = vpop.eup %9380  ;;  %v7775_v21 = vpop.f32.mrb[103].mxu0 }
 0x551   : > { %v15487_v57 = vmul.f32 %v15377_v5, %v6627_v26  ;;  %9392 = vpow2.f32 %v5624_v44  ;;  %7911 = vmatprep.mubr.f32.mxu0 %v7291_v46  ;;  %vm6513_vm9 = vcmp.lt.f32.partialorder %v6512_v0, 0.0004427343  ;;  %v5638_v12 = vmul.f32 1.442695, %v15453_v22  ;;  %v15490_v49 = vpop.eup %9382 }
 0x552   : > { %v6917_v28 = vmul.f32 0.01, %v6613_v40  ;;  %v5628_v61 = vmul.f32 1.442695, %v15460_v25  ;;  %v6514_v16 = vsel %vm6513_vm9, %v6511_v15, %v6508_v18  ;;  %v6542_v52 = vadd.f32 1.0, %v15287_v20 }
 0x553   : > { %vm7036_vm10 = vcmp.gt.f32.partialorder %v15125_v42, 20.0  ;;  %v6645_v35 = vadd.f32 1.0, %v6644_v4  ;;  %v6906_v43 = vmul.f32 0.01, %v6514_v16  ;;  %v6528_v5 = vadd.f32 1.0, %v6527_v27  ;;  %v17016_v4 = vld [vmem:[#allocation8_spill] sm:$0xff] }
 0x554   : > { %9394 = vpow2.f32 %v5638_v12  ;;  %v6625_v44 = vmul.f32 0.6931472, %v9381_v32  ;;  %v7293_v0 = vsel %vm220_vm0, %v15372_v29, %v16944_v36  ;;  %v6530_v26 = vand.u32 2147483647, %v15280_v31  ;;  %v9385_v40 = vpop.eup %9384  ;;  %v17017_v27 = vld [vmem:[#allocation17_spill] sm:$0xff] }
 0x555   : > { %9396 = vlog2.f32 %v6542_v52  ;;  %v6677_v46 = vadd.f32 1.0, %v15490_v49  ;;  %v7162_v18 = vsel %vm7034_vm6, %v16952_v6, %v6906_v43  ;;  %v15505_v15 = vmul.f32 100.0, %v17016_v4  ;;  %v17025_v29 = vld [vmem:[#allocation9_spill] sm:$0xff] }
 0x556   : > { %v15508_v32 = vmul.f32 100.0, %v17017_v27  ;;  %v9387_v12 = vpop.eup %9386  ;;  %v15513_v36 = vsel %vm7045_vm7, %v16971_v7, %v6917_v28  ;;  %vm15515_vm11 = vcmp.lt.f32.partialorder %v6647_v30, 0.0004427343  ;;  %v6662_v21 = vmul.f32 -0.5, %v15422_v47  ;;  %7912 = vmatmul.mubr.f32.gmra.mrb[158].mxu0 %v7162_v18 }
 0x557   : > { %9398 = vpow2.f32 %v5628_v61  ;;  %v6665_v6 = vand.u32 2147483647, %v15422_v47  ;;  %7916 = vmatprep.mubr.f32.mxu0 %v7293_v0  ;;  %v6526_v8 = vmul.f32 0.6931472, %v9387_v12  ;;  %v6529_v43 = vmul.f32 %v15280_v31, %v6528_v5  ;;  %v15529_v61 = vpop.f32.mrb[104].mxu0 }
 0x558   : > { %v6545_v16 = vmul.f32 -0.5, %v15287_v20  ;;  %v15523_v52 = vpop.eup %9388  ;;  %v6631_v60 = vsel %vm15466_vm8, %v15487_v57, %v6625_v44  ;;  %v6643_v30 = vmul.f32 0.6931472, %v9385_v40  ;;  %v6646_v28 = vmul.f32 %v15402_v17, %v6645_v35  ;;  %v7780_v5 = vpop.f32.mrb[105].mxu0 }
 0x559   : > { %vm6531_vm12 = vcmp.lt.f32.partialorder %v6530_v26, 0.0004427343  ;;  %v9391_v18 = vpop.eup %9390  ;;  %9400 = vlog2.f32 %v6677_v46  ;;  %v5632_v0 = vmul.f32 1.442695, %v15505_v15  ;;  %v5642_v31 = vmul.f32 1.442695, %v15508_v32 }
 0x55a   : > { %v6532_v12 = vsel %vm6531_vm12, %v6529_v43, %v6526_v8  ;;  %v6663_v4 = vadd.f32 1.0, %v6662_v21  ;;  %v15534_v27 = vmul.f32 100.0, %v17020_v3  ;;  %v7295_v17 = vsel %vm220_vm0, %v15386_v58, %v16945_v1  ;;  %v17022_v46 = vld [vmem:[#allocation37_spill] sm:$0xff] }
 0x55b   : > { %v6908_v25 = vmul.f32 0.01, %v6532_v12  ;;  %v15540_v41 = vpop.eup %9392  ;;  %vm7038_vm13 = vcmp.gt.f32.partialorder %v15179_v33, 20.0  ;;  %v6695_v57 = vadd.f32 1.0, %v15523_v52  ;;  %v6546_v35 = vadd.f32 1.0, %v6545_v16 }
 0x55c   : > { %17021 = vst [vmem:[#allocation13_spill] sm:$0xff] %v15534_v27  ;;  %9402 = vpow2.f32 %v5642_v31  ;;  %v6560_v44 = vadd.f32 1.0, %v15298_v54  ;;  %vm7047_vm14 = vcmp.gt.f32.partialorder %v15257_v37, 20.0  ;;  %v6649_v26 = vsel %vm15515_vm11, %v6646_v28, %v6643_v30 }
 0x55d   : > { %v6661_v40 = vmul.f32 0.6931472, %v9391_v18  ;;  %v7164_v1 = vsel %vm7036_vm10, %v17022_v46, %v6908_v25  ;;  %v6548_v58 = vand.u32 2147483647, %v15287_v20  ;;  %v6919_v8 = vmul.f32 0.01, %v6631_v60 }
 0x55e   : > { %v15552_v21 = vpop.eup %9394  ;;  %vm7049_vm15 = vcmp.gt.f32.partialorder %v15292_v9, 20.0  ;;  %vm15555_vm1 = vcmp.lt.f32.partialorder %v6665_v6, 0.0004427343  ;;  %7917 = vmatmul.mubr.f32.gmra.mrb[160].mxu0 %v7164_v1  ;;  %9404 = vlog2.f32 %v6560_v44  ;;  %v15560_v16 = vmul.f32 100.0, %v17025_v29 }
 0x55f   : > { %v9397_v30 = vpop.eup %9396  ;;  %v6664_v42 = vmul.f32 %v15422_v47, %v6663_v4  ;;  %v6680_v25 = vmul.f32 -0.5, %v15490_v49  ;;  %v5636_v28 = vmul.f32 1.442695, %v15534_v27  ;;  %v6713_v60 = vadd.f32 1.0, %v15552_v21  ;;  %7921 = vmatprep.mubr.f32.mxu0 %v7295_v17  ;;  %v15573_v4 = vpop.f32.mrb[106].mxu0 }
 0x560   : > { %v6921_v18 = vmul.f32 0.01, %v6649_v26  ;;  %vm7051_vm2 = vcmp.gt.f32.partialorder %v15323_v53, 20.0  ;;  %9406 = vlog2.f32 %v6695_v57  ;;  %v6544_v6 = vmul.f32 0.6931472, %v9397_v30  ;;  %v7785_v46 = vpop.f32.mrb[107].mxu0 }
 0x561   : > { %v6547_v12 = vmul.f32 %v15287_v20, %v6546_v35  ;;  %v15568_v31 = vpop.eup %9398  ;;  %v6667_v5 = vsel %vm15555_vm1, %v6664_v42, %v6661_v40  ;;  %v6683_v47 = vand.u32 2147483647, %v15490_v49  ;;  %9408 = vpow2.f32 %v5632_v0  ;;  %v17026_v0 = vld [vmem:[#allocation43_spill] sm:$0xff]  ;;  %v17031_v46 = vld [vmem:[#allocation36_spill] sm:$0xff] }
 0x562   : > { %vm6549_vm3 = vcmp.lt.f32.partialorder %v6548_v58, 0.0004427343  ;;  %v6698_v17 = vmul.f32 -0.5, %v15523_v52  ;;  %v6563_v26 = vmul.f32 -0.5, %v15298_v54  ;;  %v5646_v57 = vmul.f32 1.442695, %v15560_v16 }
 0x563   : > { %v6550_v44 = vsel %vm6549_vm3, %v6547_v12, %v6544_v6  ;;  %v6681_v20 = vadd.f32 1.0, %v6680_v25  ;;  %9410 = vlog2.f32 %v6713_v60  ;;  %v6578_v1 = vadd.f32 1.0, %v15397_v10  ;;  %v9401_v40 = vpop.eup %9400  ;;  %v17028_v6 = vld [vmem:[#allocation23_spill] sm:$0xff] }
 0x564   : > { %v6910_v35 = vmul.f32 0.01, %v6550_v44  ;;  %v6701_v43 = vand.u32 2147483647, %v15523_v52  ;;  %v15581_v58 = vmul.f32 100.0, %v17026_v0  ;;  %v7297_v30 = vsel %vm220_vm0, %v15417_v13, %v16953_v24  ;;  %v17029_v60 = vld [vmem:[#allocation11_spill] sm:$0xff] }
 0x565   : > { %9412 = vpow2.f32 %v5646_v57  ;;  %v6923_v42 = vmul.f32 0.01, %v6667_v5  ;;  %v15591_v12 = vmul.f32 100.0, %v17029_v60  ;;  %vm7040_vm4 = vcmp.gt.f32.partialorder %v17031_v46, 20.0  ;;  %v17032_v0 = vld [vmem:[#allocation40_spill] sm:$0xff]  ;;  %v17033_v5 = vld [vmem:[#allocation41_spill] sm:$0xff] }
 0x566   : > { %17027 = vst [vmem:[#allocation49_spill] sm:$0xff] %v15581_v58  ;;  %v7166_v25 = vsel %vm7038_vm13, %v17028_v6, %v6910_v35  ;;  %9414 = vlog2.f32 %v6578_v1  ;;  %v15593_v44 = vpop.eup %9402  ;;  %v15599_v3 = vsel %vm7047_vm14, %v17032_v0, %v6919_v8  ;;  %v6699_v24 = vadd.f32 1.0, %v6698_v17  ;;  %v17038_v60 = vld [vmem:[#allocation45_spill] sm:$0xff]  ;;  %v17045_v46 = vld [vmem:[#allocation27_spill] sm:$0xff] }
 0x567   : > { %17030 = vst [vmem:[#allocation37_spill] sm:$0xff] %v15591_v12  ;;  %9416 = vpow2.f32 %v5636_v28  ;;  %7922 = vmatmul.mubr.f32.gmra.mrb[162].mxu0 %v7166_v25  ;;  %v6564_v13 = vadd.f32 1.0, %v6563_v26  ;;  %v15604_v33 = vsel %vm7049_vm15, %v17033_v5, %v6921_v18  ;;  %v6679_v57 = vmul.f32 0.6931472, %v9401_v40 }
 0x568   : > { %v6731_v35 = vadd.f32 1.0, %v15593_v44  ;;  %7926 = vmatprep.mubr.f32.mxu0 %v7297_v30  ;;  %v6566_v1 = vand.u32 2147483647, %v15298_v54  ;;  %v9405_v6 = vpop.eup %9404  ;;  %v6682_v37 = vmul.f32 %v15490_v49, %v6681_v20  ;;  %vm15609_vm5 = vcmp.lt.f32.partialorder %v6683_v47, 0.0004427343 }
 0x569   : > { %v6716_v28 = vmul.f32 -0.5, %v15552_v21  ;;  %v6581_v17 = vmul.f32 -0.5, %v15397_v10  ;;  %v15618_v9 = vsel %vm7051_vm2, %v16993_v34, %v6923_v42  ;;  %vm15620_vm6 = vcmp.lt.f32.partialorder %v6701_v43, 0.0004427343  ;;  %v7788_v42 = vpop.f32.mrb[108].mxu0 }
 0x56a   : > { %v5640_v26 = vmul.f32 1.442695, %v15581_v58  ;;  %v5650_v49 = vmul.f32 1.442695, %v15591_v12  ;;  %v9407_v47 = vpop.eup %9406  ;;  %v15627_v20 = vmul.f32 %v15523_v52, %v6699_v24  ;;  %v6562_v40 = vmul.f32 0.6931472, %v9405_v6 }
 0x56b   : > { %v6565_v30 = vmul.f32 %v15298_v54, %v6564_v13  ;;  %v6596_v53 = vadd.f32 1.0, %v15437_v2  ;;  %v15631_v25 = vpop.eup %9408  ;;  %v6685_v43 = vsel %vm15609_vm5, %v6682_v37, %v6679_v57  ;;  %9418 = vlog2.f32 %v6731_v35  ;;  %v7790_v12 = vpop.f32.mrb[109].mxu0  ;;  %v17039_v52 = vld [vmem:[#allocation10_spill] sm:$0xff] }
 0x56c   : > { %vm6567_vm7 = vcmp.lt.f32.partialorder %v6566_v1, 0.0004427343  ;;  %v15636_v58 = vmul.f32 100.0, %v17038_v60  ;;  %vm7042_vm8 = vcmp.gt.f32.partialorder %v17039_v52, 20.0  ;;  %v6717_v24 = vadd.f32 1.0, %v6716_v28 }
 0x56d   : > { %v6568_v6 = vsel %vm6567_vm7, %v6565_v30, %v6562_v40  ;;  %v6582_v27 = vadd.f32 1.0, %v6581_v17  ;;  %9420 = vlog2.f32 %v6596_v53  ;;  %v9411_v54 = vpop.eup %9410  ;;  %v15646_v13 = vmul.f32 0.6931472, %v9407_v47  ;;  %v17040_v17 = vld [vmem:[#allocation18_spill] sm:$0xff]  ;;  %v17041_v47 = vld [vmem:[#allocation33_spill] sm:$0xff] }
 0x56e   : > { %v6912_v57 = vmul.f32 0.01, %v6568_v6  ;;  %v6584_v12 = vand.u32 2147483647, %v15397_v10  ;;  %9422 = vpow2.f32 %v5650_v49  ;;  %v6719_v1 = vand.u32 2147483647, %v15552_v21 }
 0x56f   : > { %v15649_v35 = vpop.eup %9412  ;;  %9424 = vpow2.f32 %v5640_v26  ;;  %v7299_v37 = vsel %vm220_vm0, %v15480_v45, %v16960_v63  ;;  %vm7997_vm9 = vcmask 7168   ;;  %v15656_v28 = vmul.f32 0.01, %v6685_v43  ;;  %v17042_v63 = vld [vmem:[#allocation48_spill] sm:$0xff]  ;;  %v17043_v45 = vld [vmem:[#allocation21_spill] sm:$0xff]  ;;  %v17044_v30 = vld [vmem:[#allocation14_spill] sm:$0xff] }
 0x570   : > { %v9415_v8 = vpop.eup %9414  ;;  %v7168_v49 = vsel %vm7040_vm4, %v17040_v17, %v6912_v57  ;;  %v6599_v26 = vmul.f32 -0.5, %v15437_v2  ;;  %v15663_v40 = vmul.f32 100.0, %v17041_v47  ;;  %7998 = vst.msk [vmem:[%s15644_s26] sm:$0xff] %vm7997_vm9, %v17042_v63  ;;  %7999 = vst.msk [vmem:[%s15644_s26 + $0x8] sm:$0xff] %vm7997_vm9, %v17043_v45  ;;  %v17046_v53 = vld [vmem:[#allocation22_spill] sm:$0xff]  ;;  %v17048_v6 = vld [vmem:[#allocation20_spill] sm:$0xff] }
 0x571   : > { %8000 = vst.msk [vmem:[%s15644_s26 + $0x10] sm:$0xff] %vm7997_vm9, %v17044_v30  ;;  %8001 = vst.msk [vmem:[%s15644_s26 + $0x18] sm:$0xff] %vm7997_vm9, %v17045_v46  ;;  %v17047_v43 = vld [vmem:[#allocation6_spill] sm:$0xff]  ;;  %v17050_v17 = vld [vmem:[#allocation28_spill] sm:$0xff]  ;;  %7927 = vmatmul.mubr.f32.gmra.mrb[164].mxu0 %v7168_v49  ;;  %vm6585_vm10 = vcmp.lt.f32.partialorder %v6584_v12, 0.0004427343 }
 0x572   : > { %8002 = vst.msk [vmem:[%s15644_s26 + $0x20] sm:$0xff] %vm7997_vm9, %v17046_v53  ;;  %8003 = vst.msk [vmem:[%s15644_s26 + $0x28] sm:$0xff] %vm7997_vm9, %v17047_v43  ;;  %v17049_v57 = vld [vmem:[#allocation38_spill] sm:$0xff]  ;;  %v17053_v30 = vld [vmem:[#allocation47_spill] sm:$0xff]  ;;  %7931 = vmatprep.mubr.f32.mxu0 %v7299_v37  ;;  %vm7044_vm11 = vcmp.gt.f32.partialorder %v15304_v62, 20.0  ;;  %vm7053_vm12 = vcmp.gt.f32.partialorder %v15381_v59, 20.0 }
 0x573   : > { %8004 = vst.msk [vmem:[%s15644_s26 + $0x30] sm:$0xff] %vm7997_vm9, %v17048_v6  ;;  %8005 = vst.msk [vmem:[%s15644_s26 + $0x38] sm:$0xff] %vm7997_vm9, %v17049_v57  ;;  %v17051_v63 = vld [vmem:[#allocation46_spill] sm:$0xff]  ;;  %v17055_v53 = vld [vmem:[#allocation51_spill] sm:$0xff]  ;;  %v6715_v6 = vmul.f32 0.6931472, %v9411_v54  ;;  %v7301_v54 = vsel %vm220_vm0, %v15513_v36, %v16971_v7 }
 0x574   : > { %8006 = vst.msk [vmem:[%s15644_s26 + $0x40] sm:$0xff] %vm7997_vm9, %v17050_v17  ;;  %8007 = vst.msk [vmem:[%s15644_s26 + $0x48] sm:$0xff] %vm7997_vm9, %v17051_v63  ;;  %v17052_v45 = vld [vmem:[#allocation34_spill] sm:$0xff]  ;;  %v6602_v12 = vand.u32 2147483647, %v15437_v2  ;;  %vm7055_vm14 = vcmp.gt.f32.partialorder %v15420_v56, 20.0 }
 0x575   : > { %8008 = vst.msk [vmem:[%s15644_s26 + $0x50] sm:$0xff] %vm7997_vm9, %v17052_v45  ;;  %8009 = vst.msk [vmem:[%s15644_s26 + $0x58] sm:$0xff] %vm7997_vm9, %v17053_v30  ;;  %v17054_v46 = vld [vmem:[#allocation50_spill] sm:$0xff]  ;;  %vm15762_vm13 = vcmp.lt.f32.partialorder %v6719_v1, 0.0004427343  ;;  %vm7057_vm15 = vcmp.gt.f32.partialorder %v15453_v22, 20.0 }
 0x576   : > { %8010 = vst.msk [vmem:[%s15644_s26 + $0x60] sm:$0xff] %vm7997_vm9, %v17054_v46  ;;  %8011 = vst.msk [vmem:[%s15644_s26 + $0x68] sm:$0xff] %vm7997_vm9, %v17055_v53  ;;  %v17061_v1 = vld [vmem:[#allocation24_spill] sm:$0xff]  ;;  %vm6603_vm2 = vcmp.lt.f32.partialorder %v6602_v12, 0.0004427343  ;;  %v17064_v12 = vld [vmem:[#allocation42_spill] sm:$0xff] }
 0x577   : > { %8012 = vst.msk [vmem:[%s15644_s26 + $0x70] sm:$0xff] %vm7997_vm9, %v15327_v50  ;;  %8013 = vst.msk [vmem:[%s15644_s26 + $0x78] sm:$0xff] %vm7997_vm9, %v15338_v23  ;;  %v15733_v50 = vpop.eup %9416  ;;  %v5644_v23 = vmul.f32 1.442695, %v15636_v58  ;;  %v15775_v53 = vmul.f32 100.0, %v17061_v1  ;;  %vm7046_vm3 = vcmp.gt.f32.partialorder %v17064_v12, 20.0 }
 0x578   : > { %8014 = vst.msk [vmem:[%s15644_s26 + $0x80] sm:$0xff] %vm7997_vm9, %v15348_v38  ;;  %8015 = vst.msk [vmem:[%s15644_s26 + $0x88] sm:$0xff] %vm7997_vm9, %v15393_v19  ;;  %v6749_v38 = vadd.f32 1.0, %v15649_v35  ;;  %v6580_v19 = vmul.f32 0.6931472, %v9415_v8  ;;  %v6734_v8 = vmul.f32 -0.5, %v15593_v44  ;;  %v9419_v37 = vpop.eup %9418 }
 0x579   : > { %8016 = vst.msk [vmem:[%s15644_s26 + $0x90] sm:$0xff] %vm7997_vm9, %v15445_v14  ;;  %8017 = vst.msk [vmem:[%s15644_s26 + $0x98] sm:$0xff] %vm7997_vm9, %v15484_v11  ;;  %v6583_v14 = vmul.f32 %v15397_v10, %v6582_v27  ;;  %v7793_v11 = vpop.f32.mrb[110].mxu0  ;;  %v17057_v27 = vld [vmem:[#allocation31_spill] sm:$0xff]  ;;  %v9421_v30 = vpop.eup %9420  ;;  %vm7059_vm4 = vcmp.gt.f32.partialorder %v15508_v32, 20.0 }
 0x57a   : > { %8018 = vst.msk [vmem:[%s15644_s26 + $0xa0] sm:$0xff] %vm7997_vm9, %v15529_v61  ;;  %8019 = vst.msk [vmem:[%s15644_s26 + $0xa8] sm:$0xff] %vm7997_vm9, %v15573_v4  ;;  %v6703_v61 = vsel %vm15620_vm6, %v15627_v20, %v15646_v13  ;;  %v6718_v4 = vmul.f32 %v15552_v21, %v6717_v24  ;;  %v7795_v49 = vpop.f32.mrb[111].mxu0  ;;  %v15750_v57 = vmul.f32 100.0, %v17057_v27  ;;  %v6600_v20 = vadd.f32 1.0, %v6599_v26  ;;  %v17060_v26 = vld [vmem:[#allocation19_spill] sm:$0xff] }
 0x57b   : > { %8020 = vst.msk [vmem:[%s15644_s26 + $0xb0] sm:$0xff] %vm7997_vm9, %v7788_v42  ;;  %v17056_v42 = vld [vmem:[#allocation12_spill] sm:$0xff]  ;;  %8021 = vst.msk [vmem:[%s15644_s26 + $0xb8] sm:$0xff] %vm7997_vm9, %v7793_v11  ;;  %v6586_v10 = vsel %vm6585_vm10, %v6583_v14, %v6580_v19  ;;  %v5654_v21 = vmul.f32 1.442695, %v15663_v40  ;;  %v6614_v24 = vadd.f32 1.0, %v15455_v48  ;;  %9426 = vlog2.f32 %v6749_v38  ;;  %v15777_v38 = vpop.eup %9422 }
 0x57c   : > { %v15744_v43 = vmul.f32 100.0, %v17056_v42  ;;  %v6914_v18 = vmul.f32 0.01, %v6586_v10  ;;  %v6737_v13 = vand.u32 2147483647, %v15593_v44  ;;  %v6721_v7 = vsel %vm15762_vm13, %v6718_v4, %v6715_v6  ;;  %v15781_v11 = vpop.eup %9424  ;;  %v7798_v49 = vpop.f32.mrb[112].mxu0 }
 0x57d   : > { %9428 = vlog2.f32 %v6614_v24  ;;  %v6927_v46 = vmul.f32 0.01, %v6703_v61  ;;  %v6735_v36 = vadd.f32 1.0, %v6734_v8  ;;  %v6598_v52 = vmul.f32 0.6931472, %v9421_v30  ;;  %8022 = vst.msk [vmem:[%s15644_s26 + $0xc0] sm:$0xff] %vm7997_vm9, %v7798_v49 }
 0x57e   : > { %v7170_v63 = vsel %vm7042_vm8, %v17060_v26, %v6914_v18  ;;  %v5648_v45 = vmul.f32 1.442695, %v15744_v43  ;;  %v6601_v19 = vmul.f32 %v15437_v2, %v6600_v20  ;;  %v5652_v14 = vmul.f32 1.442695, %v15750_v57  ;;  %v7800_v2 = vpop.f32.mrb[113].mxu0  ;;  %v17066_v30 = vld [vmem:[#allocation44_spill] sm:$0xff] }
 0x57f   : > { %7932 = vmatmul.mubr.f32.gmra.mrb[166].mxu0 %v7170_v63  ;;  %9430 = vpow2.f32 %v5654_v21  ;;  %vm15783_vm1 = vcmp.lt.f32.partialorder %v6737_v13, 0.0004427343  ;;  %v6617_v4 = vmul.f32 -0.5, %v15455_v48  ;;  %v6929_v6 = vmul.f32 0.01, %v6721_v7  ;;  %v7803_v61 = vpop.f32.mrb[114].mxu0 }
 0x580   : > { %7936 = vmatprep.mubr.f32.mxu0 %v7301_v54  ;;  %9432 = vpow2.f32 %v5644_v23  ;;  %v6733_v8 = vmul.f32 0.6931472, %v9419_v37  ;;  %v6604_v10 = vsel %vm6603_vm2, %v6601_v19, %v6598_v52  ;;  %v6736_v18 = vmul.f32 %v15593_v44, %v6735_v36  ;;  %v17065_v44 = vld [vmem:[#allocation39_spill] sm:$0xff]  ;;  %v17067_v36 = vld [vmem:[#allocation29_spill] sm:$0xff]  ;;  %8023 = vst.msk [vmem:[%s15644_s26 + $0xc8] sm:$0xff] %vm7997_vm9, %v7803_v61  ;;  %v7805_v56 = vpop.f32.mrb[115].mxu0 }
 0x581   : > { %9434 = vpow2.f32 %v5648_v45  ;;  %v6767_v20 = vadd.f32 1.0, %v15777_v38  ;;  %v6916_v21 = vmul.f32 0.01, %v6604_v10  ;;  %v5658_v24 = vmul.f32 1.442695, %v15775_v53 }
 0x582   : > { %v6752_v23 = vmul.f32 -0.5, %v15649_v35  ;;  %9436 = vpow2.f32 %v5652_v14  ;;  %v7303_v13 = vsel %vm220_vm0, %v15599_v3, %v17032_v0  ;;  %v6632_v54 = vadd.f32 1.0, %v15475_v55  ;;  %v17068_v14 = vld [vmem:[#allocation15_spill] sm:$0xff] }
 0x583   : > { %v6755_v37 = vand.u32 2147483647, %v15649_v35  ;;  %v7172_v17 = vsel %vm7044_vm11, %v17065_v44, %v6916_v21  ;;  %v6618_v26 = vadd.f32 1.0, %v6617_v4  ;;  %9438 = vpow2.f32 %v5658_v24 }
 0x584   : > { %v6770_v63 = vmul.f32 -0.5, %v15777_v38  ;;  %7937 = vmatmul.mubr.f32.gmra.mrb[168].mxu0 %v7172_v17  ;;  %v6620_v45 = vand.u32 2147483647, %v15455_v48  ;;  %9440 = vlog2.f32 %v6632_v54  ;;  %v6650_v3 = vadd.f32 1.0, %v15540_v41 }
 0x585   : > { %v9427_v0 = vpop.eup %9426  ;;  %v15812_v62 = vsel %vm7053_vm12, %v17066_v30, %v15656_v28  ;;  %v6739_v7 = vsel %vm15783_vm1, %v6736_v18, %v6733_v8  ;;  %9442 = vlog2.f32 %v6767_v20  ;;  %7941 = vmatprep.mubr.f32.mxu0 %v7303_v13  ;;  %v15817_v52 = vmul.f32 100.0, %v17067_v36 }
 0x586   : > { %v15822_v4 = vsel %vm7055_vm14, %v17068_v14, %v6927_v46  ;;  %v15827_v59 = vsel %vm7057_vm15, %v17010_v51, %v6929_v6  ;;  %v6753_v28 = vadd.f32 1.0, %v6752_v23  ;;  %9444 = vlog2.f32 %v6650_v3 }
 0x587   : > { %v9429_v19 = vpop.eup %9428  ;;  %vm15829_vm5 = vcmp.lt.f32.partialorder %v6755_v37, 0.0004427343  ;;  %v6619_v10 = vmul.f32 %v15455_v48, %v6618_v26  ;;  %v6635_v2 = vmul.f32 -0.5, %v15475_v55  ;;  %v6931_v22 = vmul.f32 0.01, %v6739_v7  ;;  %v17071_v26 = vld [vmem:[#allocation52_spill] sm:$0xff] }
 0x588   : > { %v6616_v8 = vmul.f32 0.6931472, %v9429_v19  ;;  %v6771_v6 = vadd.f32 1.0, %v6770_v63  ;;  %vm6621_vm6 = vcmp.lt.f32.partialorder %v6620_v45, 0.0004427343  ;;  %v6653_v18 = vmul.f32 -0.5, %v15540_v41 }
 0x589   : > { %v15837_v46 = vpop.eup %9430  ;;  %v6751_v21 = vmul.f32 0.6931472, %v9427_v0  ;;  %v5656_v23 = vmul.f32 1.442695, %v15817_v52  ;;  %v6668_v48 = vadd.f32 1.0, %v15568_v31  ;;  %v6754_v54 = vmul.f32 %v15649_v35, %v6753_v28  ;;  %v17072_v7 = vld [vmem:[#allocation32_spill] sm:$0xff] }
 0x58a   : > { %v15840_v20 = vpop.eup %9432  ;;  %v6622_v24 = vsel %vm6621_vm6, %v6619_v10, %v6616_v8  ;;  %v6773_v37 = vand.u32 2147483647, %v15777_v38  ;;  %v6638_v17 = vand.u32 2147483647, %v15475_v55  ;;  %vm7048_vm7 = vcmp.gt.f32.partialorder %v17071_v26, 20.0  ;;  %v17073_v10 = vld [vmem:[#allocation17_spill] sm:$0xff] }
 0x58b   : > { %v15844_v13 = vpop.eup %9434  ;;  %v6918_v44 = vmul.f32 0.01, %v6622_v24  ;;  %vm7061_vm8 = vcmp.gt.f32.partialorder %v15560_v16, 20.0  ;;  %v6785_v63 = vadd.f32 1.0, %v15837_v46  ;;  %v7305_v45 = vsel %vm220_vm0, %v15604_v33, %v17033_v5 }
 0x58c   : > { %v6636_v3 = vadd.f32 1.0, %v6635_v2  ;;  %9446 = vlog2.f32 %v6668_v48  ;;  %v15856_v0 = vpop.eup %9436  ;;  %v6788_v35 = vmul.f32 -0.5, %v15837_v46  ;;  %v6654_v28 = vadd.f32 1.0, %v6653_v18 }
 0x58d   : > { %v7174_v19 = vsel %vm7046_vm3, %v17072_v7, %v6918_v44  ;;  %v6686_v61 = vadd.f32 1.0, %v15631_v25  ;;  %v15863_v8 = vpop.eup %9438  ;;  %v15868_v56 = vsel %vm7059_vm4, %v17073_v10, %v6931_v22  ;;  %v6757_v5 = vsel %vm15829_vm5, %v6754_v54, %v6751_v21 }
 0x58e   : > { %v15873_v33 = vmul.f32 %v15777_v38, %v6771_v6  ;;  %7942 = vmatmul.mubr.f32.gmra.mrb[170].mxu0 %v7174_v19  ;;  %9448 = vpow2.f32 %v5656_v23  ;;  %v9441_v12 = vpop.eup %9440  ;;  %vm15875_vm10 = vcmp.lt.f32.partialorder %v6773_v37, 0.0004427343  ;;  %vm15879_vm11 = vcmp.lt.f32.partialorder %v6638_v17, 0.0004427343  ;;  %v17078_v38 = vld [vmem:[#allocation35_spill] sm:$0xff]  ;;  %v7808_v17 = vpop.f32.mrb[116].mxu0 }
 0x58f   : > { %7946 = vmatprep.mubr.f32.mxu0 %v7305_v45  ;;  %v6656_v32 = vand.u32 2147483647, %v15540_v41  ;;  %v6671_v49 = vmul.f32 -0.5, %v15568_v31  ;;  %9450 = vlog2.f32 %v6686_v61  ;;  %v9443_v22 = vpop.eup %9442  ;;  %vm7050_vm12 = vcmp.gt.f32.partialorder %v17078_v38, 20.0  ;;  %8024 = vst.msk [vmem:[%s15644_s26 + $0xd0] sm:$0xff] %vm7997_vm9, %v7808_v17  ;;  %v7810_v61 = vpop.f32.mrb[117].mxu0 }
 0x590   : > { %9452 = vlog2.f32 %v6785_v63  ;;  %v6791_v6 = vand.u32 2147483647, %v15837_v46  ;;  %v6634_v21 = vmul.f32 0.6931472, %v9441_v12  ;;  %v6637_v24 = vmul.f32 %v15475_v55, %v6636_v3  ;;  %v9445_v23 = vpop.eup %9444  ;;  %v7813_v17 = vpop.f32.mrb[118].mxu0 }
 0x591   : > { %v6933_v48 = vmul.f32 0.01, %v6757_v5  ;;  %v6789_v54 = vadd.f32 1.0, %v6788_v35  ;;  %v6655_v37 = vmul.f32 %v15540_v41, %v6654_v28  ;;  %v6689_v44 = vmul.f32 -0.5, %v15631_v25  ;;  %v17079_v35 = vld [vmem:[#allocation25_spill] sm:$0xff]  ;;  %8025 = vst.msk [vmem:[%s15644_s26 + $0xd8] sm:$0xff] %vm7997_vm9, %v7813_v17 }
 0x592   : > { %v6803_v45 = vadd.f32 1.0, %v15863_v8  ;;  %v6640_v7 = vsel %vm15879_vm11, %v6637_v24, %v6634_v21  ;;  %v6652_v19 = vmul.f32 0.6931472, %v9445_v23  ;;  %v6704_v63 = vadd.f32 1.0, %v15733_v50  ;;  %v17080_v21 = vld [vmem:[#allocation30_spill] sm:$0xff] }
 0x593   : > { %v6920_v55 = vmul.f32 0.01, %v6640_v7  ;;  %v7307_v41 = vsel %vm220_vm0, %v15618_v9, %v16993_v34  ;;  %vm6657_vm13 = vcmp.lt.f32.partialorder %v6656_v32, 0.0004427343  ;;  %v6672_v3 = vadd.f32 1.0, %v6671_v49  ;;  %v17083_v7 = vld [vmem:[#allocation26_spill] sm:$0xff] }
 0x594   : > { %vm7052_vm14 = vcmp.gt.f32.partialorder %v17079_v35, 20.0  ;;  %v6769_v28 = vmul.f32 0.6931472, %v9443_v22  ;;  %v6658_v5 = vsel %vm6657_vm13, %v6655_v37, %v6652_v19  ;;  %v6674_v12 = vand.u32 2147483647, %v15568_v31 }
 0x595   : > { %9454 = vlog2.f32 %v6704_v63  ;;  %v15905_v18 = vsel %vm7061_vm8, %v17025_v29, %v6933_v48  ;;  %v7176_v24 = vsel %vm7048_vm7, %v17080_v21, %v6920_v55  ;;  %v6922_v23 = vmul.f32 0.01, %v6658_v5  ;;  %v17084_v5 = vld [vmem:[#allocation13_spill] sm:$0xff] }
 0x596   : > { %v7309_v34 = vsel %vm220_vm0, %v15812_v62, %v17066_v30  ;;  %v9447_v9 = vpop.eup %9446  ;;  %v15915_v32 = vmul.f32 %v15837_v46, %v6789_v54  ;;  %9456 = vlog2.f32 %v6803_v45  ;;  %7947 = vmatmul.mubr.f32.gmra.mrb[172].mxu0 %v7176_v24  ;;  %v6690_v16 = vadd.f32 1.0, %v6689_v44 }
 0x597   : > { %v6722_v49 = vadd.f32 1.0, %v15781_v11  ;;  %7951 = vmatprep.mubr.f32.mxu0 %v7307_v41  ;;  %v6670_v22 = vmul.f32 0.6931472, %v9447_v9  ;;  %v6673_v26 = vmul.f32 %v15568_v31, %v6672_v3  ;;  %v6692_v48 = vand.u32 2147483647, %v15631_v25  ;;  %v7815_v31 = vpop.f32.mrb[119].mxu0 }
 0x598   : > { %v6707_v37 = vmul.f32 -0.5, %v15733_v50  ;;  %v15921_v30 = vpop.eup %9448  ;;  %vm7054_vm15 = vcmp.gt.f32.partialorder %v15505_v15, 20.0  ;;  %v6775_v62 = vsel %vm15875_vm10, %v15873_v33, %v6769_v28  ;;  %vm15927_vm1 = vcmp.lt.f32.partialorder %v6791_v6, 0.0004427343 }
 0x599   : > { %v6806_v54 = vmul.f32 -0.5, %v15863_v8  ;;  %vm6675_vm2 = vcmp.lt.f32.partialorder %v6674_v12, 0.0004427343  ;;  %9458 = vlog2.f32 %v6722_v49  ;;  %v9451_v44 = vpop.eup %9450  ;;  %v6809_v45 = vand.u32 2147483647, %v15863_v8 }
 0x59a   : > { %v7178_v19 = vsel %vm7050_vm12, %v17083_v7, %v6922_v23  ;;  %v6676_v2 = vsel %vm6675_vm2, %v6673_v26, %v6670_v22  ;;  %v6740_v33 = vadd.f32 1.0, %v15840_v20  ;;  %v9453_v6 = vpop.eup %9452  ;;  %v6688_v61 = vmul.f32 0.6931472, %v9451_v44  ;;  %v17089_v44 = vld [vmem:[#allocation49_spill] sm:$0xff] }
 0x59b   : > { %7952 = vmatmul.mubr.f32.gmra.mrb[174].mxu0 %v7178_v19  ;;  %v6924_v63 = vmul.f32 0.01, %v6676_v2  ;;  %v6691_v55 = vmul.f32 %v15631_v25, %v6690_v16  ;;  %v6725_v41 = vmul.f32 -0.5, %v15781_v11  ;;  %vm6693_vm3 = vcmp.lt.f32.partialorder %v6692_v48, 0.0004427343  ;;  %v17085_v25 = vld [vmem:[#allocation37_spill] sm:$0xff] }
 0x59c   : > { %7956 = vmatprep.mubr.f32.mxu0 %v7309_v34  ;;  %v6708_v3 = vadd.f32 1.0, %v6707_v37  ;;  %9460 = vlog2.f32 %v6740_v33  ;;  %v6758_v28 = vadd.f32 1.0, %v15844_v13  ;;  %vm7056_vm4 = vcmp.gt.f32.partialorder %v17084_v5, 20.0  ;;  %v17086_v34 = vld [vmem:[#allocation16_spill] sm:$0xff] }
 0x59d   : > { %v6935_v38 = vmul.f32 0.01, %v6775_v62  ;;  %v7311_v12 = vsel %vm220_vm0, %v15822_v4, %v17068_v14  ;;  %v6694_v21 = vsel %vm6693_vm3, %v6691_v55, %v6688_v61  ;;  %v6710_v24 = vand.u32 2147483647, %v15733_v50  ;;  %v7818_v4 = vpop.f32.mrb[120].mxu0  ;;  %v17090_v19 = vld [vmem:[#allocation8_spill] sm:$0xff] }
 0x59e   : > { %vm7063_vm5 = vcmp.gt.f32.partialorder %v17085_v25, 20.0  ;;  %v6787_v23 = vmul.f32 0.6931472, %v9453_v6  ;;  %v7180_v9 = vsel %vm7052_vm14, %v17086_v34, %v6924_v63  ;;  %v6926_v16 = vmul.f32 0.01, %v6694_v21  ;;  %8026 = vst.msk [vmem:[%s15644_s26 + $0xe0] sm:$0xff] %vm7997_vm9, %v7818_v4 }
 0x59f   : > { %9462 = vlog2.f32 %v6758_v28  ;;  %v9455_v49 = vpop.eup %9454  ;;  %v6807_v22 = vadd.f32 1.0, %v6806_v54  ;;  %7957 = vmatmul.mubr.f32.gmra.mrb[176].mxu0 %v7180_v9  ;;  %v6726_v26 = vadd.f32 1.0, %v6725_v41  ;;  %v6743_v48 = vmul.f32 -0.5, %v15840_v20  ;;  %v7820_v54 = vpop.f32.mrb[121].mxu0  ;;  %v17091_v21 = vld [vmem:[#allocation7_spill] sm:$0xff] }
 0x5a0   : > { %v6776_v14 = vadd.f32 1.0, %v15856_v0  ;;  %vm15954_vm6 = vcmp.lt.f32.partialorder %v6809_v45, 0.0004427343  ;;  %7961 = vmatprep.mubr.f32.mxu0 %v7311_v12  ;;  %v6706_v17 = vmul.f32 0.6931472, %v9455_v49  ;;  %v6709_v35 = vmul.f32 %v15733_v50, %v6708_v3  ;;  %v9457_v31 = vpop.eup %9456  ;;  %v17092_v9 = vld [vmem:[#allocation11_spill] sm:$0xff] }
 0x5a1   : > { %v6761_v62 = vmul.f32 -0.5, %v15844_v13  ;;  %vm7058_vm7 = vcmp.gt.f32.partialorder %v17089_v44, 20.0  ;;  %v7313_v45 = vsel %vm220_vm0, %v15827_v59, %v17010_v51  ;;  %vm6711_vm8 = vcmp.lt.f32.partialorder %v6710_v24, 0.0004427343  ;;  %v7823_v49 = vpop.f32.mrb[122].mxu0 }
 0x5a2   : > { %v6728_v7 = vand.u32 2147483647, %v15781_v11  ;;  %9464 = vlog2.f32 %v6776_v14  ;;  %v6793_v50 = vsel %vm15927_vm1, %v15915_v32, %v6787_v23  ;;  %v7182_v2 = vsel %vm7054_vm15, %v17090_v19, %v6926_v16  ;;  %8027 = vst.msk [vmem:[%s15644_s26 + $0xe8] sm:$0xff] %vm7997_vm9, %v7823_v49 }
 0x5a3   : > { %v6712_v33 = vsel %vm6711_vm8, %v6709_v35, %v6706_v17  ;;  %v6794_v6 = vadd.f32 1.0, %v15921_v30  ;;  %v9459_v63 = vpop.eup %9458  ;;  %7962 = vmatmul.mubr.f32.gmra.mrb[178].mxu0 %v7182_v2  ;;  %v6727_v51 = vmul.f32 %v15781_v11, %v6726_v26  ;;  %v6744_v59 = vadd.f32 1.0, %v6743_v48  ;;  %v17093_v17 = vld [vmem:[#allocation43_spill] sm:$0xff] }
 0x5a4   : > { %v6928_v61 = vmul.f32 0.01, %v6712_v33  ;;  %v6746_v55 = vand.u32 2147483647, %v15840_v20  ;;  %v6805_v41 = vmul.f32 0.6931472, %v9457_v31  ;;  %7966 = vmatprep.mubr.f32.mxu0 %v7313_v45  ;;  %v6808_v32 = vmul.f32 %v15863_v8, %v6807_v22 }
 0x5a5   : > { %v6724_v3 = vmul.f32 0.6931472, %v9459_v63  ;;  %v6762_v46 = vadd.f32 1.0, %v6761_v62  ;;  %9466 = vlog2.f32 %v6794_v6  ;;  %v7315_v15 = vsel %vm220_vm0, %v15868_v56, %v17073_v10 }
 0x5a6   : > { %vm6729_vm10 = vcmp.lt.f32.partialorder %v6728_v7, 0.0004427343  ;;  %v6779_v28 = vmul.f32 -0.5, %v15856_v0  ;;  %v9461_v12 = vpop.eup %9460  ;;  %v6937_v11 = vmul.f32 0.01, %v6793_v50  ;;  %v7184_v24 = vsel %vm7056_vm4, %v17091_v21, %v6928_v61 }
 0x5a7   : > { %v6730_v23 = vsel %vm6729_vm10, %v6727_v51, %v6724_v3  ;;  %v6764_v34 = vand.u32 2147483647, %v15844_v13  ;;  %v7191_v8 = vsel %vm7063_vm5, %v17092_v9, %v6935_v38  ;;  %7967 = vmatmul.mubr.f32.gmra.mrb[180].mxu0 %v7184_v24  ;;  %v6742_v10 = vmul.f32 0.6931472, %v9461_v12  ;;  %v7825_v38 = vpop.f32.mrb[123].mxu0 }
 0x5a8   : > { %v6930_v16 = vmul.f32 0.01, %v6730_v23  ;;  %v6745_v56 = vmul.f32 %v15840_v20, %v6744_v59  ;;  %v6811_v26 = vsel %vm15954_vm6, %v6808_v32, %v6805_v41  ;;  %7971 = vmatprep.mubr.f32.mxu0 %v7315_v15  ;;  %v7317_v5 = vsel %vm220_vm0, %v15905_v18, %v17025_v29 }
 0x5a9   : > { %v9463_v22 = vpop.eup %9462  ;;  %vm6747_vm11 = vcmp.lt.f32.partialorder %v6746_v55, 0.0004427343  ;;  %v6763_v25 = vmul.f32 %v15844_v13, %v6762_v46  ;;  %v6780_v20 = vadd.f32 1.0, %v6779_v28  ;;  %v6797_v4 = vmul.f32 -0.5, %v15921_v30 }
 0x5aa   : > { %v6748_v48 = vsel %vm6747_vm11, %v6745_v56, %v6742_v10  ;;  %v6760_v14 = vmul.f32 0.6931472, %v9463_v22  ;;  %v7186_v37 = vsel %vm7058_vm7, %v17093_v17, %v6930_v16  ;;  %vm16004_vm12 = vcmp.lt.f32.partialorder %v6764_v34, 0.0004427343 }
 0x5ab   : > { %v6932_v35 = vmul.f32 0.01, %v6748_v48  ;;  %v6782_v29 = vand.u32 2147483647, %v15856_v0  ;;  %vm7065_vm13 = vcmp.gt.f32.partialorder %v15663_v40, 20.0  ;;  %7972 = vmatmul.mubr.f32.gmra.mrb[182].mxu0 %v7186_v37  ;;  %vm7060_vm14 = vcmp.gt.f32.partialorder %v15636_v58, 20.0 }
 0x5ac   : > { %v9465_v13 = vpop.eup %9464  ;;  %v6766_v18 = vsel %vm16004_vm12, %v6763_v25, %v6760_v14  ;;  %v7193_v54 = vsel %vm7065_vm13, %v17041_v47, %v6937_v11  ;;  %7976 = vmatprep.mubr.f32.mxu0 %v7317_v5  ;;  %v6939_v44 = vmul.f32 0.01, %v6811_v26  ;;  %v7319_v45 = vsel %vm220_vm0, %v7191_v8, %v17092_v9 }
 0x5ad   : > { %v6778_v31 = vmul.f32 0.6931472, %v9465_v13  ;;  %v6781_v7 = vmul.f32 %v15856_v0, %v6780_v20  ;;  %v6798_v50 = vadd.f32 1.0, %v6797_v4  ;;  %v7188_v40 = vsel %vm7060_vm14, %v17038_v60, %v6932_v35  ;;  %v7828_v60 = vpop.f32.mrb[124].mxu0 }
 0x5ae   : > { %v6934_v2 = vmul.f32 0.01, %v6766_v18  ;;  %vm6783_vm15 = vcmp.lt.f32.partialorder %v6782_v29, 0.0004427343  ;;  %v6800_v58 = vand.u32 2147483647, %v15921_v30  ;;  %v7321_v0 = vsel %vm220_vm0, %v7193_v54, %v17041_v47 }
 0x5af   : > { %v9467_v19 = vpop.eup %9466  ;;  %7977 = vmatmul.mubr.f32.gmra.mrb[184].mxu0 %v7188_v40  ;;  %v6784_v33 = vsel %vm6783_vm15, %v6781_v7, %v6778_v31  ;;  %vm7062_vm1 = vcmp.gt.f32.partialorder %v15744_v43, 20.0  ;;  %vm7067_vm2 = vcmp.gt.f32.partialorder %v15775_v53, 20.0  ;;  %v6799_v63 = vmul.f32 %v15921_v30, %v6798_v50  ;;  %8028 = vst.msk [vmem:[%s15644_s26 + $0xf0] sm:$0xff] %vm7997_vm9, %v7828_v60  ;;  %v7830_v55 = vpop.f32.mrb[125].mxu0 }
 0x5b0   : > { %v6796_v6 = vmul.f32 0.6931472, %v9467_v19  ;;  %7981 = vmatprep.mubr.f32.mxu0 %v7319_v45  ;;  %v7195_v61 = vsel %vm7067_vm2, %v17061_v1, %v6939_v44  ;;  %v7190_v51 = vsel %vm7062_vm1, %v17056_v42, %v6934_v2  ;;  %v6936_v59 = vmul.f32 0.01, %v6784_v33  ;;  %v7833_v42 = vpop.f32.mrb[126].mxu0 }
 0x5b1   : > { %vm6801_vm3 = vcmp.lt.f32.partialorder %v6800_v58, 0.0004427343  ;;  %vm7064_vm4 = vcmp.gt.f32.partialorder %v15750_v57, 20.0  ;;  %v7323_v47 = vsel %vm220_vm0, %v7195_v61, %v17061_v1  ;;  %8029 = vst.msk [vmem:[%s15644_s26 + $0xf8] sm:$0xff] %vm7997_vm9, %v7833_v42  ;;  %v7835_v41 = vpop.f32.mrb[127].mxu0  ;;  %vm7066_vm5 = vcmp.gt.f32.partialorder %v15817_v52, 20.0 }
 0x5b2   : > { %v6802_v43 = vsel %vm6801_vm3, %v6799_v63, %v6796_v6  ;;  %v7192_v53 = vsel %vm7064_vm4, %v17057_v27, %v6936_v59  ;;  %v7838_v39 = vpop.f32.mrb[128].mxu0 }
 0x5b3   : > { %7982 = vmatmul.mubr.f32.gmra.mrb[186].mxu0 %v7190_v51  ;;  %v6938_v30 = vmul.f32 0.01, %v6802_v43  ;;  %8030 = vst.msk [vmem:[%s15644_s26 + $0x100] sm:$0xff] %vm7997_vm9, %v7838_v39  ;;  %v7840_v27 = vpop.f32.mrb[129].mxu0 }
 0x5b4   : > { %7986 = vmatprep.mubr.f32.mxu0 %v7321_v0 }
 0x5b5   : > { %v7194_v57 = vsel %vm7066_vm5, %v17067_v36, %v6938_v30  ;;  %v7843_v1 = vpop.f32.mrb[130].mxu0 }
 0x5b6   : > { %8031 = vst.msk [vmem:[%s15644_s26 + $0x108] sm:$0xff] %vm7997_vm9, %v7843_v1  ;;  %v7845_v3 = vpop.f32.mrb[131].mxu0 }
 0x5b7   : > { %7987 = vmatmul.mubr.f32.gmra.mrb[188].mxu0 %v7192_v53 }
 0x5b8   : > { %7991 = vmatprep.mubr.f32.mxu0 %v7323_v47 }
 0x5bb   : > { %7992 = vmatmul.mubr.f32.gmra.mrb[190].mxu0 %v7194_v57 }
 0x5bf   : > { %v7848_v46 = vpop.f32.mrb[132].mxu0 }
 0x5c0   : > { %8032 = vst.msk [vmem:[%s15644_s26 + $0x110] sm:$0xff] %vm7997_vm9, %v7848_v46  ;;  %v7850_v32 = vpop.f32.mrb[133].mxu0 }
 0x5c6   : > { %v7853_v52 = vpop.f32.mrb[134].mxu0 }
 0x5c7   : > { %8033 = vst.msk [vmem:[%s15644_s26 + $0x118] sm:$0xff] %vm7997_vm9, %v7853_v52  ;;  %v7855_v36 = vpop.f32.mrb[135].mxu0 }
 0x5cd   : > { %v7858_v15 = vpop.f32.mrb[136].mxu0 }
 0x5ce   : > { %8034 = vst.msk [vmem:[%s15644_s26 + $0x120] sm:$0xff] %vm7997_vm9, %v7858_v15  ;;  %v7860_v28 = vpop.f32.mrb[137].mxu0 }
 0x5d6   : > { %v7863_v12 = vpop.f32.mrb[138].mxu0 }
 0x5d7   : > { %8035 = vst.msk [vmem:[%s15644_s26 + $0x128] sm:$0xff] %vm7997_vm9, %v7863_v12  ;;  %v7865_v11 = vpop.f32.mrb[139].mxu0 }
 0x5e1   : > { %v7868_v21 = vpop.f32.mrb[140].mxu0 }
 0x5e2   : > { %8036 = vst.msk [vmem:[%s15644_s26 + $0x130] sm:$0xff] %vm7997_vm9, %v7868_v21  ;;  %v7870_v24 = vpop.f32.mrb[141].mxu0 }
 0x5e7   : > { %v7873_v23 = vpop.f32.mrb[142].mxu0 }
 0x5e8   : > { %8037 = vst.msk [vmem:[%s15644_s26 + $0x138] sm:$0xff] %vm7997_vm9, %v7873_v23  ;;  %v7875_v34 = vpop.f32.mrb[143].mxu0 }
 0x5ef   : > { %v7878_v9 = vpop.f32.mrb[144].mxu0 }
 0x5f0   : > { %8038 = vst.msk [vmem:[%s15644_s26 + $0x140] sm:$0xff] %vm7997_vm9, %v7878_v9  ;;  %v7880_v8 = vpop.f32.mrb[145].mxu0 }
 0x5f7   : > { %v7883_v16 = vpop.f32.mrb[146].mxu0 }
 0x5f8   : > { %8039 = vst.msk [vmem:[%s15644_s26 + $0x148] sm:$0xff] %vm7997_vm9, %v7883_v16  ;;  %v7885_v10 = vpop.f32.mrb[147].mxu0 }
 0x601   : > { %v7888_v56 = vpop.f32.mrb[148].mxu0 }
 0x602   : > { %8040 = vst.msk [vmem:[%s15644_s26 + $0x150] sm:$0xff] %vm7997_vm9, %v7888_v56  ;;  %v7890_v49 = vpop.f32.mrb[149].mxu0 }
 0x608   : > { %v7893_v22 = vpop.f32.mrb[150].mxu0 }
 0x609   : > { %8041 = vst.msk [vmem:[%s15644_s26 + $0x158] sm:$0xff] %vm7997_vm9, %v7893_v22  ;;  %v7895_v26 = vpop.f32.mrb[151].mxu0 }
 0x610   : > { %v7898_v5 = vpop.f32.mrb[152].mxu0 }
 0x611   : > { %8042 = vst.msk [vmem:[%s15644_s26 + $0x160] sm:$0xff] %vm7997_vm9, %v7898_v5  ;;  %v7900_v25 = vpop.f32.mrb[153].mxu0 }
 0x618   : > { %v7903_v38 = vpop.f32.mrb[154].mxu0 }
 0x619   : > { %8043 = vst.msk [vmem:[%s15644_s26 + $0x168] sm:$0xff] %vm7997_vm9, %v7903_v38  ;;  %v7905_v48 = vpop.f32.mrb[155].mxu0 }
 0x623   : > { %v7908_v14 = vpop.f32.mrb[156].mxu0 }
 0x624   : > { %8044 = vst.msk [vmem:[%s15644_s26 + $0x170] sm:$0xff] %vm7997_vm9, %v7908_v14  ;;  %v7910_v20 = vpop.f32.mrb[157].mxu0 }
 0x629   : > { %v7913_v4 = vpop.f32.mrb[158].mxu0 }
 0x62a   : > { %8045 = vst.msk [vmem:[%s15644_s26 + $0x178] sm:$0xff] %vm7997_vm9, %v7913_v4  ;;  %v7915_v17 = vpop.f32.mrb[159].mxu0 }
 0x631   : > { %v7918_v37 = vpop.f32.mrb[160].mxu0 }
 0x632   : > { %8046 = vst.msk [vmem:[%s15644_s26 + $0x180] sm:$0xff] %vm7997_vm9, %v7918_v37  ;;  %v7920_v35 = vpop.f32.mrb[161].mxu0 }
 0x63a   : > { %v7923_v62 = vpop.f32.mrb[162].mxu0 }
 0x63b   : > { %8047 = vst.msk [vmem:[%s15644_s26 + $0x188] sm:$0xff] %vm7997_vm9, %v7923_v62  ;;  %v7925_v29 = vpop.f32.mrb[163].mxu0 }
 0x644   : > { %v7928_v13 = vpop.f32.mrb[164].mxu0 }
 0x645   : > { %8048 = vst.msk [vmem:[%s15644_s26 + $0x190] sm:$0xff] %vm7997_vm9, %v7928_v13  ;;  %v7930_v18 = vpop.f32.mrb[165].mxu0 }
 0x652   : > { %v7933_v54 = vpop.f32.mrb[166].mxu0 }
 0x653   : > { %8049 = vst.msk [vmem:[%s15644_s26 + $0x198] sm:$0xff] %vm7997_vm9, %v7933_v54  ;;  %v7935_v31 = vpop.f32.mrb[167].mxu0 }
 0x657   : > { %v7938_v44 = vpop.f32.mrb[168].mxu0 }
 0x658   : > { %8050 = vst.msk [vmem:[%s15644_s26 + $0x1a0] sm:$0xff] %vm7997_vm9, %v7938_v44  ;;  %v7940_v45 = vpop.f32.mrb[169].mxu0 }
 0x661   : > { %v7943_v7 = vpop.f32.mrb[170].mxu0 }
 0x662   : > { %8051 = vst.msk [vmem:[%s15644_s26 + $0x1a8] sm:$0xff] %vm7997_vm9, %v7943_v7  ;;  %v7945_v50 = vpop.f32.mrb[171].mxu0 }
 0x669   : > { %v7948_v19 = vpop.f32.mrb[172].mxu0 }
 0x66a   : > { %8052 = vst.msk [vmem:[%s15644_s26 + $0x1b0] sm:$0xff] %vm7997_vm9, %v7948_v19  ;;  %v7950_v40 = vpop.f32.mrb[173].mxu0 }
 0x66e   : > { %v7953_v2 = vpop.f32.mrb[174].mxu0 }
 0x66f   : > { %8053 = vst.msk [vmem:[%s15644_s26 + $0x1b8] sm:$0xff] %vm7997_vm9, %v7953_v2  ;;  %v7955_v58 = vpop.f32.mrb[175].mxu0 }
 0x672   : > { %v7958_v33 = vpop.f32.mrb[176].mxu0 }
 0x673   : > { %8054 = vst.msk [vmem:[%s15644_s26 + $0x1c0] sm:$0xff] %vm7997_vm9, %v7958_v33  ;;  %v7960_v6 = vpop.f32.mrb[177].mxu0 }
 0x676   : > { %v7963_v0 = vpop.f32.mrb[178].mxu0 }
 0x677   : > { %8055 = vst.msk [vmem:[%s15644_s26 + $0x1c8] sm:$0xff] %vm7997_vm9, %v7963_v0  ;;  %v7965_v63 = vpop.f32.mrb[179].mxu0 }
 0x67a   : > { %v7968_v60 = vpop.f32.mrb[180].mxu0 }
 0x67b   : > { %8056 = vst.msk [vmem:[%s15644_s26 + $0x1d0] sm:$0xff] %vm7997_vm9, %v7968_v60  ;;  %v7970_v61 = vpop.f32.mrb[181].mxu0 }
 0x67e   : > { %v7973_v51 = vpop.f32.mrb[182].mxu0 }
 0x67f   : > { %8057 = vst.msk [vmem:[%s15644_s26 + $0x1d8] sm:$0xff] %vm7997_vm9, %v7973_v51  ;;  %v7975_v59 = vpop.f32.mrb[183].mxu0 }
 0x682   : > { %v7978_v55 = vpop.f32.mrb[184].mxu0 }
 0x683   : > { %8058 = vst.msk [vmem:[%s15644_s26 + $0x1e0] sm:$0xff] %vm7997_vm9, %v7978_v55  ;;  %v7980_v43 = vpop.f32.mrb[185].mxu0 }
 0x686   : > { %v7983_v47 = vpop.f32.mrb[186].mxu0 }
 0x687   : > { %8059 = vst.msk [vmem:[%s15644_s26 + $0x1e8] sm:$0xff] %vm7997_vm9, %v7983_v47  ;;  %v7985_v53 = vpop.f32.mrb[187].mxu0 }
 0x68a   : > { %v7988_v30 = vpop.f32.mrb[188].mxu0 }
 0x68b   : > { %8060 = vst.msk [vmem:[%s15644_s26 + $0x1f0] sm:$0xff] %vm7997_vm9, %v7988_v30  ;;  %v7990_v42 = vpop.f32.mrb[189].mxu0 }
 0x68e   : > { %v7993_v41 = vpop.f32.mrb[190].mxu0 }
 0x68f   : > { %8061 = vst.msk [vmem:[%s15644_s26 + $0x1f8] sm:$0xff] %vm7997_vm9, %v7993_v41  ;;  %v7995_v57 = vpop.f32.mrb[191].mxu0 }
 0x690 PF: > { %s15_s15 = sadd.s32 1, %s9506_s15  }
 0x691   : > { %p12_p3 = scmp.ge.s32.totalorder %s15_s15, 4  }
 0x693   :  { %14 = sbr.rel (!%p12_p3) target bundleno = 1 (0x1), region = 72 }
 0x69a   :  { %8084 = vsyncpa [#allocation4], 1 }
 0x69b   :  { %8086 = vsyncpa [#allocation4 + $0x1], 1 }

</bundles_post_ra>
